<compile_context>
chip_gen: v6e
topology: v6e:2x2x1
jax: 0.10.0
libtpu: 0.0.40
codegen_flags: <defaults>
</compile_context>

<pallas_src>
import jax
import jax.numpy as jnp
from jax.experimental import pallas as pl
from jax.experimental.pallas import tpu as pltpu

BN_EPS = 1e-5
CONV1_K = 5
CONV1_STRIDE = 2

_VMEM = pl.BlockSpec(memory_space=pltpu.MemorySpace.VMEM)


def _round_up(x, m):
    return (x + m - 1) // m * m


# ------------------------------ Pallas kernel -------------------------------

def _make_align_kernel(n_batch, n_spatial, m_real, m_pad):
    """Fully-fused forward: conv1(GEMM)+BN1+ReLU, conv2(125 matmuls)+BN2+ReLU,
    fc3+ReLU, fc4+sigmoid.  All intermediates stay in VMEM/vregs."""
    inv_m = 1.0 / m_real
    inv_n = 1.0 / n_batch

    def kernel(p_ref, w1_ref, g1_ref, b1_ref, w2_hbm, g2_ref, b2_ref,
               w3_ref, b3_ref, w4_ref, b4_ref, o_ref, a1_ref, w2_vmem, w2_sem):
        # Kick off the conv2-weight DMA immediately so it overlaps conv1 + BN1.
        w2_copy = pltpu.make_async_copy(w2_hbm, w2_vmem, w2_sem)
        w2_copy.start()

        # ---- conv1 as GEMM (bf16 MXU operands, f32 accumulation) ----
        # rows enumerate (spatial, batch) = (do,ho,wo,n); columns are channels.
        y = jnp.dot(p_ref[...], w1_ref[...], preferred_element_type=jnp.float32)

        # ---- BatchNorm1 (exact batch stats, two-pass variance) + ReLU ----
        # Zero-padded rows contribute nothing to the sum; divide by the real count.
        mean = jnp.sum(y, axis=0, keepdims=True) * inv_m
        d = y - mean
        if m_pad != m_real:
            rows = jax.lax.broadcasted_iota(jnp.int32, y.shape, 0)
            d = jnp.where(rows < m_real, d, 0.0)   # keep pad rows out of the variance
        var = jnp.sum(d * d, axis=0, keepdims=True) * inv_m
        scale = jax.lax.rsqrt(var + BN_EPS) * g1_ref[...]
        a1 = jnp.maximum(d * scale + b1_ref[...], 0.0)
        a1_ref[...] = a1.astype(jnp.bfloat16)       # VMEM scratch feeding conv2

        # ---- conv2: its 5^3 receptive field covers conv1's whole 5^3 output ----
        # 125 unrolled accumulating matmuls; rows are spatial-major so each spatial
        # position s is the contiguous row block [s*N, (s+1)*N).  Four interleaved
        # accumulators break the serial add/pop dependency chain.
        w2_copy.wait()
        c2 = w2_vmem.shape[2]
        accs = [jnp.zeros((n_batch, c2), jnp.float32) for _ in range(4)]
        for s in range(n_spatial):
            blk = a1_ref[pl.ds(s * n_batch, n_batch), :]          # [N, 32] bf16
            accs[s % 4] = accs[s % 4] + jnp.dot(
                blk, w2_vmem[s], preferred_element_type=jnp.float32)
        y2 = (accs[0] + accs[1]) + (accs[2] + accs[3])            # [N, 64] f32

        # ---- BatchNorm2 (batch stats) + ReLU ----
        mean2 = jnp.sum(y2, axis=0, keepdims=True) * inv_n
        d2 = y2 - mean2
        var2 = jnp.sum(d2 * d2, axis=0, keepdims=True) * inv_n
        scale2 = jax.lax.rsqrt(var2 + BN_EPS) * g2_ref[...]
        a2 = jnp.maximum(d2 * scale2 + b2_ref[...], 0.0)

        # ---- fc3 + ReLU (bf16 operands, f32 accumulate/bias) ----
        h = jnp.dot(a2.astype(jnp.bfloat16), w3_ref[...],
                    preferred_element_type=jnp.float32) + b3_ref[...]
        h = jnp.maximum(h, 0.0)

        # ---- fc4 + numerically stable sigmoid (EUP exp + approx EUP reciprocal) ----
        z = jnp.dot(h.astype(jnp.bfloat16), w4_ref[...],
                    preferred_element_type=jnp.float32) + b4_ref[...]
        ez = jnp.exp(-jnp.abs(z))
        r = pl.reciprocal(1.0 + ez, approx=True)
        o_ref[...] = jnp.where(z >= 0.0, r, ez * r)

    return kernel


def _fused_forward(patches_pad, prep, n_batch, n_spatial, m_real):
    m_pad = patches_pad.shape[0]
    c1 = prep["w1"].shape[1]
    c2 = prep["w2"].shape[2]
    out_dim = prep["w4"].shape[1]
    kernel = _make_align_kernel(n_batch, n_spatial, m_real, m_pad)
    return pl.pallas_call(
        kernel,
        out_shape=jax.ShapeDtypeStruct((n_batch, out_dim), jnp.float32),
        in_specs=[_VMEM, _VMEM, _VMEM, _VMEM,
                  pl.BlockSpec(memory_space=pl.ANY),   # w2 stays in HBM; manual DMA
                  _VMEM, _VMEM, _VMEM, _VMEM, _VMEM, _VMEM],
        out_specs=_VMEM,
        scratch_shapes=[
            pltpu.VMEM((m_pad, c1), jnp.bfloat16),          # conv1 activation
            pltpu.VMEM((n_spatial, c1, c2), jnp.bfloat16),  # conv2 weight landing buf
            pltpu.SemaphoreType.DMA,
        ],
        compiler_params=pltpu.CompilerParams(vmem_limit_bytes=32 * 1024 * 1024),
    )(patches_pad, prep["w1"], prep["g1"], prep["b1"], prep["w2"],
      prep["g2"], prep["b2"], prep["w3"], prep["b3"], prep["w4"], prep["b4"])


# -------------------------------- JAX glue ----------------------------------

def extract_conv1_patches_spatial_major(x, kernel_size, stride):
    """x: [N, C, D, H, W] -> patches [Do*Ho*Wo*N, C*k^3] (spatial-major rows).

    Feature index order is (ci, kd, kh, kw) row-major, matching
    conv1_w.reshape(Cout, C*k^3).
    """
    n, c, d, h, w = x.shape
    do = (d - kernel_size) // stride + 1
    ho = (h - kernel_size) // stride + 1
    wo = (w - kernel_size) // stride + 1
    patches = jax.lax.conv_general_dilated_patches(
        x,
        filter_shape=(kernel_size,) * 3,
        window_strides=(stride,) * 3,
        padding="VALID",
        dimension_numbers=("NCDHW", "OIDHW", "NDHWC"),
    )  # [N, Do, Ho, Wo, C*k^3]
    # Spatial-major / batch-minor rows: row = ((do*Ho+ho)*Wo+wo)*N + n.
    patches = patches.transpose(1, 2, 3, 0, 4)
    return patches.reshape(do * ho * wo * n, c * kernel_size ** 3), (n, do, ho, wo)


def prepare_params(p):
    """Repack PyTorch-layout parameters for the fused Pallas kernel (done once)."""
    c1_out, c1_in, k1 = p["conv1_w"].shape[0], p["conv1_w"].shape[1], p["conv1_w"].shape[2]
    k_feat = c1_in * k1 ** 3
    k_pad = _round_up(k_feat, 128)
    w1 = p["conv1_w"].reshape(c1_out, k_feat).T                     # [K, 32]
    w1 = jnp.pad(w1, ((0, k_pad - k_feat), (0, 0))).astype(jnp.bfloat16)

    c2_out, c2_in, k2 = p["conv2_w"].shape[0], p["conv2_w"].shape[1], p["conv2_w"].shape[2]
    # [co, ci, kd, kh, kw] -> [kd, kh, kw, ci, co] -> [k^3, ci, co]; the leading s
    # index matches the (do,ho,wo) row-major order of the spatial-major conv1 rows.
    w2 = (p["conv2_w"].transpose(2, 3, 4, 1, 0)
          .reshape(k2 ** 3, c2_in, c2_out).astype(jnp.bfloat16))    # [125, 32, 64]

    return {
        "w1": w1,
        "g1": p["bn1_g"].reshape(1, -1).astype(jnp.float32),
        "b1": p["bn1_b"].reshape(1, -1).astype(jnp.float32),
        "w2": w2,
        "g2": p["bn2_g"].reshape(1, -1).astype(jnp.float32),
        "b2": p["bn2_b"].reshape(1, -1).astype(jnp.float32),
        "w3": p["fc3_w"].T.astype(jnp.bfloat16),                    # [64, 256]
        "b3": p["fc3_b"].reshape(1, -1).astype(jnp.float32),
        "w4": p["fc4_w"].T.astype(jnp.bfloat16),                    # [256, 6]
        "b4": p["fc4_b"].reshape(1, -1).astype(jnp.float32),
    }


@jax.jit
def align_net_forward(x, prep):
    n = x.shape[0]
    patches, (_, do, ho, wo) = extract_conv1_patches_spatial_major(
        x, CONV1_K, CONV1_STRIDE)
    n_spatial = do * ho * wo
    assert n_spatial == prep["w2"].shape[0], (
        "fused kernel assumes conv2 output spatial size == 1 (fc_inputsize == 1)")
    m_real = n_spatial * n
    m_pad = _round_up(m_real, 8)
    k_feat = patches.shape[1]
    k_pad = prep["w1"].shape[0]
    # Zero-pad contraction dim to 128 lanes and rows to an 8-sublane multiple, then
    # cast to bf16; pad + transpose + convert fuse into the surrounding XLA fusion.
    patches = jnp.pad(patches, ((0, m_pad - m_real), (0, k_pad - k_feat)))
    patches = patches.astype(jnp.bfloat16)
    return _fused_forward(patches, prep, n, n_spatial, m_real)      # [N, 6]


# ---------------------------- pure-JAX reference ----------------------------

def _bn_train(y, gamma, beta, eps=BN_EPS):
    mean = jnp.mean(y, axis=(0, 2, 3, 4), keepdims=True)
    var = jnp.mean((y - mean) ** 2, axis=(0, 2, 3, 4), keepdims=True)
    g = gamma.reshape(1, -1, 1, 1, 1)
    b = beta.reshape(1, -1, 1, 1, 1)
    return (y - mean) * jax.lax.rsqrt(var + eps) * g + b


@jax.jit
def reference_forward(x, p):
    dn = ("NCDHW", "OIDHW", "NCDHW")
    hi = jax.lax.Precision.HIGHEST
    y = jax.lax.conv_general_dilated(x, p["conv1_w"], (2, 2, 2), "VALID",
                                     dimension_numbers=dn, precision=hi)
    y = jnp.maximum(_bn_train(y, p["bn1_g"], p["bn1_b"]), 0.0)
    y = jax.lax.conv_general_dilated(y, p["conv2_w"], (1, 1, 1), "VALID",
                                     dimension_numbers=dn, precision=hi)
    y = jnp.maximum(_bn_train(y, p["bn2_g"], p["bn2_b"]), 0.0)
    flat = y.reshape(y.shape[0], -1)
    h = jnp.maximum(flat @ p["fc3_w"].T + p["fc3_b"], 0.0)
    z = h @ p["fc4_w"].T + p["fc4_b"]
    return jax.nn.sigmoid(z)


# --------------------------------- driver -----------------------------------

if __name__ == "__main__":
    key = jax.random.PRNGKey(0)
    kx, k1, k2, k3, k4, k5, k6, k7, k8, k9, k10 = jax.random.split(key, 11)

    # Input 13^3: conv1(k=5,s=2) -> 5^3, conv2(k=5,s=1) -> 1^3, so fc_inputsize=1.
    N, C, D, H, W = 2, 1, 13, 13, 13
    fc_inputsize = 1

    x = jax.random.normal(kx, (N, C, D, H, W), dtype=jnp.float32)

    # Parameters in PyTorch layout (Conv3d: [Cout, Cin, k, k, k]; Linear: [out, in]).
    params = {
        "conv1_w": jax.random.normal(k1, (32, 1, 5, 5, 5), jnp.float32) * 0.05,
        "bn1_g": 1.0 + 0.1 * jax.random.normal(k5, (32,), jnp.float32),
        "bn1_b": 0.1 * jax.random.normal(k6, (32,), jnp.float32),
        "conv2_w": jax.random.normal(k2, (64, 32, 5, 5, 5), jnp.float32) * 0.02,
        "bn2_g": 1.0 + 0.1 * jax.random.normal(k7, (64,), jnp.float32),
        "bn2_b": 0.1 * jax.random.normal(k8, (64,), jnp.float32),
        "fc3_w": jax.random.normal(k3, (256, 64 * fc_inputsize), jnp.float32) * 0.05,
        "fc3_b": 0.01 * jax.random.normal(k9, (256,), jnp.float32),
        "fc4_w": jax.random.normal(k4, (6, 256), jnp.float32) * 0.05,
        "fc4_b": 0.01 * jax.random.normal(k10, (6,), jnp.float32),
    }

    prep = prepare_params(params)
    out = jax.block_until_ready(align_net_forward(x, prep))
    ref = jax.block_until_ready(reference_forward(x, params))

    assert out.shape == (N, 6), out.shape
    assert bool(jnp.all(jnp.isfinite(out)))
    assert bool(jnp.all((out >= 0.0) & (out <= 1.0)))        # sigmoid output range
    max_diff = float(jnp.max(jnp.abs(out - ref)))
    assert bool(jnp.allclose(out, ref, atol=3e-2, rtol=3e-2)), max_diff
    print("KERNEL_OK")
</pallas_src>

<mosaic_0001>
module attributes {stable_mosaic.version = 11 : i64} {
  func.func @kernel(%arg0: memref<256x128xbf16, #tpu.memory_space<vmem>>, %arg1: memref<128x32xbf16, #tpu.memory_space<vmem>>, %arg2: memref<1x32xf32, #tpu.memory_space<vmem>>, %arg3: memref<1x32xf32, #tpu.memory_space<vmem>>, %arg4: memref<125x32x64xbf16, #tpu.memory_space<any>>, %arg5: memref<1x64xf32, #tpu.memory_space<vmem>>, %arg6: memref<1x64xf32, #tpu.memory_space<vmem>>, %arg7: memref<64x256xbf16, #tpu.memory_space<vmem>>, %arg8: memref<1x256xf32, #tpu.memory_space<vmem>>, %arg9: memref<256x6xbf16, #tpu.memory_space<vmem>>, %arg10: memref<1x6xf32, #tpu.memory_space<vmem>>, %arg11: memref<2x6xf32, #tpu.memory_space<vmem>>, %arg12: memref<256x32xbf16, #tpu.memory_space<vmem>>, %arg13: memref<125x32x64xbf16, #tpu.memory_space<vmem>>, %arg14: memref<!tpu.dma_semaphore, #tpu.memory_space<semaphore_mem>>) attributes {dimension_semantics = [], scalar_prefetch = 0 : i64, scratch_operands = 3 : i64, tpu.core_type = #tpu.core_type<tc>} {
    tpu.enqueue_dma source(%arg4 : memref<125x32x64xbf16, #tpu.memory_space<any>>) target(%arg13 : memref<125x32x64xbf16, #tpu.memory_space<vmem>>) target_semaphore(%arg14 : memref<!tpu.dma_semaphore, #tpu.memory_space<semaphore_mem>>)
    %c0 = arith.constant 0 : index
    %c0_0 = arith.constant 0 : index
    %0 = vector.load %arg0[%c0, %c0_0] : memref<256x128xbf16, #tpu.memory_space<vmem>>, vector<256x128xbf16>
    %c0_1 = arith.constant 0 : index
    %c0_2 = arith.constant 0 : index
    %1 = vector.load %arg1[%c0_1, %c0_2] : memref<128x32xbf16, #tpu.memory_space<vmem>>, vector<128x32xbf16>
    %cst = arith.constant dense<0.000000e+00> : vector<256x32xf32>
    %2 = tpu.matmul %0, %1, %cst {dimension_numbers = #tpu.dot_dimension_numbers<[1], [0], [0], [1], [0, 0, 1, 1], [], []>} : vector<256x128xbf16>, vector<128x32xbf16>, vector<256x32xf32> -> vector<256x32xf32>
    %cst_3 = arith.constant dense<0.000000e+00> : vector<32xf32>
    %3 = vector.multi_reduction <add>, %2, %cst_3 [0] : vector<256x32xf32> to vector<32xf32>
    %4 = vector.shape_cast %3 : vector<32xf32> to vector<1x32xf32>
    %cst_4 = arith.constant 4.000000e-03 : f32
    %5 = vector.broadcast %cst_4 : f32 to vector<1x32xf32>
    %6 = arith.mulf %4, %5 : vector<1x32xf32>
    %7 = vector.broadcast %6 : vector<1x32xf32> to vector<256x32xf32>
    %8 = arith.subf %2, %7 : vector<256x32xf32>
    %9 = tpu.iota {dimensions = array<i32: 0>} : vector<256x32xi32>
    %c250_i32 = arith.constant 250 : i32
    %10 = vector.broadcast %c250_i32 : i32 to vector<256x32xi32>
    %11 = arith.cmpi slt, %9, %10 : vector<256x32xi32>
    %cst_5 = arith.constant 0.000000e+00 : f32
    %12 = vector.broadcast %cst_5 : f32 to vector<256x32xf32>
    %13 = arith.select %11, %8, %12 : vector<256x32xi1>, vector<256x32xf32>
    %14 = arith.mulf %13, %13 : vector<256x32xf32>
    %cst_6 = arith.constant dense<0.000000e+00> : vector<32xf32>
    %15 = vector.multi_reduction <add>, %14, %cst_6 [0] : vector<256x32xf32> to vector<32xf32>
    %16 = vector.shape_cast %15 : vector<32xf32> to vector<1x32xf32>
    %cst_7 = arith.constant 4.000000e-03 : f32
    %17 = vector.broadcast %cst_7 : f32 to vector<1x32xf32>
    %18 = arith.mulf %16, %17 : vector<1x32xf32>
    %cst_8 = arith.constant 9.99999974E-6 : f32
    %19 = vector.broadcast %cst_8 : f32 to vector<1x32xf32>
    %20 = arith.addf %18, %19 : vector<1x32xf32>
    %21 = math.rsqrt %20 : vector<1x32xf32>
    %c0_9 = arith.constant 0 : index
    %c0_10 = arith.constant 0 : index
    %22 = vector.load %arg2[%c0_9, %c0_10] : memref<1x32xf32, #tpu.memory_space<vmem>>, vector<1x32xf32>
    %23 = arith.mulf %21, %22 : vector<1x32xf32>
    %24 = vector.broadcast %23 : vector<1x32xf32> to vector<256x32xf32>
    %25 = arith.mulf %13, %24 : vector<256x32xf32>
    %c0_11 = arith.constant 0 : index
    %c0_12 = arith.constant 0 : index
    %26 = vector.load %arg3[%c0_11, %c0_12] : memref<1x32xf32, #tpu.memory_space<vmem>>, vector<1x32xf32>
    %27 = vector.broadcast %26 : vector<1x32xf32> to vector<256x32xf32>
    %28 = arith.addf %25, %27 : vector<256x32xf32>
    %cst_13 = arith.constant 0.000000e+00 : f32
    %29 = vector.broadcast %cst_13 : f32 to vector<256x32xf32>
    %30 = arith.maximumf %28, %29 : vector<256x32xf32>
    %31 = arith.truncf %30 : vector<256x32xf32> to vector<256x32xbf16>
    %c0_14 = arith.constant 0 : index
    %c0_15 = arith.constant 0 : index
    %32 = vector.load %arg12[%c0_14, %c0_15] : memref<256x32xbf16, #tpu.memory_space<vmem>>, vector<256x32xbf16>
    tpu.vector_store %arg12[%c0_14, %c0_15], %31 {strides = array<i32>} : memref<256x32xbf16, #tpu.memory_space<vmem>>, vector<256x32xbf16>,
    tpu.wait_dma2 semaphore(%arg14 : memref<!tpu.dma_semaphore, #tpu.memory_space<semaphore_mem>>) src(%arg4 : memref<125x32x64xbf16, #tpu.memory_space<any>>) dst(%arg13 : memref<125x32x64xbf16, #tpu.memory_space<vmem>>)
    %cst_16 = arith.constant 0.000000e+00 : f32
    %33 = vector.broadcast %cst_16 : f32 to vector<2x64xf32>
    %cst_17 = arith.constant 0.000000e+00 : f32
    %34 = vector.broadcast %cst_17 : f32 to vector<2x64xf32>
    %cst_18 = arith.constant 0.000000e+00 : f32
    %35 = vector.broadcast %cst_18 : f32 to vector<2x64xf32>
    %cst_19 = arith.constant 0.000000e+00 : f32
    %36 = vector.broadcast %cst_19 : f32 to vector<2x64xf32>
    %c0_20 = arith.constant 0 : index
    %c0_21 = arith.constant 0 : index
    %37 = vector.load %arg12[%c0_20, %c0_21] : memref<256x32xbf16, #tpu.memory_space<vmem>>, vector<2x32xbf16>
    %c0_22 = arith.constant 0 : index
    %c0_23 = arith.constant 0 : index
    %c0_24 = arith.constant 0 : index
    %38 = vector.load %arg13[%c0_22, %c0_23, %c0_24] : memref<125x32x64xbf16, #tpu.memory_space<vmem>>, vector<1x32x64xbf16>
    %39 = vector.shape_cast %38 : vector<1x32x64xbf16> to vector<32x64xbf16>
    %cst_25 = arith.constant dense<0.000000e+00> : vector<2x64xf32>
    %40 = tpu.matmul %37, %39, %cst_25 {dimension_numbers = #tpu.dot_dimension_numbers<[1], [0], [0], [1], [0, 0, 1, 1], [], []>} : vector<2x32xbf16>, vector<32x64xbf16>, vector<2x64xf32> -> vector<2x64xf32>
    %41 = arith.addf %33, %40 : vector<2x64xf32>
    %c2 = arith.constant 2 : index
    %c0_26 = arith.constant 0 : index
    %42 = vector.load %arg12[%c2, %c0_26] : memref<256x32xbf16, #tpu.memory_space<vmem>>, vector<2x32xbf16>
    %c1 = arith.constant 1 : index
    %c0_27 = arith.constant 0 : index
    %c0_28 = arith.constant 0 : index
    %43 = vector.load %arg13[%c1, %c0_27, %c0_28] : memref<125x32x64xbf16, #tpu.memory_space<vmem>>, vector<1x32x64xbf16>
    %44 = vector.shape_cast %43 : vector<1x32x64xbf16> to vector<32x64xbf16>
    %cst_29 = arith.constant dense<0.000000e+00> : vector<2x64xf32>
    %45 = tpu.matmul %42, %44, %cst_29 {dimension_numbers = #tpu.dot_dimension_numbers<[1], [0], [0], [1], [0, 0, 1, 1], [], []>} : vector<2x32xbf16>, vector<32x64xbf16>, vector<2x64xf32> -> vector<2x64xf32>
    %46 = arith.addf %34, %45 : vector<2x64xf32>
    %c4 = arith.constant 4 : index
    %c0_30 = arith.constant 0 : index
    %47 = vector.load %arg12[%c4, %c0_30] : memref<256x32xbf16, #tpu.memory_space<vmem>>, vector<2x32xbf16>
    %c2_31 = arith.constant 2 : index
    %c0_32 = arith.constant 0 : index
    %c0_33 = arith.constant 0 : index
    %48 = vector.load %arg13[%c2_31, %c0_32, %c0_33] : memref<125x32x64xbf16, #tpu.memory_space<vmem>>, vector<1x32x64xbf16>
    %49 = vector.shape_cast %48 : vector<1x32x64xbf16> to vector<32x64xbf16>
    %cst_34 = arith.constant dense<0.000000e+00> : vector<2x64xf32>
    %50 = tpu.matmul %47, %49, %cst_34 {dimension_numbers = #tpu.dot_dimension_numbers<[1], [0], [0], [1], [0, 0, 1, 1], [], []>} : vector<2x32xbf16>, vector<32x64xbf16>, vector<2x64xf32> -> vector<2x64xf32>
    %51 = arith.addf %35, %50 : vector<2x64xf32>
    %c6 = arith.constant 6 : index
    %c0_35 = arith.constant 0 : index
    %52 = vector.load %arg12[%c6, %c0_35] : memref<256x32xbf16, #tpu.memory_space<vmem>>, vector<2x32xbf16>
    %c3 = arith.constant 3 : index
    %c0_36 = arith.constant 0 : index
    %c0_37 = arith.constant 0 : index
    %53 = vector.load %arg13[%c3, %c0_36, %c0_37] : memref<125x32x64xbf16, #tpu.memory_space<vmem>>, vector<1x32x64xbf16>
    %54 = vector.shape_cast %53 : vector<1x32x64xbf16> to vector<32x64xbf16>
    %cst_38 = arith.constant dense<0.000000e+00> : vector<2x64xf32>
    %55 = tpu.matmul %52, %54, %cst_38 {dimension_numbers = #tpu.dot_dimension_numbers<[1], [0], [0], [1], [0, 0, 1, 1], [], []>} : vector<2x32xbf16>, vector<32x64xbf16>, vector<2x64xf32> -> vector<2x64xf32>
    %56 = arith.addf %36, %55 : vector<2x64xf32>
    %c8 = arith.constant 8 : index
    %c0_39 = arith.constant 0 : index
    %57 = vector.load %arg12[%c8, %c0_39] : memref<256x32xbf16, #tpu.memory_space<vmem>>, vector<2x32xbf16>
    %c4_40 = arith.constant 4 : index
    %c0_41 = arith.constant 0 : index
    %c0_42 = arith.constant 0 : index
    %58 = vector.load %arg13[%c4_40, %c0_41, %c0_42] : memref<125x32x64xbf16, #tpu.memory_space<vmem>>, vector<1x32x64xbf16>
    %59 = vector.shape_cast %58 : vector<1x32x64xbf16> to vector<32x64xbf16>
    %cst_43 = arith.constant dense<0.000000e+00> : vector<2x64xf32>
    %60 = tpu.matmul %57, %59, %cst_43 {dimension_numbers = #tpu.dot_dimension_numbers<[1], [0], [0], [1], [0, 0, 1, 1], [], []>} : vector<2x32xbf16>, vector<32x64xbf16>, vector<2x64xf32> -> vector<2x64xf32>
    %61 = arith.addf %41, %60 : vector<2x64xf32>
    %c10 = arith.constant 10 : index
    %c0_44 = arith.constant 0 : index
    %62 = vector.load %arg12[%c10, %c0_44] : memref<256x32xbf16, #tpu.memory_space<vmem>>, vector<2x32xbf16>
    %c5 = arith.constant 5 : index
    %c0_45 = arith.constant 0 : index
    %c0_46 = arith.constant 0 : index
    %63 = vector.load %arg13[%c5, %c0_45, %c0_46] : memref<125x32x64xbf16, #tpu.memory_space<vmem>>, vector<1x32x64xbf16>
    %64 = vector.shape_cast %63 : vector<1x32x64xbf16> to vector<32x64xbf16>
    %cst_47 = arith.constant dense<0.000000e+00> : vector<2x64xf32>
    %65 = tpu.matmul %62, %64, %cst_47 {dimension_numbers = #tpu.dot_dimension_numbers<[1], [0], [0], [1], [0, 0, 1, 1], [], []>} : vector<2x32xbf16>, vector<32x64xbf16>, vector<2x64xf32> -> vector<2x64xf32>
    %66 = arith.addf %46, %65 : vector<2x64xf32>
    %c12 = arith.constant 12 : index
    %c0_48 = arith.constant 0 : index
    %67 = vector.load %arg12[%c12, %c0_48] : memref<256x32xbf16, #tpu.memory_space<vmem>>, vector<2x32xbf16>
    %c6_49 = arith.constant 6 : index
    %c0_50 = arith.constant 0 : index
    %c0_51 = arith.constant 0 : index
    %68 = vector.load %arg13[%c6_49, %c0_50, %c0_51] : memref<125x32x64xbf16, #tpu.memory_space<vmem>>, vector<1x32x64xbf16>
    %69 = vector.shape_cast %68 : vector<1x32x64xbf16> to vector<32x64xbf16>
    %cst_52 = arith.constant dense<0.000000e+00> : vector<2x64xf32>
    %70 = tpu.matmul %67, %69, %cst_52 {dimension_numbers = #tpu.dot_dimension_numbers<[1], [0], [0], [1], [0, 0, 1, 1], [], []>} : vector<2x32xbf16>, vector<32x64xbf16>, vector<2x64xf32> -> vector<2x64xf32>
    %71 = arith.addf %51, %70 : vector<2x64xf32>
    %c14 = arith.constant 14 : index
    %c0_53 = arith.constant 0 : index
    %72 = vector.load %arg12[%c14, %c0_53] : memref<256x32xbf16, #tpu.memory_space<vmem>>, vector<2x32xbf16>
    %c7 = arith.constant 7 : index
    %c0_54 = arith.constant 0 : index
    %c0_55 = arith.constant 0 : index
    %73 = vector.load %arg13[%c7, %c0_54, %c0_55] : memref<125x32x64xbf16, #tpu.memory_space<vmem>>, vector<1x32x64xbf16>
    %74 = vector.shape_cast %73 : vector<1x32x64xbf16> to vector<32x64xbf16>
    %cst_56 = arith.constant dense<0.000000e+00> : vector<2x64xf32>
    %75 = tpu.matmul %72, %74, %cst_56 {dimension_numbers = #tpu.dot_dimension_numbers<[1], [0], [0], [1], [0, 0, 1, 1], [], []>} : vector<2x32xbf16>, vector<32x64xbf16>, vector<2x64xf32> -> vector<2x64xf32>
    %76 = arith.addf %56, %75 : vector<2x64xf32>
    %c16 = arith.constant 16 : index
    %c0_57 = arith.constant 0 : index
    %77 = vector.load %arg12[%c16, %c0_57] : memref<256x32xbf16, #tpu.memory_space<vmem>>, vector<2x32xbf16>
    %c8_58 = arith.constant 8 : index
    %c0_59 = arith.constant 0 : index
    %c0_60 = arith.constant 0 : index
    %78 = vector.load %arg13[%c8_58, %c0_59, %c0_60] : memref<125x32x64xbf16, #tpu.memory_space<vmem>>, vector<1x32x64xbf16>
    %79 = vector.shape_cast %78 : vector<1x32x64xbf16> to vector<32x64xbf16>
    %cst_61 = arith.constant dense<0.000000e+00> : vector<2x64xf32>
    %80 = tpu.matmul %77, %79, %cst_61 {dimension_numbers = #tpu.dot_dimension_numbers<[1], [0], [0], [1], [0, 0, 1, 1], [], []>} : vector<2x32xbf16>, vector<32x64xbf16>, vector<2x64xf32> -> vector<2x64xf32>
    %81 = arith.addf %61, %80 : vector<2x64xf32>
    %c18 = arith.constant 18 : index
    %c0_62 = arith.constant 0 : index
    %82 = vector.load %arg12[%c18, %c0_62] : memref<256x32xbf16, #tpu.memory_space<vmem>>, vector<2x32xbf16>
    %c9 = arith.constant 9 : index
    %c0_63 = arith.constant 0 : index
    %c0_64 = arith.constant 0 : index
    %83 = vector.load %arg13[%c9, %c0_63, %c0_64] : memref<125x32x64xbf16, #tpu.memory_space<vmem>>, vector<1x32x64xbf16>
    %84 = vector.shape_cast %83 : vector<1x32x64xbf16> to vector<32x64xbf16>
    %cst_65 = arith.constant dense<0.000000e+00> : vector<2x64xf32>
    %85 = tpu.matmul %82, %84, %cst_65 {dimension_numbers = #tpu.dot_dimension_numbers<[1], [0], [0], [1], [0, 0, 1, 1], [], []>} : vector<2x32xbf16>, vector<32x64xbf16>, vector<2x64xf32> -> vector<2x64xf32>
    %86 = arith.addf %66, %85 : vector<2x64xf32>
    %c20 = arith.constant 20 : index
    %c0_66 = arith.constant 0 : index
    %87 = vector.load %arg12[%c20, %c0_66] : memref<256x32xbf16, #tpu.memory_space<vmem>>, vector<2x32xbf16>
    %c10_67 = arith.constant 10 : index
    %c0_68 = arith.constant 0 : index
    %c0_69 = arith.constant 0 : index
    %88 = vector.load %arg13[%c10_67, %c0_68, %c0_69] : memref<125x32x64xbf16, #tpu.memory_space<vmem>>, vector<1x32x64xbf16>
    %89 = vector.shape_cast %88 : vector<1x32x64xbf16> to vector<32x64xbf16>
    %cst_70 = arith.constant dense<0.000000e+00> : vector<2x64xf32>
    %90 = tpu.matmul %87, %89, %cst_70 {dimension_numbers = #tpu.dot_dimension_numbers<[1], [0], [0], [1], [0, 0, 1, 1], [], []>} : vector<2x32xbf16>, vector<32x64xbf16>, vector<2x64xf32> -> vector<2x64xf32>
    %91 = arith.addf %71, %90 : vector<2x64xf32>
    %c22 = arith.constant 22 : index
    %c0_71 = arith.constant 0 : index
    %92 = vector.load %arg12[%c22, %c0_71] : memref<256x32xbf16, #tpu.memory_space<vmem>>, vector<2x32xbf16>
    %c11 = arith.constant 11 : index
    %c0_72 = arith.constant 0 : index
    %c0_73 = arith.constant 0 : index
    %93 = vector.load %arg13[%c11, %c0_72, %c0_73] : memref<125x32x64xbf16, #tpu.memory_space<vmem>>, vector<1x32x64xbf16>
    %94 = vector.shape_cast %93 : vector<1x32x64xbf16> to vector<32x64xbf16>
    %cst_74 = arith.constant dense<0.000000e+00> : vector<2x64xf32>
    %95 = tpu.matmul %92, %94, %cst_74 {dimension_numbers = #tpu.dot_dimension_numbers<[1], [0], [0], [1], [0, 0, 1, 1], [], []>} : vector<2x32xbf16>, vector<32x64xbf16>, vector<2x64xf32> -> vector<2x64xf32>
    %96 = arith.addf %76, %95 : vector<2x64xf32>
    %c24 = arith.constant 24 : index
    %c0_75 = arith.constant 0 : index
    %97 = vector.load %arg12[%c24, %c0_75] : memref<256x32xbf16, #tpu.memory_space<vmem>>, vector<2x32xbf16>
    %c12_76 = arith.constant 12 : index
    %c0_77 = arith.constant 0 : index
    %c0_78 = arith.constant 0 : index
    %98 = vector.load %arg13[%c12_76, %c0_77, %c0_78] : memref<125x32x64xbf16, #tpu.memory_space<vmem>>, vector<1x32x64xbf16>
    %99 = vector.shape_cast %98 : vector<1x32x64xbf16> to vector<32x64xbf16>
    %cst_79 = arith.constant dense<0.000000e+00> : vector<2x64xf32>
    %100 = tpu.matmul %97, %99, %cst_79 {dimension_numbers = #tpu.dot_dimension_numbers<[1], [0], [0], [1], [0, 0, 1, 1], [], []>} : vector<2x32xbf16>, vector<32x64xbf16>, vector<2x64xf32> -> vector<2x64xf32>
    %101 = arith.addf %81, %100 : vector<2x64xf32>
    %c26 = arith.constant 26 : index
    %c0_80 = arith.constant 0 : index
    %102 = vector.load %arg12[%c26, %c0_80] : memref<256x32xbf16, #tpu.memory_space<vmem>>, vector<2x32xbf16>
    %c13 = arith.constant 13 : index
    %c0_81 = arith.constant 0 : index
    %c0_82 = arith.constant 0 : index
    %103 = vector.load %arg13[%c13, %c0_81, %c0_82] : memref<125x32x64xbf16, #tpu.memory_space<vmem>>, vector<1x32x64xbf16>
    %104 = vector.shape_cast %103 : vector<1x32x64xbf16> to vector<32x64xbf16>
    %cst_83 = arith.constant dense<0.000000e+00> : vector<2x64xf32>
    %105 = tpu.matmul %102, %104, %cst_83 {dimension_numbers = #tpu.dot_dimension_numbers<[1], [0], [0], [1], [0, 0, 1, 1], [], []>} : vector<2x32xbf16>, vector<32x64xbf16>, vector<2x64xf32> -> vector<2x64xf32>
    %106 = arith.addf %86, %105 : vector<2x64xf32>
    %c28 = arith.constant 28 : index
    %c0_84 = arith.constant 0 : index
    %107 = vector.load %arg12[%c28, %c0_84] : memref<256x32xbf16, #tpu.memory_space<vmem>>, vector<2x32xbf16>
    %c14_85 = arith.constant 14 : index
    %c0_86 = arith.constant 0 : index
    %c0_87 = arith.constant 0 : index
    %108 = vector.load %arg13[%c14_85, %c0_86, %c0_87] : memref<125x32x64xbf16, #tpu.memory_space<vmem>>, vector<1x32x64xbf16>
    %109 = vector.shape_cast %108 : vector<1x32x64xbf16> to vector<32x64xbf16>
    %cst_88 = arith.constant dense<0.000000e+00> : vector<2x64xf32>
    %110 = tpu.matmul %107, %109, %cst_88 {dimension_numbers = #tpu.dot_dimension_numbers<[1], [0], [0], [1], [0, 0, 1, 1], [], []>} : vector<2x32xbf16>, vector<32x64xbf16>, vector<2x64xf32> -> vector<2x64xf32>
    %111 = arith.addf %91, %110 : vector<2x64xf32>
    %c30 = arith.constant 30 : index
    %c0_89 = arith.constant 0 : index
    %112 = vector.load %arg12[%c30, %c0_89] : memref<256x32xbf16, #tpu.memory_space<vmem>>, vector<2x32xbf16>
    %c15 = arith.constant 15 : index
    %c0_90 = arith.constant 0 : index
    %c0_91 = arith.constant 0 : index
    %113 = vector.load %arg13[%c15, %c0_90, %c0_91] : memref<125x32x64xbf16, #tpu.memory_space<vmem>>, vector<1x32x64xbf16>
    %114 = vector.shape_cast %113 : vector<1x32x64xbf16> to vector<32x64xbf16>
    %cst_92 = arith.constant dense<0.000000e+00> : vector<2x64xf32>
    %115 = tpu.matmul %112, %114, %cst_92 {dimension_numbers = #tpu.dot_dimension_numbers<[1], [0], [0], [1], [0, 0, 1, 1], [], []>} : vector<2x32xbf16>, vector<32x64xbf16>, vector<2x64xf32> -> vector<2x64xf32>
    %116 = arith.addf %96, %115 : vector<2x64xf32>
    %c32 = arith.constant 32 : index
    %c0_93 = arith.constant 0 : index
    %117 = vector.load %arg12[%c32, %c0_93] : memref<256x32xbf16, #tpu.memory_space<vmem>>, vector<2x32xbf16>
    %c16_94 = arith.constant 16 : index
    %c0_95 = arith.constant 0 : index
    %c0_96 = arith.constant 0 : index
    %118 = vector.load %arg13[%c16_94, %c0_95, %c0_96] : memref<125x32x64xbf16, #tpu.memory_space<vmem>>, vector<1x32x64xbf16>
    %119 = vector.shape_cast %118 : vector<1x32x64xbf16> to vector<32x64xbf16>
    %cst_97 = arith.constant dense<0.000000e+00> : vector<2x64xf32>
    %120 = tpu.matmul %117, %119, %cst_97 {dimension_numbers = #tpu.dot_dimension_numbers<[1], [0], [0], [1], [0, 0, 1, 1], [], []>} : vector<2x32xbf16>, vector<32x64xbf16>, vector<2x64xf32> -> vector<2x64xf32>
    %121 = arith.addf %101, %120 : vector<2x64xf32>
    %c34 = arith.constant 34 : index
    %c0_98 = arith.constant 0 : index
    %122 = vector.load %arg12[%c34, %c0_98] : memref<256x32xbf16, #tpu.memory_space<vmem>>, vector<2x32xbf16>
    %c17 = arith.constant 17 : index
    %c0_99 = arith.constant 0 : index
    %c0_100 = arith.constant 0 : index
    %123 = vector.load %arg13[%c17, %c0_99, %c0_100] : memref<125x32x64xbf16, #tpu.memory_space<vmem>>, vector<1x32x64xbf16>
    %124 = vector.shape_cast %123 : vector<1x32x64xbf16> to vector<32x64xbf16>
    %cst_101 = arith.constant dense<0.000000e+00> : vector<2x64xf32>
    %125 = tpu.matmul %122, %124, %cst_101 {dimension_numbers = #tpu.dot_dimension_numbers<[1], [0], [0], [1], [0, 0, 1, 1], [], []>} : vector<2x32xbf16>, vector<32x64xbf16>, vector<2x64xf32> -> vector<2x64xf32>
    %126 = arith.addf %106, %125 : vector<2x64xf32>
    %c36 = arith.constant 36 : index
    %c0_102 = arith.constant 0 : index
    %127 = vector.load %arg12[%c36, %c0_102] : memref<256x32xbf16, #tpu.memory_space<vmem>>, vector<2x32xbf16>
    %c18_103 = arith.constant 18 : index
    %c0_104 = arith.constant 0 : index
    %c0_105 = arith.constant 0 : index
    %128 = vector.load %arg13[%c18_103, %c0_104, %c0_105] : memref<125x32x64xbf16, #tpu.memory_space<vmem>>, vector<1x32x64xbf16>
    %129 = vector.shape_cast %128 : vector<1x32x64xbf16> to vector<32x64xbf16>
    %cst_106 = arith.constant dense<0.000000e+00> : vector<2x64xf32>
    %130 = tpu.matmul %127, %129, %cst_106 {dimension_numbers = #tpu.dot_dimension_numbers<[1], [0], [0], [1], [0, 0, 1, 1], [], []>} : vector<2x32xbf16>, vector<32x64xbf16>, vector<2x64xf32> -> vector<2x64xf32>
    %131 = arith.addf %111, %130 : vector<2x64xf32>
    %c38 = arith.constant 38 : index
    %c0_107 = arith.constant 0 : index
    %132 = vector.load %arg12[%c38, %c0_107] : memref<256x32xbf16, #tpu.memory_space<vmem>>, vector<2x32xbf16>
    %c19 = arith.constant 19 : index
    %c0_108 = arith.constant 0 : index
    %c0_109 = arith.constant 0 : index
    %133 = vector.load %arg13[%c19, %c0_108, %c0_109] : memref<125x32x64xbf16, #tpu.memory_space<vmem>>, vector<1x32x64xbf16>
    %134 = vector.shape_cast %133 : vector<1x32x64xbf16> to vector<32x64xbf16>
    %cst_110 = arith.constant dense<0.000000e+00> : vector<2x64xf32>
    %135 = tpu.matmul %132, %134, %cst_110 {dimension_numbers = #tpu.dot_dimension_numbers<[1], [0], [0], [1], [0, 0, 1, 1], [], []>} : vector<2x32xbf16>, vector<32x64xbf16>, vector<2x64xf32> -> vector<2x64xf32>
    %136 = arith.addf %116, %135 : vector<2x64xf32>
    %c40 = arith.constant 40 : index
    %c0_111 = arith.constant 0 : index
    %137 = vector.load %arg12[%c40, %c0_111] : memref<256x32xbf16, #tpu.memory_space<vmem>>, vector<2x32xbf16>
    %c20_112 = arith.constant 20 : index
    %c0_113 = arith.constant 0 : index
    %c0_114 = arith.constant 0 : index
    %138 = vector.load %arg13[%c20_112, %c0_113, %c0_114] : memref<125x32x64xbf16, #tpu.memory_space<vmem>>, vector<1x32x64xbf16>
    %139 = vector.shape_cast %138 : vector<1x32x64xbf16> to vector<32x64xbf16>
    %cst_115 = arith.constant dense<0.000000e+00> : vector<2x64xf32>
    %140 = tpu.matmul %137, %139, %cst_115 {dimension_numbers = #tpu.dot_dimension_numbers<[1], [0], [0], [1], [0, 0, 1, 1], [], []>} : vector<2x32xbf16>, vector<32x64xbf16>, vector<2x64xf32> -> vector<2x64xf32>
    %141 = arith.addf %121, %140 : vector<2x64xf32>
    %c42 = arith.constant 42 : index
    %c0_116 = arith.constant 0 : index
    %142 = vector.load %arg12[%c42, %c0_116] : memref<256x32xbf16, #tpu.memory_space<vmem>>, vector<2x32xbf16>
    %c21 = arith.constant 21 : index
    %c0_117 = arith.constant 0 : index
    %c0_118 = arith.constant 0 : index
    %143 = vector.load %arg13[%c21, %c0_117, %c0_118] : memref<125x32x64xbf16, #tpu.memory_space<vmem>>, vector<1x32x64xbf16>
    %144 = vector.shape_cast %143 : vector<1x32x64xbf16> to vector<32x64xbf16>
    %cst_119 = arith.constant dense<0.000000e+00> : vector<2x64xf32>
    %145 = tpu.matmul %142, %144, %cst_119 {dimension_numbers = #tpu.dot_dimension_numbers<[1], [0], [0], [1], [0, 0, 1, 1], [], []>} : vector<2x32xbf16>, vector<32x64xbf16>, vector<2x64xf32> -> vector<2x64xf32>
    %146 = arith.addf %126, %145 : vector<2x64xf32>
    %c44 = arith.constant 44 : index
    %c0_120 = arith.constant 0 : index
    %147 = vector.load %arg12[%c44, %c0_120] : memref<256x32xbf16, #tpu.memory_space<vmem>>, vector<2x32xbf16>
    %c22_121 = arith.constant 22 : index
    %c0_122 = arith.constant 0 : index
    %c0_123 = arith.constant 0 : index
    %148 = vector.load %arg13[%c22_121, %c0_122, %c0_123] : memref<125x32x64xbf16, #tpu.memory_space<vmem>>, vector<1x32x64xbf16>
    %149 = vector.shape_cast %148 : vector<1x32x64xbf16> to vector<32x64xbf16>
    %cst_124 = arith.constant dense<0.000000e+00> : vector<2x64xf32>
    %150 = tpu.matmul %147, %149, %cst_124 {dimension_numbers = #tpu.dot_dimension_numbers<[1], [0], [0], [1], [0, 0, 1, 1], [], []>} : vector<2x32xbf16>, vector<32x64xbf16>, vector<2x64xf32> -> vector<2x64xf32>
    %151 = arith.addf %131, %150 : vector<2x64xf32>
    %c46 = arith.constant 46 : index
    %c0_125 = arith.constant 0 : index
    %152 = vector.load %arg12[%c46, %c0_125] : memref<256x32xbf16, #tpu.memory_space<vmem>>, vector<2x32xbf16>
    %c23 = arith.constant 23 : index
    %c0_126 = arith.constant 0 : index
    %c0_127 = arith.constant 0 : index
    %153 = vector.load %arg13[%c23, %c0_126, %c0_127] : memref<125x32x64xbf16, #tpu.memory_space<vmem>>, vector<1x32x64xbf16>
    %154 = vector.shape_cast %153 : vector<1x32x64xbf16> to vector<32x64xbf16>
    %cst_128 = arith.constant dense<0.000000e+00> : vector<2x64xf32>
    %155 = tpu.matmul %152, %154, %cst_128 {dimension_numbers = #tpu.dot_dimension_numbers<[1], [0], [0], [1], [0, 0, 1, 1], [], []>} : vector<2x32xbf16>, vector<32x64xbf16>, vector<2x64xf32> -> vector<2x64xf32>
    %156 = arith.addf %136, %155 : vector<2x64xf32>
    %c48 = arith.constant 48 : index
    %c0_129 = arith.constant 0 : index
    %157 = vector.load %arg12[%c48, %c0_129] : memref<256x32xbf16, #tpu.memory_space<vmem>>, vector<2x32xbf16>
    %c24_130 = arith.constant 24 : index
    %c0_131 = arith.constant 0 : index
    %c0_132 = arith.constant 0 : index
    %158 = vector.load %arg13[%c24_130, %c0_131, %c0_132] : memref<125x32x64xbf16, #tpu.memory_space<vmem>>, vector<1x32x64xbf16>
    %159 = vector.shape_cast %158 : vector<1x32x64xbf16> to vector<32x64xbf16>
    %cst_133 = arith.constant dense<0.000000e+00> : vector<2x64xf32>
    %160 = tpu.matmul %157, %159, %cst_133 {dimension_numbers = #tpu.dot_dimension_numbers<[1], [0], [0], [1], [0, 0, 1, 1], [], []>} : vector<2x32xbf16>, vector<32x64xbf16>, vector<2x64xf32> -> vector<2x64xf32>
    %161 = arith.addf %141, %160 : vector<2x64xf32>
    %c50 = arith.constant 50 : index
    %c0_134 = arith.constant 0 : index
    %162 = vector.load %arg12[%c50, %c0_134] : memref<256x32xbf16, #tpu.memory_space<vmem>>, vector<2x32xbf16>
    %c25 = arith.constant 25 : index
    %c0_135 = arith.constant 0 : index
    %c0_136 = arith.constant 0 : index
    %163 = vector.load %arg13[%c25, %c0_135, %c0_136] : memref<125x32x64xbf16, #tpu.memory_space<vmem>>, vector<1x32x64xbf16>
    %164 = vector.shape_cast %163 : vector<1x32x64xbf16> to vector<32x64xbf16>
    %cst_137 = arith.constant dense<0.000000e+00> : vector<2x64xf32>
    %165 = tpu.matmul %162, %164, %cst_137 {dimension_numbers = #tpu.dot_dimension_numbers<[1], [0], [0], [1], [0, 0, 1, 1], [], []>} : vector<2x32xbf16>, vector<32x64xbf16>, vector<2x64xf32> -> vector<2x64xf32>
    %166 = arith.addf %146, %165 : vector<2x64xf32>
    %c52 = arith.constant 52 : index
    %c0_138 = arith.constant 0 : index
    %167 = vector.load %arg12[%c52, %c0_138] : memref<256x32xbf16, #tpu.memory_space<vmem>>, vector<2x32xbf16>
    %c26_139 = arith.constant 26 : index
    %c0_140 = arith.constant 0 : index
    %c0_141 = arith.constant 0 : index
    %168 = vector.load %arg13[%c26_139, %c0_140, %c0_141] : memref<125x32x64xbf16, #tpu.memory_space<vmem>>, vector<1x32x64xbf16>
    %169 = vector.shape_cast %168 : vector<1x32x64xbf16> to vector<32x64xbf16>
    %cst_142 = arith.constant dense<0.000000e+00> : vector<2x64xf32>
    %170 = tpu.matmul %167, %169, %cst_142 {dimension_numbers = #tpu.dot_dimension_numbers<[1], [0], [0], [1], [0, 0, 1, 1], [], []>} : vector<2x32xbf16>, vector<32x64xbf16>, vector<2x64xf32> -> vector<2x64xf32>
    %171 = arith.addf %151, %170 : vector<2x64xf32>
    %c54 = arith.constant 54 : index
    %c0_143 = arith.constant 0 : index
    %172 = vector.load %arg12[%c54, %c0_143] : memref<256x32xbf16, #tpu.memory_space<vmem>>, vector<2x32xbf16>
    %c27 = arith.constant 27 : index
    %c0_144 = arith.constant 0 : index
    %c0_145 = arith.constant 0 : index
    %173 = vector.load %arg13[%c27, %c0_144, %c0_145] : memref<125x32x64xbf16, #tpu.memory_space<vmem>>, vector<1x32x64xbf16>
    %174 = vector.shape_cast %173 : vector<1x32x64xbf16> to vector<32x64xbf16>
    %cst_146 = arith.constant dense<0.000000e+00> : vector<2x64xf32>
    %175 = tpu.matmul %172, %174, %cst_146 {dimension_numbers = #tpu.dot_dimension_numbers<[1], [0], [0], [1], [0, 0, 1, 1], [], []>} : vector<2x32xbf16>, vector<32x64xbf16>, vector<2x64xf32> -> vector<2x64xf32>
    %176 = arith.addf %156, %175 : vector<2x64xf32>
    %c56 = arith.constant 56 : index
    %c0_147 = arith.constant 0 : index
    %177 = vector.load %arg12[%c56, %c0_147] : memref<256x32xbf16, #tpu.memory_space<vmem>>, vector<2x32xbf16>
    %c28_148 = arith.constant 28 : index
    %c0_149 = arith.constant 0 : index
    %c0_150 = arith.constant 0 : index
    %178 = vector.load %arg13[%c28_148, %c0_149, %c0_150] : memref<125x32x64xbf16, #tpu.memory_space<vmem>>, vector<1x32x64xbf16>
    %179 = vector.shape_cast %178 : vector<1x32x64xbf16> to vector<32x64xbf16>
    %cst_151 = arith.constant dense<0.000000e+00> : vector<2x64xf32>
    %180 = tpu.matmul %177, %179, %cst_151 {dimension_numbers = #tpu.dot_dimension_numbers<[1], [0], [0], [1], [0, 0, 1, 1], [], []>} : vector<2x32xbf16>, vector<32x64xbf16>, vector<2x64xf32> -> vector<2x64xf32>
    %181 = arith.addf %161, %180 : vector<2x64xf32>
    %c58 = arith.constant 58 : index
    %c0_152 = arith.constant 0 : index
    %182 = vector.load %arg12[%c58, %c0_152] : memref<256x32xbf16, #tpu.memory_space<vmem>>, vector<2x32xbf16>
    %c29 = arith.constant 29 : index
    %c0_153 = arith.constant 0 : index
    %c0_154 = arith.constant 0 : index
    %183 = vector.load %arg13[%c29, %c0_153, %c0_154] : memref<125x32x64xbf16, #tpu.memory_space<vmem>>, vector<1x32x64xbf16>
    %184 = vector.shape_cast %183 : vector<1x32x64xbf16> to vector<32x64xbf16>
    %cst_155 = arith.constant dense<0.000000e+00> : vector<2x64xf32>
    %185 = tpu.matmul %182, %184, %cst_155 {dimension_numbers = #tpu.dot_dimension_numbers<[1], [0], [0], [1], [0, 0, 1, 1], [], []>} : vector<2x32xbf16>, vector<32x64xbf16>, vector<2x64xf32> -> vector<2x64xf32>
    %186 = arith.addf %166, %185 : vector<2x64xf32>
    %c60 = arith.constant 60 : index
    %c0_156 = arith.constant 0 : index
    %187 = vector.load %arg12[%c60, %c0_156] : memref<256x32xbf16, #tpu.memory_space<vmem>>, vector<2x32xbf16>
    %c30_157 = arith.constant 30 : index
    %c0_158 = arith.constant 0 : index
    %c0_159 = arith.constant 0 : index
    %188 = vector.load %arg13[%c30_157, %c0_158, %c0_159] : memref<125x32x64xbf16, #tpu.memory_space<vmem>>, vector<1x32x64xbf16>
    %189 = vector.shape_cast %188 : vector<1x32x64xbf16> to vector<32x64xbf16>
    %cst_160 = arith.constant dense<0.000000e+00> : vector<2x64xf32>
    %190 = tpu.matmul %187, %189, %cst_160 {dimension_numbers = #tpu.dot_dimension_numbers<[1], [0], [0], [1], [0, 0, 1, 1], [], []>} : vector<2x32xbf16>, vector<32x64xbf16>, vector<2x64xf32> -> vector<2x64xf32>
    %191 = arith.addf %171, %190 : vector<2x64xf32>
    %c62 = arith.constant 62 : index
    %c0_161 = arith.constant 0 : index
    %192 = vector.load %arg12[%c62, %c0_161] : memref<256x32xbf16, #tpu.memory_space<vmem>>, vector<2x32xbf16>
    %c31 = arith.constant 31 : index
    %c0_162 = arith.constant 0 : index
    %c0_163 = arith.constant 0 : index
    %193 = vector.load %arg13[%c31, %c0_162, %c0_163] : memref<125x32x64xbf16, #tpu.memory_space<vmem>>, vector<1x32x64xbf16>
    %194 = vector.shape_cast %193 : vector<1x32x64xbf16> to vector<32x64xbf16>
    %cst_164 = arith.constant dense<0.000000e+00> : vector<2x64xf32>
    %195 = tpu.matmul %192, %194, %cst_164 {dimension_numbers = #tpu.dot_dimension_numbers<[1], [0], [0], [1], [0, 0, 1, 1], [], []>} : vector<2x32xbf16>, vector<32x64xbf16>, vector<2x64xf32> -> vector<2x64xf32>
    %196 = arith.addf %176, %195 : vector<2x64xf32>
    %c64 = arith.constant 64 : index
    %c0_165 = arith.constant 0 : index
    %197 = vector.load %arg12[%c64, %c0_165] : memref<256x32xbf16, #tpu.memory_space<vmem>>, vector<2x32xbf16>
    %c32_166 = arith.constant 32 : index
    %c0_167 = arith.constant 0 : index
    %c0_168 = arith.constant 0 : index
    %198 = vector.load %arg13[%c32_166, %c0_167, %c0_168] : memref<125x32x64xbf16, #tpu.memory_space<vmem>>, vector<1x32x64xbf16>
    %199 = vector.shape_cast %198 : vector<1x32x64xbf16> to vector<32x64xbf16>
    %cst_169 = arith.constant dense<0.000000e+00> : vector<2x64xf32>
    %200 = tpu.matmul %197, %199, %cst_169 {dimension_numbers = #tpu.dot_dimension_numbers<[1], [0], [0], [1], [0, 0, 1, 1], [], []>} : vector<2x32xbf16>, vector<32x64xbf16>, vector<2x64xf32> -> vector<2x64xf32>
    %201 = arith.addf %181, %200 : vector<2x64xf32>
    %c66 = arith.constant 66 : index
    %c0_170 = arith.constant 0 : index
    %202 = vector.load %arg12[%c66, %c0_170] : memref<256x32xbf16, #tpu.memory_space<vmem>>, vector<2x32xbf16>
    %c33 = arith.constant 33 : index
    %c0_171 = arith.constant 0 : index
    %c0_172 = arith.constant 0 : index
    %203 = vector.load %arg13[%c33, %c0_171, %c0_172] : memref<125x32x64xbf16, #tpu.memory_space<vmem>>, vector<1x32x64xbf16>
    %204 = vector.shape_cast %203 : vector<1x32x64xbf16> to vector<32x64xbf16>
    %cst_173 = arith.constant dense<0.000000e+00> : vector<2x64xf32>
    %205 = tpu.matmul %202, %204, %cst_173 {dimension_numbers = #tpu.dot_dimension_numbers<[1], [0], [0], [1], [0, 0, 1, 1], [], []>} : vector<2x32xbf16>, vector<32x64xbf16>, vector<2x64xf32> -> vector<2x64xf32>
    %206 = arith.addf %186, %205 : vector<2x64xf32>
    %c68 = arith.constant 68 : index
    %c0_174 = arith.constant 0 : index
    %207 = vector.load %arg12[%c68, %c0_174] : memref<256x32xbf16, #tpu.memory_space<vmem>>, vector<2x32xbf16>
    %c34_175 = arith.constant 34 : index
    %c0_176 = arith.constant 0 : index
    %c0_177 = arith.constant 0 : index
    %208 = vector.load %arg13[%c34_175, %c0_176, %c0_177] : memref<125x32x64xbf16, #tpu.memory_space<vmem>>, vector<1x32x64xbf16>
    %209 = vector.shape_cast %208 : vector<1x32x64xbf16> to vector<32x64xbf16>
    %cst_178 = arith.constant dense<0.000000e+00> : vector<2x64xf32>
    %210 = tpu.matmul %207, %209, %cst_178 {dimension_numbers = #tpu.dot_dimension_numbers<[1], [0], [0], [1], [0, 0, 1, 1], [], []>} : vector<2x32xbf16>, vector<32x64xbf16>, vector<2x64xf32> -> vector<2x64xf32>
    %211 = arith.addf %191, %210 : vector<2x64xf32>
    %c70 = arith.constant 70 : index
    %c0_179 = arith.constant 0 : index
    %212 = vector.load %arg12[%c70, %c0_179] : memref<256x32xbf16, #tpu.memory_space<vmem>>, vector<2x32xbf16>
    %c35 = arith.constant 35 : index
    %c0_180 = arith.constant 0 : index
    %c0_181 = arith.constant 0 : index
    %213 = vector.load %arg13[%c35, %c0_180, %c0_181] : memref<125x32x64xbf16, #tpu.memory_space<vmem>>, vector<1x32x64xbf16>
    %214 = vector.shape_cast %213 : vector<1x32x64xbf16> to vector<32x64xbf16>
    %cst_182 = arith.constant dense<0.000000e+00> : vector<2x64xf32>
    %215 = tpu.matmul %212, %214, %cst_182 {dimension_numbers = #tpu.dot_dimension_numbers<[1], [0], [0], [1], [0, 0, 1, 1], [], []>} : vector<2x32xbf16>, vector<32x64xbf16>, vector<2x64xf32> -> vector<2x64xf32>
    %216 = arith.addf %196, %215 : vector<2x64xf32>
    %c72 = arith.constant 72 : index
    %c0_183 = arith.constant 0 : index
    %217 = vector.load %arg12[%c72, %c0_183] : memref<256x32xbf16, #tpu.memory_space<vmem>>, vector<2x32xbf16>
    %c36_184 = arith.constant 36 : index
    %c0_185 = arith.constant 0 : index
    %c0_186 = arith.constant 0 : index
    %218 = vector.load %arg13[%c36_184, %c0_185, %c0_186] : memref<125x32x64xbf16, #tpu.memory_space<vmem>>, vector<1x32x64xbf16>
    %219 = vector.shape_cast %218 : vector<1x32x64xbf16> to vector<32x64xbf16>
    %cst_187 = arith.constant dense<0.000000e+00> : vector<2x64xf32>
    %220 = tpu.matmul %217, %219, %cst_187 {dimension_numbers = #tpu.dot_dimension_numbers<[1], [0], [0], [1], [0, 0, 1, 1], [], []>} : vector<2x32xbf16>, vector<32x64xbf16>, vector<2x64xf32> -> vector<2x64xf32>
    %221 = arith.addf %201, %220 : vector<2x64xf32>
    %c74 = arith.constant 74 : index
    %c0_188 = arith.constant 0 : index
    %222 = vector.load %arg12[%c74, %c0_188] : memref<256x32xbf16, #tpu.memory_space<vmem>>, vector<2x32xbf16>
    %c37 = arith.constant 37 : index
    %c0_189 = arith.constant 0 : index
    %c0_190 = arith.constant 0 : index
    %223 = vector.load %arg13[%c37, %c0_189, %c0_190] : memref<125x32x64xbf16, #tpu.memory_space<vmem>>, vector<1x32x64xbf16>
    %224 = vector.shape_cast %223 : vector<1x32x64xbf16> to vector<32x64xbf16>
    %cst_191 = arith.constant dense<0.000000e+00> : vector<2x64xf32>
    %225 = tpu.matmul %222, %224, %cst_191 {dimension_numbers = #tpu.dot_dimension_numbers<[1], [0], [0], [1], [0, 0, 1, 1], [], []>} : vector<2x32xbf16>, vector<32x64xbf16>, vector<2x64xf32> -> vector<2x64xf32>
    %226 = arith.addf %206, %225 : vector<2x64xf32>
    %c76 = arith.constant 76 : index
    %c0_192 = arith.constant 0 : index
    %227 = vector.load %arg12[%c76, %c0_192] : memref<256x32xbf16, #tpu.memory_space<vmem>>, vector<2x32xbf16>
    %c38_193 = arith.constant 38 : index
    %c0_194 = arith.constant 0 : index
    %c0_195 = arith.constant 0 : index
    %228 = vector.load %arg13[%c38_193, %c0_194, %c0_195] : memref<125x32x64xbf16, #tpu.memory_space<vmem>>, vector<1x32x64xbf16>
    %229 = vector.shape_cast %228 : vector<1x32x64xbf16> to vector<32x64xbf16>
    %cst_196 = arith.constant dense<0.000000e+00> : vector<2x64xf32>
    %230 = tpu.matmul %227, %229, %cst_196 {dimension_numbers = #tpu.dot_dimension_numbers<[1], [0], [0], [1], [0, 0, 1, 1], [], []>} : vector<2x32xbf16>, vector<32x64xbf16>, vector<2x64xf32> -> vector<2x64xf32>
    %231 = arith.addf %211, %230 : vector<2x64xf32>
    %c78 = arith.constant 78 : index
    %c0_197 = arith.constant 0 : index
    %232 = vector.load %arg12[%c78, %c0_197] : memref<256x32xbf16, #tpu.memory_space<vmem>>, vector<2x32xbf16>
    %c39 = arith.constant 39 : index
    %c0_198 = arith.constant 0 : index
    %c0_199 = arith.constant 0 : index
    %233 = vector.load %arg13[%c39, %c0_198, %c0_199] : memref<125x32x64xbf16, #tpu.memory_space<vmem>>, vector<1x32x64xbf16>
    %234 = vector.shape_cast %233 : vector<1x32x64xbf16> to vector<32x64xbf16>
    %cst_200 = arith.constant dense<0.000000e+00> : vector<2x64xf32>
    %235 = tpu.matmul %232, %234, %cst_200 {dimension_numbers = #tpu.dot_dimension_numbers<[1], [0], [0], [1], [0, 0, 1, 1], [], []>} : vector<2x32xbf16>, vector<32x64xbf16>, vector<2x64xf32> -> vector<2x64xf32>
    %236 = arith.addf %216, %235 : vector<2x64xf32>
    %c80 = arith.constant 80 : index
    %c0_201 = arith.constant 0 : index
    %237 = vector.load %arg12[%c80, %c0_201] : memref<256x32xbf16, #tpu.memory_space<vmem>>, vector<2x32xbf16>
    %c40_202 = arith.constant 40 : index
    %c0_203 = arith.constant 0 : index
    %c0_204 = arith.constant 0 : index
    %238 = vector.load %arg13[%c40_202, %c0_203, %c0_204] : memref<125x32x64xbf16, #tpu.memory_space<vmem>>, vector<1x32x64xbf16>
    %239 = vector.shape_cast %238 : vector<1x32x64xbf16> to vector<32x64xbf16>
    %cst_205 = arith.constant dense<0.000000e+00> : vector<2x64xf32>
    %240 = tpu.matmul %237, %239, %cst_205 {dimension_numbers = #tpu.dot_dimension_numbers<[1], [0], [0], [1], [0, 0, 1, 1], [], []>} : vector<2x32xbf16>, vector<32x64xbf16>, vector<2x64xf32> -> vector<2x64xf32>
    %241 = arith.addf %221, %240 : vector<2x64xf32>
    %c82 = arith.constant 82 : index
    %c0_206 = arith.constant 0 : index
    %242 = vector.load %arg12[%c82, %c0_206] : memref<256x32xbf16, #tpu.memory_space<vmem>>, vector<2x32xbf16>
    %c41 = arith.constant 41 : index
    %c0_207 = arith.constant 0 : index
    %c0_208 = arith.constant 0 : index
    %243 = vector.load %arg13[%c41, %c0_207, %c0_208] : memref<125x32x64xbf16, #tpu.memory_space<vmem>>, vector<1x32x64xbf16>
    %244 = vector.shape_cast %243 : vector<1x32x64xbf16> to vector<32x64xbf16>
    %cst_209 = arith.constant dense<0.000000e+00> : vector<2x64xf32>
    %245 = tpu.matmul %242, %244, %cst_209 {dimension_numbers = #tpu.dot_dimension_numbers<[1], [0], [0], [1], [0, 0, 1, 1], [], []>} : vector<2x32xbf16>, vector<32x64xbf16>, vector<2x64xf32> -> vector<2x64xf32>
    %246 = arith.addf %226, %245 : vector<2x64xf32>
    %c84 = arith.constant 84 : index
    %c0_210 = arith.constant 0 : index
    %247 = vector.load %arg12[%c84, %c0_210] : memref<256x32xbf16, #tpu.memory_space<vmem>>, vector<2x32xbf16>
    %c42_211 = arith.constant 42 : index
    %c0_212 = arith.constant 0 : index
    %c0_213 = arith.constant 0 : index
    %248 = vector.load %arg13[%c42_211, %c0_212, %c0_213] : memref<125x32x64xbf16, #tpu.memory_space<vmem>>, vector<1x32x64xbf16>
    %249 = vector.shape_cast %248 : vector<1x32x64xbf16> to vector<32x64xbf16>
    %cst_214 = arith.constant dense<0.000000e+00> : vector<2x64xf32>
    %250 = tpu.matmul %247, %249, %cst_214 {dimension_numbers = #tpu.dot_dimension_numbers<[1], [0], [0], [1], [0, 0, 1, 1], [], []>} : vector<2x32xbf16>, vector<32x64xbf16>, vector<2x64xf32> -> vector<2x64xf32>
    %251 = arith.addf %231, %250 : vector<2x64xf32>
    %c86 = arith.constant 86 : index
    %c0_215 = arith.constant 0 : index
    %252 = vector.load %arg12[%c86, %c0_215] : memref<256x32xbf16, #tpu.memory_space<vmem>>, vector<2x32xbf16>
    %c43 = arith.constant 43 : index
    %c0_216 = arith.constant 0 : index
    %c0_217 = arith.constant 0 : index
    %253 = vector.load %arg13[%c43, %c0_216, %c0_217] : memref<125x32x64xbf16, #tpu.memory_space<vmem>>, vector<1x32x64xbf16>
    %254 = vector.shape_cast %253 : vector<1x32x64xbf16> to vector<32x64xbf16>
    %cst_218 = arith.constant dense<0.000000e+00> : vector<2x64xf32>
    %255 = tpu.matmul %252, %254, %cst_218 {dimension_numbers = #tpu.dot_dimension_numbers<[1], [0], [0], [1], [0, 0, 1, 1], [], []>} : vector<2x32xbf16>, vector<32x64xbf16>, vector<2x64xf32> -> vector<2x64xf32>
    %256 = arith.addf %236, %255 : vector<2x64xf32>
    %c88 = arith.constant 88 : index
    %c0_219 = arith.constant 0 : index
    %257 = vector.load %arg12[%c88, %c0_219] : memref<256x32xbf16, #tpu.memory_space<vmem>>, vector<2x32xbf16>
    %c44_220 = arith.constant 44 : index
    %c0_221 = arith.constant 0 : index
    %c0_222 = arith.constant 0 : index
    %258 = vector.load %arg13[%c44_220, %c0_221, %c0_222] : memref<125x32x64xbf16, #tpu.memory_space<vmem>>, vector<1x32x64xbf16>
    %259 = vector.shape_cast %258 : vector<1x32x64xbf16> to vector<32x64xbf16>
    %cst_223 = arith.constant dense<0.000000e+00> : vector<2x64xf32>
    %260 = tpu.matmul %257, %259, %cst_223 {dimension_numbers = #tpu.dot_dimension_numbers<[1], [0], [0], [1], [0, 0, 1, 1], [], []>} : vector<2x32xbf16>, vector<32x64xbf16>, vector<2x64xf32> -> vector<2x64xf32>
    %261 = arith.addf %241, %260 : vector<2x64xf32>
    %c90 = arith.constant 90 : index
    %c0_224 = arith.constant 0 : index
    %262 = vector.load %arg12[%c90, %c0_224] : memref<256x32xbf16, #tpu.memory_space<vmem>>, vector<2x32xbf16>
    %c45 = arith.constant 45 : index
    %c0_225 = arith.constant 0 : index
    %c0_226 = arith.constant 0 : index
    %263 = vector.load %arg13[%c45, %c0_225, %c0_226] : memref<125x32x64xbf16, #tpu.memory_space<vmem>>, vector<1x32x64xbf16>
    %264 = vector.shape_cast %263 : vector<1x32x64xbf16> to vector<32x64xbf16>
    %cst_227 = arith.constant dense<0.000000e+00> : vector<2x64xf32>
    %265 = tpu.matmul %262, %264, %cst_227 {dimension_numbers = #tpu.dot_dimension_numbers<[1], [0], [0], [1], [0, 0, 1, 1], [], []>} : vector<2x32xbf16>, vector<32x64xbf16>, vector<2x64xf32> -> vector<2x64xf32>
    %266 = arith.addf %246, %265 : vector<2x64xf32>
    %c92 = arith.constant 92 : index
    %c0_228 = arith.constant 0 : index
    %267 = vector.load %arg12[%c92, %c0_228] : memref<256x32xbf16, #tpu.memory_space<vmem>>, vector<2x32xbf16>
    %c46_229 = arith.constant 46 : index
    %c0_230 = arith.constant 0 : index
    %c0_231 = arith.constant 0 : index
    %268 = vector.load %arg13[%c46_229, %c0_230, %c0_231] : memref<125x32x64xbf16, #tpu.memory_space<vmem>>, vector<1x32x64xbf16>
    %269 = vector.shape_cast %268 : vector<1x32x64xbf16> to vector<32x64xbf16>
    %cst_232 = arith.constant dense<0.000000e+00> : vector<2x64xf32>
    %270 = tpu.matmul %267, %269, %cst_232 {dimension_numbers = #tpu.dot_dimension_numbers<[1], [0], [0], [1], [0, 0, 1, 1], [], []>} : vector<2x32xbf16>, vector<32x64xbf16>, vector<2x64xf32> -> vector<2x64xf32>
    %271 = arith.addf %251, %270 : vector<2x64xf32>
    %c94 = arith.constant 94 : index
    %c0_233 = arith.constant 0 : index
    %272 = vector.load %arg12[%c94, %c0_233] : memref<256x32xbf16, #tpu.memory_space<vmem>>, vector<2x32xbf16>
    %c47 = arith.constant 47 : index
    %c0_234 = arith.constant 0 : index
    %c0_235 = arith.constant 0 : index
    %273 = vector.load %arg13[%c47, %c0_234, %c0_235] : memref<125x32x64xbf16, #tpu.memory_space<vmem>>, vector<1x32x64xbf16>
    %274 = vector.shape_cast %273 : vector<1x32x64xbf16> to vector<32x64xbf16>
    %cst_236 = arith.constant dense<0.000000e+00> : vector<2x64xf32>
    %275 = tpu.matmul %272, %274, %cst_236 {dimension_numbers = #tpu.dot_dimension_numbers<[1], [0], [0], [1], [0, 0, 1, 1], [], []>} : vector<2x32xbf16>, vector<32x64xbf16>, vector<2x64xf32> -> vector<2x64xf32>
    %276 = arith.addf %256, %275 : vector<2x64xf32>
    %c96 = arith.constant 96 : index
    %c0_237 = arith.constant 0 : index
    %277 = vector.load %arg12[%c96, %c0_237] : memref<256x32xbf16, #tpu.memory_space<vmem>>, vector<2x32xbf16>
    %c48_238 = arith.constant 48 : index
    %c0_239 = arith.constant 0 : index
    %c0_240 = arith.constant 0 : index
    %278 = vector.load %arg13[%c48_238, %c0_239, %c0_240] : memref<125x32x64xbf16, #tpu.memory_space<vmem>>, vector<1x32x64xbf16>
    %279 = vector.shape_cast %278 : vector<1x32x64xbf16> to vector<32x64xbf16>
    %cst_241 = arith.constant dense<0.000000e+00> : vector<2x64xf32>
    %280 = tpu.matmul %277, %279, %cst_241 {dimension_numbers = #tpu.dot_dimension_numbers<[1], [0], [0], [1], [0, 0, 1, 1], [], []>} : vector<2x32xbf16>, vector<32x64xbf16>, vector<2x64xf32> -> vector<2x64xf32>
    %281 = arith.addf %261, %280 : vector<2x64xf32>
    %c98 = arith.constant 98 : index
    %c0_242 = arith.constant 0 : index
    %282 = vector.load %arg12[%c98, %c0_242] : memref<256x32xbf16, #tpu.memory_space<vmem>>, vector<2x32xbf16>
    %c49 = arith.constant 49 : index
    %c0_243 = arith.constant 0 : index
    %c0_244 = arith.constant 0 : index
    %283 = vector.load %arg13[%c49, %c0_243, %c0_244] : memref<125x32x64xbf16, #tpu.memory_space<vmem>>, vector<1x32x64xbf16>
    %284 = vector.shape_cast %283 : vector<1x32x64xbf16> to vector<32x64xbf16>
    %cst_245 = arith.constant dense<0.000000e+00> : vector<2x64xf32>
    %285 = tpu.matmul %282, %284, %cst_245 {dimension_numbers = #tpu.dot_dimension_numbers<[1], [0], [0], [1], [0, 0, 1, 1], [], []>} : vector<2x32xbf16>, vector<32x64xbf16>, vector<2x64xf32> -> vector<2x64xf32>
    %286 = arith.addf %266, %285 : vector<2x64xf32>
    %c100 = arith.constant 100 : index
    %c0_246 = arith.constant 0 : index
    %287 = vector.load %arg12[%c100, %c0_246] : memref<256x32xbf16, #tpu.memory_space<vmem>>, vector<2x32xbf16>
    %c50_247 = arith.constant 50 : index
    %c0_248 = arith.constant 0 : index
    %c0_249 = arith.constant 0 : index
    %288 = vector.load %arg13[%c50_247, %c0_248, %c0_249] : memref<125x32x64xbf16, #tpu.memory_space<vmem>>, vector<1x32x64xbf16>
    %289 = vector.shape_cast %288 : vector<1x32x64xbf16> to vector<32x64xbf16>
    %cst_250 = arith.constant dense<0.000000e+00> : vector<2x64xf32>
    %290 = tpu.matmul %287, %289, %cst_250 {dimension_numbers = #tpu.dot_dimension_numbers<[1], [0], [0], [1], [0, 0, 1, 1], [], []>} : vector<2x32xbf16>, vector<32x64xbf16>, vector<2x64xf32> -> vector<2x64xf32>
    %291 = arith.addf %271, %290 : vector<2x64xf32>
    %c102 = arith.constant 102 : index
    %c0_251 = arith.constant 0 : index
    %292 = vector.load %arg12[%c102, %c0_251] : memref<256x32xbf16, #tpu.memory_space<vmem>>, vector<2x32xbf16>
    %c51 = arith.constant 51 : index
    %c0_252 = arith.constant 0 : index
    %c0_253 = arith.constant 0 : index
    %293 = vector.load %arg13[%c51, %c0_252, %c0_253] : memref<125x32x64xbf16, #tpu.memory_space<vmem>>, vector<1x32x64xbf16>
    %294 = vector.shape_cast %293 : vector<1x32x64xbf16> to vector<32x64xbf16>
    %cst_254 = arith.constant dense<0.000000e+00> : vector<2x64xf32>
    %295 = tpu.matmul %292, %294, %cst_254 {dimension_numbers = #tpu.dot_dimension_numbers<[1], [0], [0], [1], [0, 0, 1, 1], [], []>} : vector<2x32xbf16>, vector<32x64xbf16>, vector<2x64xf32> -> vector<2x64xf32>
    %296 = arith.addf %276, %295 : vector<2x64xf32>
    %c104 = arith.constant 104 : index
    %c0_255 = arith.constant 0 : index
    %297 = vector.load %arg12[%c104, %c0_255] : memref<256x32xbf16, #tpu.memory_space<vmem>>, vector<2x32xbf16>
    %c52_256 = arith.constant 52 : index
    %c0_257 = arith.constant 0 : index
    %c0_258 = arith.constant 0 : index
    %298 = vector.load %arg13[%c52_256, %c0_257, %c0_258] : memref<125x32x64xbf16, #tpu.memory_space<vmem>>, vector<1x32x64xbf16>
    %299 = vector.shape_cast %298 : vector<1x32x64xbf16> to vector<32x64xbf16>
    %cst_259 = arith.constant dense<0.000000e+00> : vector<2x64xf32>
    %300 = tpu.matmul %297, %299, %cst_259 {dimension_numbers = #tpu.dot_dimension_numbers<[1], [0], [0], [1], [0, 0, 1, 1], [], []>} : vector<2x32xbf16>, vector<32x64xbf16>, vector<2x64xf32> -> vector<2x64xf32>
    %301 = arith.addf %281, %300 : vector<2x64xf32>
    %c106 = arith.constant 106 : index
    %c0_260 = arith.constant 0 : index
    %302 = vector.load %arg12[%c106, %c0_260] : memref<256x32xbf16, #tpu.memory_space<vmem>>, vector<2x32xbf16>
    %c53 = arith.constant 53 : index
    %c0_261 = arith.constant 0 : index
    %c0_262 = arith.constant 0 : index
    %303 = vector.load %arg13[%c53, %c0_261, %c0_262] : memref<125x32x64xbf16, #tpu.memory_space<vmem>>, vector<1x32x64xbf16>
    %304 = vector.shape_cast %303 : vector<1x32x64xbf16> to vector<32x64xbf16>
    %cst_263 = arith.constant dense<0.000000e+00> : vector<2x64xf32>
    %305 = tpu.matmul %302, %304, %cst_263 {dimension_numbers = #tpu.dot_dimension_numbers<[1], [0], [0], [1], [0, 0, 1, 1], [], []>} : vector<2x32xbf16>, vector<32x64xbf16>, vector<2x64xf32> -> vector<2x64xf32>
    %306 = arith.addf %286, %305 : vector<2x64xf32>
    %c108 = arith.constant 108 : index
    %c0_264 = arith.constant 0 : index
    %307 = vector.load %arg12[%c108, %c0_264] : memref<256x32xbf16, #tpu.memory_space<vmem>>, vector<2x32xbf16>
    %c54_265 = arith.constant 54 : index
    %c0_266 = arith.constant 0 : index
    %c0_267 = arith.constant 0 : index
    %308 = vector.load %arg13[%c54_265, %c0_266, %c0_267] : memref<125x32x64xbf16, #tpu.memory_space<vmem>>, vector<1x32x64xbf16>
    %309 = vector.shape_cast %308 : vector<1x32x64xbf16> to vector<32x64xbf16>
    %cst_268 = arith.constant dense<0.000000e+00> : vector<2x64xf32>
    %310 = tpu.matmul %307, %309, %cst_268 {dimension_numbers = #tpu.dot_dimension_numbers<[1], [0], [0], [1], [0, 0, 1, 1], [], []>} : vector<2x32xbf16>, vector<32x64xbf16>, vector<2x64xf32> -> vector<2x64xf32>
    %311 = arith.addf %291, %310 : vector<2x64xf32>
    %c110 = arith.constant 110 : index
    %c0_269 = arith.constant 0 : index
    %312 = vector.load %arg12[%c110, %c0_269] : memref<256x32xbf16, #tpu.memory_space<vmem>>, vector<2x32xbf16>
    %c55 = arith.constant 55 : index
    %c0_270 = arith.constant 0 : index
    %c0_271 = arith.constant 0 : index
    %313 = vector.load %arg13[%c55, %c0_270, %c0_271] : memref<125x32x64xbf16, #tpu.memory_space<vmem>>, vector<1x32x64xbf16>
    %314 = vector.shape_cast %313 : vector<1x32x64xbf16> to vector<32x64xbf16>
    %cst_272 = arith.constant dense<0.000000e+00> : vector<2x64xf32>
    %315 = tpu.matmul %312, %314, %cst_272 {dimension_numbers = #tpu.dot_dimension_numbers<[1], [0], [0], [1], [0, 0, 1, 1], [], []>} : vector<2x32xbf16>, vector<32x64xbf16>, vector<2x64xf32> -> vector<2x64xf32>
    %316 = arith.addf %296, %315 : vector<2x64xf32>
    %c112 = arith.constant 112 : index
    %c0_273 = arith.constant 0 : index
    %317 = vector.load %arg12[%c112, %c0_273] : memref<256x32xbf16, #tpu.memory_space<vmem>>, vector<2x32xbf16>
    %c56_274 = arith.constant 56 : index
    %c0_275 = arith.constant 0 : index
    %c0_276 = arith.constant 0 : index
    %318 = vector.load %arg13[%c56_274, %c0_275, %c0_276] : memref<125x32x64xbf16, #tpu.memory_space<vmem>>, vector<1x32x64xbf16>
    %319 = vector.shape_cast %318 : vector<1x32x64xbf16> to vector<32x64xbf16>
    %cst_277 = arith.constant dense<0.000000e+00> : vector<2x64xf32>
    %320 = tpu.matmul %317, %319, %cst_277 {dimension_numbers = #tpu.dot_dimension_numbers<[1], [0], [0], [1], [0, 0, 1, 1], [], []>} : vector<2x32xbf16>, vector<32x64xbf16>, vector<2x64xf32> -> vector<2x64xf32>
    %321 = arith.addf %301, %320 : vector<2x64xf32>
    %c114 = arith.constant 114 : index
    %c0_278 = arith.constant 0 : index
    %322 = vector.load %arg12[%c114, %c0_278] : memref<256x32xbf16, #tpu.memory_space<vmem>>, vector<2x32xbf16>
    %c57 = arith.constant 57 : index
    %c0_279 = arith.constant 0 : index
    %c0_280 = arith.constant 0 : index
    %323 = vector.load %arg13[%c57, %c0_279, %c0_280] : memref<125x32x64xbf16, #tpu.memory_space<vmem>>, vector<1x32x64xbf16>
    %324 = vector.shape_cast %323 : vector<1x32x64xbf16> to vector<32x64xbf16>
    %cst_281 = arith.constant dense<0.000000e+00> : vector<2x64xf32>
    %325 = tpu.matmul %322, %324, %cst_281 {dimension_numbers = #tpu.dot_dimension_numbers<[1], [0], [0], [1], [0, 0, 1, 1], [], []>} : vector<2x32xbf16>, vector<32x64xbf16>, vector<2x64xf32> -> vector<2x64xf32>
    %326 = arith.addf %306, %325 : vector<2x64xf32>
    %c116 = arith.constant 116 : index
    %c0_282 = arith.constant 0 : index
    %327 = vector.load %arg12[%c116, %c0_282] : memref<256x32xbf16, #tpu.memory_space<vmem>>, vector<2x32xbf16>
    %c58_283 = arith.constant 58 : index
    %c0_284 = arith.constant 0 : index
    %c0_285 = arith.constant 0 : index
    %328 = vector.load %arg13[%c58_283, %c0_284, %c0_285] : memref<125x32x64xbf16, #tpu.memory_space<vmem>>, vector<1x32x64xbf16>
    %329 = vector.shape_cast %328 : vector<1x32x64xbf16> to vector<32x64xbf16>
    %cst_286 = arith.constant dense<0.000000e+00> : vector<2x64xf32>
    %330 = tpu.matmul %327, %329, %cst_286 {dimension_numbers = #tpu.dot_dimension_numbers<[1], [0], [0], [1], [0, 0, 1, 1], [], []>} : vector<2x32xbf16>, vector<32x64xbf16>, vector<2x64xf32> -> vector<2x64xf32>
    %331 = arith.addf %311, %330 : vector<2x64xf32>
    %c118 = arith.constant 118 : index
    %c0_287 = arith.constant 0 : index
    %332 = vector.load %arg12[%c118, %c0_287] : memref<256x32xbf16, #tpu.memory_space<vmem>>, vector<2x32xbf16>
    %c59 = arith.constant 59 : index
    %c0_288 = arith.constant 0 : index
    %c0_289 = arith.constant 0 : index
    %333 = vector.load %arg13[%c59, %c0_288, %c0_289] : memref<125x32x64xbf16, #tpu.memory_space<vmem>>, vector<1x32x64xbf16>
    %334 = vector.shape_cast %333 : vector<1x32x64xbf16> to vector<32x64xbf16>
    %cst_290 = arith.constant dense<0.000000e+00> : vector<2x64xf32>
    %335 = tpu.matmul %332, %334, %cst_290 {dimension_numbers = #tpu.dot_dimension_numbers<[1], [0], [0], [1], [0, 0, 1, 1], [], []>} : vector<2x32xbf16>, vector<32x64xbf16>, vector<2x64xf32> -> vector<2x64xf32>
    %336 = arith.addf %316, %335 : vector<2x64xf32>
    %c120 = arith.constant 120 : index
    %c0_291 = arith.constant 0 : index
    %337 = vector.load %arg12[%c120, %c0_291] : memref<256x32xbf16, #tpu.memory_space<vmem>>, vector<2x32xbf16>
    %c60_292 = arith.constant 60 : index
    %c0_293 = arith.constant 0 : index
    %c0_294 = arith.constant 0 : index
    %338 = vector.load %arg13[%c60_292, %c0_293, %c0_294] : memref<125x32x64xbf16, #tpu.memory_space<vmem>>, vector<1x32x64xbf16>
    %339 = vector.shape_cast %338 : vector<1x32x64xbf16> to vector<32x64xbf16>
    %cst_295 = arith.constant dense<0.000000e+00> : vector<2x64xf32>
    %340 = tpu.matmul %337, %339, %cst_295 {dimension_numbers = #tpu.dot_dimension_numbers<[1], [0], [0], [1], [0, 0, 1, 1], [], []>} : vector<2x32xbf16>, vector<32x64xbf16>, vector<2x64xf32> -> vector<2x64xf32>
    %341 = arith.addf %321, %340 : vector<2x64xf32>
    %c122 = arith.constant 122 : index
    %c0_296 = arith.constant 0 : index
    %342 = vector.load %arg12[%c122, %c0_296] : memref<256x32xbf16, #tpu.memory_space<vmem>>, vector<2x32xbf16>
    %c61 = arith.constant 61 : index
    %c0_297 = arith.constant 0 : index
    %c0_298 = arith.constant 0 : index
    %343 = vector.load %arg13[%c61, %c0_297, %c0_298] : memref<125x32x64xbf16, #tpu.memory_space<vmem>>, vector<1x32x64xbf16>
    %344 = vector.shape_cast %343 : vector<1x32x64xbf16> to vector<32x64xbf16>
    %cst_299 = arith.constant dense<0.000000e+00> : vector<2x64xf32>
    %345 = tpu.matmul %342, %344, %cst_299 {dimension_numbers = #tpu.dot_dimension_numbers<[1], [0], [0], [1], [0, 0, 1, 1], [], []>} : vector<2x32xbf16>, vector<32x64xbf16>, vector<2x64xf32> -> vector<2x64xf32>
    %346 = arith.addf %326, %345 : vector<2x64xf32>
    %c124 = arith.constant 124 : index
    %c0_300 = arith.constant 0 : index
    %347 = vector.load %arg12[%c124, %c0_300] : memref<256x32xbf16, #tpu.memory_space<vmem>>, vector<2x32xbf16>
    %c62_301 = arith.constant 62 : index
    %c0_302 = arith.constant 0 : index
    %c0_303 = arith.constant 0 : index
    %348 = vector.load %arg13[%c62_301, %c0_302, %c0_303] : memref<125x32x64xbf16, #tpu.memory_space<vmem>>, vector<1x32x64xbf16>
    %349 = vector.shape_cast %348 : vector<1x32x64xbf16> to vector<32x64xbf16>
    %cst_304 = arith.constant dense<0.000000e+00> : vector<2x64xf32>
    %350 = tpu.matmul %347, %349, %cst_304 {dimension_numbers = #tpu.dot_dimension_numbers<[1], [0], [0], [1], [0, 0, 1, 1], [], []>} : vector<2x32xbf16>, vector<32x64xbf16>, vector<2x64xf32> -> vector<2x64xf32>
    %351 = arith.addf %331, %350 : vector<2x64xf32>
    %c126 = arith.constant 126 : index
    %c0_305 = arith.constant 0 : index
    %352 = vector.load %arg12[%c126, %c0_305] : memref<256x32xbf16, #tpu.memory_space<vmem>>, vector<2x32xbf16>
    %c63 = arith.constant 63 : index
    %c0_306 = arith.constant 0 : index
    %c0_307 = arith.constant 0 : index
    %353 = vector.load %arg13[%c63, %c0_306, %c0_307] : memref<125x32x64xbf16, #tpu.memory_space<vmem>>, vector<1x32x64xbf16>
    %354 = vector.shape_cast %353 : vector<1x32x64xbf16> to vector<32x64xbf16>
    %cst_308 = arith.constant dense<0.000000e+00> : vector<2x64xf32>
    %355 = tpu.matmul %352, %354, %cst_308 {dimension_numbers = #tpu.dot_dimension_numbers<[1], [0], [0], [1], [0, 0, 1, 1], [], []>} : vector<2x32xbf16>, vector<32x64xbf16>, vector<2x64xf32> -> vector<2x64xf32>
    %356 = arith.addf %336, %355 : vector<2x64xf32>
    %c128 = arith.constant 128 : index
    %c0_309 = arith.constant 0 : index
    %357 = vector.load %arg12[%c128, %c0_309] : memref<256x32xbf16, #tpu.memory_space<vmem>>, vector<2x32xbf16>
    %c64_310 = arith.constant 64 : index
    %c0_311 = arith.constant 0 : index
    %c0_312 = arith.constant 0 : index
    %358 = vector.load %arg13[%c64_310, %c0_311, %c0_312] : memref<125x32x64xbf16, #tpu.memory_space<vmem>>, vector<1x32x64xbf16>
    %359 = vector.shape_cast %358 : vector<1x32x64xbf16> to vector<32x64xbf16>
    %cst_313 = arith.constant dense<0.000000e+00> : vector<2x64xf32>
    %360 = tpu.matmul %357, %359, %cst_313 {dimension_numbers = #tpu.dot_dimension_numbers<[1], [0], [0], [1], [0, 0, 1, 1], [], []>} : vector<2x32xbf16>, vector<32x64xbf16>, vector<2x64xf32> -> vector<2x64xf32>
    %361 = arith.addf %341, %360 : vector<2x64xf32>
    %c130 = arith.constant 130 : index
    %c0_314 = arith.constant 0 : index
    %362 = vector.load %arg12[%c130, %c0_314] : memref<256x32xbf16, #tpu.memory_space<vmem>>, vector<2x32xbf16>
    %c65 = arith.constant 65 : index
    %c0_315 = arith.constant 0 : index
    %c0_316 = arith.constant 0 : index
    %363 = vector.load %arg13[%c65, %c0_315, %c0_316] : memref<125x32x64xbf16, #tpu.memory_space<vmem>>, vector<1x32x64xbf16>
    %364 = vector.shape_cast %363 : vector<1x32x64xbf16> to vector<32x64xbf16>
    %cst_317 = arith.constant dense<0.000000e+00> : vector<2x64xf32>
    %365 = tpu.matmul %362, %364, %cst_317 {dimension_numbers = #tpu.dot_dimension_numbers<[1], [0], [0], [1], [0, 0, 1, 1], [], []>} : vector<2x32xbf16>, vector<32x64xbf16>, vector<2x64xf32> -> vector<2x64xf32>
    %366 = arith.addf %346, %365 : vector<2x64xf32>
    %c132 = arith.constant 132 : index
    %c0_318 = arith.constant 0 : index
    %367 = vector.load %arg12[%c132, %c0_318] : memref<256x32xbf16, #tpu.memory_space<vmem>>, vector<2x32xbf16>
    %c66_319 = arith.constant 66 : index
    %c0_320 = arith.constant 0 : index
    %c0_321 = arith.constant 0 : index
    %368 = vector.load %arg13[%c66_319, %c0_320, %c0_321] : memref<125x32x64xbf16, #tpu.memory_space<vmem>>, vector<1x32x64xbf16>
    %369 = vector.shape_cast %368 : vector<1x32x64xbf16> to vector<32x64xbf16>
    %cst_322 = arith.constant dense<0.000000e+00> : vector<2x64xf32>
    %370 = tpu.matmul %367, %369, %cst_322 {dimension_numbers = #tpu.dot_dimension_numbers<[1], [0], [0], [1], [0, 0, 1, 1], [], []>} : vector<2x32xbf16>, vector<32x64xbf16>, vector<2x64xf32> -> vector<2x64xf32>
    %371 = arith.addf %351, %370 : vector<2x64xf32>
    %c134 = arith.constant 134 : index
    %c0_323 = arith.constant 0 : index
    %372 = vector.load %arg12[%c134, %c0_323] : memref<256x32xbf16, #tpu.memory_space<vmem>>, vector<2x32xbf16>
    %c67 = arith.constant 67 : index
    %c0_324 = arith.constant 0 : index
    %c0_325 = arith.constant 0 : index
    %373 = vector.load %arg13[%c67, %c0_324, %c0_325] : memref<125x32x64xbf16, #tpu.memory_space<vmem>>, vector<1x32x64xbf16>
    %374 = vector.shape_cast %373 : vector<1x32x64xbf16> to vector<32x64xbf16>
    %cst_326 = arith.constant dense<0.000000e+00> : vector<2x64xf32>
    %375 = tpu.matmul %372, %374, %cst_326 {dimension_numbers = #tpu.dot_dimension_numbers<[1], [0], [0], [1], [0, 0, 1, 1], [], []>} : vector<2x32xbf16>, vector<32x64xbf16>, vector<2x64xf32> -> vector<2x64xf32>
    %376 = arith.addf %356, %375 : vector<2x64xf32>
    %c136 = arith.constant 136 : index
    %c0_327 = arith.constant 0 : index
    %377 = vector.load %arg12[%c136, %c0_327] : memref<256x32xbf16, #tpu.memory_space<vmem>>, vector<2x32xbf16>
    %c68_328 = arith.constant 68 : index
    %c0_329 = arith.constant 0 : index
    %c0_330 = arith.constant 0 : index
    %378 = vector.load %arg13[%c68_328, %c0_329, %c0_330] : memref<125x32x64xbf16, #tpu.memory_space<vmem>>, vector<1x32x64xbf16>
    %379 = vector.shape_cast %378 : vector<1x32x64xbf16> to vector<32x64xbf16>
    %cst_331 = arith.constant dense<0.000000e+00> : vector<2x64xf32>
    %380 = tpu.matmul %377, %379, %cst_331 {dimension_numbers = #tpu.dot_dimension_numbers<[1], [0], [0], [1], [0, 0, 1, 1], [], []>} : vector<2x32xbf16>, vector<32x64xbf16>, vector<2x64xf32> -> vector<2x64xf32>
    %381 = arith.addf %361, %380 : vector<2x64xf32>
    %c138 = arith.constant 138 : index
    %c0_332 = arith.constant 0 : index
    %382 = vector.load %arg12[%c138, %c0_332] : memref<256x32xbf16, #tpu.memory_space<vmem>>, vector<2x32xbf16>
    %c69 = arith.constant 69 : index
    %c0_333 = arith.constant 0 : index
    %c0_334 = arith.constant 0 : index
    %383 = vector.load %arg13[%c69, %c0_333, %c0_334] : memref<125x32x64xbf16, #tpu.memory_space<vmem>>, vector<1x32x64xbf16>
    %384 = vector.shape_cast %383 : vector<1x32x64xbf16> to vector<32x64xbf16>
    %cst_335 = arith.constant dense<0.000000e+00> : vector<2x64xf32>
    %385 = tpu.matmul %382, %384, %cst_335 {dimension_numbers = #tpu.dot_dimension_numbers<[1], [0], [0], [1], [0, 0, 1, 1], [], []>} : vector<2x32xbf16>, vector<32x64xbf16>, vector<2x64xf32> -> vector<2x64xf32>
    %386 = arith.addf %366, %385 : vector<2x64xf32>
    %c140 = arith.constant 140 : index
    %c0_336 = arith.constant 0 : index
    %387 = vector.load %arg12[%c140, %c0_336] : memref<256x32xbf16, #tpu.memory_space<vmem>>, vector<2x32xbf16>
    %c70_337 = arith.constant 70 : index
    %c0_338 = arith.constant 0 : index
    %c0_339 = arith.constant 0 : index
    %388 = vector.load %arg13[%c70_337, %c0_338, %c0_339] : memref<125x32x64xbf16, #tpu.memory_space<vmem>>, vector<1x32x64xbf16>
    %389 = vector.shape_cast %388 : vector<1x32x64xbf16> to vector<32x64xbf16>
    %cst_340 = arith.constant dense<0.000000e+00> : vector<2x64xf32>
    %390 = tpu.matmul %387, %389, %cst_340 {dimension_numbers = #tpu.dot_dimension_numbers<[1], [0], [0], [1], [0, 0, 1, 1], [], []>} : vector<2x32xbf16>, vector<32x64xbf16>, vector<2x64xf32> -> vector<2x64xf32>
    %391 = arith.addf %371, %390 : vector<2x64xf32>
    %c142 = arith.constant 142 : index
    %c0_341 = arith.constant 0 : index
    %392 = vector.load %arg12[%c142, %c0_341] : memref<256x32xbf16, #tpu.memory_space<vmem>>, vector<2x32xbf16>
    %c71 = arith.constant 71 : index
    %c0_342 = arith.constant 0 : index
    %c0_343 = arith.constant 0 : index
    %393 = vector.load %arg13[%c71, %c0_342, %c0_343] : memref<125x32x64xbf16, #tpu.memory_space<vmem>>, vector<1x32x64xbf16>
    %394 = vector.shape_cast %393 : vector<1x32x64xbf16> to vector<32x64xbf16>
    %cst_344 = arith.constant dense<0.000000e+00> : vector<2x64xf32>
    %395 = tpu.matmul %392, %394, %cst_344 {dimension_numbers = #tpu.dot_dimension_numbers<[1], [0], [0], [1], [0, 0, 1, 1], [], []>} : vector<2x32xbf16>, vector<32x64xbf16>, vector<2x64xf32> -> vector<2x64xf32>
    %396 = arith.addf %376, %395 : vector<2x64xf32>
    %c144 = arith.constant 144 : index
    %c0_345 = arith.constant 0 : index
    %397 = vector.load %arg12[%c144, %c0_345] : memref<256x32xbf16, #tpu.memory_space<vmem>>, vector<2x32xbf16>
    %c72_346 = arith.constant 72 : index
    %c0_347 = arith.constant 0 : index
    %c0_348 = arith.constant 0 : index
    %398 = vector.load %arg13[%c72_346, %c0_347, %c0_348] : memref<125x32x64xbf16, #tpu.memory_space<vmem>>, vector<1x32x64xbf16>
    %399 = vector.shape_cast %398 : vector<1x32x64xbf16> to vector<32x64xbf16>
    %cst_349 = arith.constant dense<0.000000e+00> : vector<2x64xf32>
    %400 = tpu.matmul %397, %399, %cst_349 {dimension_numbers = #tpu.dot_dimension_numbers<[1], [0], [0], [1], [0, 0, 1, 1], [], []>} : vector<2x32xbf16>, vector<32x64xbf16>, vector<2x64xf32> -> vector<2x64xf32>
    %401 = arith.addf %381, %400 : vector<2x64xf32>
    %c146 = arith.constant 146 : index
    %c0_350 = arith.constant 0 : index
    %402 = vector.load %arg12[%c146, %c0_350] : memref<256x32xbf16, #tpu.memory_space<vmem>>, vector<2x32xbf16>
    %c73 = arith.constant 73 : index
    %c0_351 = arith.constant 0 : index
    %c0_352 = arith.constant 0 : index
    %403 = vector.load %arg13[%c73, %c0_351, %c0_352] : memref<125x32x64xbf16, #tpu.memory_space<vmem>>, vector<1x32x64xbf16>
    %404 = vector.shape_cast %403 : vector<1x32x64xbf16> to vector<32x64xbf16>
    %cst_353 = arith.constant dense<0.000000e+00> : vector<2x64xf32>
    %405 = tpu.matmul %402, %404, %cst_353 {dimension_numbers = #tpu.dot_dimension_numbers<[1], [0], [0], [1], [0, 0, 1, 1], [], []>} : vector<2x32xbf16>, vector<32x64xbf16>, vector<2x64xf32> -> vector<2x64xf32>
    %406 = arith.addf %386, %405 : vector<2x64xf32>
    %c148 = arith.constant 148 : index
    %c0_354 = arith.constant 0 : index
    %407 = vector.load %arg12[%c148, %c0_354] : memref<256x32xbf16, #tpu.memory_space<vmem>>, vector<2x32xbf16>
    %c74_355 = arith.constant 74 : index
    %c0_356 = arith.constant 0 : index
    %c0_357 = arith.constant 0 : index
    %408 = vector.load %arg13[%c74_355, %c0_356, %c0_357] : memref<125x32x64xbf16, #tpu.memory_space<vmem>>, vector<1x32x64xbf16>
    %409 = vector.shape_cast %408 : vector<1x32x64xbf16> to vector<32x64xbf16>
    %cst_358 = arith.constant dense<0.000000e+00> : vector<2x64xf32>
    %410 = tpu.matmul %407, %409, %cst_358 {dimension_numbers = #tpu.dot_dimension_numbers<[1], [0], [0], [1], [0, 0, 1, 1], [], []>} : vector<2x32xbf16>, vector<32x64xbf16>, vector<2x64xf32> -> vector<2x64xf32>
    %411 = arith.addf %391, %410 : vector<2x64xf32>
    %c150 = arith.constant 150 : index
    %c0_359 = arith.constant 0 : index
    %412 = vector.load %arg12[%c150, %c0_359] : memref<256x32xbf16, #tpu.memory_space<vmem>>, vector<2x32xbf16>
    %c75 = arith.constant 75 : index
    %c0_360 = arith.constant 0 : index
    %c0_361 = arith.constant 0 : index
    %413 = vector.load %arg13[%c75, %c0_360, %c0_361] : memref<125x32x64xbf16, #tpu.memory_space<vmem>>, vector<1x32x64xbf16>
    %414 = vector.shape_cast %413 : vector<1x32x64xbf16> to vector<32x64xbf16>
    %cst_362 = arith.constant dense<0.000000e+00> : vector<2x64xf32>
    %415 = tpu.matmul %412, %414, %cst_362 {dimension_numbers = #tpu.dot_dimension_numbers<[1], [0], [0], [1], [0, 0, 1, 1], [], []>} : vector<2x32xbf16>, vector<32x64xbf16>, vector<2x64xf32> -> vector<2x64xf32>
    %416 = arith.addf %396, %415 : vector<2x64xf32>
    %c152 = arith.constant 152 : index
    %c0_363 = arith.constant 0 : index
    %417 = vector.load %arg12[%c152, %c0_363] : memref<256x32xbf16, #tpu.memory_space<vmem>>, vector<2x32xbf16>
    %c76_364 = arith.constant 76 : index
    %c0_365 = arith.constant 0 : index
    %c0_366 = arith.constant 0 : index
    %418 = vector.load %arg13[%c76_364, %c0_365, %c0_366] : memref<125x32x64xbf16, #tpu.memory_space<vmem>>, vector<1x32x64xbf16>
    %419 = vector.shape_cast %418 : vector<1x32x64xbf16> to vector<32x64xbf16>
    %cst_367 = arith.constant dense<0.000000e+00> : vector<2x64xf32>
    %420 = tpu.matmul %417, %419, %cst_367 {dimension_numbers = #tpu.dot_dimension_numbers<[1], [0], [0], [1], [0, 0, 1, 1], [], []>} : vector<2x32xbf16>, vector<32x64xbf16>, vector<2x64xf32> -> vector<2x64xf32>
    %421 = arith.addf %401, %420 : vector<2x64xf32>
    %c154 = arith.constant 154 : index
    %c0_368 = arith.constant 0 : index
    %422 = vector.load %arg12[%c154, %c0_368] : memref<256x32xbf16, #tpu.memory_space<vmem>>, vector<2x32xbf16>
    %c77 = arith.constant 77 : index
    %c0_369 = arith.constant 0 : index
    %c0_370 = arith.constant 0 : index
    %423 = vector.load %arg13[%c77, %c0_369, %c0_370] : memref<125x32x64xbf16, #tpu.memory_space<vmem>>, vector<1x32x64xbf16>
    %424 = vector.shape_cast %423 : vector<1x32x64xbf16> to vector<32x64xbf16>
    %cst_371 = arith.constant dense<0.000000e+00> : vector<2x64xf32>
    %425 = tpu.matmul %422, %424, %cst_371 {dimension_numbers = #tpu.dot_dimension_numbers<[1], [0], [0], [1], [0, 0, 1, 1], [], []>} : vector<2x32xbf16>, vector<32x64xbf16>, vector<2x64xf32> -> vector<2x64xf32>
    %426 = arith.addf %406, %425 : vector<2x64xf32>
    %c156 = arith.constant 156 : index
    %c0_372 = arith.constant 0 : index
    %427 = vector.load %arg12[%c156, %c0_372] : memref<256x32xbf16, #tpu.memory_space<vmem>>, vector<2x32xbf16>
    %c78_373 = arith.constant 78 : index
    %c0_374 = arith.constant 0 : index
    %c0_375 = arith.constant 0 : index
    %428 = vector.load %arg13[%c78_373, %c0_374, %c0_375] : memref<125x32x64xbf16, #tpu.memory_space<vmem>>, vector<1x32x64xbf16>
    %429 = vector.shape_cast %428 : vector<1x32x64xbf16> to vector<32x64xbf16>
    %cst_376 = arith.constant dense<0.000000e+00> : vector<2x64xf32>
    %430 = tpu.matmul %427, %429, %cst_376 {dimension_numbers = #tpu.dot_dimension_numbers<[1], [0], [0], [1], [0, 0, 1, 1], [], []>} : vector<2x32xbf16>, vector<32x64xbf16>, vector<2x64xf32> -> vector<2x64xf32>
    %431 = arith.addf %411, %430 : vector<2x64xf32>
    %c158 = arith.constant 158 : index
    %c0_377 = arith.constant 0 : index
    %432 = vector.load %arg12[%c158, %c0_377] : memref<256x32xbf16, #tpu.memory_space<vmem>>, vector<2x32xbf16>
    %c79 = arith.constant 79 : index
    %c0_378 = arith.constant 0 : index
    %c0_379 = arith.constant 0 : index
    %433 = vector.load %arg13[%c79, %c0_378, %c0_379] : memref<125x32x64xbf16, #tpu.memory_space<vmem>>, vector<1x32x64xbf16>
    %434 = vector.shape_cast %433 : vector<1x32x64xbf16> to vector<32x64xbf16>
    %cst_380 = arith.constant dense<0.000000e+00> : vector<2x64xf32>
    %435 = tpu.matmul %432, %434, %cst_380 {dimension_numbers = #tpu.dot_dimension_numbers<[1], [0], [0], [1], [0, 0, 1, 1], [], []>} : vector<2x32xbf16>, vector<32x64xbf16>, vector<2x64xf32> -> vector<2x64xf32>
    %436 = arith.addf %416, %435 : vector<2x64xf32>
    %c160 = arith.constant 160 : index
    %c0_381 = arith.constant 0 : index
    %437 = vector.load %arg12[%c160, %c0_381] : memref<256x32xbf16, #tpu.memory_space<vmem>>, vector<2x32xbf16>
    %c80_382 = arith.constant 80 : index
    %c0_383 = arith.constant 0 : index
    %c0_384 = arith.constant 0 : index
    %438 = vector.load %arg13[%c80_382, %c0_383, %c0_384] : memref<125x32x64xbf16, #tpu.memory_space<vmem>>, vector<1x32x64xbf16>
    %439 = vector.shape_cast %438 : vector<1x32x64xbf16> to vector<32x64xbf16>
    %cst_385 = arith.constant dense<0.000000e+00> : vector<2x64xf32>
    %440 = tpu.matmul %437, %439, %cst_385 {dimension_numbers = #tpu.dot_dimension_numbers<[1], [0], [0], [1], [0, 0, 1, 1], [], []>} : vector<2x32xbf16>, vector<32x64xbf16>, vector<2x64xf32> -> vector<2x64xf32>
    %441 = arith.addf %421, %440 : vector<2x64xf32>
    %c162 = arith.constant 162 : index
    %c0_386 = arith.constant 0 : index
    %442 = vector.load %arg12[%c162, %c0_386] : memref<256x32xbf16, #tpu.memory_space<vmem>>, vector<2x32xbf16>
    %c81 = arith.constant 81 : index
    %c0_387 = arith.constant 0 : index
    %c0_388 = arith.constant 0 : index
    %443 = vector.load %arg13[%c81, %c0_387, %c0_388] : memref<125x32x64xbf16, #tpu.memory_space<vmem>>, vector<1x32x64xbf16>
    %444 = vector.shape_cast %443 : vector<1x32x64xbf16> to vector<32x64xbf16>
    %cst_389 = arith.constant dense<0.000000e+00> : vector<2x64xf32>
    %445 = tpu.matmul %442, %444, %cst_389 {dimension_numbers = #tpu.dot_dimension_numbers<[1], [0], [0], [1], [0, 0, 1, 1], [], []>} : vector<2x32xbf16>, vector<32x64xbf16>, vector<2x64xf32> -> vector<2x64xf32>
    %446 = arith.addf %426, %445 : vector<2x64xf32>
    %c164 = arith.constant 164 : index
    %c0_390 = arith.constant 0 : index
    %447 = vector.load %arg12[%c164, %c0_390] : memref<256x32xbf16, #tpu.memory_space<vmem>>, vector<2x32xbf16>
    %c82_391 = arith.constant 82 : index
    %c0_392 = arith.constant 0 : index
    %c0_393 = arith.constant 0 : index
    %448 = vector.load %arg13[%c82_391, %c0_392, %c0_393] : memref<125x32x64xbf16, #tpu.memory_space<vmem>>, vector<1x32x64xbf16>
    %449 = vector.shape_cast %448 : vector<1x32x64xbf16> to vector<32x64xbf16>
    %cst_394 = arith.constant dense<0.000000e+00> : vector<2x64xf32>
    %450 = tpu.matmul %447, %449, %cst_394 {dimension_numbers = #tpu.dot_dimension_numbers<[1], [0], [0], [1], [0, 0, 1, 1], [], []>} : vector<2x32xbf16>, vector<32x64xbf16>, vector<2x64xf32> -> vector<2x64xf32>
    %451 = arith.addf %431, %450 : vector<2x64xf32>
    %c166 = arith.constant 166 : index
    %c0_395 = arith.constant 0 : index
    %452 = vector.load %arg12[%c166, %c0_395] : memref<256x32xbf16, #tpu.memory_space<vmem>>, vector<2x32xbf16>
    %c83 = arith.constant 83 : index
    %c0_396 = arith.constant 0 : index
    %c0_397 = arith.constant 0 : index
    %453 = vector.load %arg13[%c83, %c0_396, %c0_397] : memref<125x32x64xbf16, #tpu.memory_space<vmem>>, vector<1x32x64xbf16>
    %454 = vector.shape_cast %453 : vector<1x32x64xbf16> to vector<32x64xbf16>
    %cst_398 = arith.constant dense<0.000000e+00> : vector<2x64xf32>
    %455 = tpu.matmul %452, %454, %cst_398 {dimension_numbers = #tpu.dot_dimension_numbers<[1], [0], [0], [1], [0, 0, 1, 1], [], []>} : vector<2x32xbf16>, vector<32x64xbf16>, vector<2x64xf32> -> vector<2x64xf32>
    %456 = arith.addf %436, %455 : vector<2x64xf32>
    %c168 = arith.constant 168 : index
    %c0_399 = arith.constant 0 : index
    %457 = vector.load %arg12[%c168, %c0_399] : memref<256x32xbf16, #tpu.memory_space<vmem>>, vector<2x32xbf16>
    %c84_400 = arith.constant 84 : index
    %c0_401 = arith.constant 0 : index
    %c0_402 = arith.constant 0 : index
    %458 = vector.load %arg13[%c84_400, %c0_401, %c0_402] : memref<125x32x64xbf16, #tpu.memory_space<vmem>>, vector<1x32x64xbf16>
    %459 = vector.shape_cast %458 : vector<1x32x64xbf16> to vector<32x64xbf16>
    %cst_403 = arith.constant dense<0.000000e+00> : vector<2x64xf32>
    %460 = tpu.matmul %457, %459, %cst_403 {dimension_numbers = #tpu.dot_dimension_numbers<[1], [0], [0], [1], [0, 0, 1, 1], [], []>} : vector<2x32xbf16>, vector<32x64xbf16>, vector<2x64xf32> -> vector<2x64xf32>
    %461 = arith.addf %441, %460 : vector<2x64xf32>
    %c170 = arith.constant 170 : index
    %c0_404 = arith.constant 0 : index
    %462 = vector.load %arg12[%c170, %c0_404] : memref<256x32xbf16, #tpu.memory_space<vmem>>, vector<2x32xbf16>
    %c85 = arith.constant 85 : index
    %c0_405 = arith.constant 0 : index
    %c0_406 = arith.constant 0 : index
    %463 = vector.load %arg13[%c85, %c0_405, %c0_406] : memref<125x32x64xbf16, #tpu.memory_space<vmem>>, vector<1x32x64xbf16>
    %464 = vector.shape_cast %463 : vector<1x32x64xbf16> to vector<32x64xbf16>
    %cst_407 = arith.constant dense<0.000000e+00> : vector<2x64xf32>
    %465 = tpu.matmul %462, %464, %cst_407 {dimension_numbers = #tpu.dot_dimension_numbers<[1], [0], [0], [1], [0, 0, 1, 1], [], []>} : vector<2x32xbf16>, vector<32x64xbf16>, vector<2x64xf32> -> vector<2x64xf32>
    %466 = arith.addf %446, %465 : vector<2x64xf32>
    %c172 = arith.constant 172 : index
    %c0_408 = arith.constant 0 : index
    %467 = vector.load %arg12[%c172, %c0_408] : memref<256x32xbf16, #tpu.memory_space<vmem>>, vector<2x32xbf16>
    %c86_409 = arith.constant 86 : index
    %c0_410 = arith.constant 0 : index
    %c0_411 = arith.constant 0 : index
    %468 = vector.load %arg13[%c86_409, %c0_410, %c0_411] : memref<125x32x64xbf16, #tpu.memory_space<vmem>>, vector<1x32x64xbf16>
    %469 = vector.shape_cast %468 : vector<1x32x64xbf16> to vector<32x64xbf16>
    %cst_412 = arith.constant dense<0.000000e+00> : vector<2x64xf32>
    %470 = tpu.matmul %467, %469, %cst_412 {dimension_numbers = #tpu.dot_dimension_numbers<[1], [0], [0], [1], [0, 0, 1, 1], [], []>} : vector<2x32xbf16>, vector<32x64xbf16>, vector<2x64xf32> -> vector<2x64xf32>
    %471 = arith.addf %451, %470 : vector<2x64xf32>
    %c174 = arith.constant 174 : index
    %c0_413 = arith.constant 0 : index
    %472 = vector.load %arg12[%c174, %c0_413] : memref<256x32xbf16, #tpu.memory_space<vmem>>, vector<2x32xbf16>
    %c87 = arith.constant 87 : index
    %c0_414 = arith.constant 0 : index
    %c0_415 = arith.constant 0 : index
    %473 = vector.load %arg13[%c87, %c0_414, %c0_415] : memref<125x32x64xbf16, #tpu.memory_space<vmem>>, vector<1x32x64xbf16>
    %474 = vector.shape_cast %473 : vector<1x32x64xbf16> to vector<32x64xbf16>
    %cst_416 = arith.constant dense<0.000000e+00> : vector<2x64xf32>
    %475 = tpu.matmul %472, %474, %cst_416 {dimension_numbers = #tpu.dot_dimension_numbers<[1], [0], [0], [1], [0, 0, 1, 1], [], []>} : vector<2x32xbf16>, vector<32x64xbf16>, vector<2x64xf32> -> vector<2x64xf32>
    %476 = arith.addf %456, %475 : vector<2x64xf32>
    %c176 = arith.constant 176 : index
    %c0_417 = arith.constant 0 : index
    %477 = vector.load %arg12[%c176, %c0_417] : memref<256x32xbf16, #tpu.memory_space<vmem>>, vector<2x32xbf16>
    %c88_418 = arith.constant 88 : index
    %c0_419 = arith.constant 0 : index
    %c0_420 = arith.constant 0 : index
    %478 = vector.load %arg13[%c88_418, %c0_419, %c0_420] : memref<125x32x64xbf16, #tpu.memory_space<vmem>>, vector<1x32x64xbf16>
    %479 = vector.shape_cast %478 : vector<1x32x64xbf16> to vector<32x64xbf16>
    %cst_421 = arith.constant dense<0.000000e+00> : vector<2x64xf32>
    %480 = tpu.matmul %477, %479, %cst_421 {dimension_numbers = #tpu.dot_dimension_numbers<[1], [0], [0], [1], [0, 0, 1, 1], [], []>} : vector<2x32xbf16>, vector<32x64xbf16>, vector<2x64xf32> -> vector<2x64xf32>
    %481 = arith.addf %461, %480 : vector<2x64xf32>
    %c178 = arith.constant 178 : index
    %c0_422 = arith.constant 0 : index
    %482 = vector.load %arg12[%c178, %c0_422] : memref<256x32xbf16, #tpu.memory_space<vmem>>, vector<2x32xbf16>
    %c89 = arith.constant 89 : index
    %c0_423 = arith.constant 0 : index
    %c0_424 = arith.constant 0 : index
    %483 = vector.load %arg13[%c89, %c0_423, %c0_424] : memref<125x32x64xbf16, #tpu.memory_space<vmem>>, vector<1x32x64xbf16>
    %484 = vector.shape_cast %483 : vector<1x32x64xbf16> to vector<32x64xbf16>
    %cst_425 = arith.constant dense<0.000000e+00> : vector<2x64xf32>
    %485 = tpu.matmul %482, %484, %cst_425 {dimension_numbers = #tpu.dot_dimension_numbers<[1], [0], [0], [1], [0, 0, 1, 1], [], []>} : vector<2x32xbf16>, vector<32x64xbf16>, vector<2x64xf32> -> vector<2x64xf32>
    %486 = arith.addf %466, %485 : vector<2x64xf32>
    %c180 = arith.constant 180 : index
    %c0_426 = arith.constant 0 : index
    %487 = vector.load %arg12[%c180, %c0_426] : memref<256x32xbf16, #tpu.memory_space<vmem>>, vector<2x32xbf16>
    %c90_427 = arith.constant 90 : index
    %c0_428 = arith.constant 0 : index
    %c0_429 = arith.constant 0 : index
    %488 = vector.load %arg13[%c90_427, %c0_428, %c0_429] : memref<125x32x64xbf16, #tpu.memory_space<vmem>>, vector<1x32x64xbf16>
    %489 = vector.shape_cast %488 : vector<1x32x64xbf16> to vector<32x64xbf16>
    %cst_430 = arith.constant dense<0.000000e+00> : vector<2x64xf32>
    %490 = tpu.matmul %487, %489, %cst_430 {dimension_numbers = #tpu.dot_dimension_numbers<[1], [0], [0], [1], [0, 0, 1, 1], [], []>} : vector<2x32xbf16>, vector<32x64xbf16>, vector<2x64xf32> -> vector<2x64xf32>
    %491 = arith.addf %471, %490 : vector<2x64xf32>
    %c182 = arith.constant 182 : index
    %c0_431 = arith.constant 0 : index
    %492 = vector.load %arg12[%c182, %c0_431] : memref<256x32xbf16, #tpu.memory_space<vmem>>, vector<2x32xbf16>
    %c91 = arith.constant 91 : index
    %c0_432 = arith.constant 0 : index
    %c0_433 = arith.constant 0 : index
    %493 = vector.load %arg13[%c91, %c0_432, %c0_433] : memref<125x32x64xbf16, #tpu.memory_space<vmem>>, vector<1x32x64xbf16>
    %494 = vector.shape_cast %493 : vector<1x32x64xbf16> to vector<32x64xbf16>
    %cst_434 = arith.constant dense<0.000000e+00> : vector<2x64xf32>
    %495 = tpu.matmul %492, %494, %cst_434 {dimension_numbers = #tpu.dot_dimension_numbers<[1], [0], [0], [1], [0, 0, 1, 1], [], []>} : vector<2x32xbf16>, vector<32x64xbf16>, vector<2x64xf32> -> vector<2x64xf32>
    %496 = arith.addf %476, %495 : vector<2x64xf32>
    %c184 = arith.constant 184 : index
    %c0_435 = arith.constant 0 : index
    %497 = vector.load %arg12[%c184, %c0_435] : memref<256x32xbf16, #tpu.memory_space<vmem>>, vector<2x32xbf16>
    %c92_436 = arith.constant 92 : index
    %c0_437 = arith.constant 0 : index
    %c0_438 = arith.constant 0 : index
    %498 = vector.load %arg13[%c92_436, %c0_437, %c0_438] : memref<125x32x64xbf16, #tpu.memory_space<vmem>>, vector<1x32x64xbf16>
    %499 = vector.shape_cast %498 : vector<1x32x64xbf16> to vector<32x64xbf16>
    %cst_439 = arith.constant dense<0.000000e+00> : vector<2x64xf32>
    %500 = tpu.matmul %497, %499, %cst_439 {dimension_numbers = #tpu.dot_dimension_numbers<[1], [0], [0], [1], [0, 0, 1, 1], [], []>} : vector<2x32xbf16>, vector<32x64xbf16>, vector<2x64xf32> -> vector<2x64xf32>
    %501 = arith.addf %481, %500 : vector<2x64xf32>
    %c186 = arith.constant 186 : index
    %c0_440 = arith.constant 0 : index
    %502 = vector.load %arg12[%c186, %c0_440] : memref<256x32xbf16, #tpu.memory_space<vmem>>, vector<2x32xbf16>
    %c93 = arith.constant 93 : index
    %c0_441 = arith.constant 0 : index
    %c0_442 = arith.constant 0 : index
    %503 = vector.load %arg13[%c93, %c0_441, %c0_442] : memref<125x32x64xbf16, #tpu.memory_space<vmem>>, vector<1x32x64xbf16>
    %504 = vector.shape_cast %503 : vector<1x32x64xbf16> to vector<32x64xbf16>
    %cst_443 = arith.constant dense<0.000000e+00> : vector<2x64xf32>
    %505 = tpu.matmul %502, %504, %cst_443 {dimension_numbers = #tpu.dot_dimension_numbers<[1], [0], [0], [1], [0, 0, 1, 1], [], []>} : vector<2x32xbf16>, vector<32x64xbf16>, vector<2x64xf32> -> vector<2x64xf32>
    %506 = arith.addf %486, %505 : vector<2x64xf32>
    %c188 = arith.constant 188 : index
    %c0_444 = arith.constant 0 : index
    %507 = vector.load %arg12[%c188, %c0_444] : memref<256x32xbf16, #tpu.memory_space<vmem>>, vector<2x32xbf16>
    %c94_445 = arith.constant 94 : index
    %c0_446 = arith.constant 0 : index
    %c0_447 = arith.constant 0 : index
    %508 = vector.load %arg13[%c94_445, %c0_446, %c0_447] : memref<125x32x64xbf16, #tpu.memory_space<vmem>>, vector<1x32x64xbf16>
    %509 = vector.shape_cast %508 : vector<1x32x64xbf16> to vector<32x64xbf16>
    %cst_448 = arith.constant dense<0.000000e+00> : vector<2x64xf32>
    %510 = tpu.matmul %507, %509, %cst_448 {dimension_numbers = #tpu.dot_dimension_numbers<[1], [0], [0], [1], [0, 0, 1, 1], [], []>} : vector<2x32xbf16>, vector<32x64xbf16>, vector<2x64xf32> -> vector<2x64xf32>
    %511 = arith.addf %491, %510 : vector<2x64xf32>
    %c190 = arith.constant 190 : index
    %c0_449 = arith.constant 0 : index
    %512 = vector.load %arg12[%c190, %c0_449] : memref<256x32xbf16, #tpu.memory_space<vmem>>, vector<2x32xbf16>
    %c95 = arith.constant 95 : index
    %c0_450 = arith.constant 0 : index
    %c0_451 = arith.constant 0 : index
    %513 = vector.load %arg13[%c95, %c0_450, %c0_451] : memref<125x32x64xbf16, #tpu.memory_space<vmem>>, vector<1x32x64xbf16>
    %514 = vector.shape_cast %513 : vector<1x32x64xbf16> to vector<32x64xbf16>
    %cst_452 = arith.constant dense<0.000000e+00> : vector<2x64xf32>
    %515 = tpu.matmul %512, %514, %cst_452 {dimension_numbers = #tpu.dot_dimension_numbers<[1], [0], [0], [1], [0, 0, 1, 1], [], []>} : vector<2x32xbf16>, vector<32x64xbf16>, vector<2x64xf32> -> vector<2x64xf32>
    %516 = arith.addf %496, %515 : vector<2x64xf32>
    %c192 = arith.constant 192 : index
    %c0_453 = arith.constant 0 : index
    %517 = vector.load %arg12[%c192, %c0_453] : memref<256x32xbf16, #tpu.memory_space<vmem>>, vector<2x32xbf16>
    %c96_454 = arith.constant 96 : index
    %c0_455 = arith.constant 0 : index
    %c0_456 = arith.constant 0 : index
    %518 = vector.load %arg13[%c96_454, %c0_455, %c0_456] : memref<125x32x64xbf16, #tpu.memory_space<vmem>>, vector<1x32x64xbf16>
    %519 = vector.shape_cast %518 : vector<1x32x64xbf16> to vector<32x64xbf16>
    %cst_457 = arith.constant dense<0.000000e+00> : vector<2x64xf32>
    %520 = tpu.matmul %517, %519, %cst_457 {dimension_numbers = #tpu.dot_dimension_numbers<[1], [0], [0], [1], [0, 0, 1, 1], [], []>} : vector<2x32xbf16>, vector<32x64xbf16>, vector<2x64xf32> -> vector<2x64xf32>
    %521 = arith.addf %501, %520 : vector<2x64xf32>
    %c194 = arith.constant 194 : index
    %c0_458 = arith.constant 0 : index
    %522 = vector.load %arg12[%c194, %c0_458] : memref<256x32xbf16, #tpu.memory_space<vmem>>, vector<2x32xbf16>
    %c97 = arith.constant 97 : index
    %c0_459 = arith.constant 0 : index
    %c0_460 = arith.constant 0 : index
    %523 = vector.load %arg13[%c97, %c0_459, %c0_460] : memref<125x32x64xbf16, #tpu.memory_space<vmem>>, vector<1x32x64xbf16>
    %524 = vector.shape_cast %523 : vector<1x32x64xbf16> to vector<32x64xbf16>
    %cst_461 = arith.constant dense<0.000000e+00> : vector<2x64xf32>
    %525 = tpu.matmul %522, %524, %cst_461 {dimension_numbers = #tpu.dot_dimension_numbers<[1], [0], [0], [1], [0, 0, 1, 1], [], []>} : vector<2x32xbf16>, vector<32x64xbf16>, vector<2x64xf32> -> vector<2x64xf32>
    %526 = arith.addf %506, %525 : vector<2x64xf32>
    %c196 = arith.constant 196 : index
    %c0_462 = arith.constant 0 : index
    %527 = vector.load %arg12[%c196, %c0_462] : memref<256x32xbf16, #tpu.memory_space<vmem>>, vector<2x32xbf16>
    %c98_463 = arith.constant 98 : index
    %c0_464 = arith.constant 0 : index
    %c0_465 = arith.constant 0 : index
    %528 = vector.load %arg13[%c98_463, %c0_464, %c0_465] : memref<125x32x64xbf16, #tpu.memory_space<vmem>>, vector<1x32x64xbf16>
    %529 = vector.shape_cast %528 : vector<1x32x64xbf16> to vector<32x64xbf16>
    %cst_466 = arith.constant dense<0.000000e+00> : vector<2x64xf32>
    %530 = tpu.matmul %527, %529, %cst_466 {dimension_numbers = #tpu.dot_dimension_numbers<[1], [0], [0], [1], [0, 0, 1, 1], [], []>} : vector<2x32xbf16>, vector<32x64xbf16>, vector<2x64xf32> -> vector<2x64xf32>
    %531 = arith.addf %511, %530 : vector<2x64xf32>
    %c198 = arith.constant 198 : index
    %c0_467 = arith.constant 0 : index
    %532 = vector.load %arg12[%c198, %c0_467] : memref<256x32xbf16, #tpu.memory_space<vmem>>, vector<2x32xbf16>
    %c99 = arith.constant 99 : index
    %c0_468 = arith.constant 0 : index
    %c0_469 = arith.constant 0 : index
    %533 = vector.load %arg13[%c99, %c0_468, %c0_469] : memref<125x32x64xbf16, #tpu.memory_space<vmem>>, vector<1x32x64xbf16>
    %534 = vector.shape_cast %533 : vector<1x32x64xbf16> to vector<32x64xbf16>
    %cst_470 = arith.constant dense<0.000000e+00> : vector<2x64xf32>
    %535 = tpu.matmul %532, %534, %cst_470 {dimension_numbers = #tpu.dot_dimension_numbers<[1], [0], [0], [1], [0, 0, 1, 1], [], []>} : vector<2x32xbf16>, vector<32x64xbf16>, vector<2x64xf32> -> vector<2x64xf32>
    %536 = arith.addf %516, %535 : vector<2x64xf32>
    %c200 = arith.constant 200 : index
    %c0_471 = arith.constant 0 : index
    %537 = vector.load %arg12[%c200, %c0_471] : memref<256x32xbf16, #tpu.memory_space<vmem>>, vector<2x32xbf16>
    %c100_472 = arith.constant 100 : index
    %c0_473 = arith.constant 0 : index
    %c0_474 = arith.constant 0 : index
    %538 = vector.load %arg13[%c100_472, %c0_473, %c0_474] : memref<125x32x64xbf16, #tpu.memory_space<vmem>>, vector<1x32x64xbf16>
    %539 = vector.shape_cast %538 : vector<1x32x64xbf16> to vector<32x64xbf16>
    %cst_475 = arith.constant dense<0.000000e+00> : vector<2x64xf32>
    %540 = tpu.matmul %537, %539, %cst_475 {dimension_numbers = #tpu.dot_dimension_numbers<[1], [0], [0], [1], [0, 0, 1, 1], [], []>} : vector<2x32xbf16>, vector<32x64xbf16>, vector<2x64xf32> -> vector<2x64xf32>
    %541 = arith.addf %521, %540 : vector<2x64xf32>
    %c202 = arith.constant 202 : index
    %c0_476 = arith.constant 0 : index
    %542 = vector.load %arg12[%c202, %c0_476] : memref<256x32xbf16, #tpu.memory_space<vmem>>, vector<2x32xbf16>
    %c101 = arith.constant 101 : index
    %c0_477 = arith.constant 0 : index
    %c0_478 = arith.constant 0 : index
    %543 = vector.load %arg13[%c101, %c0_477, %c0_478] : memref<125x32x64xbf16, #tpu.memory_space<vmem>>, vector<1x32x64xbf16>
    %544 = vector.shape_cast %543 : vector<1x32x64xbf16> to vector<32x64xbf16>
    %cst_479 = arith.constant dense<0.000000e+00> : vector<2x64xf32>
    %545 = tpu.matmul %542, %544, %cst_479 {dimension_numbers = #tpu.dot_dimension_numbers<[1], [0], [0], [1], [0, 0, 1, 1], [], []>} : vector<2x32xbf16>, vector<32x64xbf16>, vector<2x64xf32> -> vector<2x64xf32>
    %546 = arith.addf %526, %545 : vector<2x64xf32>
    %c204 = arith.constant 204 : index
    %c0_480 = arith.constant 0 : index
    %547 = vector.load %arg12[%c204, %c0_480] : memref<256x32xbf16, #tpu.memory_space<vmem>>, vector<2x32xbf16>
    %c102_481 = arith.constant 102 : index
    %c0_482 = arith.constant 0 : index
    %c0_483 = arith.constant 0 : index
    %548 = vector.load %arg13[%c102_481, %c0_482, %c0_483] : memref<125x32x64xbf16, #tpu.memory_space<vmem>>, vector<1x32x64xbf16>
    %549 = vector.shape_cast %548 : vector<1x32x64xbf16> to vector<32x64xbf16>
    %cst_484 = arith.constant dense<0.000000e+00> : vector<2x64xf32>
    %550 = tpu.matmul %547, %549, %cst_484 {dimension_numbers = #tpu.dot_dimension_numbers<[1], [0], [0], [1], [0, 0, 1, 1], [], []>} : vector<2x32xbf16>, vector<32x64xbf16>, vector<2x64xf32> -> vector<2x64xf32>
    %551 = arith.addf %531, %550 : vector<2x64xf32>
    %c206 = arith.constant 206 : index
    %c0_485 = arith.constant 0 : index
    %552 = vector.load %arg12[%c206, %c0_485] : memref<256x32xbf16, #tpu.memory_space<vmem>>, vector<2x32xbf16>
    %c103 = arith.constant 103 : index
    %c0_486 = arith.constant 0 : index
    %c0_487 = arith.constant 0 : index
    %553 = vector.load %arg13[%c103, %c0_486, %c0_487] : memref<125x32x64xbf16, #tpu.memory_space<vmem>>, vector<1x32x64xbf16>
    %554 = vector.shape_cast %553 : vector<1x32x64xbf16> to vector<32x64xbf16>
    %cst_488 = arith.constant dense<0.000000e+00> : vector<2x64xf32>
    %555 = tpu.matmul %552, %554, %cst_488 {dimension_numbers = #tpu.dot_dimension_numbers<[1], [0], [0], [1], [0, 0, 1, 1], [], []>} : vector<2x32xbf16>, vector<32x64xbf16>, vector<2x64xf32> -> vector<2x64xf32>
    %556 = arith.addf %536, %555 : vector<2x64xf32>
    %c208 = arith.constant 208 : index
    %c0_489 = arith.constant 0 : index
    %557 = vector.load %arg12[%c208, %c0_489] : memref<256x32xbf16, #tpu.memory_space<vmem>>, vector<2x32xbf16>
    %c104_490 = arith.constant 104 : index
    %c0_491 = arith.constant 0 : index
    %c0_492 = arith.constant 0 : index
    %558 = vector.load %arg13[%c104_490, %c0_491, %c0_492] : memref<125x32x64xbf16, #tpu.memory_space<vmem>>, vector<1x32x64xbf16>
    %559 = vector.shape_cast %558 : vector<1x32x64xbf16> to vector<32x64xbf16>
    %cst_493 = arith.constant dense<0.000000e+00> : vector<2x64xf32>
    %560 = tpu.matmul %557, %559, %cst_493 {dimension_numbers = #tpu.dot_dimension_numbers<[1], [0], [0], [1], [0, 0, 1, 1], [], []>} : vector<2x32xbf16>, vector<32x64xbf16>, vector<2x64xf32> -> vector<2x64xf32>
    %561 = arith.addf %541, %560 : vector<2x64xf32>
    %c210 = arith.constant 210 : index
    %c0_494 = arith.constant 0 : index
    %562 = vector.load %arg12[%c210, %c0_494] : memref<256x32xbf16, #tpu.memory_space<vmem>>, vector<2x32xbf16>
    %c105 = arith.constant 105 : index
    %c0_495 = arith.constant 0 : index
    %c0_496 = arith.constant 0 : index
    %563 = vector.load %arg13[%c105, %c0_495, %c0_496] : memref<125x32x64xbf16, #tpu.memory_space<vmem>>, vector<1x32x64xbf16>
    %564 = vector.shape_cast %563 : vector<1x32x64xbf16> to vector<32x64xbf16>
    %cst_497 = arith.constant dense<0.000000e+00> : vector<2x64xf32>
    %565 = tpu.matmul %562, %564, %cst_497 {dimension_numbers = #tpu.dot_dimension_numbers<[1], [0], [0], [1], [0, 0, 1, 1], [], []>} : vector<2x32xbf16>, vector<32x64xbf16>, vector<2x64xf32> -> vector<2x64xf32>
    %566 = arith.addf %546, %565 : vector<2x64xf32>
    %c212 = arith.constant 212 : index
    %c0_498 = arith.constant 0 : index
    %567 = vector.load %arg12[%c212, %c0_498] : memref<256x32xbf16, #tpu.memory_space<vmem>>, vector<2x32xbf16>
    %c106_499 = arith.constant 106 : index
    %c0_500 = arith.constant 0 : index
    %c0_501 = arith.constant 0 : index
    %568 = vector.load %arg13[%c106_499, %c0_500, %c0_501] : memref<125x32x64xbf16, #tpu.memory_space<vmem>>, vector<1x32x64xbf16>
    %569 = vector.shape_cast %568 : vector<1x32x64xbf16> to vector<32x64xbf16>
    %cst_502 = arith.constant dense<0.000000e+00> : vector<2x64xf32>
    %570 = tpu.matmul %567, %569, %cst_502 {dimension_numbers = #tpu.dot_dimension_numbers<[1], [0], [0], [1], [0, 0, 1, 1], [], []>} : vector<2x32xbf16>, vector<32x64xbf16>, vector<2x64xf32> -> vector<2x64xf32>
    %571 = arith.addf %551, %570 : vector<2x64xf32>
    %c214 = arith.constant 214 : index
    %c0_503 = arith.constant 0 : index
    %572 = vector.load %arg12[%c214, %c0_503] : memref<256x32xbf16, #tpu.memory_space<vmem>>, vector<2x32xbf16>
    %c107 = arith.constant 107 : index
    %c0_504 = arith.constant 0 : index
    %c0_505 = arith.constant 0 : index
    %573 = vector.load %arg13[%c107, %c0_504, %c0_505] : memref<125x32x64xbf16, #tpu.memory_space<vmem>>, vector<1x32x64xbf16>
    %574 = vector.shape_cast %573 : vector<1x32x64xbf16> to vector<32x64xbf16>
    %cst_506 = arith.constant dense<0.000000e+00> : vector<2x64xf32>
    %575 = tpu.matmul %572, %574, %cst_506 {dimension_numbers = #tpu.dot_dimension_numbers<[1], [0], [0], [1], [0, 0, 1, 1], [], []>} : vector<2x32xbf16>, vector<32x64xbf16>, vector<2x64xf32> -> vector<2x64xf32>
    %576 = arith.addf %556, %575 : vector<2x64xf32>
    %c216 = arith.constant 216 : index
    %c0_507 = arith.constant 0 : index
    %577 = vector.load %arg12[%c216, %c0_507] : memref<256x32xbf16, #tpu.memory_space<vmem>>, vector<2x32xbf16>
    %c108_508 = arith.constant 108 : index
    %c0_509 = arith.constant 0 : index
    %c0_510 = arith.constant 0 : index
    %578 = vector.load %arg13[%c108_508, %c0_509, %c0_510] : memref<125x32x64xbf16, #tpu.memory_space<vmem>>, vector<1x32x64xbf16>
    %579 = vector.shape_cast %578 : vector<1x32x64xbf16> to vector<32x64xbf16>
    %cst_511 = arith.constant dense<0.000000e+00> : vector<2x64xf32>
    %580 = tpu.matmul %577, %579, %cst_511 {dimension_numbers = #tpu.dot_dimension_numbers<[1], [0], [0], [1], [0, 0, 1, 1], [], []>} : vector<2x32xbf16>, vector<32x64xbf16>, vector<2x64xf32> -> vector<2x64xf32>
    %581 = arith.addf %561, %580 : vector<2x64xf32>
    %c218 = arith.constant 218 : index
    %c0_512 = arith.constant 0 : index
    %582 = vector.load %arg12[%c218, %c0_512] : memref<256x32xbf16, #tpu.memory_space<vmem>>, vector<2x32xbf16>
    %c109 = arith.constant 109 : index
    %c0_513 = arith.constant 0 : index
    %c0_514 = arith.constant 0 : index
    %583 = vector.load %arg13[%c109, %c0_513, %c0_514] : memref<125x32x64xbf16, #tpu.memory_space<vmem>>, vector<1x32x64xbf16>
    %584 = vector.shape_cast %583 : vector<1x32x64xbf16> to vector<32x64xbf16>
    %cst_515 = arith.constant dense<0.000000e+00> : vector<2x64xf32>
    %585 = tpu.matmul %582, %584, %cst_515 {dimension_numbers = #tpu.dot_dimension_numbers<[1], [0], [0], [1], [0, 0, 1, 1], [], []>} : vector<2x32xbf16>, vector<32x64xbf16>, vector<2x64xf32> -> vector<2x64xf32>
    %586 = arith.addf %566, %585 : vector<2x64xf32>
    %c220 = arith.constant 220 : index
    %c0_516 = arith.constant 0 : index
    %587 = vector.load %arg12[%c220, %c0_516] : memref<256x32xbf16, #tpu.memory_space<vmem>>, vector<2x32xbf16>
    %c110_517 = arith.constant 110 : index
    %c0_518 = arith.constant 0 : index
    %c0_519 = arith.constant 0 : index
    %588 = vector.load %arg13[%c110_517, %c0_518, %c0_519] : memref<125x32x64xbf16, #tpu.memory_space<vmem>>, vector<1x32x64xbf16>
    %589 = vector.shape_cast %588 : vector<1x32x64xbf16> to vector<32x64xbf16>
    %cst_520 = arith.constant dense<0.000000e+00> : vector<2x64xf32>
    %590 = tpu.matmul %587, %589, %cst_520 {dimension_numbers = #tpu.dot_dimension_numbers<[1], [0], [0], [1], [0, 0, 1, 1], [], []>} : vector<2x32xbf16>, vector<32x64xbf16>, vector<2x64xf32> -> vector<2x64xf32>
    %591 = arith.addf %571, %590 : vector<2x64xf32>
    %c222 = arith.constant 222 : index
    %c0_521 = arith.constant 0 : index
    %592 = vector.load %arg12[%c222, %c0_521] : memref<256x32xbf16, #tpu.memory_space<vmem>>, vector<2x32xbf16>
    %c111 = arith.constant 111 : index
    %c0_522 = arith.constant 0 : index
    %c0_523 = arith.constant 0 : index
    %593 = vector.load %arg13[%c111, %c0_522, %c0_523] : memref<125x32x64xbf16, #tpu.memory_space<vmem>>, vector<1x32x64xbf16>
    %594 = vector.shape_cast %593 : vector<1x32x64xbf16> to vector<32x64xbf16>
    %cst_524 = arith.constant dense<0.000000e+00> : vector<2x64xf32>
    %595 = tpu.matmul %592, %594, %cst_524 {dimension_numbers = #tpu.dot_dimension_numbers<[1], [0], [0], [1], [0, 0, 1, 1], [], []>} : vector<2x32xbf16>, vector<32x64xbf16>, vector<2x64xf32> -> vector<2x64xf32>
    %596 = arith.addf %576, %595 : vector<2x64xf32>
    %c224 = arith.constant 224 : index
    %c0_525 = arith.constant 0 : index
    %597 = vector.load %arg12[%c224, %c0_525] : memref<256x32xbf16, #tpu.memory_space<vmem>>, vector<2x32xbf16>
    %c112_526 = arith.constant 112 : index
    %c0_527 = arith.constant 0 : index
    %c0_528 = arith.constant 0 : index
    %598 = vector.load %arg13[%c112_526, %c0_527, %c0_528] : memref<125x32x64xbf16, #tpu.memory_space<vmem>>, vector<1x32x64xbf16>
    %599 = vector.shape_cast %598 : vector<1x32x64xbf16> to vector<32x64xbf16>
    %cst_529 = arith.constant dense<0.000000e+00> : vector<2x64xf32>
    %600 = tpu.matmul %597, %599, %cst_529 {dimension_numbers = #tpu.dot_dimension_numbers<[1], [0], [0], [1], [0, 0, 1, 1], [], []>} : vector<2x32xbf16>, vector<32x64xbf16>, vector<2x64xf32> -> vector<2x64xf32>
    %601 = arith.addf %581, %600 : vector<2x64xf32>
    %c226 = arith.constant 226 : index
    %c0_530 = arith.constant 0 : index
    %602 = vector.load %arg12[%c226, %c0_530] : memref<256x32xbf16, #tpu.memory_space<vmem>>, vector<2x32xbf16>
    %c113 = arith.constant 113 : index
    %c0_531 = arith.constant 0 : index
    %c0_532 = arith.constant 0 : index
    %603 = vector.load %arg13[%c113, %c0_531, %c0_532] : memref<125x32x64xbf16, #tpu.memory_space<vmem>>, vector<1x32x64xbf16>
    %604 = vector.shape_cast %603 : vector<1x32x64xbf16> to vector<32x64xbf16>
    %cst_533 = arith.constant dense<0.000000e+00> : vector<2x64xf32>
    %605 = tpu.matmul %602, %604, %cst_533 {dimension_numbers = #tpu.dot_dimension_numbers<[1], [0], [0], [1], [0, 0, 1, 1], [], []>} : vector<2x32xbf16>, vector<32x64xbf16>, vector<2x64xf32> -> vector<2x64xf32>
    %606 = arith.addf %586, %605 : vector<2x64xf32>
    %c228 = arith.constant 228 : index
    %c0_534 = arith.constant 0 : index
    %607 = vector.load %arg12[%c228, %c0_534] : memref<256x32xbf16, #tpu.memory_space<vmem>>, vector<2x32xbf16>
    %c114_535 = arith.constant 114 : index
    %c0_536 = arith.constant 0 : index
    %c0_537 = arith.constant 0 : index
    %608 = vector.load %arg13[%c114_535, %c0_536, %c0_537] : memref<125x32x64xbf16, #tpu.memory_space<vmem>>, vector<1x32x64xbf16>
    %609 = vector.shape_cast %608 : vector<1x32x64xbf16> to vector<32x64xbf16>
    %cst_538 = arith.constant dense<0.000000e+00> : vector<2x64xf32>
    %610 = tpu.matmul %607, %609, %cst_538 {dimension_numbers = #tpu.dot_dimension_numbers<[1], [0], [0], [1], [0, 0, 1, 1], [], []>} : vector<2x32xbf16>, vector<32x64xbf16>, vector<2x64xf32> -> vector<2x64xf32>
    %611 = arith.addf %591, %610 : vector<2x64xf32>
    %c230 = arith.constant 230 : index
    %c0_539 = arith.constant 0 : index
    %612 = vector.load %arg12[%c230, %c0_539] : memref<256x32xbf16, #tpu.memory_space<vmem>>, vector<2x32xbf16>
    %c115 = arith.constant 115 : index
    %c0_540 = arith.constant 0 : index
    %c0_541 = arith.constant 0 : index
    %613 = vector.load %arg13[%c115, %c0_540, %c0_541] : memref<125x32x64xbf16, #tpu.memory_space<vmem>>, vector<1x32x64xbf16>
    %614 = vector.shape_cast %613 : vector<1x32x64xbf16> to vector<32x64xbf16>
    %cst_542 = arith.constant dense<0.000000e+00> : vector<2x64xf32>
    %615 = tpu.matmul %612, %614, %cst_542 {dimension_numbers = #tpu.dot_dimension_numbers<[1], [0], [0], [1], [0, 0, 1, 1], [], []>} : vector<2x32xbf16>, vector<32x64xbf16>, vector<2x64xf32> -> vector<2x64xf32>
    %616 = arith.addf %596, %615 : vector<2x64xf32>
    %c232 = arith.constant 232 : index
    %c0_543 = arith.constant 0 : index
    %617 = vector.load %arg12[%c232, %c0_543] : memref<256x32xbf16, #tpu.memory_space<vmem>>, vector<2x32xbf16>
    %c116_544 = arith.constant 116 : index
    %c0_545 = arith.constant 0 : index
    %c0_546 = arith.constant 0 : index
    %618 = vector.load %arg13[%c116_544, %c0_545, %c0_546] : memref<125x32x64xbf16, #tpu.memory_space<vmem>>, vector<1x32x64xbf16>
    %619 = vector.shape_cast %618 : vector<1x32x64xbf16> to vector<32x64xbf16>
    %cst_547 = arith.constant dense<0.000000e+00> : vector<2x64xf32>
    %620 = tpu.matmul %617, %619, %cst_547 {dimension_numbers = #tpu.dot_dimension_numbers<[1], [0], [0], [1], [0, 0, 1, 1], [], []>} : vector<2x32xbf16>, vector<32x64xbf16>, vector<2x64xf32> -> vector<2x64xf32>
    %621 = arith.addf %601, %620 : vector<2x64xf32>
    %c234 = arith.constant 234 : index
    %c0_548 = arith.constant 0 : index
    %622 = vector.load %arg12[%c234, %c0_548] : memref<256x32xbf16, #tpu.memory_space<vmem>>, vector<2x32xbf16>
    %c117 = arith.constant 117 : index
    %c0_549 = arith.constant 0 : index
    %c0_550 = arith.constant 0 : index
    %623 = vector.load %arg13[%c117, %c0_549, %c0_550] : memref<125x32x64xbf16, #tpu.memory_space<vmem>>, vector<1x32x64xbf16>
    %624 = vector.shape_cast %623 : vector<1x32x64xbf16> to vector<32x64xbf16>
    %cst_551 = arith.constant dense<0.000000e+00> : vector<2x64xf32>
    %625 = tpu.matmul %622, %624, %cst_551 {dimension_numbers = #tpu.dot_dimension_numbers<[1], [0], [0], [1], [0, 0, 1, 1], [], []>} : vector<2x32xbf16>, vector<32x64xbf16>, vector<2x64xf32> -> vector<2x64xf32>
    %626 = arith.addf %606, %625 : vector<2x64xf32>
    %c236 = arith.constant 236 : index
    %c0_552 = arith.constant 0 : index
    %627 = vector.load %arg12[%c236, %c0_552] : memref<256x32xbf16, #tpu.memory_space<vmem>>, vector<2x32xbf16>
    %c118_553 = arith.constant 118 : index
    %c0_554 = arith.constant 0 : index
    %c0_555 = arith.constant 0 : index
    %628 = vector.load %arg13[%c118_553, %c0_554, %c0_555] : memref<125x32x64xbf16, #tpu.memory_space<vmem>>, vector<1x32x64xbf16>
    %629 = vector.shape_cast %628 : vector<1x32x64xbf16> to vector<32x64xbf16>
    %cst_556 = arith.constant dense<0.000000e+00> : vector<2x64xf32>
    %630 = tpu.matmul %627, %629, %cst_556 {dimension_numbers = #tpu.dot_dimension_numbers<[1], [0], [0], [1], [0, 0, 1, 1], [], []>} : vector<2x32xbf16>, vector<32x64xbf16>, vector<2x64xf32> -> vector<2x64xf32>
    %631 = arith.addf %611, %630 : vector<2x64xf32>
    %c238 = arith.constant 238 : index
    %c0_557 = arith.constant 0 : index
    %632 = vector.load %arg12[%c238, %c0_557] : memref<256x32xbf16, #tpu.memory_space<vmem>>, vector<2x32xbf16>
    %c119 = arith.constant 119 : index
    %c0_558 = arith.constant 0 : index
    %c0_559 = arith.constant 0 : index
    %633 = vector.load %arg13[%c119, %c0_558, %c0_559] : memref<125x32x64xbf16, #tpu.memory_space<vmem>>, vector<1x32x64xbf16>
    %634 = vector.shape_cast %633 : vector<1x32x64xbf16> to vector<32x64xbf16>
    %cst_560 = arith.constant dense<0.000000e+00> : vector<2x64xf32>
    %635 = tpu.matmul %632, %634, %cst_560 {dimension_numbers = #tpu.dot_dimension_numbers<[1], [0], [0], [1], [0, 0, 1, 1], [], []>} : vector<2x32xbf16>, vector<32x64xbf16>, vector<2x64xf32> -> vector<2x64xf32>
    %636 = arith.addf %616, %635 : vector<2x64xf32>
    %c240 = arith.constant 240 : index
    %c0_561 = arith.constant 0 : index
    %637 = vector.load %arg12[%c240, %c0_561] : memref<256x32xbf16, #tpu.memory_space<vmem>>, vector<2x32xbf16>
    %c120_562 = arith.constant 120 : index
    %c0_563 = arith.constant 0 : index
    %c0_564 = arith.constant 0 : index
    %638 = vector.load %arg13[%c120_562, %c0_563, %c0_564] : memref<125x32x64xbf16, #tpu.memory_space<vmem>>, vector<1x32x64xbf16>
    %639 = vector.shape_cast %638 : vector<1x32x64xbf16> to vector<32x64xbf16>
    %cst_565 = arith.constant dense<0.000000e+00> : vector<2x64xf32>
    %640 = tpu.matmul %637, %639, %cst_565 {dimension_numbers = #tpu.dot_dimension_numbers<[1], [0], [0], [1], [0, 0, 1, 1], [], []>} : vector<2x32xbf16>, vector<32x64xbf16>, vector<2x64xf32> -> vector<2x64xf32>
    %641 = arith.addf %621, %640 : vector<2x64xf32>
    %c242 = arith.constant 242 : index
    %c0_566 = arith.constant 0 : index
    %642 = vector.load %arg12[%c242, %c0_566] : memref<256x32xbf16, #tpu.memory_space<vmem>>, vector<2x32xbf16>
    %c121 = arith.constant 121 : index
    %c0_567 = arith.constant 0 : index
    %c0_568 = arith.constant 0 : index
    %643 = vector.load %arg13[%c121, %c0_567, %c0_568] : memref<125x32x64xbf16, #tpu.memory_space<vmem>>, vector<1x32x64xbf16>
    %644 = vector.shape_cast %643 : vector<1x32x64xbf16> to vector<32x64xbf16>
    %cst_569 = arith.constant dense<0.000000e+00> : vector<2x64xf32>
    %645 = tpu.matmul %642, %644, %cst_569 {dimension_numbers = #tpu.dot_dimension_numbers<[1], [0], [0], [1], [0, 0, 1, 1], [], []>} : vector<2x32xbf16>, vector<32x64xbf16>, vector<2x64xf32> -> vector<2x64xf32>
    %646 = arith.addf %626, %645 : vector<2x64xf32>
    %c244 = arith.constant 244 : index
    %c0_570 = arith.constant 0 : index
    %647 = vector.load %arg12[%c244, %c0_570] : memref<256x32xbf16, #tpu.memory_space<vmem>>, vector<2x32xbf16>
    %c122_571 = arith.constant 122 : index
    %c0_572 = arith.constant 0 : index
    %c0_573 = arith.constant 0 : index
    %648 = vector.load %arg13[%c122_571, %c0_572, %c0_573] : memref<125x32x64xbf16, #tpu.memory_space<vmem>>, vector<1x32x64xbf16>
    %649 = vector.shape_cast %648 : vector<1x32x64xbf16> to vector<32x64xbf16>
    %cst_574 = arith.constant dense<0.000000e+00> : vector<2x64xf32>
    %650 = tpu.matmul %647, %649, %cst_574 {dimension_numbers = #tpu.dot_dimension_numbers<[1], [0], [0], [1], [0, 0, 1, 1], [], []>} : vector<2x32xbf16>, vector<32x64xbf16>, vector<2x64xf32> -> vector<2x64xf32>
    %651 = arith.addf %631, %650 : vector<2x64xf32>
    %c246 = arith.constant 246 : index
    %c0_575 = arith.constant 0 : index
    %652 = vector.load %arg12[%c246, %c0_575] : memref<256x32xbf16, #tpu.memory_space<vmem>>, vector<2x32xbf16>
    %c123 = arith.constant 123 : index
    %c0_576 = arith.constant 0 : index
    %c0_577 = arith.constant 0 : index
    %653 = vector.load %arg13[%c123, %c0_576, %c0_577] : memref<125x32x64xbf16, #tpu.memory_space<vmem>>, vector<1x32x64xbf16>
    %654 = vector.shape_cast %653 : vector<1x32x64xbf16> to vector<32x64xbf16>
    %cst_578 = arith.constant dense<0.000000e+00> : vector<2x64xf32>
    %655 = tpu.matmul %652, %654, %cst_578 {dimension_numbers = #tpu.dot_dimension_numbers<[1], [0], [0], [1], [0, 0, 1, 1], [], []>} : vector<2x32xbf16>, vector<32x64xbf16>, vector<2x64xf32> -> vector<2x64xf32>
    %656 = arith.addf %636, %655 : vector<2x64xf32>
    %c248 = arith.constant 248 : index
    %c0_579 = arith.constant 0 : index
    %657 = vector.load %arg12[%c248, %c0_579] : memref<256x32xbf16, #tpu.memory_space<vmem>>, vector<2x32xbf16>
    %c124_580 = arith.constant 124 : index
    %c0_581 = arith.constant 0 : index
    %c0_582 = arith.constant 0 : index
    %658 = vector.load %arg13[%c124_580, %c0_581, %c0_582] : memref<125x32x64xbf16, #tpu.memory_space<vmem>>, vector<1x32x64xbf16>
    %659 = vector.shape_cast %658 : vector<1x32x64xbf16> to vector<32x64xbf16>
    %cst_583 = arith.constant dense<0.000000e+00> : vector<2x64xf32>
    %660 = tpu.matmul %657, %659, %cst_583 {dimension_numbers = #tpu.dot_dimension_numbers<[1], [0], [0], [1], [0, 0, 1, 1], [], []>} : vector<2x32xbf16>, vector<32x64xbf16>, vector<2x64xf32> -> vector<2x64xf32>
    %661 = arith.addf %641, %660 : vector<2x64xf32>
    %662 = arith.addf %661, %646 : vector<2x64xf32>
    %663 = arith.addf %651, %656 : vector<2x64xf32>
    %664 = arith.addf %662, %663 : vector<2x64xf32>
    %cst_584 = arith.constant dense<0.000000e+00> : vector<64xf32>
    %665 = vector.multi_reduction <add>, %664, %cst_584 [0] : vector<2x64xf32> to vector<64xf32>
    %666 = vector.shape_cast %665 : vector<64xf32> to vector<1x64xf32>
    %cst_585 = arith.constant 5.000000e-01 : f32
    %667 = vector.broadcast %cst_585 : f32 to vector<1x64xf32>
    %668 = arith.mulf %666, %667 : vector<1x64xf32>
    %669 = vector.broadcast %668 : vector<1x64xf32> to vector<2x64xf32>
    %670 = arith.subf %664, %669 : vector<2x64xf32>
    %671 = arith.mulf %670, %670 : vector<2x64xf32>
    %cst_586 = arith.constant dense<0.000000e+00> : vector<64xf32>
    %672 = vector.multi_reduction <add>, %671, %cst_586 [0] : vector<2x64xf32> to vector<64xf32>
    %673 = vector.shape_cast %672 : vector<64xf32> to vector<1x64xf32>
    %cst_587 = arith.constant 5.000000e-01 : f32
    %674 = vector.broadcast %cst_587 : f32 to vector<1x64xf32>
    %675 = arith.mulf %673, %674 : vector<1x64xf32>
    %cst_588 = arith.constant 9.99999974E-6 : f32
    %676 = vector.broadcast %cst_588 : f32 to vector<1x64xf32>
    %677 = arith.addf %675, %676 : vector<1x64xf32>
    %678 = math.rsqrt %677 : vector<1x64xf32>
    %c0_589 = arith.constant 0 : index
    %c0_590 = arith.constant 0 : index
    %679 = vector.load %arg5[%c0_589, %c0_590] : memref<1x64xf32, #tpu.memory_space<vmem>>, vector<1x64xf32>
    %680 = arith.mulf %678, %679 : vector<1x64xf32>
    %681 = vector.broadcast %680 : vector<1x64xf32> to vector<2x64xf32>
    %682 = arith.mulf %670, %681 : vector<2x64xf32>
    %c0_591 = arith.constant 0 : index
    %c0_592 = arith.constant 0 : index
    %683 = vector.load %arg6[%c0_591, %c0_592] : memref<1x64xf32, #tpu.memory_space<vmem>>, vector<1x64xf32>
    %684 = vector.broadcast %683 : vector<1x64xf32> to vector<2x64xf32>
    %685 = arith.addf %682, %684 : vector<2x64xf32>
    %cst_593 = arith.constant 0.000000e+00 : f32
    %686 = vector.broadcast %cst_593 : f32 to vector<2x64xf32>
    %687 = arith.maximumf %685, %686 : vector<2x64xf32>
    %688 = arith.truncf %687 : vector<2x64xf32> to vector<2x64xbf16>
    %c0_594 = arith.constant 0 : index
    %c0_595 = arith.constant 0 : index
    %689 = vector.load %arg7[%c0_594, %c0_595] : memref<64x256xbf16, #tpu.memory_space<vmem>>, vector<64x256xbf16>
    %cst_596 = arith.constant dense<0.000000e+00> : vector<2x256xf32>
    %690 = tpu.matmul %688, %689, %cst_596 {dimension_numbers = #tpu.dot_dimension_numbers<[1], [0], [0], [1], [0, 0, 1, 1], [], []>} : vector<2x64xbf16>, vector<64x256xbf16>, vector<2x256xf32> -> vector<2x256xf32>
    %c0_597 = arith.constant 0 : index
    %c0_598 = arith.constant 0 : index
    %691 = vector.load %arg8[%c0_597, %c0_598] : memref<1x256xf32, #tpu.memory_space<vmem>>, vector<1x256xf32>
    %692 = vector.broadcast %691 : vector<1x256xf32> to vector<2x256xf32>
    %693 = arith.addf %690, %692 : vector<2x256xf32>
    %cst_599 = arith.constant 0.000000e+00 : f32
    %694 = vector.broadcast %cst_599 : f32 to vector<2x256xf32>
    %695 = arith.maximumf %693, %694 : vector<2x256xf32>
    %696 = arith.truncf %695 : vector<2x256xf32> to vector<2x256xbf16>
    %c0_600 = arith.constant 0 : index
    %c0_601 = arith.constant 0 : index
    %697 = vector.load %arg9[%c0_600, %c0_601] : memref<256x6xbf16, #tpu.memory_space<vmem>>, vector<256x6xbf16>
    %cst_602 = arith.constant dense<0.000000e+00> : vector<2x6xf32>
    %698 = tpu.matmul %696, %697, %cst_602 {dimension_numbers = #tpu.dot_dimension_numbers<[1], [0], [0], [1], [0, 0, 1, 1], [], []>} : vector<2x256xbf16>, vector<256x6xbf16>, vector<2x6xf32> -> vector<2x6xf32>
    %c0_603 = arith.constant 0 : index
    %c0_604 = arith.constant 0 : index
    %699 = vector.load %arg10[%c0_603, %c0_604] : memref<1x6xf32, #tpu.memory_space<vmem>>, vector<1x6xf32>
    %700 = vector.broadcast %699 : vector<1x6xf32> to vector<2x6xf32>
    %701 = arith.addf %698, %700 : vector<2x6xf32>
    %702 = math.absf %701 : vector<2x6xf32>
    %cst_605 = arith.constant 0.000000e+00 : f32
    %703 = vector.broadcast %cst_605 : f32 to vector<2x6xf32>
    %704 = arith.subf %703, %702 : vector<2x6xf32>
    %705 = math.exp %704 : vector<2x6xf32>
    %cst_606 = arith.constant 1.000000e+00 : f32
    %706 = vector.broadcast %cst_606 : f32 to vector<2x6xf32>
    %707 = arith.addf %706, %705 : vector<2x6xf32>
    %708 = tpu.reciprocal %707 {approx = true} : vector<2x6xf32> -> vector<2x6xf32>
    %cst_607 = arith.constant 0.000000e+00 : f32
    %709 = vector.broadcast %cst_607 : f32 to vector<2x6xf32>
    %710 = arith.cmpf oge, %701, %709 : vector<2x6xf32>
    %711 = arith.mulf %705, %708 : vector<2x6xf32>
    %712 = arith.select %710, %708, %711 : vector<2x6xi1>, vector<2x6xf32>
    %c0_608 = arith.constant 0 : index
    %c0_609 = arith.constant 0 : index
    %713 = vector.load %arg11[%c0_608, %c0_609] : memref<2x6xf32, #tpu.memory_space<vmem>>, vector<2x6xf32>
    tpu.vector_store %arg11[%c0_608, %c0_609], %712 {strides = array<i32>} : memref<2x6xf32, #tpu.memory_space<vmem>>, vector<2x6xf32>,
    return
  }
}

</mosaic_0001>

<bundles_post_ra>
// kernel: align_net_forward.1
= control target key start
LH: loop header
LB: loop body
LE: loop exit
PB: predicated region body
PF: predicated region fallthrough
CT: control target
= control target key end

     0   :  { %16 = vsyncpa [#allocation6], 0  ;;  %s14635_s0 = inlined_call_operand.vmem [shape: bf16[256,128], index: 0, kind: input, shape index: {}]   ;;  %s14636_s1 = inlined_call_operand.vmem [shape: bf16[128,32], index: 1, kind: input, shape index: {}]   ;;  %s14637_s2 = inlined_call_operand.vmem [shape: f32[1,32], index: 2, kind: input, shape index: {}]   ;;  %s14638_s3 = inlined_call_operand.vmem [shape: f32[1,32], index: 3, kind: input, shape index: {}]   ;;  %s14639_s4 = inlined_call_operand.vmem [shape: bf16[125,32,64], index: 4, kind: input, shape index: {}]   ;;  %s14640_s5 = inlined_call_operand.vmem [shape: f32[1,64], index: 5, kind: input, shape index: {}]   ;;  %s14641_s6 = inlined_call_operand.vmem [shape: f32[1,64], index: 6, kind: input, shape index: {}]   ;;  %s14642_s7 = inlined_call_operand.vmem [shape: bf16[64,256], index: 7, kind: input, shape index: {}]   ;;  %s14643_s8 = inlined_call_operand.vmem [shape: f32[1,256], index: 8, kind: input, shape index: {}]   ;;  %s14644_s9 = inlined_call_operand.vmem [shape: bf16[256,6], index: 9, kind: input, shape index: {}]   ;;  %s14645_s10 = inlined_call_operand.vmem [shape: f32[1,6], index: 10, kind: input, shape index: {}]   ;;  %s14646_s11 = inlined_call_operand.hbm [shape: f32[2,6], index: 11, kind: output, shape index: {}]  }
   0x1   :  { %v71_v0 = vld [vmem:[%s14639_s4] sm:$0xff]  ;;  %v73_v1 = vld [vmem:[%s14639_s4 + $0x8] sm:$0xff]  ;;  %v75_v2 = vld [vmem:[%s14639_s4 + $0x10] sm:$0xff] }
   0x2   :  { %72 = vst [vmem:[#allocation3] sm:$0xff] %v71_v0  ;;  %74 = vst [vmem:[#allocation3 + $0x8] sm:$0xff] %v73_v1  ;;  %v77_v3 = vld [vmem:[%s14639_s4 + $0x18] sm:$0xff]  ;;  %v79_v4 = vld [vmem:[%s14639_s4 + $0x20] sm:$0xff] }
   0x3   :  { %76 = vst [vmem:[#allocation3 + $0x10] sm:$0xff] %v75_v2  ;;  %78 = vst [vmem:[#allocation3 + $0x18] sm:$0xff] %v77_v3  ;;  %v81_v5 = vld [vmem:[%s14639_s4 + $0x28] sm:$0xff]  ;;  %v83_v6 = vld [vmem:[%s14639_s4 + $0x30] sm:$0xff] }
   0x4   :  { %80 = vst [vmem:[#allocation3 + $0x20] sm:$0xff] %v79_v4  ;;  %v85_v7 = vld [vmem:[%s14639_s4 + $0x38] sm:$0xff]  ;;  %82 = vst [vmem:[#allocation3 + $0x28] sm:$0xff] %v81_v5  ;;  %v87_v8 = vld [vmem:[%s14639_s4 + $0x40] sm:$0xff] }
   0x5   :  { %84 = vst [vmem:[#allocation3 + $0x30] sm:$0xff] %v83_v6  ;;  %86 = vst [vmem:[#allocation3 + $0x38] sm:$0xff] %v85_v7  ;;  %v89_v9 = vld [vmem:[%s14639_s4 + $0x48] sm:$0xff]  ;;  %v91_v10 = vld [vmem:[%s14639_s4 + $0x50] sm:$0xff] }
   0x6   :  { %88 = vst [vmem:[#allocation3 + $0x40] sm:$0xff] %v87_v8  ;;  %90 = vst [vmem:[#allocation3 + $0x48] sm:$0xff] %v89_v9  ;;  %v93_v11 = vld [vmem:[%s14639_s4 + $0x58] sm:$0xff]  ;;  %v95_v12 = vld [vmem:[%s14639_s4 + $0x60] sm:$0xff] }
   0x7   :  { %92 = vst [vmem:[#allocation3 + $0x50] sm:$0xff] %v91_v10  ;;  %v97_v13 = vld [vmem:[%s14639_s4 + $0x68] sm:$0xff]  ;;  %94 = vst [vmem:[#allocation3 + $0x58] sm:$0xff] %v93_v11  ;;  %v99_v14 = vld [vmem:[%s14639_s4 + $0x70] sm:$0xff] }
   0x8   :  { %96 = vst [vmem:[#allocation3 + $0x60] sm:$0xff] %v95_v12  ;;  %98 = vst [vmem:[#allocation3 + $0x68] sm:$0xff] %v97_v13  ;;  %v101_v15 = vld [vmem:[%s14639_s4 + $0x78] sm:$0xff]  ;;  %v103_v16 = vld [vmem:[%s14639_s4 + $0x80] sm:$0xff] }
   0x9   :  { %100 = vst [vmem:[#allocation3 + $0x70] sm:$0xff] %v99_v14  ;;  %102 = vst [vmem:[#allocation3 + $0x78] sm:$0xff] %v101_v15  ;;  %v105_v17 = vld [vmem:[%s14639_s4 + $0x88] sm:$0xff]  ;;  %v107_v18 = vld [vmem:[%s14639_s4 + $0x90] sm:$0xff] }
   0xa   :  { %104 = vst [vmem:[#allocation3 + $0x80] sm:$0xff] %v103_v16  ;;  %v109_v19 = vld [vmem:[%s14639_s4 + $0x98] sm:$0xff]  ;;  %106 = vst [vmem:[#allocation3 + $0x88] sm:$0xff] %v105_v17  ;;  %v111_v20 = vld [vmem:[%s14639_s4 + $0xa0] sm:$0xff] }
   0xb   :  { %108 = vst [vmem:[#allocation3 + $0x90] sm:$0xff] %v107_v18  ;;  %110 = vst [vmem:[#allocation3 + $0x98] sm:$0xff] %v109_v19  ;;  %v113_v21 = vld [vmem:[%s14639_s4 + $0xa8] sm:$0xff]  ;;  %v115_v22 = vld [vmem:[%s14639_s4 + $0xb0] sm:$0xff] }
   0xc   :  { %112 = vst [vmem:[#allocation3 + $0xa0] sm:$0xff] %v111_v20  ;;  %114 = vst [vmem:[#allocation3 + $0xa8] sm:$0xff] %v113_v21  ;;  %v117_v23 = vld [vmem:[%s14639_s4 + $0xb8] sm:$0xff]  ;;  %v119_v24 = vld [vmem:[%s14639_s4 + $0xc0] sm:$0xff] }
   0xd   :  { %116 = vst [vmem:[#allocation3 + $0xb0] sm:$0xff] %v115_v22  ;;  %v121_v25 = vld [vmem:[%s14639_s4 + $0xc8] sm:$0xff]  ;;  %118 = vst [vmem:[#allocation3 + $0xb8] sm:$0xff] %v117_v23  ;;  %v123_v26 = vld [vmem:[%s14639_s4 + $0xd0] sm:$0xff] }
   0xe   :  { %120 = vst [vmem:[#allocation3 + $0xc0] sm:$0xff] %v119_v24  ;;  %122 = vst [vmem:[#allocation3 + $0xc8] sm:$0xff] %v121_v25  ;;  %v125_v27 = vld [vmem:[%s14639_s4 + $0xd8] sm:$0xff]  ;;  %v127_v28 = vld [vmem:[%s14639_s4 + $0xe0] sm:$0xff] }
   0xf   :  { %124 = vst [vmem:[#allocation3 + $0xd0] sm:$0xff] %v123_v26  ;;  %126 = vst [vmem:[#allocation3 + $0xd8] sm:$0xff] %v125_v27  ;;  %v129_v29 = vld [vmem:[%s14639_s4 + $0xe8] sm:$0xff]  ;;  %v131_v30 = vld [vmem:[%s14639_s4 + $0xf0] sm:$0xff] }
  0x10   :  { %128 = vst [vmem:[#allocation3 + $0xe0] sm:$0xff] %v127_v28  ;;  %v133_v31 = vld [vmem:[%s14639_s4 + $0xf8] sm:$0xff]  ;;  %130 = vst [vmem:[#allocation3 + $0xe8] sm:$0xff] %v129_v29  ;;  %v135_v32 = vld [vmem:[%s14639_s4 + $0x100] sm:$0xff] }
  0x11   :  { %132 = vst [vmem:[#allocation3 + $0xf0] sm:$0xff] %v131_v30  ;;  %134 = vst [vmem:[#allocation3 + $0xf8] sm:$0xff] %v133_v31  ;;  %v137_v33 = vld [vmem:[%s14639_s4 + $0x108] sm:$0xff]  ;;  %v139_v34 = vld [vmem:[%s14639_s4 + $0x110] sm:$0xff] }
  0x12   :  { %136 = vst [vmem:[#allocation3 + $0x100] sm:$0xff] %v135_v32  ;;  %138 = vst [vmem:[#allocation3 + $0x108] sm:$0xff] %v137_v33  ;;  %v141_v35 = vld [vmem:[%s14639_s4 + $0x118] sm:$0xff]  ;;  %v143_v36 = vld [vmem:[%s14639_s4 + $0x120] sm:$0xff] }
  0x13   :  { %140 = vst [vmem:[#allocation3 + $0x110] sm:$0xff] %v139_v34  ;;  %v145_v37 = vld [vmem:[%s14639_s4 + $0x128] sm:$0xff]  ;;  %142 = vst [vmem:[#allocation3 + $0x118] sm:$0xff] %v141_v35  ;;  %v147_v38 = vld [vmem:[%s14639_s4 + $0x130] sm:$0xff] }
  0x14   :  { %144 = vst [vmem:[#allocation3 + $0x120] sm:$0xff] %v143_v36  ;;  %146 = vst [vmem:[#allocation3 + $0x128] sm:$0xff] %v145_v37  ;;  %v149_v39 = vld [vmem:[%s14639_s4 + $0x138] sm:$0xff]  ;;  %v151_v40 = vld [vmem:[%s14639_s4 + $0x140] sm:$0xff] }
  0x15   :  { %148 = vst [vmem:[#allocation3 + $0x130] sm:$0xff] %v147_v38  ;;  %150 = vst [vmem:[#allocation3 + $0x138] sm:$0xff] %v149_v39  ;;  %v153_v41 = vld [vmem:[%s14639_s4 + $0x148] sm:$0xff]  ;;  %v155_v42 = vld [vmem:[%s14639_s4 + $0x150] sm:$0xff] }
  0x16   :  { %152 = vst [vmem:[#allocation3 + $0x140] sm:$0xff] %v151_v40  ;;  %v157_v43 = vld [vmem:[%s14639_s4 + $0x158] sm:$0xff]  ;;  %154 = vst [vmem:[#allocation3 + $0x148] sm:$0xff] %v153_v41  ;;  %v159_v44 = vld [vmem:[%s14639_s4 + $0x160] sm:$0xff] }
  0x17   :  { %156 = vst [vmem:[#allocation3 + $0x150] sm:$0xff] %v155_v42  ;;  %158 = vst [vmem:[#allocation3 + $0x158] sm:$0xff] %v157_v43  ;;  %v161_v45 = vld [vmem:[%s14639_s4 + $0x168] sm:$0xff]  ;;  %v163_v46 = vld [vmem:[%s14639_s4 + $0x170] sm:$0xff] }
  0x18   :  { %160 = vst [vmem:[#allocation3 + $0x160] sm:$0xff] %v159_v44  ;;  %162 = vst [vmem:[#allocation3 + $0x168] sm:$0xff] %v161_v45  ;;  %v165_v47 = vld [vmem:[%s14639_s4 + $0x178] sm:$0xff]  ;;  %v167_v48 = vld [vmem:[%s14639_s4 + $0x180] sm:$0xff] }
  0x19   :  { %164 = vst [vmem:[#allocation3 + $0x170] sm:$0xff] %v163_v46  ;;  %v169_v49 = vld [vmem:[%s14639_s4 + $0x188] sm:$0xff]  ;;  %166 = vst [vmem:[#allocation3 + $0x178] sm:$0xff] %v165_v47  ;;  %v171_v50 = vld [vmem:[%s14639_s4 + $0x190] sm:$0xff] }
  0x1a   :  { %168 = vst [vmem:[#allocation3 + $0x180] sm:$0xff] %v167_v48  ;;  %170 = vst [vmem:[#allocation3 + $0x188] sm:$0xff] %v169_v49  ;;  %v173_v51 = vld [vmem:[%s14639_s4 + $0x198] sm:$0xff]  ;;  %v175_v52 = vld [vmem:[%s14639_s4 + $0x1a0] sm:$0xff] }
  0x1b   :  { %172 = vst [vmem:[#allocation3 + $0x190] sm:$0xff] %v171_v50  ;;  %174 = vst [vmem:[#allocation3 + $0x198] sm:$0xff] %v173_v51  ;;  %v177_v53 = vld [vmem:[%s14639_s4 + $0x1a8] sm:$0xff]  ;;  %v179_v54 = vld [vmem:[%s14639_s4 + $0x1b0] sm:$0xff] }
  0x1c   :  { %176 = vst [vmem:[#allocation3 + $0x1a0] sm:$0xff] %v175_v52  ;;  %v181_v55 = vld [vmem:[%s14639_s4 + $0x1b8] sm:$0xff]  ;;  %178 = vst [vmem:[#allocation3 + $0x1a8] sm:$0xff] %v177_v53  ;;  %v183_v56 = vld [vmem:[%s14639_s4 + $0x1c0] sm:$0xff] }
  0x1d   :  { %180 = vst [vmem:[#allocation3 + $0x1b0] sm:$0xff] %v179_v54  ;;  %182 = vst [vmem:[#allocation3 + $0x1b8] sm:$0xff] %v181_v55  ;;  %v185_v57 = vld [vmem:[%s14639_s4 + $0x1c8] sm:$0xff]  ;;  %v187_v58 = vld [vmem:[%s14639_s4 + $0x1d0] sm:$0xff] }
  0x1e   :  { %184 = vst [vmem:[#allocation3 + $0x1c0] sm:$0xff] %v183_v56  ;;  %186 = vst [vmem:[#allocation3 + $0x1c8] sm:$0xff] %v185_v57  ;;  %v189_v59 = vld [vmem:[%s14639_s4 + $0x1d8] sm:$0xff]  ;;  %v191_v60 = vld [vmem:[%s14639_s4 + $0x1e0] sm:$0xff] }
  0x1f   :  { %188 = vst [vmem:[#allocation3 + $0x1d0] sm:$0xff] %v187_v58  ;;  %v193_v61 = vld [vmem:[%s14639_s4 + $0x1e8] sm:$0xff]  ;;  %190 = vst [vmem:[#allocation3 + $0x1d8] sm:$0xff] %v189_v59  ;;  %v195_v62 = vld [vmem:[%s14639_s4 + $0x1f0] sm:$0xff] }
  0x20   :  { %192 = vst [vmem:[#allocation3 + $0x1e0] sm:$0xff] %v191_v60  ;;  %194 = vst [vmem:[#allocation3 + $0x1e8] sm:$0xff] %v193_v61  ;;  %v197_v63 = vld [vmem:[%s14639_s4 + $0x1f8] sm:$0xff]  ;;  %v199_v0 = vld [vmem:[%s14639_s4 + $0x200] sm:$0xff] }
  0x21   :  { %196 = vst [vmem:[#allocation3 + $0x1f0] sm:$0xff] %v195_v62  ;;  %198 = vst [vmem:[#allocation3 + $0x1f8] sm:$0xff] %v197_v63  ;;  %v201_v1 = vld [vmem:[%s14639_s4 + $0x208] sm:$0xff]  ;;  %v203_v2 = vld [vmem:[%s14639_s4 + $0x210] sm:$0xff] }
  0x22   :  { %200 = vst [vmem:[#allocation3 + $0x200] sm:$0xff] %v199_v0  ;;  %v205_v3 = vld [vmem:[%s14639_s4 + $0x218] sm:$0xff]  ;;  %202 = vst [vmem:[#allocation3 + $0x208] sm:$0xff] %v201_v1  ;;  %v207_v4 = vld [vmem:[%s14639_s4 + $0x220] sm:$0xff] }
  0x23   :  { %204 = vst [vmem:[#allocation3 + $0x210] sm:$0xff] %v203_v2  ;;  %206 = vst [vmem:[#allocation3 + $0x218] sm:$0xff] %v205_v3  ;;  %v209_v5 = vld [vmem:[%s14639_s4 + $0x228] sm:$0xff]  ;;  %v211_v6 = vld [vmem:[%s14639_s4 + $0x230] sm:$0xff] }
  0x24   :  { %208 = vst [vmem:[#allocation3 + $0x220] sm:$0xff] %v207_v4  ;;  %210 = vst [vmem:[#allocation3 + $0x228] sm:$0xff] %v209_v5  ;;  %v213_v7 = vld [vmem:[%s14639_s4 + $0x238] sm:$0xff]  ;;  %v215_v8 = vld [vmem:[%s14639_s4 + $0x240] sm:$0xff] }
  0x25   :  { %212 = vst [vmem:[#allocation3 + $0x230] sm:$0xff] %v211_v6  ;;  %v217_v9 = vld [vmem:[%s14639_s4 + $0x248] sm:$0xff]  ;;  %214 = vst [vmem:[#allocation3 + $0x238] sm:$0xff] %v213_v7  ;;  %v219_v10 = vld [vmem:[%s14639_s4 + $0x250] sm:$0xff] }
  0x26   :  { %216 = vst [vmem:[#allocation3 + $0x240] sm:$0xff] %v215_v8  ;;  %218 = vst [vmem:[#allocation3 + $0x248] sm:$0xff] %v217_v9  ;;  %v221_v11 = vld [vmem:[%s14639_s4 + $0x258] sm:$0xff]  ;;  %v223_v12 = vld [vmem:[%s14639_s4 + $0x260] sm:$0xff] }
  0x27   :  { %220 = vst [vmem:[#allocation3 + $0x250] sm:$0xff] %v219_v10  ;;  %222 = vst [vmem:[#allocation3 + $0x258] sm:$0xff] %v221_v11  ;;  %v225_v13 = vld [vmem:[%s14639_s4 + $0x268] sm:$0xff]  ;;  %v227_v14 = vld [vmem:[%s14639_s4 + $0x270] sm:$0xff] }
  0x28   :  { %224 = vst [vmem:[#allocation3 + $0x260] sm:$0xff] %v223_v12  ;;  %v229_v15 = vld [vmem:[%s14639_s4 + $0x278] sm:$0xff]  ;;  %226 = vst [vmem:[#allocation3 + $0x268] sm:$0xff] %v225_v13  ;;  %v231_v16 = vld [vmem:[%s14639_s4 + $0x280] sm:$0xff] }
  0x29   :  { %228 = vst [vmem:[#allocation3 + $0x270] sm:$0xff] %v227_v14  ;;  %230 = vst [vmem:[#allocation3 + $0x278] sm:$0xff] %v229_v15  ;;  %v233_v17 = vld [vmem:[%s14639_s4 + $0x288] sm:$0xff]  ;;  %v235_v18 = vld [vmem:[%s14639_s4 + $0x290] sm:$0xff] }
  0x2a   :  { %232 = vst [vmem:[#allocation3 + $0x280] sm:$0xff] %v231_v16  ;;  %234 = vst [vmem:[#allocation3 + $0x288] sm:$0xff] %v233_v17  ;;  %v237_v19 = vld [vmem:[%s14639_s4 + $0x298] sm:$0xff]  ;;  %v239_v20 = vld [vmem:[%s14639_s4 + $0x2a0] sm:$0xff] }
  0x2b   :  { %236 = vst [vmem:[#allocation3 + $0x290] sm:$0xff] %v235_v18  ;;  %v241_v21 = vld [vmem:[%s14639_s4 + $0x2a8] sm:$0xff]  ;;  %238 = vst [vmem:[#allocation3 + $0x298] sm:$0xff] %v237_v19  ;;  %v243_v22 = vld [vmem:[%s14639_s4 + $0x2b0] sm:$0xff] }
  0x2c   :  { %240 = vst [vmem:[#allocation3 + $0x2a0] sm:$0xff] %v239_v20  ;;  %242 = vst [vmem:[#allocation3 + $0x2a8] sm:$0xff] %v241_v21  ;;  %v245_v23 = vld [vmem:[%s14639_s4 + $0x2b8] sm:$0xff]  ;;  %v247_v24 = vld [vmem:[%s14639_s4 + $0x2c0] sm:$0xff] }
  0x2d   :  { %244 = vst [vmem:[#allocation3 + $0x2b0] sm:$0xff] %v243_v22  ;;  %246 = vst [vmem:[#allocation3 + $0x2b8] sm:$0xff] %v245_v23  ;;  %v249_v25 = vld [vmem:[%s14639_s4 + $0x2c8] sm:$0xff]  ;;  %v251_v26 = vld [vmem:[%s14639_s4 + $0x2d0] sm:$0xff] }
  0x2e   :  { %248 = vst [vmem:[#allocation3 + $0x2c0] sm:$0xff] %v247_v24  ;;  %v253_v27 = vld [vmem:[%s14639_s4 + $0x2d8] sm:$0xff]  ;;  %250 = vst [vmem:[#allocation3 + $0x2c8] sm:$0xff] %v249_v25  ;;  %v255_v28 = vld [vmem:[%s14639_s4 + $0x2e0] sm:$0xff] }
  0x2f   :  { %252 = vst [vmem:[#allocation3 + $0x2d0] sm:$0xff] %v251_v26  ;;  %254 = vst [vmem:[#allocation3 + $0x2d8] sm:$0xff] %v253_v27  ;;  %v257_v29 = vld [vmem:[%s14639_s4 + $0x2e8] sm:$0xff]  ;;  %v259_v30 = vld [vmem:[%s14639_s4 + $0x2f0] sm:$0xff] }
  0x30   :  { %256 = vst [vmem:[#allocation3 + $0x2e0] sm:$0xff] %v255_v28  ;;  %258 = vst [vmem:[#allocation3 + $0x2e8] sm:$0xff] %v257_v29  ;;  %v261_v31 = vld [vmem:[%s14639_s4 + $0x2f8] sm:$0xff]  ;;  %v263_v32 = vld [vmem:[%s14639_s4 + $0x300] sm:$0xff] }
  0x31   :  { %260 = vst [vmem:[#allocation3 + $0x2f0] sm:$0xff] %v259_v30  ;;  %v265_v33 = vld [vmem:[%s14639_s4 + $0x308] sm:$0xff]  ;;  %262 = vst [vmem:[#allocation3 + $0x2f8] sm:$0xff] %v261_v31  ;;  %v267_v34 = vld [vmem:[%s14639_s4 + $0x310] sm:$0xff] }
  0x32   :  { %264 = vst [vmem:[#allocation3 + $0x300] sm:$0xff] %v263_v32  ;;  %266 = vst [vmem:[#allocation3 + $0x308] sm:$0xff] %v265_v33  ;;  %v269_v35 = vld [vmem:[%s14639_s4 + $0x318] sm:$0xff]  ;;  %v271_v36 = vld [vmem:[%s14639_s4 + $0x320] sm:$0xff] }
  0x33   :  { %268 = vst [vmem:[#allocation3 + $0x310] sm:$0xff] %v267_v34  ;;  %270 = vst [vmem:[#allocation3 + $0x318] sm:$0xff] %v269_v35  ;;  %v273_v37 = vld [vmem:[%s14639_s4 + $0x328] sm:$0xff]  ;;  %v275_v38 = vld [vmem:[%s14639_s4 + $0x330] sm:$0xff] }
  0x34   :  { %272 = vst [vmem:[#allocation3 + $0x320] sm:$0xff] %v271_v36  ;;  %v277_v39 = vld [vmem:[%s14639_s4 + $0x338] sm:$0xff]  ;;  %274 = vst [vmem:[#allocation3 + $0x328] sm:$0xff] %v273_v37  ;;  %v279_v40 = vld [vmem:[%s14639_s4 + $0x340] sm:$0xff] }
  0x35   :  { %276 = vst [vmem:[#allocation3 + $0x330] sm:$0xff] %v275_v38  ;;  %278 = vst [vmem:[#allocation3 + $0x338] sm:$0xff] %v277_v39  ;;  %v281_v41 = vld [vmem:[%s14639_s4 + $0x348] sm:$0xff]  ;;  %v283_v42 = vld [vmem:[%s14639_s4 + $0x350] sm:$0xff] }
  0x36   :  { %280 = vst [vmem:[#allocation3 + $0x340] sm:$0xff] %v279_v40  ;;  %282 = vst [vmem:[#allocation3 + $0x348] sm:$0xff] %v281_v41  ;;  %v285_v43 = vld [vmem:[%s14639_s4 + $0x358] sm:$0xff]  ;;  %v287_v44 = vld [vmem:[%s14639_s4 + $0x360] sm:$0xff] }
  0x37   :  { %284 = vst [vmem:[#allocation3 + $0x350] sm:$0xff] %v283_v42  ;;  %v289_v45 = vld [vmem:[%s14639_s4 + $0x368] sm:$0xff]  ;;  %286 = vst [vmem:[#allocation3 + $0x358] sm:$0xff] %v285_v43  ;;  %v291_v46 = vld [vmem:[%s14639_s4 + $0x370] sm:$0xff] }
  0x38   :  { %288 = vst [vmem:[#allocation3 + $0x360] sm:$0xff] %v287_v44  ;;  %290 = vst [vmem:[#allocation3 + $0x368] sm:$0xff] %v289_v45  ;;  %v293_v47 = vld [vmem:[%s14639_s4 + $0x378] sm:$0xff]  ;;  %v295_v48 = vld [vmem:[%s14639_s4 + $0x380] sm:$0xff] }
  0x39   :  { %292 = vst [vmem:[#allocation3 + $0x370] sm:$0xff] %v291_v46  ;;  %294 = vst [vmem:[#allocation3 + $0x378] sm:$0xff] %v293_v47  ;;  %v297_v49 = vld [vmem:[%s14639_s4 + $0x388] sm:$0xff]  ;;  %v299_v50 = vld [vmem:[%s14639_s4 + $0x390] sm:$0xff] }
  0x3a   :  { %296 = vst [vmem:[#allocation3 + $0x380] sm:$0xff] %v295_v48  ;;  %v301_v51 = vld [vmem:[%s14639_s4 + $0x398] sm:$0xff]  ;;  %298 = vst [vmem:[#allocation3 + $0x388] sm:$0xff] %v297_v49  ;;  %v303_v52 = vld [vmem:[%s14639_s4 + $0x3a0] sm:$0xff] }
  0x3b   :  { %300 = vst [vmem:[#allocation3 + $0x390] sm:$0xff] %v299_v50  ;;  %302 = vst [vmem:[#allocation3 + $0x398] sm:$0xff] %v301_v51  ;;  %v305_v53 = vld [vmem:[%s14639_s4 + $0x3a8] sm:$0xff]  ;;  %v307_v54 = vld [vmem:[%s14639_s4 + $0x3b0] sm:$0xff] }
  0x3c   :  { %304 = vst [vmem:[#allocation3 + $0x3a0] sm:$0xff] %v303_v52  ;;  %306 = vst [vmem:[#allocation3 + $0x3a8] sm:$0xff] %v305_v53  ;;  %v309_v55 = vld [vmem:[%s14639_s4 + $0x3b8] sm:$0xff]  ;;  %v311_v56 = vld [vmem:[%s14639_s4 + $0x3c0] sm:$0xff] }
  0x3d   :  { %308 = vst [vmem:[#allocation3 + $0x3b0] sm:$0xff] %v307_v54  ;;  %v313_v57 = vld [vmem:[%s14639_s4 + $0x3c8] sm:$0xff]  ;;  %310 = vst [vmem:[#allocation3 + $0x3b8] sm:$0xff] %v309_v55  ;;  %v315_v58 = vld [vmem:[%s14639_s4 + $0x3d0] sm:$0xff] }
  0x3e   :  { %312 = vst [vmem:[#allocation3 + $0x3c0] sm:$0xff] %v311_v56  ;;  %314 = vst [vmem:[#allocation3 + $0x3c8] sm:$0xff] %v313_v57  ;;  %v317_v59 = vld [vmem:[%s14639_s4 + $0x3d8] sm:$0xff]  ;;  %v319_v60 = vld [vmem:[%s14639_s4 + $0x3e0] sm:$0xff] }
  0x3f   :  { %316 = vst [vmem:[#allocation3 + $0x3d0] sm:$0xff] %v315_v58  ;;  %318 = vst [vmem:[#allocation3 + $0x3d8] sm:$0xff] %v317_v59  ;;  %v321_v61 = vld [vmem:[%s14639_s4 + $0x3e8] sm:$0xff]  ;;  %v323_v62 = vld [vmem:[%s14639_s4 + $0x3f0] sm:$0xff] }
  0x40   :  { %320 = vst [vmem:[#allocation3 + $0x3e0] sm:$0xff] %v319_v60  ;;  %v325_v63 = vld [vmem:[%s14639_s4 + $0x3f8] sm:$0xff]  ;;  %322 = vst [vmem:[#allocation3 + $0x3e8] sm:$0xff] %v321_v61  ;;  %v327_v0 = vld [vmem:[%s14639_s4 + $0x400] sm:$0xff] }
  0x41   :  { %324 = vst [vmem:[#allocation3 + $0x3f0] sm:$0xff] %v323_v62  ;;  %326 = vst [vmem:[#allocation3 + $0x3f8] sm:$0xff] %v325_v63  ;;  %v329_v1 = vld [vmem:[%s14639_s4 + $0x408] sm:$0xff]  ;;  %v331_v2 = vld [vmem:[%s14639_s4 + $0x410] sm:$0xff] }
  0x42   :  { %328 = vst [vmem:[#allocation3 + $0x400] sm:$0xff] %v327_v0  ;;  %330 = vst [vmem:[#allocation3 + $0x408] sm:$0xff] %v329_v1  ;;  %v333_v3 = vld [vmem:[%s14639_s4 + $0x418] sm:$0xff]  ;;  %v335_v4 = vld [vmem:[%s14639_s4 + $0x420] sm:$0xff] }
  0x43   :  { %332 = vst [vmem:[#allocation3 + $0x410] sm:$0xff] %v331_v2  ;;  %v337_v5 = vld [vmem:[%s14639_s4 + $0x428] sm:$0xff]  ;;  %334 = vst [vmem:[#allocation3 + $0x418] sm:$0xff] %v333_v3  ;;  %v339_v6 = vld [vmem:[%s14639_s4 + $0x430] sm:$0xff] }
  0x44   :  { %336 = vst [vmem:[#allocation3 + $0x420] sm:$0xff] %v335_v4  ;;  %338 = vst [vmem:[#allocation3 + $0x428] sm:$0xff] %v337_v5  ;;  %v341_v7 = vld [vmem:[%s14639_s4 + $0x438] sm:$0xff]  ;;  %v343_v8 = vld [vmem:[%s14639_s4 + $0x440] sm:$0xff] }
  0x45   :  { %340 = vst [vmem:[#allocation3 + $0x430] sm:$0xff] %v339_v6  ;;  %342 = vst [vmem:[#allocation3 + $0x438] sm:$0xff] %v341_v7  ;;  %v345_v9 = vld [vmem:[%s14639_s4 + $0x448] sm:$0xff]  ;;  %v347_v10 = vld [vmem:[%s14639_s4 + $0x450] sm:$0xff] }
  0x46   :  { %344 = vst [vmem:[#allocation3 + $0x440] sm:$0xff] %v343_v8  ;;  %v349_v11 = vld [vmem:[%s14639_s4 + $0x458] sm:$0xff]  ;;  %346 = vst [vmem:[#allocation3 + $0x448] sm:$0xff] %v345_v9  ;;  %v351_v12 = vld [vmem:[%s14639_s4 + $0x460] sm:$0xff] }
  0x47   :  { %348 = vst [vmem:[#allocation3 + $0x450] sm:$0xff] %v347_v10  ;;  %350 = vst [vmem:[#allocation3 + $0x458] sm:$0xff] %v349_v11  ;;  %v353_v13 = vld [vmem:[%s14639_s4 + $0x468] sm:$0xff]  ;;  %v355_v14 = vld [vmem:[%s14639_s4 + $0x470] sm:$0xff] }
  0x48   :  { %352 = vst [vmem:[#allocation3 + $0x460] sm:$0xff] %v351_v12  ;;  %354 = vst [vmem:[#allocation3 + $0x468] sm:$0xff] %v353_v13  ;;  %v357_v15 = vld [vmem:[%s14639_s4 + $0x478] sm:$0xff]  ;;  %v359_v16 = vld [vmem:[%s14639_s4 + $0x480] sm:$0xff] }
  0x49   :  { %356 = vst [vmem:[#allocation3 + $0x470] sm:$0xff] %v355_v14  ;;  %v361_v17 = vld [vmem:[%s14639_s4 + $0x488] sm:$0xff]  ;;  %358 = vst [vmem:[#allocation3 + $0x478] sm:$0xff] %v357_v15  ;;  %v363_v18 = vld [vmem:[%s14639_s4 + $0x490] sm:$0xff] }
  0x4a   :  { %360 = vst [vmem:[#allocation3 + $0x480] sm:$0xff] %v359_v16  ;;  %362 = vst [vmem:[#allocation3 + $0x488] sm:$0xff] %v361_v17  ;;  %v365_v19 = vld [vmem:[%s14639_s4 + $0x498] sm:$0xff]  ;;  %v367_v20 = vld [vmem:[%s14639_s4 + $0x4a0] sm:$0xff] }
  0x4b   :  { %364 = vst [vmem:[#allocation3 + $0x490] sm:$0xff] %v363_v18  ;;  %366 = vst [vmem:[#allocation3 + $0x498] sm:$0xff] %v365_v19  ;;  %v369_v21 = vld [vmem:[%s14639_s4 + $0x4a8] sm:$0xff]  ;;  %v371_v22 = vld [vmem:[%s14639_s4 + $0x4b0] sm:$0xff] }
  0x4c   :  { %368 = vst [vmem:[#allocation3 + $0x4a0] sm:$0xff] %v367_v20  ;;  %v373_v23 = vld [vmem:[%s14639_s4 + $0x4b8] sm:$0xff]  ;;  %370 = vst [vmem:[#allocation3 + $0x4a8] sm:$0xff] %v369_v21  ;;  %v375_v24 = vld [vmem:[%s14639_s4 + $0x4c0] sm:$0xff] }
  0x4d   :  { %372 = vst [vmem:[#allocation3 + $0x4b0] sm:$0xff] %v371_v22  ;;  %374 = vst [vmem:[#allocation3 + $0x4b8] sm:$0xff] %v373_v23  ;;  %v377_v25 = vld [vmem:[%s14639_s4 + $0x4c8] sm:$0xff]  ;;  %v379_v26 = vld [vmem:[%s14639_s4 + $0x4d0] sm:$0xff] }
  0x4e   :  { %376 = vst [vmem:[#allocation3 + $0x4c0] sm:$0xff] %v375_v24  ;;  %378 = vst [vmem:[#allocation3 + $0x4c8] sm:$0xff] %v377_v25  ;;  %v381_v27 = vld [vmem:[%s14639_s4 + $0x4d8] sm:$0xff]  ;;  %v383_v28 = vld [vmem:[%s14639_s4 + $0x4e0] sm:$0xff] }
  0x4f   :  { %380 = vst [vmem:[#allocation3 + $0x4d0] sm:$0xff] %v379_v26  ;;  %v385_v29 = vld [vmem:[%s14639_s4 + $0x4e8] sm:$0xff]  ;;  %382 = vst [vmem:[#allocation3 + $0x4d8] sm:$0xff] %v381_v27  ;;  %v387_v30 = vld [vmem:[%s14639_s4 + $0x4f0] sm:$0xff] }
  0x50   :  { %384 = vst [vmem:[#allocation3 + $0x4e0] sm:$0xff] %v383_v28  ;;  %386 = vst [vmem:[#allocation3 + $0x4e8] sm:$0xff] %v385_v29  ;;  %v389_v31 = vld [vmem:[%s14639_s4 + $0x4f8] sm:$0xff]  ;;  %v391_v32 = vld [vmem:[%s14639_s4 + $0x500] sm:$0xff] }
  0x51   :  { %388 = vst [vmem:[#allocation3 + $0x4f0] sm:$0xff] %v387_v30  ;;  %390 = vst [vmem:[#allocation3 + $0x4f8] sm:$0xff] %v389_v31  ;;  %v393_v33 = vld [vmem:[%s14639_s4 + $0x508] sm:$0xff]  ;;  %v395_v34 = vld [vmem:[%s14639_s4 + $0x510] sm:$0xff] }
  0x52   :  { %392 = vst [vmem:[#allocation3 + $0x500] sm:$0xff] %v391_v32  ;;  %v397_v35 = vld [vmem:[%s14639_s4 + $0x518] sm:$0xff]  ;;  %394 = vst [vmem:[#allocation3 + $0x508] sm:$0xff] %v393_v33  ;;  %v399_v36 = vld [vmem:[%s14639_s4 + $0x520] sm:$0xff] }
  0x53   :  { %396 = vst [vmem:[#allocation3 + $0x510] sm:$0xff] %v395_v34  ;;  %398 = vst [vmem:[#allocation3 + $0x518] sm:$0xff] %v397_v35  ;;  %v401_v37 = vld [vmem:[%s14639_s4 + $0x528] sm:$0xff]  ;;  %v403_v38 = vld [vmem:[%s14639_s4 + $0x530] sm:$0xff] }
  0x54   :  { %400 = vst [vmem:[#allocation3 + $0x520] sm:$0xff] %v399_v36  ;;  %402 = vst [vmem:[#allocation3 + $0x528] sm:$0xff] %v401_v37  ;;  %v405_v39 = vld [vmem:[%s14639_s4 + $0x538] sm:$0xff]  ;;  %v407_v40 = vld [vmem:[%s14639_s4 + $0x540] sm:$0xff] }
  0x55   :  { %404 = vst [vmem:[#allocation3 + $0x530] sm:$0xff] %v403_v38  ;;  %v409_v41 = vld [vmem:[%s14639_s4 + $0x548] sm:$0xff]  ;;  %406 = vst [vmem:[#allocation3 + $0x538] sm:$0xff] %v405_v39  ;;  %v411_v42 = vld [vmem:[%s14639_s4 + $0x550] sm:$0xff] }
  0x56   :  { %408 = vst [vmem:[#allocation3 + $0x540] sm:$0xff] %v407_v40  ;;  %410 = vst [vmem:[#allocation3 + $0x548] sm:$0xff] %v409_v41  ;;  %v413_v43 = vld [vmem:[%s14639_s4 + $0x558] sm:$0xff]  ;;  %v415_v44 = vld [vmem:[%s14639_s4 + $0x560] sm:$0xff] }
  0x57   :  { %412 = vst [vmem:[#allocation3 + $0x550] sm:$0xff] %v411_v42  ;;  %414 = vst [vmem:[#allocation3 + $0x558] sm:$0xff] %v413_v43  ;;  %v417_v45 = vld [vmem:[%s14639_s4 + $0x568] sm:$0xff]  ;;  %v419_v46 = vld [vmem:[%s14639_s4 + $0x570] sm:$0xff] }
  0x58   :  { %416 = vst [vmem:[#allocation3 + $0x560] sm:$0xff] %v415_v44  ;;  %v421_v47 = vld [vmem:[%s14639_s4 + $0x578] sm:$0xff]  ;;  %418 = vst [vmem:[#allocation3 + $0x568] sm:$0xff] %v417_v45  ;;  %v423_v48 = vld [vmem:[%s14639_s4 + $0x580] sm:$0xff] }
  0x59   :  { %420 = vst [vmem:[#allocation3 + $0x570] sm:$0xff] %v419_v46  ;;  %422 = vst [vmem:[#allocation3 + $0x578] sm:$0xff] %v421_v47  ;;  %v425_v49 = vld [vmem:[%s14639_s4 + $0x588] sm:$0xff]  ;;  %v427_v50 = vld [vmem:[%s14639_s4 + $0x590] sm:$0xff] }
  0x5a   :  { %424 = vst [vmem:[#allocation3 + $0x580] sm:$0xff] %v423_v48  ;;  %426 = vst [vmem:[#allocation3 + $0x588] sm:$0xff] %v425_v49  ;;  %v429_v51 = vld [vmem:[%s14639_s4 + $0x598] sm:$0xff]  ;;  %v431_v52 = vld [vmem:[%s14639_s4 + $0x5a0] sm:$0xff] }
  0x5b   :  { %428 = vst [vmem:[#allocation3 + $0x590] sm:$0xff] %v427_v50  ;;  %v433_v53 = vld [vmem:[%s14639_s4 + $0x5a8] sm:$0xff]  ;;  %430 = vst [vmem:[#allocation3 + $0x598] sm:$0xff] %v429_v51  ;;  %v435_v54 = vld [vmem:[%s14639_s4 + $0x5b0] sm:$0xff] }
  0x5c   :  { %432 = vst [vmem:[#allocation3 + $0x5a0] sm:$0xff] %v431_v52  ;;  %434 = vst [vmem:[#allocation3 + $0x5a8] sm:$0xff] %v433_v53  ;;  %v437_v55 = vld [vmem:[%s14639_s4 + $0x5b8] sm:$0xff]  ;;  %v439_v56 = vld [vmem:[%s14639_s4 + $0x5c0] sm:$0xff] }
  0x5d   :  { %436 = vst [vmem:[#allocation3 + $0x5b0] sm:$0xff] %v435_v54  ;;  %438 = vst [vmem:[#allocation3 + $0x5b8] sm:$0xff] %v437_v55  ;;  %v441_v57 = vld [vmem:[%s14639_s4 + $0x5c8] sm:$0xff]  ;;  %v443_v58 = vld [vmem:[%s14639_s4 + $0x5d0] sm:$0xff] }
  0x5e   :  { %440 = vst [vmem:[#allocation3 + $0x5c0] sm:$0xff] %v439_v56  ;;  %v445_v59 = vld [vmem:[%s14639_s4 + $0x5d8] sm:$0xff]  ;;  %442 = vst [vmem:[#allocation3 + $0x5c8] sm:$0xff] %v441_v57  ;;  %v447_v60 = vld [vmem:[%s14639_s4 + $0x5e0] sm:$0xff] }
  0x5f   :  { %444 = vst [vmem:[#allocation3 + $0x5d0] sm:$0xff] %v443_v58  ;;  %446 = vst [vmem:[#allocation3 + $0x5d8] sm:$0xff] %v445_v59  ;;  %v449_v61 = vld [vmem:[%s14639_s4 + $0x5e8] sm:$0xff]  ;;  %v451_v62 = vld [vmem:[%s14639_s4 + $0x5f0] sm:$0xff] }
  0x60   :  { %448 = vst [vmem:[#allocation3 + $0x5e0] sm:$0xff] %v447_v60  ;;  %450 = vst [vmem:[#allocation3 + $0x5e8] sm:$0xff] %v449_v61  ;;  %v453_v63 = vld [vmem:[%s14639_s4 + $0x5f8] sm:$0xff]  ;;  %v455_v0 = vld [vmem:[%s14639_s4 + $0x600] sm:$0xff] }
  0x61   :  { %452 = vst [vmem:[#allocation3 + $0x5f0] sm:$0xff] %v451_v62  ;;  %v457_v1 = vld [vmem:[%s14639_s4 + $0x608] sm:$0xff]  ;;  %454 = vst [vmem:[#allocation3 + $0x5f8] sm:$0xff] %v453_v63  ;;  %v459_v2 = vld [vmem:[%s14639_s4 + $0x610] sm:$0xff] }
  0x62   :  { %456 = vst [vmem:[#allocation3 + $0x600] sm:$0xff] %v455_v0  ;;  %458 = vst [vmem:[#allocation3 + $0x608] sm:$0xff] %v457_v1  ;;  %v461_v3 = vld [vmem:[%s14639_s4 + $0x618] sm:$0xff]  ;;  %v463_v4 = vld [vmem:[%s14639_s4 + $0x620] sm:$0xff] }
  0x63   :  { %460 = vst [vmem:[#allocation3 + $0x610] sm:$0xff] %v459_v2  ;;  %462 = vst [vmem:[#allocation3 + $0x618] sm:$0xff] %v461_v3  ;;  %v465_v5 = vld [vmem:[%s14639_s4 + $0x628] sm:$0xff]  ;;  %v467_v6 = vld [vmem:[%s14639_s4 + $0x630] sm:$0xff] }
  0x64   :  { %464 = vst [vmem:[#allocation3 + $0x620] sm:$0xff] %v463_v4  ;;  %v469_v7 = vld [vmem:[%s14639_s4 + $0x638] sm:$0xff]  ;;  %466 = vst [vmem:[#allocation3 + $0x628] sm:$0xff] %v465_v5  ;;  %v471_v8 = vld [vmem:[%s14639_s4 + $0x640] sm:$0xff] }
  0x65   :  { %468 = vst [vmem:[#allocation3 + $0x630] sm:$0xff] %v467_v6  ;;  %470 = vst [vmem:[#allocation3 + $0x638] sm:$0xff] %v469_v7  ;;  %v473_v9 = vld [vmem:[%s14639_s4 + $0x648] sm:$0xff]  ;;  %v475_v10 = vld [vmem:[%s14639_s4 + $0x650] sm:$0xff] }
  0x66   :  { %472 = vst [vmem:[#allocation3 + $0x640] sm:$0xff] %v471_v8  ;;  %474 = vst [vmem:[#allocation3 + $0x648] sm:$0xff] %v473_v9  ;;  %v477_v11 = vld [vmem:[%s14639_s4 + $0x658] sm:$0xff]  ;;  %v479_v12 = vld [vmem:[%s14639_s4 + $0x660] sm:$0xff] }
  0x67   :  { %476 = vst [vmem:[#allocation3 + $0x650] sm:$0xff] %v475_v10  ;;  %v481_v13 = vld [vmem:[%s14639_s4 + $0x668] sm:$0xff]  ;;  %478 = vst [vmem:[#allocation3 + $0x658] sm:$0xff] %v477_v11  ;;  %v483_v14 = vld [vmem:[%s14639_s4 + $0x670] sm:$0xff] }
  0x68   :  { %480 = vst [vmem:[#allocation3 + $0x660] sm:$0xff] %v479_v12  ;;  %482 = vst [vmem:[#allocation3 + $0x668] sm:$0xff] %v481_v13  ;;  %v485_v15 = vld [vmem:[%s14639_s4 + $0x678] sm:$0xff]  ;;  %v487_v16 = vld [vmem:[%s14639_s4 + $0x680] sm:$0xff] }
  0x69   :  { %484 = vst [vmem:[#allocation3 + $0x670] sm:$0xff] %v483_v14  ;;  %486 = vst [vmem:[#allocation3 + $0x678] sm:$0xff] %v485_v15  ;;  %v489_v17 = vld [vmem:[%s14639_s4 + $0x688] sm:$0xff]  ;;  %v491_v18 = vld [vmem:[%s14639_s4 + $0x690] sm:$0xff] }
  0x6a   :  { %488 = vst [vmem:[#allocation3 + $0x680] sm:$0xff] %v487_v16  ;;  %v493_v19 = vld [vmem:[%s14639_s4 + $0x698] sm:$0xff]  ;;  %490 = vst [vmem:[#allocation3 + $0x688] sm:$0xff] %v489_v17  ;;  %v495_v20 = vld [vmem:[%s14639_s4 + $0x6a0] sm:$0xff] }
  0x6b   :  { %492 = vst [vmem:[#allocation3 + $0x690] sm:$0xff] %v491_v18  ;;  %494 = vst [vmem:[#allocation3 + $0x698] sm:$0xff] %v493_v19  ;;  %v497_v21 = vld [vmem:[%s14639_s4 + $0x6a8] sm:$0xff]  ;;  %v499_v22 = vld [vmem:[%s14639_s4 + $0x6b0] sm:$0xff] }
  0x6c   :  { %496 = vst [vmem:[#allocation3 + $0x6a0] sm:$0xff] %v495_v20  ;;  %498 = vst [vmem:[#allocation3 + $0x6a8] sm:$0xff] %v497_v21  ;;  %v501_v23 = vld [vmem:[%s14639_s4 + $0x6b8] sm:$0xff]  ;;  %v503_v24 = vld [vmem:[%s14639_s4 + $0x6c0] sm:$0xff] }
  0x6d   :  { %500 = vst [vmem:[#allocation3 + $0x6b0] sm:$0xff] %v499_v22  ;;  %v505_v25 = vld [vmem:[%s14639_s4 + $0x6c8] sm:$0xff]  ;;  %502 = vst [vmem:[#allocation3 + $0x6b8] sm:$0xff] %v501_v23  ;;  %v507_v26 = vld [vmem:[%s14639_s4 + $0x6d0] sm:$0xff] }
  0x6e   :  { %504 = vst [vmem:[#allocation3 + $0x6c0] sm:$0xff] %v503_v24  ;;  %506 = vst [vmem:[#allocation3 + $0x6c8] sm:$0xff] %v505_v25  ;;  %v509_v27 = vld [vmem:[%s14639_s4 + $0x6d8] sm:$0xff]  ;;  %v511_v28 = vld [vmem:[%s14639_s4 + $0x6e0] sm:$0xff] }
  0x6f   :  { %508 = vst [vmem:[#allocation3 + $0x6d0] sm:$0xff] %v507_v26  ;;  %510 = vst [vmem:[#allocation3 + $0x6d8] sm:$0xff] %v509_v27  ;;  %v513_v29 = vld [vmem:[%s14639_s4 + $0x6e8] sm:$0xff]  ;;  %v515_v30 = vld [vmem:[%s14639_s4 + $0x6f0] sm:$0xff] }
  0x70   :  { %512 = vst [vmem:[#allocation3 + $0x6e0] sm:$0xff] %v511_v28  ;;  %v517_v31 = vld [vmem:[%s14639_s4 + $0x6f8] sm:$0xff]  ;;  %514 = vst [vmem:[#allocation3 + $0x6e8] sm:$0xff] %v513_v29  ;;  %v519_v32 = vld [vmem:[%s14639_s4 + $0x700] sm:$0xff] }
  0x71   :  { %516 = vst [vmem:[#allocation3 + $0x6f0] sm:$0xff] %v515_v30  ;;  %518 = vst [vmem:[#allocation3 + $0x6f8] sm:$0xff] %v517_v31  ;;  %v521_v33 = vld [vmem:[%s14639_s4 + $0x708] sm:$0xff]  ;;  %v523_v34 = vld [vmem:[%s14639_s4 + $0x710] sm:$0xff] }
  0x72   :  { %520 = vst [vmem:[#allocation3 + $0x700] sm:$0xff] %v519_v32  ;;  %522 = vst [vmem:[#allocation3 + $0x708] sm:$0xff] %v521_v33  ;;  %v525_v35 = vld [vmem:[%s14639_s4 + $0x718] sm:$0xff]  ;;  %v527_v36 = vld [vmem:[%s14639_s4 + $0x720] sm:$0xff] }
  0x73   :  { %524 = vst [vmem:[#allocation3 + $0x710] sm:$0xff] %v523_v34  ;;  %v529_v37 = vld [vmem:[%s14639_s4 + $0x728] sm:$0xff]  ;;  %526 = vst [vmem:[#allocation3 + $0x718] sm:$0xff] %v525_v35  ;;  %v531_v38 = vld [vmem:[%s14639_s4 + $0x730] sm:$0xff] }
  0x74   :  { %528 = vst [vmem:[#allocation3 + $0x720] sm:$0xff] %v527_v36  ;;  %530 = vst [vmem:[#allocation3 + $0x728] sm:$0xff] %v529_v37  ;;  %v533_v39 = vld [vmem:[%s14639_s4 + $0x738] sm:$0xff]  ;;  %v535_v40 = vld [vmem:[%s14639_s4 + $0x740] sm:$0xff] }
  0x75   :  { %532 = vst [vmem:[#allocation3 + $0x730] sm:$0xff] %v531_v38  ;;  %534 = vst [vmem:[#allocation3 + $0x738] sm:$0xff] %v533_v39  ;;  %v537_v41 = vld [vmem:[%s14639_s4 + $0x748] sm:$0xff]  ;;  %v539_v42 = vld [vmem:[%s14639_s4 + $0x750] sm:$0xff] }
  0x76   :  { %536 = vst [vmem:[#allocation3 + $0x740] sm:$0xff] %v535_v40  ;;  %v541_v43 = vld [vmem:[%s14639_s4 + $0x758] sm:$0xff]  ;;  %538 = vst [vmem:[#allocation3 + $0x748] sm:$0xff] %v537_v41  ;;  %v543_v44 = vld [vmem:[%s14639_s4 + $0x760] sm:$0xff] }
  0x77   :  { %540 = vst [vmem:[#allocation3 + $0x750] sm:$0xff] %v539_v42  ;;  %542 = vst [vmem:[#allocation3 + $0x758] sm:$0xff] %v541_v43  ;;  %v545_v45 = vld [vmem:[%s14639_s4 + $0x768] sm:$0xff]  ;;  %v547_v46 = vld [vmem:[%s14639_s4 + $0x770] sm:$0xff] }
  0x78   :  { %544 = vst [vmem:[#allocation3 + $0x760] sm:$0xff] %v543_v44  ;;  %546 = vst [vmem:[#allocation3 + $0x768] sm:$0xff] %v545_v45  ;;  %v549_v47 = vld [vmem:[%s14639_s4 + $0x778] sm:$0xff]  ;;  %v551_v48 = vld [vmem:[%s14639_s4 + $0x780] sm:$0xff] }
  0x79   :  { %548 = vst [vmem:[#allocation3 + $0x770] sm:$0xff] %v547_v46  ;;  %v553_v49 = vld [vmem:[%s14639_s4 + $0x788] sm:$0xff]  ;;  %550 = vst [vmem:[#allocation3 + $0x778] sm:$0xff] %v549_v47  ;;  %v555_v50 = vld [vmem:[%s14639_s4 + $0x790] sm:$0xff] }
  0x7a   :  { %552 = vst [vmem:[#allocation3 + $0x780] sm:$0xff] %v551_v48  ;;  %554 = vst [vmem:[#allocation3 + $0x788] sm:$0xff] %v553_v49  ;;  %v557_v51 = vld [vmem:[%s14639_s4 + $0x798] sm:$0xff]  ;;  %v559_v52 = vld [vmem:[%s14639_s4 + $0x7a0] sm:$0xff] }
  0x7b   :  { %556 = vst [vmem:[#allocation3 + $0x790] sm:$0xff] %v555_v50  ;;  %558 = vst [vmem:[#allocation3 + $0x798] sm:$0xff] %v557_v51  ;;  %v561_v53 = vld [vmem:[%s14639_s4 + $0x7a8] sm:$0xff]  ;;  %v563_v54 = vld [vmem:[%s14639_s4 + $0x7b0] sm:$0xff] }
  0x7c   :  { %560 = vst [vmem:[#allocation3 + $0x7a0] sm:$0xff] %v559_v52  ;;  %v565_v55 = vld [vmem:[%s14639_s4 + $0x7b8] sm:$0xff]  ;;  %562 = vst [vmem:[#allocation3 + $0x7a8] sm:$0xff] %v561_v53  ;;  %v567_v56 = vld [vmem:[%s14639_s4 + $0x7c0] sm:$0xff] }
  0x7d   :  { %564 = vst [vmem:[#allocation3 + $0x7b0] sm:$0xff] %v563_v54  ;;  %566 = vst [vmem:[#allocation3 + $0x7b8] sm:$0xff] %v565_v55  ;;  %v569_v57 = vld [vmem:[%s14639_s4 + $0x7c8] sm:$0xff] }
  0x7e   :  { %568 = vst [vmem:[#allocation3 + $0x7c0] sm:$0xff] %v567_v56  ;;  %570 = vst [vmem:[#allocation3 + $0x7c8] sm:$0xff] %v569_v57 }
  0x7f   :  { %578 = vsyncadd [#allocation4], 32000  ;;  %v12046_v58 = vld [vmem:[%s14636_s1 + $0x38] sm:$0xff]   ;;  %v12047_v59 = vld [vmem:[%s14636_s1 + $0x30] sm:$0xff]   ;;  %vm932_vm0 = vcmask 261120   ;;  %vm1473_vm2 = vcmask 257024  }
  0x80   :  { %10994 = vmatprep.subr.bf16.mxu0 %v12046_v58  ;;  %v12048_v60 = vld [vmem:[%s14636_s1 + $0x28] sm:$0xff]   ;;  %v12049_v61 = vld [vmem:[%s14636_s1 + $0x20] sm:$0xff]   ;;  %v12050_v63 = vld [vmem:[%s14636_s1 + $0x18] sm:$0xff]  }
  0x81   :  { %10995 = vmatpush3.bf16.msra.mxu0 %v12046_v58  ;;  %v12054_v62 = vld [vmem:[%s14635_s0] sm:$0xff]   ;;  %v12051_v0 = vld [vmem:[%s14636_s1 + $0x10] sm:$0xff]   ;;  %v12052_v1 = vld [vmem:[%s14636_s1 + $0x8] sm:$0xff]  }
  0x82   :  { %10996 = vmatprep.subr.bf16.mxu0 %v12047_v59  ;;  %11010 = vmatprep.mubr.bf16.mxu0 %v12054_v62  ;;  %v12053_v2 = vld [vmem:[%s14636_s1] sm:$0xff]   ;;  %v12055_v3 = vld [vmem:[%s14635_s0 + $0x8] sm:$0xff]   ;;  %v12056_v4 = vld [vmem:[%s14635_s0 + $0x10] sm:$0xff]  }
  0x83   :  { %v12057_v5 = vld [vmem:[%s14635_s0 + $0x18] sm:$0xff]   ;;  %v12058_v6 = vld [vmem:[%s14635_s0 + $0x20] sm:$0xff]   ;;  %v12059_v7 = vld [vmem:[%s14635_s0 + $0x28] sm:$0xff]  }
  0x84   :  { %v12060_v8 = vld [vmem:[%s14635_s0 + $0x30] sm:$0xff]   ;;  %v12061_v9 = vld [vmem:[%s14635_s0 + $0x38] sm:$0xff]   ;;  %v12062_v10 = vld [vmem:[%s14635_s0 + $0x40] sm:$0xff]  }
  0x85   :  { %10997 = vmatpush3.bf16.msra.mxu0 %v12047_v59  ;;  %v12063_v11 = vld [vmem:[%s14635_s0 + $0x48] sm:$0xff]   ;;  %v12064_v12 = vld [vmem:[%s14635_s0 + $0x50] sm:$0xff]   ;;  %v12065_v13 = vld [vmem:[%s14635_s0 + $0x58] sm:$0xff]  }
  0x86   :  { %10998 = vmatprep.subr.bf16.mxu0 %v12048_v60  ;;  %v12066_v14 = vld [vmem:[%s14635_s0 + $0x60] sm:$0xff]   ;;  %v12067_v15 = vld [vmem:[%s14635_s0 + $0x68] sm:$0xff]   ;;  %v12068_v16 = vld [vmem:[%s14635_s0 + $0x70] sm:$0xff]  }
  0x87   :  { %v12069_v17 = vld [vmem:[%s14635_s0 + $0x78] sm:$0xff]  }
  0x89   :  { %10999 = vmatpush3.bf16.msra.mxu0 %v12048_v60 }
  0x8a   :  { %11000 = vmatprep.subr.bf16.mxu0 %v12049_v61 }
  0x8d   :  { %11001 = vmatpush3.bf16.msra.mxu0 %v12049_v61 }
  0x8e   :  { %11002 = vmatprep.subr.bf16.mxu0 %v12050_v63 }
  0x91   :  { %11003 = vmatpush3.bf16.msra.mxu0 %v12050_v63 }
  0x92   :  { %11004 = vmatprep.subr.bf16.mxu0 %v12051_v0 }
  0x95   :  { %11005 = vmatpush3.bf16.msra.mxu0 %v12051_v0 }
  0x96   :  { %11006 = vmatprep.subr.bf16.mxu0 %v12052_v1 }
  0x99   :  { %11007 = vmatpush3.bf16.msra.mxu0 %v12052_v1 }
  0x9a   :  { %11008 = vmatprep.subr.bf16.mxu0 %v12053_v2 }
  0x9d   :  { %11009 = vmatpush3.bf16.msra.mxu0 %v12053_v2 }
  0xa0   :  { %11011 = vmatmul.mubr.bf16.vlgmr.msra.gmra.mxu0 %v12055_v3 }
  0xa1   :  { %11014 = vmatprep.mubr.bf16.mxu0 %v12056_v4 }
  0xa8   :  { %11015 = vmatmul.mubr.bf16.gmra.mxu0 %v12057_v5 }
  0xa9   :  { %11018 = vmatprep.mubr.bf16.mxu0 %v12058_v6 }
  0xb0   :  { %11019 = vmatmul.mubr.bf16.gmra.mxu0 %v12059_v7 }
  0xb1   :  { %11022 = vmatprep.mubr.bf16.mxu0 %v12060_v8 }
  0xb8   :  { %11023 = vmatmul.mubr.bf16.gmra.mxu0 %v12061_v9 }
  0xb9   :  { %11026 = vmatprep.mubr.bf16.mxu0 %v12062_v10 }
  0xc0   :  { %11027 = vmatmul.mubr.bf16.gmra.mxu0 %v12063_v11 }
  0xc1   :  { %11030 = vmatprep.mubr.bf16.mxu0 %v12064_v12 }
  0xc8   :  { %11031 = vmatmul.mubr.bf16.gmra.mxu0 %v12065_v13 }
  0xc9   :  { %11034 = vmatprep.mubr.bf16.mxu0 %v12066_v14 }
  0xd0   :  { %11035 = vmatmul.mubr.bf16.gmra.mxu0 %v12067_v15 }
  0xd1   :  { %11038 = vmatprep.mubr.bf16.mxu0 %v12068_v16 }
  0xd8   :  { %11039 = vmatmul.mubr.bf16.gmra.mxu0 %v12069_v17 }
 0x160   :  { %v13359_v18 = vpop.f32.mrf.mxu0 }
 0x161   :  { %v936_v26 = vsel %vm932_vm0, %v13359_v18, 0.0 }
 0x162   :  { %v13361_v19 = vpop.f32.mrf.mxu0 }
 0x163   :  { %v933_v22 = vsel %vm932_vm0, %v13361_v19, 0.0 }
 0x164   :  { %v13363_v20 = vpop.f32.mrf.mxu0 }
 0x165   :  { %v938_v29 = vsel %vm932_vm0, %v13363_v20, 0.0 }
 0x166   :  { %v13365_v21 = vpop.f32.mrf.mxu0 }
 0x167   :  { %v934_v23 = vsel %vm932_vm0, %v13365_v21, 0.0 }
 0x168   :  { %v935_v24 = vadd.f32 %v934_v23, %v933_v22  ;;  %v13371_v25 = vpop.f32.mrf.mxu0 }
 0x169   :  { %v944_v38 = vsel %vm932_vm0, %v13371_v25, 0.0 }
 0x16a   :  { %v937_v27 = vadd.f32 %v936_v26, %v935_v24  ;;  %v13375_v28 = vpop.f32.mrf.mxu0 }
 0x16b   :  { %v940_v32 = vsel %vm932_vm0, %v13375_v28, 0.0 }
 0x16c   :  { %v939_v30 = vadd.f32 %v938_v29, %v937_v27  ;;  %v13379_v31 = vpop.f32.mrf.mxu0 }
 0x16d   :  { %v946_v41 = vsel %vm932_vm0, %v13379_v31, 0.0 }
 0x16e   :  { %v941_v33 = vadd.f32 %v940_v32, %v939_v30  ;;  %v13383_v34 = vpop.f32.mrf.mxu0 }
 0x16f   :  { %v942_v35 = vsel %vm932_vm0, %v13383_v34, 0.0 }
 0x170   :  { %v943_v36 = vadd.f32 %v942_v35, %v941_v33  ;;  %v13387_v37 = vpop.f32.mrf.mxu0 }
 0x171   :  { %v952_v50 = vsel %vm932_vm0, %v13387_v37, 0.0 }
 0x172   :  { %v945_v39 = vadd.f32 %v944_v38, %v943_v36  ;;  %v13391_v40 = vpop.f32.mrf.mxu0 }
 0x173   :  { %v948_v44 = vsel %vm932_vm0, %v13391_v40, 0.0 }
 0x174   :  { %v947_v42 = vadd.f32 %v946_v41, %v945_v39  ;;  %v13395_v43 = vpop.f32.mrf.mxu0 }
 0x175   :  { %v954_v53 = vsel %vm932_vm0, %v13395_v43, 0.0 }
 0x176   :  { %v949_v45 = vadd.f32 %v948_v44, %v947_v42  ;;  %v13399_v46 = vpop.f32.mrf.mxu0 }
 0x177   :  { %v950_v47 = vsel %vm932_vm0, %v13399_v46, 0.0 }
 0x178   :  { %v951_v48 = vadd.f32 %v950_v47, %v949_v45  ;;  %v13403_v49 = vpop.f32.mrf.mxu0 }
 0x179   :  { %v960_v62 = vsel %vm932_vm0, %v13403_v49, 0.0 }
 0x17a   :  { %v953_v51 = vadd.f32 %v952_v50, %v951_v48  ;;  %v13407_v52 = vpop.f32.mrf.mxu0 }
 0x17b   :  { %v956_v56 = vsel %vm932_vm0, %v13407_v52, 0.0 }
 0x17c   :  { %v955_v54 = vadd.f32 %v954_v53, %v953_v51  ;;  %v13411_v55 = vpop.f32.mrf.mxu0 }
 0x17d   :  { %v962_v1 = vsel %vm932_vm0, %v13411_v55, 0.0 }
 0x17e   :  { %v957_v57 = vadd.f32 %v956_v56, %v955_v54  ;;  %v13415_v58 = vpop.f32.mrf.mxu0 }
 0x17f   :  { %v958_v59 = vsel %vm932_vm0, %v13415_v58, 0.0 }
 0x180   :  { %v959_v60 = vadd.f32 %v958_v59, %v957_v57  ;;  %v13419_v61 = vpop.f32.mrf.mxu0 }
 0x181   :  { %v968_v10 = vsel %vm932_vm0, %v13419_v61, 0.0 }
 0x182   :  { %v961_v63 = vadd.f32 %v960_v62, %v959_v60  ;;  %v13423_v0 = vpop.f32.mrf.mxu0 }
 0x183   :  { %v964_v4 = vsel %vm932_vm0, %v13423_v0, 0.0 }
 0x184   :  { %v963_v2 = vadd.f32 %v962_v1, %v961_v63  ;;  %v13427_v3 = vpop.f32.mrf.mxu0 }
 0x185   :  { %v970_v13 = vsel %vm932_vm0, %v13427_v3, 0.0 }
 0x186   :  { %v965_v5 = vadd.f32 %v964_v4, %v963_v2  ;;  %v13431_v6 = vpop.f32.mrf.mxu0 }
 0x187   :  { %v966_v7 = vsel %vm932_vm0, %v13431_v6, 0.0 }
 0x188   :  { %v967_v8 = vadd.f32 %v966_v7, %v965_v5  ;;  %v13435_v9 = vpop.f32.mrf.mxu0 }
 0x189   :  { %v976_v27 = vsel %vm932_vm0, %v13435_v9, 0.0 }
 0x18a   :  { %v969_v11 = vadd.f32 %v968_v10, %v967_v8  ;;  %v13439_v12 = vpop.f32.mrf.mxu0 }
 0x18b   :  { %v972_v16 = vsel %vm932_vm0, %v13439_v12, 0.0 }
 0x18c   :  { %v971_v14 = vadd.f32 %v970_v13, %v969_v11  ;;  %v13443_v15 = vpop.f32.mrf.mxu0 }
 0x18d   :  { %v978_v32 = vsel %vm932_vm0, %v13443_v15, 0.0 }
 0x18e   :  { %v973_v17 = vadd.f32 %v972_v16, %v971_v14  ;;  %v13447_v22 = vpop.f32.mrf.mxu0 }
 0x18f   :  { %v974_v23 = vsel %vm932_vm0, %v13447_v22, 0.0 }
 0x190   :  { %v975_v24 = vadd.f32 %v974_v23, %v973_v17  ;;  %v13451_v26 = vpop.f32.mrf.mxu0 }
 0x191   :  { %v984_v45 = vsel %vm932_vm0, %v13451_v26, 0.0 }
 0x192   :  { %v977_v29 = vadd.f32 %v976_v27, %v975_v24  ;;  %v13455_v30 = vpop.f32.mrf.mxu0 }
 0x193   :  { %v980_v36 = vsel %vm932_vm0, %v13455_v30, 0.0 }
 0x194   :  { %v979_v33 = vadd.f32 %v978_v32, %v977_v29  ;;  %v13459_v35 = vpop.f32.mrf.mxu0 }
 0x195   :  { %v986_v50 = vsel %vm932_vm0, %v13459_v35, 0.0 }
 0x196   :  { %v981_v38 = vadd.f32 %v980_v36, %v979_v33  ;;  %v13463_v39 = vpop.f32.mrf.mxu0 }
 0x197   :  { %v982_v41 = vsel %vm932_vm0, %v13463_v39, 0.0 }
 0x198   :  { %v983_v42 = vadd.f32 %v982_v41, %v981_v38  ;;  %v13467_v44 = vpop.f32.mrf.mxu0 }
 0x199   :  { %v992_v62 = vsel %vm932_vm0, %v13467_v44, 0.0 }
 0x19a   :  { %v985_v47 = vadd.f32 %v984_v45, %v983_v42  ;;  %v13471_v48 = vpop.f32.mrf.mxu0 }
 0x19b   :  { %v988_v54 = vsel %vm932_vm0, %v13471_v48, 0.0 }
 0x19c   :  { %v987_v51 = vadd.f32 %v986_v50, %v985_v47  ;;  %v13475_v53 = vpop.f32.mrf.mxu0 }
 0x19d   :  { %v994_v1 = vsel %vm932_vm0, %v13475_v53, 0.0 }
 0x19e   :  { %v989_v56 = vadd.f32 %v988_v54, %v987_v51  ;;  %v13479_v57 = vpop.f32.mrf.mxu0 }
 0x19f   :  { %v990_v59 = vsel %vm932_vm0, %v13479_v57, 0.0 }
 0x1a0   :  { %v991_v60 = vadd.f32 %v990_v59, %v989_v56 }
 0x1a2   :  { %v993_v63 = vadd.f32 %v992_v62, %v991_v60 }
 0x1a4   :  { %v995_v2 = vadd.f32 %v994_v1, %v993_v63 }
 0x1a6   :  { %v996_v4 = vrot.slane %v995_v2, 4 }
 0x1a8   :  { %v997_v5 = vadd.f32 %v996_v4, %v995_v2 }
 0x1aa   :  { %v998_v7 = vrot.slane %v997_v5, 2 }
 0x1ac   :  { %v999_v8 = vadd.f32 %v998_v7, %v997_v5 }
 0x1ae   :  { %v1000_v10 = vrot.slane %v999_v8, 1 }
 0x1b0   :  { %v1001_v11 = vadd.f32 %v1000_v10, %v999_v8 }
 0x1b2   :  { %v13487_v13 = vmul.f32 0.004, %v1001_v11 }
 0x1b4   :  { %v13491_v14 = vsub.f32 %v13361_v19, %v13487_v13  ;;  %v13495_v16 = vsub.f32 %v13365_v21, %v13487_v13  ;;  %v13499_v17 = vsub.f32 %v13359_v18, %v13487_v13  ;;  %v13503_v23 = vsub.f32 %v13363_v20, %v13487_v13 }
 0x1b5   :  { %v13511_v19 = vsub.f32 %v13375_v28, %v13487_v13  ;;  %v13517_v18 = vsub.f32 %v13383_v34, %v13487_v13  ;;  %v13525_v36 = vsub.f32 %v13371_v25, %v13487_v13  ;;  %v13532_v34 = vsub.f32 %v13379_v31, %v13487_v13 }
 0x1b6   :  { %v1132_v24 = vmul.f32 %v13491_v14, %v13491_v14  ;;  %v1133_v27 = vmul.f32 %v13495_v16, %v13495_v16  ;;  %v1134_v21 = vmul.f32 %v13499_v17, %v13499_v17  ;;  %v1135_v20 = vmul.f32 %v13503_v23, %v13503_v23 }
 0x1b7   :  { %v1136_v28 = vmul.f32 %v13511_v19, %v13511_v19  ;;  %v1137_v42 = vmul.f32 %v13517_v18, %v13517_v18  ;;  %v13539_v25 = vsub.f32 %v13391_v40, %v13487_v13  ;;  %v1138_v50 = vmul.f32 %v13525_v36, %v13525_v36 }
 0x1b8   :  { %v1164_v29 = vsel %vm932_vm0, %v1132_v24, 0.0  ;;  %v1165_v32 = vsel %vm932_vm0, %v1133_v27, 0.0  ;;  %v1167_v38 = vsel %vm932_vm0, %v1134_v21, 0.0  ;;  %v1169_v45 = vsel %vm932_vm0, %v1135_v20, 0.0 }
 0x1b9   :  { %v1166_v33 = vadd.f32 %v1165_v32, %v1164_v29  ;;  %v1171_v51 = vsel %vm932_vm0, %v1136_v28, 0.0  ;;  %v13546_v31 = vsub.f32 %v13399_v46, %v13487_v13  ;;  %v1139_v56 = vmul.f32 %v13532_v34, %v13532_v34 }
 0x1ba   :  { %v1173_v59 = vsel %vm932_vm0, %v1137_v42, 0.0  ;;  %v13553_v40 = vsub.f32 %v13387_v37, %v13487_v13  ;;  %v1140_v62 = vmul.f32 %v13539_v25, %v13539_v25  ;;  %v1175_v63 = vsel %vm932_vm0, %v1138_v50, 0.0 }
 0x1bb   :  { %v1168_v41 = vadd.f32 %v1167_v38, %v1166_v33  ;;  %v13560_v46 = vsub.f32 %v13395_v43, %v13487_v13  ;;  %v1141_v2 = vmul.f32 %v13546_v31, %v13546_v31  ;;  %v1177_v4 = vsel %vm932_vm0, %v1139_v56, 0.0 }
 0x1bc   :  { %v13567_v37 = vsub.f32 %v13407_v52, %v13487_v13  ;;  %v1142_v7 = vmul.f32 %v13553_v40, %v13553_v40  ;;  %v1179_v8 = vsel %vm932_vm0, %v1140_v62, 0.0  ;;  %v13574_v43 = vsub.f32 %v13415_v58, %v13487_v13 }
 0x1bd   :  { %v1170_v47 = vadd.f32 %v1169_v45, %v1168_v41  ;;  %v1143_v11 = vmul.f32 %v13560_v46, %v13560_v46  ;;  %v1181_v24 = vsel %vm932_vm0, %v1141_v2, 0.0  ;;  %v13581_v52 = vsub.f32 %v13403_v49, %v13487_v13 }
 0x1be   :  { %v1144_v21 = vmul.f32 %v13567_v37, %v13567_v37  ;;  %v1183_v20 = vsel %vm932_vm0, %v1142_v7, 0.0  ;;  %v13588_v58 = vsub.f32 %v13411_v55, %v13487_v13  ;;  %v1145_v32 = vmul.f32 %v13574_v43, %v13574_v43 }
 0x1bf   :  { %v1172_v54 = vadd.f32 %v1171_v51, %v1170_v47  ;;  %v1185_v33 = vsel %vm932_vm0, %v1143_v11, 0.0  ;;  %v13595_v49 = vsub.f32 %v13423_v0, %v13487_v13  ;;  %v1146_v38 = vmul.f32 %v13581_v52, %v13581_v52 }
 0x1c0   :  { %v1187_v41 = vsel %vm932_vm0, %v1144_v21, 0.0  ;;  %v13602_v55 = vsub.f32 %v13431_v6, %v13487_v13  ;;  %v1147_v45 = vmul.f32 %v13588_v58, %v13588_v58  ;;  %v1189_v47 = vsel %vm932_vm0, %v1145_v32, 0.0 }
 0x1c1   :  { %v1174_v60 = vadd.f32 %v1173_v59, %v1172_v54  ;;  %v13609_v0 = vsub.f32 %v13419_v61, %v13487_v13  ;;  %v1148_v51 = vmul.f32 %v13595_v49, %v13595_v49  ;;  %v1191_v54 = vsel %vm932_vm0, %v1146_v38, 0.0 }
 0x1c2   :  { %v13616_v6 = vsub.f32 %v13427_v3, %v13487_v13  ;;  %v1149_v59 = vmul.f32 %v13602_v55, %v13602_v55  ;;  %v13623_v61 = vsub.f32 %v13439_v12, %v13487_v13  ;;  %v13630_v3 = vsub.f32 %v13447_v22, %v13487_v13 }
 0x1c3   :  { %v1176_v1 = vadd.f32 %v1175_v63, %v1174_v60  ;;  %v1193_v60 = vsel %vm932_vm0, %v1147_v45, 0.0  ;;  %v1150_v63 = vmul.f32 %v13609_v0, %v13609_v0  ;;  %v13637_v12 = vsub.f32 %v13435_v9, %v13487_v13 }
 0x1c4   :  { %v13644_v22 = vsub.f32 %v13443_v15, %v13487_v13  ;;  %v13651_v9 = vsub.f32 %v13455_v30, %v13487_v13  ;;  %v13658_v15 = vsub.f32 %v13463_v39, %v13487_v13  ;;  %v13665_v30 = vsub.f32 %v13451_v26, %v13487_v13 }
 0x1c5   :  { %v1178_v5 = vadd.f32 %v1177_v4, %v1176_v1  ;;  %v1195_v1 = vsel %vm932_vm0, %v1148_v51, 0.0  ;;  %v1151_v4 = vmul.f32 %v13616_v6, %v13616_v6  ;;  %v13674_v39 = vsub.f32 %v13459_v35, %v13487_v13 }
 0x1c6   :  { %v1156_v45 = vmul.f32 %v13651_v9, %v13651_v9  ;;  %v1157_v51 = vmul.f32 %v13658_v15, %v13658_v15  ;;  %v13681_v26 = vsub.f32 %v13471_v48, %v13487_v13  ;;  %v13689_v35 = vsub.f32 %v13479_v57, %v13487_v13 }
 0x1c7   :  { %v1180_v10 = vadd.f32 %v1179_v8, %v1178_v5  ;;  %v1197_v5 = vsel %vm932_vm0, %v1149_v59, 0.0  ;;  %v1152_v8 = vmul.f32 %v13623_v61, %v13623_v61  ;;  %v1034_v48 = vsub.f32 %v13475_v53, %v13487_v13 }
 0x1c9   :  { %v1182_v27 = vadd.f32 %v1181_v24, %v1180_v10  ;;  %v1199_v10 = vsel %vm932_vm0, %v1150_v63, 0.0  ;;  %v1153_v24 = vmul.f32 %v13630_v3, %v13630_v3  ;;  %v1203_v32 = vsel %vm932_vm0, %v1152_v8, 0.0 }
 0x1cb   :  { %v1184_v29 = vadd.f32 %v1183_v20, %v1182_v27  ;;  %v1201_v27 = vsel %vm932_vm0, %v1151_v4, 0.0  ;;  %v1035_v20 = vlaneseq  ;;  %v1205_v38 = vsel %vm932_vm0, %v1153_v24, 0.0 }
 0x1cd   :  { %v1186_v28 = vadd.f32 %v1185_v33, %v1184_v29  ;;  %v1154_v29 = vmul.f32 %v13637_v12, %v13637_v12 }
 0x1cf   :  { %v1188_v42 = vadd.f32 %v1187_v41, %v1186_v28  ;;  %v1155_v28 = vmul.f32 %v13644_v22, %v13644_v22 }
 0x1d1   :  { %v1190_v50 = vadd.f32 %v1189_v47, %v1188_v42  ;;  %v13667_v42 = vshrl.u32 %v1035_v20, 7  ;;  %v1207_v47 = vsel %vm932_vm0, %v1154_v29, 0.0 }
 0x1d3   :  { %v1192_v56 = vadd.f32 %v1191_v54, %v1190_v50  ;;  %v1209_v54 = vsel %vm932_vm0, %v1155_v28, 0.0  ;;  %v1067_v59 = vadd.s32 248, %v13667_v42 }
 0x1d5   :  { %v1194_v62 = vadd.f32 %v1193_v60, %v1192_v56  ;;  %v1158_v60 = vmul.f32 %v13665_v30, %v13665_v30  ;;  %vm1099_vm1 = vcmp.lt.s32.totalorder %v1067_v59, 250 }
 0x1d6   :  { %v1131_v24 = vsel %vm1099_vm1, %v1034_v48, 0.0 }
 0x1d7   :  { %v1196_v2 = vadd.f32 %v1195_v1, %v1194_v62  ;;  %v1211_v62 = vsel %vm932_vm0, %v1156_v45, 0.0  ;;  %v1159_v1 = vmul.f32 %v13674_v39, %v13674_v39  ;;  %v1215_v57 = vsel %vm932_vm0, %v1158_v60, 0.0  ;;  %v1236_v60 = vld [vmem:[%s14637_s2] sm:$0x1] }
 0x1d9   :  { %v1198_v7 = vadd.f32 %v1197_v5, %v1196_v2  ;;  %v1213_v2 = vsel %vm932_vm0, %v1157_v51, 0.0  ;;  %v13698_v5 = vsub.f32 %v13467_v44, %v13487_v13 }
 0x1db   :  { %v1200_v11 = vadd.f32 %v1199_v10, %v1198_v7  ;;  %v1160_v7 = vmul.f32 %v13681_v26, %v13681_v26  ;;  %v1161_v10 = vmul.f32 %v13689_v35, %v13689_v35  ;;  %v1162_v53 = vmul.f32 %v13698_v5, %v13698_v5 }
 0x1dd   :  { %v1202_v21 = vadd.f32 %v1201_v27, %v1200_v11  ;;  %v1217_v11 = vsel %vm932_vm0, %v1159_v1, 0.0  ;;  %v1219_v44 = vsel %vm932_vm0, %v1160_v7, 0.0  ;;  %v1221_v20 = vsel %vm932_vm0, %v1161_v10, 0.0 }
 0x1df   :  { %v1204_v33 = vadd.f32 %v1203_v32, %v1202_v21  ;;  %v1163_v21 = vmul.f32 %v1131_v24, %v1131_v24  ;;  %v1223_v32 = vsel %vm932_vm0, %v1162_v53, 0.0 }
 0x1e1   :  { %v1206_v41 = vadd.f32 %v1205_v38, %v1204_v33  ;;  %v1225_v28 = vsel %vm932_vm0, %v1163_v21, 0.0 }
 0x1e3   :  { %v1208_v50 = vadd.f32 %v1207_v47, %v1206_v41 }
 0x1e5   :  { %v1210_v56 = vadd.f32 %v1209_v54, %v1208_v50 }
 0x1e7   :  { %v1212_v63 = vadd.f32 %v1211_v62, %v1210_v56  ;;  %v13716_v62 = vsub.s32 0, %v13667_v42 }
 0x1e9   :  { %v1214_v4 = vadd.f32 %v1213_v2, %v1212_v63 }
 0x1eb   :  { %v1216_v8 = vadd.f32 %v1215_v57, %v1214_v4 }
 0x1ed   :  { %v1218_v27 = vadd.f32 %v1217_v11, %v1216_v8 }
 0x1ef   :  { %v1220_v13 = vadd.f32 %v1219_v44, %v1218_v27 }
 0x1f1   :  { %v1222_v29 = vadd.f32 %v1221_v20, %v1220_v13 }
 0x1f3   :  { %v1224_v33 = vadd.f32 %v1223_v32, %v1222_v29 }
 0x1f5   :  { %v1226_v38 = vadd.f32 %v1225_v28, %v1224_v33 }
 0x1f7   :  { %v1227_v41 = vrot.slane %v1226_v38, 4 }
 0x1f9   :  { %v1228_v45 = vadd.f32 %v1227_v41, %v1226_v38 }
 0x1fb   :  { %v1229_v47 = vrot.slane %v1228_v45, 2 }
 0x1fd   :  { %v1230_v50 = vadd.f32 %v1229_v47, %v1228_v45 }
 0x1ff   :  { %v1231_v51 = vrot.slane %v1230_v50, 1 }
 0x201   :  { %v1232_v54 = vadd.f32 %v1231_v51, %v1230_v50 }
 0x203   :  { %v1233_v56 = vmul.f32 0.004, %v1232_v54 }
 0x205   :  { %v1234_v59 = vadd.f32 1e-05, %v1233_v56 }
 0x207   :  { %12070 = vrsqrt.f32 %v1234_v59 }
 0x214   :  { %v12071_v63 = vpop.eup %12070 }
 0x215   :  { %v1237_v1 = vmul.f32 %v12071_v63, %v1236_v60 }
 0x217   :  { %v1241_v2 = vrot.slane %v1237_v1, %v13716_v62 }
 0x219   :  { %v1242_v48 = vmul.f32 %v1241_v2, %v13491_v14  ;;  %v1243_v4 = vmul.f32 %v1241_v2, %v13495_v16  ;;  %v1244_v7 = vmul.f32 %v1241_v2, %v13499_v17  ;;  %v1245_v57 = vmul.f32 %v1241_v2, %v13503_v23 }
 0x21a   :  { %v1246_v8 = vmul.f32 %v1241_v2, %v13511_v19  ;;  %v1247_v10 = vmul.f32 %v1241_v2, %v13517_v18  ;;  %v1248_v11 = vmul.f32 %v1241_v2, %v13525_v36  ;;  %v1249_v27 = vmul.f32 %v1241_v2, %v13532_v34 }
 0x21b   :  { %v1250_v53 = vmul.f32 %v1241_v2, %v13539_v25  ;;  %v1251_v44 = vmul.f32 %v1241_v2, %v13546_v31  ;;  %v1252_v14 = vmul.f32 %v1241_v2, %v13553_v40  ;;  %v1253_v16 = vmul.f32 %v1241_v2, %v13560_v46 }
 0x21c   :  { %v1254_v17 = vmul.f32 %v1241_v2, %v13567_v37  ;;  %v1255_v23 = vmul.f32 %v1241_v2, %v13574_v43  ;;  %v1256_v19 = vmul.f32 %v1241_v2, %v13581_v52  ;;  %v1257_v18 = vmul.f32 %v1241_v2, %v13588_v58  ;;  %v10012_v52 = vld [vmem:[%s14638_s3] ss:$0 sm:$0xff] }
 0x21d   :  { %v1258_v36 = vmul.f32 %v1241_v2, %v13595_v49  ;;  %v1259_v34 = vmul.f32 %v1241_v2, %v13602_v55  ;;  %v1260_v25 = vmul.f32 %v1241_v2, %v13609_v0  ;;  %v1261_v31 = vmul.f32 %v1241_v2, %v13616_v6 }
 0x21e   :  { %v1262_v40 = vmul.f32 %v1241_v2, %v13623_v61  ;;  %v1263_v46 = vmul.f32 %v1241_v2, %v13630_v3  ;;  %v1264_v37 = vmul.f32 %v1241_v2, %v13637_v12  ;;  %v1265_v43 = vmul.f32 %v1241_v2, %v13644_v22 }
 0x21f   :  { %v1266_v58 = vmul.f32 %v1241_v2, %v13651_v9  ;;  %v1267_v49 = vmul.f32 %v1241_v2, %v13658_v15  ;;  %v1268_v55 = vmul.f32 %v1241_v2, %v13665_v30  ;;  %v1269_v0 = vmul.f32 %v1241_v2, %v13674_v39 }
 0x220   :  { %v1270_v6 = vmul.f32 %v1241_v2, %v13681_v26  ;;  %v1271_v61 = vmul.f32 %v1241_v2, %v13689_v35  ;;  %v1272_v3 = vmul.f32 %v1241_v2, %v13698_v5  ;;  %v1273_v12 = vmul.f32 %v1241_v2, %v1131_v24 }
 0x221   :  { %v13753_v22 = vadd.f32 %v10012_v52, %v1242_v48  ;;  %v13755_v13 = vadd.f32 %v10012_v52, %v1243_v4  ;;  %v13757_v21 = vadd.f32 %v10012_v52, %v1244_v7  ;;  %v13759_v9 = vadd.f32 %v10012_v52, %v1245_v57 }
 0x222   :  { %v13761_v15 = vadd.f32 %v10012_v52, %v1246_v8  ;;  %v13763_v30 = vadd.f32 %v10012_v52, %v1247_v10  ;;  %v13765_v39 = vadd.f32 %v10012_v52, %v1248_v11  ;;  %v13767_v26 = vadd.f32 %v10012_v52, %v1249_v27 }
 0x223   :  { %v13769_v35 = vadd.f32 %v10012_v52, %v1250_v53  ;;  %v13771_v5 = vadd.f32 %v10012_v52, %v1251_v44  ;;  %v13773_v24 = vadd.f32 %v10012_v52, %v1252_v14  ;;  %v13775_v20 = vadd.f32 %v10012_v52, %v1253_v16 }
 0x224   :  { %v13777_v29 = vadd.f32 %v10012_v52, %v1254_v17  ;;  %v13779_v32 = vadd.f32 %v10012_v52, %v1255_v23  ;;  %v13781_v33 = vadd.f32 %v10012_v52, %v1256_v19  ;;  %v13783_v28 = vadd.f32 %v10012_v52, %v1257_v18 }
 0x225   :  { %v13785_v38 = vadd.f32 %v10012_v52, %v1258_v36  ;;  %v13787_v41 = vadd.f32 %v10012_v52, %v1259_v34  ;;  %v13789_v45 = vadd.f32 %v10012_v52, %v1260_v25  ;;  %v13791_v47 = vadd.f32 %v10012_v52, %v1261_v31 }
 0x226   :  { %v13793_v50 = vadd.f32 %v10012_v52, %v1262_v40  ;;  %v13795_v51 = vadd.f32 %v10012_v52, %v1263_v46  ;;  %v13797_v54 = vadd.f32 %v10012_v52, %v1264_v37  ;;  %v13799_v56 = vadd.f32 %v10012_v52, %v1265_v43 }
 0x227   :  { %v13801_v59 = vadd.f32 %v10012_v52, %v1266_v58  ;;  %v13803_v60 = vadd.f32 %v10012_v52, %v1267_v49  ;;  %v13805_v63 = vadd.f32 %v10012_v52, %v1268_v55  ;;  %v13807_v1 = vadd.f32 %v10012_v52, %v1269_v0 }
 0x228   :  { %v13809_v2 = vadd.f32 %v10012_v52, %v1270_v6  ;;  %v13811_v48 = vadd.f32 %v10012_v52, %v1271_v61  ;;  %v13813_v4 = vadd.f32 %v10012_v52, %v1272_v3  ;;  %v13815_v7 = vadd.f32 %v10012_v52, %v1273_v12 }
 0x229   :  { %v1313_v57 = vmax.f32 %v13753_v22, 0.0  ;;  %v1314_v8 = vmax.f32 %v13755_v13, 0.0  ;;  %v1315_v10 = vmax.f32 %v13757_v21, 0.0  ;;  %v1316_v11 = vmax.f32 %v13759_v9, 0.0 }
 0x22a   :  { %v1317_v27 = vmax.f32 %v13761_v15, 0.0  ;;  %v1318_v53 = vmax.f32 %v13763_v30, 0.0  ;;  %v1319_v44 = vmax.f32 %v13765_v39, 0.0  ;;  %v1320_v14 = vmax.f32 %v13767_v26, 0.0 }
 0x22b   :  { %v1321_v16 = vmax.f32 %v13769_v35, 0.0  ;;  %v1322_v17 = vmax.f32 %v13771_v5, 0.0  ;;  %v1323_v23 = vmax.f32 %v13773_v24, 0.0  ;;  %v1324_v19 = vmax.f32 %v13775_v20, 0.0 }
 0x22c   :  { %v1325_v18 = vmax.f32 %v13777_v29, 0.0  ;;  %v1326_v36 = vmax.f32 %v13779_v32, 0.0  ;;  %v1327_v34 = vmax.f32 %v13781_v33, 0.0  ;;  %v1328_v25 = vmax.f32 %v13783_v28, 0.0 }
 0x22d   :  { %v1329_v31 = vmax.f32 %v13785_v38, 0.0  ;;  %v1330_v40 = vmax.f32 %v13787_v41, 0.0  ;;  %v1331_v46 = vmax.f32 %v13789_v45, 0.0  ;;  %v1332_v37 = vmax.f32 %v13791_v47, 0.0 }
 0x22e   :  { %v1333_v43 = vmax.f32 %v13793_v50, 0.0  ;;  %v1334_v52 = vmax.f32 %v13795_v51, 0.0  ;;  %v1335_v58 = vmax.f32 %v13797_v54, 0.0  ;;  %v1336_v49 = vmax.f32 %v13799_v56, 0.0 }
 0x22f   :  { %v1337_v55 = vmax.f32 %v13801_v59, 0.0  ;;  %v1338_v0 = vmax.f32 %v13803_v60, 0.0  ;;  %v1339_v6 = vmax.f32 %v13805_v63, 0.0  ;;  %v1340_v61 = vmax.f32 %v13807_v1, 0.0 }
 0x230   :  { %v1341_v3 = vmax.f32 %v13809_v2, 0.0  ;;  %v1342_v12 = vmax.f32 %v13811_v48, 0.0  ;;  %v1343_v22 = vmax.f32 %v13813_v4, 0.0  ;;  %v1344_v13 = vmax.f32 %v13815_v7, 0.0 }
 0x231   :  { %v10541_v21 = vpack.c.bf16 %v1313_v57, %v1313_v57  ;;  %v10542_v9 = vpack.c.bf16 %v1314_v8, %v1314_v8  ;;  %v10543_v15 = vpack.c.bf16 %v1315_v10, %v1315_v10  ;;  %v10544_v30 = vpack.c.bf16 %v1316_v11, %v1316_v11 }
 0x232   :  { %v10545_v39 = vpack.c.bf16 %v1317_v27, %v1317_v27  ;;  %v10546_v26 = vpack.c.bf16 %v1318_v53, %v1318_v53  ;;  %v10547_v35 = vpack.c.bf16 %v1319_v44, %v1319_v44  ;;  %v10548_v5 = vpack.c.bf16 %v1320_v14, %v1320_v14 }
 0x233   :  { %v10549_v24 = vpack.c.bf16 %v1321_v16, %v1321_v16  ;;  %v10550_v20 = vpack.c.bf16 %v1322_v17, %v1322_v17  ;;  %v10551_v29 = vpack.c.bf16 %v1323_v23, %v1323_v23  ;;  %v10552_v32 = vpack.c.bf16 %v1324_v19, %v1324_v19  ;;  %1474 = vst.msk [vmem:[#allocation2] sm:$0xf] %vm1473_vm2, %v10541_v21 }
 0x234   :  { %1475 = vst.msk [vmem:[#allocation2 + $0x4] sm:$0xf] %vm1473_vm2, %v10542_v9  ;;  %1476 = vst.msk [vmem:[#allocation2 + $0x8] sm:$0xf] %vm1473_vm2, %v10543_v15  ;;  %v10553_v33 = vpack.c.bf16 %v1325_v18, %v1325_v18  ;;  %v10554_v28 = vpack.c.bf16 %v1326_v36, %v1326_v36  ;;  %v10555_v38 = vpack.c.bf16 %v1327_v34, %v1327_v34 }
 0x235   :  { %1477 = vst.msk [vmem:[#allocation2 + $0xc] sm:$0xf] %vm1473_vm2, %v10544_v30  ;;  %v10556_v41 = vpack.c.bf16 %v1328_v25, %v1328_v25  ;;  %1478 = vst.msk [vmem:[#allocation2 + $0x10] sm:$0xf] %vm1473_vm2, %v10545_v39  ;;  %v10557_v45 = vpack.c.bf16 %v1329_v31, %v1329_v31  ;;  %v10558_v47 = vpack.c.bf16 %v1330_v40, %v1330_v40 }
 0x236   :  { %1479 = vst.msk [vmem:[#allocation2 + $0x14] sm:$0xf] %vm1473_vm2, %v10546_v26  ;;  %1480 = vst.msk [vmem:[#allocation2 + $0x18] sm:$0xf] %vm1473_vm2, %v10547_v35  ;;  %v10559_v50 = vpack.c.bf16 %v1331_v46, %v1331_v46  ;;  %v10560_v51 = vpack.c.bf16 %v1332_v37, %v1332_v37  ;;  %v10561_v54 = vpack.c.bf16 %v1333_v43, %v1333_v43 }
 0x237   :  { %1481 = vst.msk [vmem:[#allocation2 + $0x1c] sm:$0xf] %vm1473_vm2, %v10548_v5  ;;  %1482 = vst.msk [vmem:[#allocation2 + $0x20] sm:$0xf] %vm1473_vm2, %v10549_v24  ;;  %v10562_v56 = vpack.c.bf16 %v1334_v52, %v1334_v52  ;;  %v10563_v59 = vpack.c.bf16 %v1335_v58, %v1335_v58  ;;  %v10564_v60 = vpack.c.bf16 %v1336_v49, %v1336_v49 }
 0x238   :  { %1483 = vst.msk [vmem:[#allocation2 + $0x24] sm:$0xf] %vm1473_vm2, %v10550_v20  ;;  %1484 = vst.msk [vmem:[#allocation2 + $0x28] sm:$0xf] %vm1473_vm2, %v10551_v29  ;;  %v10565_v63 = vpack.c.bf16 %v1337_v55, %v1337_v55  ;;  %v10566_v1 = vpack.c.bf16 %v1338_v0, %v1338_v0  ;;  %v10567_v2 = vpack.c.bf16 %v1339_v6, %v1339_v6 }
 0x239   :  { %1485 = vst.msk [vmem:[#allocation2 + $0x2c] sm:$0xf] %vm1473_vm2, %v10552_v32  ;;  %1486 = vst.msk [vmem:[#allocation2 + $0x30] sm:$0xf] %vm1473_vm2, %v10553_v33  ;;  %v10568_v48 = vpack.c.bf16 %v1340_v61, %v1340_v61  ;;  %v10569_v4 = vpack.c.bf16 %v1341_v3, %v1341_v3  ;;  %v10570_v7 = vpack.c.bf16 %v1342_v12, %v1342_v12 }
 0x23a   :  { %1487 = vst.msk [vmem:[#allocation2 + $0x34] sm:$0xf] %vm1473_vm2, %v10554_v28  ;;  %1488 = vst.msk [vmem:[#allocation2 + $0x38] sm:$0xf] %vm1473_vm2, %v10555_v38  ;;  %v10571_v57 = vpack.c.bf16 %v1343_v22, %v1343_v22  ;;  %v10572_v8 = vpack.c.bf16 %v1344_v13, %v1344_v13 }
 0x23b   :  { %1489 = vst.msk [vmem:[#allocation2 + $0x3c] sm:$0xf] %vm1473_vm2, %v10556_v41  ;;  %1490 = vst.msk [vmem:[#allocation2 + $0x40] sm:$0xf] %vm1473_vm2, %v10557_v45 }
 0x23c   :  { %1491 = vst.msk [vmem:[#allocation2 + $0x44] sm:$0xf] %vm1473_vm2, %v10558_v47  ;;  %1492 = vst.msk [vmem:[#allocation2 + $0x48] sm:$0xf] %vm1473_vm2, %v10559_v50 }
 0x23d   :  { %1493 = vst.msk [vmem:[#allocation2 + $0x4c] sm:$0xf] %vm1473_vm2, %v10560_v51  ;;  %1494 = vst.msk [vmem:[#allocation2 + $0x50] sm:$0xf] %vm1473_vm2, %v10561_v54 }
 0x23e   :  { %1495 = vst.msk [vmem:[#allocation2 + $0x54] sm:$0xf] %vm1473_vm2, %v10562_v56  ;;  %1496 = vst.msk [vmem:[#allocation2 + $0x58] sm:$0xf] %vm1473_vm2, %v10563_v59 }
 0x23f   :  { %1497 = vst.msk [vmem:[#allocation2 + $0x5c] sm:$0xf] %vm1473_vm2, %v10564_v60  ;;  %1498 = vst.msk [vmem:[#allocation2 + $0x60] sm:$0xf] %vm1473_vm2, %v10565_v63 }
 0x240   :  { %1499 = vst.msk [vmem:[#allocation2 + $0x64] sm:$0xf] %vm1473_vm2, %v10566_v1  ;;  %1500 = vst.msk [vmem:[#allocation2 + $0x68] sm:$0xf] %vm1473_vm2, %v10567_v2 }
 0x241   :  { %1501 = vst.msk [vmem:[#allocation2 + $0x6c] sm:$0xf] %vm1473_vm2, %v10568_v48  ;;  %1502 = vst.msk [vmem:[#allocation2 + $0x70] sm:$0xf] %vm1473_vm2, %v10569_v4 }
 0x242   :  { %1503 = vst.msk [vmem:[#allocation2 + $0x74] sm:$0xf] %vm1473_vm2, %v10570_v7  ;;  %1504 = vst.msk [vmem:[#allocation2 + $0x78] sm:$0xf] %vm1473_vm2, %v10571_v57 }
 0x243   :  { %1505 = vst.msk [vmem:[#allocation2 + $0x7c] sm:$0xf] %vm1473_vm2, %v10572_v8 }
 0x244   :  { %12469 = dma.done.wait [#allocation4], 32000 }
 0x245   :  { %12470 = vsyncadd [#allocation4], 4294935296  ;;  %v12473_v10 = vmov 0.0   ;;  %vm12474_vm3 = vmmov 0   ;;  %v12072_v11 = vld [vmem:[#allocation3 + $0x48] sm:$0xff]   ;;  %v12074_v53 = vld [vmem:[#allocation3 + $0x40] sm:$0xff]  }
 0x246   :  { %11042 = vmatprep.subr.bf16.mxu0 %v12473_v10  ;;  %11050 = vmatprep.subr.bf16.mxu1 %v12473_v10  ;;  %v12073_v27 = vld [vmem:[#allocation3 + $0x8] sm:$0xff]   ;;  %v12075_v44 = vld [vmem:[#allocation3] sm:$0xff]   ;;  %v12077_v17 = vld [vmem:[#allocation3 + $0xb8] sm:$0xff]   ;;  %vm9627_vm4 = vcmask 517120   ;;  %vm9725_vm5 = vcmask 523264   ;;  %s12476_s12 = smov [#allocation5]  }
 0x247   :  { %11046 = vmatprep.mubr.msk.bf16.mxu0 %vm12474_vm3, %v12473_v10  ;;  %11054 = vmatprep.mubr.msk.bf16.mxu1 %vm12474_vm3, %v12473_v10  ;;  %v1534_v14 = vld [vmem:[#allocation2 + $0x4] sm:$0x1]  ;;  %v1511_v16 = vld [vmem:[#allocation2] sm:$0x1]  ;;  %v12076_v23 = vld [vmem:[#allocation3 + $0x58] sm:$0xff]   ;;  %s9966_s13 = sshll.u32 %s12476_s12, 4  ;;  %s9967_s13 = int_to_ptr.vmem [resolvable:$true] %s9966_s13 }
 0x248   :  { %11043 = vmatpush3.bf16.msra.mxu0 %v12072_v11  ;;  %11051 = vmatpush3.bf16.msra.mxu1 %v12073_v27  ;;  %v12080_v19 = vld [vmem:[#allocation2 + $0x4] ss:$0 sps:$4 sm:$0x22]   ;;  %v12079_v18 = vld [vmem:[#allocation3 + $0xb0] sm:$0xff]   ;;  %v12083_v40 = vld [vmem:[#allocation3 + $0xd8] sm:$0xff]   ;;  %vm9958_vm6 = vcmask 41984   ;;  %p12454_p1 = scmp.lt.s32.totalorder %s9967_s13, %s9967_s13 }
 0x249   :  { %11044 = vmatprep.subr.bf16.mxu0 %v12473_v10  ;;  %11052 = vmatprep.subr.bf16.mxu1 %v12473_v10  ;;  %v12081_v36 = vld [vmem:[#allocation2 + $0x8] ss:$0 sps:$4 sm:$0x88]   ;;  %v12078_v34 = vld [vmem:[#allocation3 + $0x50] sm:$0xff]   ;;  %v1659_v31 = vrot.slane %v12080_v19, 1  ;;  %v12082_v46 = vld [vmem:[#allocation3 + $0x18] sm:$0xff]  }
 0x24a   :  { %v2225_v25 = vrot.slane %v12081_v36, 3  ;;  %v12087_v37 = vld [vmem:[#allocation2 + $0xc] ss:$0 sps:$4 sm:$0x22]   ;;  %v12084_v52 = vld [vmem:[#allocation3 + $0x10] sm:$0xff]   ;;  %v12089_v0 = vld [vmem:[#allocation3 + $0xf8] sm:$0xff]  }
 0x24b   :  { %v12086_v43 = vld [vmem:[#allocation2] ss:$0 sps:$4 sm:$0x22]   ;;  %v12085_v58 = vld [vmem:[#allocation3 + $0xd0] sm:$0xff]   ;;  %v2353_v49 = vrot.slane %v12087_v37, 1  ;;  %v12088_v61 = vld [vmem:[#allocation3 + $0x68] sm:$0xff]  }
 0x24c   :  { %11045 = vmatpush3.bf16.msra.mxu0 %v12074_v53  ;;  %11053 = vmatpush3.bf16.msra.mxu1 %v12075_v44  ;;  %v1718_v55 = vrot.slane %v12086_v43, 1  ;;  %v12093_v6 = vld [vmem:[#allocation2 + $0xc] ss:$0 sps:$4 sm:$0x88]   ;;  %v12091_v3 = vld [vmem:[#allocation3 + $0xf0] sm:$0xff]   ;;  %v12090_v22 = vld [vmem:[#allocation3 + $0x60] sm:$0xff]  }
 0x24d   :  { %11130 = vmatprep.subr.bf16.mxu0 %v12473_v10  ;;  %11058 = vmatprep.subr.bf16.mxu1 %v12473_v10  ;;  %v12092_v12 = vld [vmem:[#allocation2 + $0x4] ss:$0 sps:$4 sm:$0x44]   ;;  %v2485_v13 = vrot.slane %v12093_v6, 3  ;;  %v12095_v9 = vld [vmem:[#allocation3 + $0x118] sm:$0xff]   ;;  %v12094_v15 = vld [vmem:[#allocation3 + $0x28] sm:$0xff]  }
 0x24e   :  { %v1783_v21 = vrot.slane %v12092_v12, 2  ;;  %v12098_v30 = vld [vmem:[#allocation2] ss:$0 sps:$4 sm:$0x44]   ;;  %v12097_v35 = vld [vmem:[#allocation3 + $0x110] sm:$0xff]   ;;  %v12101_v20 = vld [vmem:[#allocation3 + $0x138] sm:$0xff]  }
 0x24f   :  { %11047 = vmatmul.mubr.msk.bf16.vlgmr.msra.gmra.mxu0 %vm932_vm0, %v1534_v14  ;;  %11055 = vmatmul.mubr.msk.bf16.vlgmr.msra.gmra.mxu1 %vm932_vm0, %v1511_v16  ;;  %v12099_v39 = vld [vmem:[#allocation2 + $0x10] ss:$0 sps:$4 sm:$0x22]   ;;  %v12096_v26 = vld [vmem:[#allocation3 + $0x20] sm:$0xff]   ;;  %v1842_v24 = vrot.slane %v12098_v30, 2  ;;  %v12100_v29 = vld [vmem:[#allocation3 + $0x78] sm:$0xff]  }
 0x250   :  { %11131 = vmatpush3.bf16.msra.mxu0 %v12077_v17  ;;  %11059 = vmatpush3.bf16.msra.mxu1 %v12076_v23  ;;  %v2613_v5 = vrot.slane %v12099_v39, 1  ;;  %v12105_v32 = vld [vmem:[#allocation2 + $0x10] ss:$0 sps:$4 sm:$0x88]   ;;  %v12107_v47 = vld [vmem:[#allocation3 + $0x158] sm:$0xff]   ;;  %v12112_v2 = vld [vmem:[#allocation3 + $0x88] sm:$0xff]  }
 0x251   :  { %11132 = vmatprep.subr.bf16.mxu0 %v12473_v10  ;;  %11060 = vmatprep.subr.bf16.mxu1 %v12473_v10  ;;  %v12102_v33 = vld [vmem:[#allocation3 + $0x70] sm:$0xff]   ;;  %v12104_v38 = vld [vmem:[#allocation2 + $0x4] ss:$0 sps:$4 sm:$0x88]   ;;  %v2745_v41 = vrot.slane %v12105_v32, 3  ;;  %v12106_v50 = vld [vmem:[#allocation3 + $0x38] sm:$0xff]  }
 0x252   :  { %11062 = vmatprep.mubr.msk.bf16.mxu1 %vm12474_vm3, %v12473_v10  ;;  %11134 = vmatprep.mubr.msk.bf16.mxu0 %vm12474_vm3, %v12473_v10  ;;  %v12103_v28 = vld [vmem:[#allocation3 + $0x130] sm:$0xff]   ;;  %v1907_v45 = vrot.slane %v12104_v38, 3  ;;  %v12110_v54 = vld [vmem:[#allocation2] ss:$0 sps:$4 sm:$0x88]   ;;  %v12113_v1 = vld [vmem:[#allocation3 + $0x178] sm:$0xff]  }
 0x253   :  { %v12111_v51 = vld [vmem:[#allocation2 + $0x14] ss:$0 sps:$4 sm:$0x22]   ;;  %v1966_v63 = vrot.slane %v12110_v54, 3  ;;  %v12114_v7 = vld [vmem:[#allocation3 + $0x80] sm:$0xff]   ;;  %v12118_v11 = vld [vmem:[#allocation3 + $0x198] sm:$0xff]  }
 0x254   :  { %11133 = vmatpush3.bf16.msra.mxu0 %v12079_v18  ;;  %11061 = vmatpush3.bf16.msra.mxu1 %v12078_v34  ;;  %v12109_v56 = vld [vmem:[#allocation3 + $0x150] sm:$0xff]   ;;  %v2873_v60 = vrot.slane %v12111_v51, 1  ;;  %v2022_v8 = vld [vmem:[#allocation2 + $0x8] sm:$0x1]  ;;  %v12117_v27 = vld [vmem:[#allocation3 + $0x98] sm:$0xff]  }
 0x255   :  { %11146 = vmatprep.subr.bf16.mxu0 %v12473_v10  ;;  %11066 = vmatprep.subr.bf16.mxu1 %v12473_v10  ;;  %v12108_v59 = vld [vmem:[#allocation3 + $0x30] sm:$0xff]   ;;  %v12122_v53 = vld [vmem:[#allocation2 + $0x18] ss:$0 sps:$4 sm:$0x22]   ;;  %v12123_v18 = vld [vmem:[#allocation3 + $0xa8] sm:$0xff]  }
 0x256   :  { %v12116_v48 = vld [vmem:[#allocation2 + $0x14] ss:$0 sps:$4 sm:$0x88]   ;;  %v12121_v44 = vld [vmem:[#allocation2 + $0x8] ss:$0 sps:$4 sm:$0x22]  }
 0x257   :  { %11135 = vmatmul.mubr.msk.bf16.vlgmr.msra.gmra.mxu0 %vm932_vm0, %v2225_v25  ;;  %11063 = vmatmul.mubr.msk.bf16.vlgmr.msra.gmra.mxu1 %vm932_vm0, %v1659_v31  ;;  %v12115_v4 = vld [vmem:[#allocation3 + $0x170] sm:$0xff]   ;;  %v3005_v57 = vrot.slane %v12116_v48, 3  ;;  %v3133_v17 = vrot.slane %v12122_v53, 1  ;;  %v2093_v23 = vrot.slane %v12121_v44, 1  ;;  %v12124_v19 = vld [vmem:[#allocation3 + $0x1b8] sm:$0xff]   ;;  %v12125_v31 = vld [vmem:[#allocation3 + $0xa0] sm:$0xff]  }
 0x258   :  { %11147 = vmatpush3.bf16.msra.mxu0 %v12083_v40  ;;  %11067 = vmatpush3.bf16.msra.mxu1 %v12082_v46  ;;  %v12120_v14 = vld [vmem:[#allocation3 + $0x190] sm:$0xff]   ;;  %v12127_v36 = vld [vmem:[#allocation2 + $0x8] ss:$0 sps:$4 sm:$0x44]   ;;  %v12130_v43 = vld [vmem:[#allocation3 + $0x1d8] sm:$0xff]  }
 0x259   :  { %11148 = vmatprep.subr.bf16.mxu0 %v12473_v10  ;;  %11068 = vmatprep.subr.bf16.mxu1 %v12473_v10  ;;  %v12119_v16 = vld [vmem:[#allocation3 + $0x90] sm:$0xff]   ;;  %v12128_v34 = vld [vmem:[#allocation2 + $0x18] ss:$0 sps:$4 sm:$0x88]   ;;  %v2159_v46 = vrot.slane %v12127_v36, 2  ;;  %v12129_v37 = vld [vmem:[#allocation3 + $0xc8] sm:$0xff]  }
 0x25a   :  { %11070 = vmatprep.mubr.msk.bf16.mxu1 %vm12474_vm3, %v12473_v10  ;;  %11150 = vmatprep.mubr.msk.bf16.mxu0 %vm12474_vm3, %v12473_v10  ;;  %v12126_v25 = vld [vmem:[#allocation3 + $0x1b0] sm:$0xff]   ;;  %v3265_v40 = vrot.slane %v12128_v34, 3  ;;  %v12134_v6 = vld [vmem:[#allocation3 + $0xe8] sm:$0xff]   ;;  %v12139_v12 = vld [vmem:[#allocation2 + $0x1c] ss:$0 sps:$4 sm:$0x88]  }
 0x25b   :  { %v12140_v30 = vld [vmem:[#allocation3 + $0x108] sm:$0xff]   ;;  %v12144_v39 = vld [vmem:[#allocation2 + $0x20] ss:$0 sps:$4 sm:$0x22]   ;;  %v12148_v38 = vld [vmem:[#allocation3 + $0x230] sm:$0xff]  }
 0x25c   :  { %11149 = vmatpush3.bf16.msra.mxu0 %v12085_v58  ;;  %11069 = vmatpush3.bf16.msra.mxu1 %v12084_v52  ;;  %v12133_v52 = vld [vmem:[#allocation2 + $0x1c] ss:$0 sps:$4 sm:$0x22]   ;;  %v12132_v58 = vld [vmem:[#allocation3 + $0x1d0] sm:$0xff]   ;;  %v12164_v44 = vld [vmem:[#allocation3 + $0x180] sm:$0xff]  }
 0x25d   :  { %11162 = vmatprep.subr.bf16.mxu0 %v12473_v10  ;;  %11074 = vmatprep.subr.bf16.mxu1 %v12473_v10  ;;  %v12149_v32 = vld [vmem:[#allocation2 + $0x10] ss:$0 sps:$4 sm:$0x44]   ;;  %v12155_v51 = vld [vmem:[#allocation2 + $0x24] ss:$0 sps:$4 sm:$0x22]  }
 0x25e   :  { %v12154_v54 = vld [vmem:[#allocation3 + $0x250] sm:$0xff]   ;;  %v12161_v48 = vld [vmem:[#allocation2 + $0x24] ss:$0 sps:$4 sm:$0x88]  }
 0x25f   :  { %11151 = vmatmul.mubr.msk.bf16.vlgmr.msra.gmra.mxu0 %vm932_vm0, %v2353_v49  ;;  %11071 = vmatmul.mubr.msk.bf16.vlgmr.msra.gmra.mxu1 %vm932_vm0, %v1718_v55  ;;  %v12131_v49 = vld [vmem:[#allocation3 + $0xc0] sm:$0xff]   ;;  %v2282_v55 = vld [vmem:[#allocation2 + $0xc] sm:$0x1]  ;;  %v12166_v53 = vld [vmem:[#allocation2 + $0x28] ss:$0 sps:$4 sm:$0x22]  }
 0x260   :  { %11163 = vmatpush3.bf16.msra.mxu0 %v12089_v0  ;;  %11075 = vmatpush3.bf16.msra.mxu1 %v12088_v61  ;;  %v3393_v0 = vrot.slane %v12133_v52, 1  ;;  %v12135_v61 = vld [vmem:[#allocation3 + $0x1f8] sm:$0xff]   ;;  %v12170_v34 = vld [vmem:[#allocation3 + $0x2b0] sm:$0xff]  }
 0x261   :  { %11164 = vmatprep.subr.bf16.mxu0 %v12473_v10  ;;  %11076 = vmatprep.subr.bf16.mxu1 %v12473_v10  ;;  %v12171_v36 = vld [vmem:[#allocation2 + $0x18] ss:$0 sps:$4 sm:$0x44]   ;;  %v12176_v52 = vld [vmem:[#allocation3 + $0x2d0] sm:$0xff]  }
 0x262   :  { %11078 = vmatprep.mubr.msk.bf16.mxu1 %vm12474_vm3, %v12473_v10  ;;  %11166 = vmatprep.mubr.msk.bf16.mxu0 %vm12474_vm3, %v12473_v10 }
 0x264   :  { %11165 = vmatpush3.bf16.msra.mxu0 %v12091_v3  ;;  %11077 = vmatpush3.bf16.msra.mxu1 %v12090_v22  ;;  %v12138_v3 = vld [vmem:[#allocation2 + $0xc] ss:$0 sps:$4 sm:$0x44]   ;;  %v12137_v22 = vld [vmem:[#allocation3 + $0x1f0] sm:$0xff]  }
 0x265   :  { %11178 = vmatprep.subr.bf16.mxu0 %v12473_v10  ;;  %11082 = vmatprep.subr.bf16.mxu1 %v12473_v10 }
 0x267   :  { %11167 = vmatmul.mubr.msk.bf16.vlgmr.msra.gmra.mxu0 %vm932_vm0, %v2485_v13  ;;  %11079 = vmatmul.mubr.msk.bf16.vlgmr.msra.gmra.mxu1 %vm932_vm0, %v1783_v21  ;;  %v12136_v13 = vld [vmem:[#allocation3 + $0xe0] sm:$0xff]   ;;  %v3525_v21 = vrot.slane %v12139_v12, 3  ;;  %v12181_v12 = vld [vmem:[#allocation3 + $0x2f0] sm:$0xff]  }
 0x268   :  { %11179 = vmatpush3.bf16.msra.mxu0 %v12095_v9  ;;  %11083 = vmatpush3.bf16.msra.mxu1 %v12094_v15  ;;  %v2419_v9 = vrot.slane %v12138_v3, 2  ;;  %v12141_v15 = vld [vmem:[#allocation3 + $0x218] sm:$0xff]  }
 0x269   :  { %11180 = vmatprep.subr.bf16.mxu0 %v12473_v10  ;;  %11084 = vmatprep.subr.bf16.mxu1 %v12473_v10  ;;  %v12182_v3 = vld [vmem:[#allocation2 + $0x1c] ss:$0 sps:$4 sm:$0x44]  }
 0x26a   :  { %11086 = vmatprep.mubr.msk.bf16.mxu1 %vm12474_vm3, %v12473_v10  ;;  %11182 = vmatprep.mubr.msk.bf16.mxu0 %vm12474_vm3, %v12473_v10 }
 0x26c   :  { %11181 = vmatpush3.bf16.msra.mxu0 %v12097_v35  ;;  %11085 = vmatpush3.bf16.msra.mxu1 %v12096_v26  ;;  %v12143_v26 = vld [vmem:[#allocation3 + $0x210] sm:$0xff]   ;;  %v12142_v35 = vld [vmem:[#allocation3 + $0x100] sm:$0xff]  }
 0x26d   :  { %11194 = vmatprep.subr.bf16.mxu0 %v12473_v10  ;;  %11090 = vmatprep.subr.bf16.mxu1 %v12473_v10 }
 0x26f   :  { %11183 = vmatmul.mubr.msk.bf16.vlgmr.msra.gmra.mxu0 %vm932_vm0, %v2613_v5  ;;  %11087 = vmatmul.mubr.msk.bf16.vlgmr.msra.gmra.mxu1 %vm932_vm0, %v1842_v24  ;;  %v2542_v5 = vld [vmem:[#allocation2 + $0x10] sm:$0x1]  ;;  %v3653_v24 = vrot.slane %v12144_v39, 1 }
 0x270   :  { %11195 = vmatpush3.bf16.msra.mxu0 %v12101_v20  ;;  %11091 = vmatpush3.bf16.msra.mxu1 %v12100_v29  ;;  %v12146_v20 = vld [vmem:[#allocation3 + $0x238] sm:$0xff]   ;;  %v12145_v29 = vld [vmem:[#allocation3 + $0x128] sm:$0xff]   ;;  %v12188_v39 = vld [vmem:[#allocation2 + $0x30] ss:$0 sps:$4 sm:$0x22]  }
 0x271   :  { %11196 = vmatprep.subr.bf16.mxu0 %v12473_v10  ;;  %11092 = vmatprep.subr.bf16.mxu1 %v12473_v10 }
 0x272   :  { %11094 = vmatprep.mubr.msk.bf16.mxu1 %vm12474_vm3, %v12473_v10  ;;  %11198 = vmatprep.mubr.msk.bf16.mxu0 %vm12474_vm3, %v12473_v10 }
 0x274   :  { %11197 = vmatpush3.bf16.msra.mxu0 %v12103_v28  ;;  %11093 = vmatpush3.bf16.msra.mxu1 %v12102_v33  ;;  %v12150_v33 = vld [vmem:[#allocation2 + $0x20] ss:$0 sps:$4 sm:$0x88]  }
 0x275   :  { %11210 = vmatprep.subr.bf16.mxu0 %v12473_v10  ;;  %11098 = vmatprep.subr.bf16.mxu1 %v12473_v10  ;;  %v12147_v28 = vld [vmem:[#allocation3 + $0x120] sm:$0xff]  }
 0x277   :  { %11199 = vmatmul.mubr.msk.bf16.vlgmr.msra.gmra.mxu0 %vm932_vm0, %v2745_v41  ;;  %11095 = vmatmul.mubr.msk.bf16.vlgmr.msra.gmra.mxu1 %vm932_vm0, %v1907_v45  ;;  %v2679_v41 = vrot.slane %v12149_v32, 2  ;;  %v3785_v45 = vrot.slane %v12150_v33, 3  ;;  %v12192_v32 = vld [vmem:[#allocation3 + $0x330] sm:$0xff]   ;;  %v12193_v33 = vld [vmem:[#allocation2 + $0x20] ss:$0 sps:$4 sm:$0x44]  }
 0x278   :  { %11211 = vmatpush3.bf16.msra.mxu0 %v12107_v47  ;;  %11099 = vmatpush3.bf16.msra.mxu1 %v12106_v50  ;;  %v12152_v47 = vld [vmem:[#allocation3 + $0x258] sm:$0xff]   ;;  %v12151_v50 = vld [vmem:[#allocation3 + $0x148] sm:$0xff]  }
 0x279   :  { %11212 = vmatprep.subr.bf16.mxu0 %v12473_v10  ;;  %11100 = vmatprep.subr.bf16.mxu1 %v12473_v10 }
 0x27a   :  { %11102 = vmatprep.mubr.msk.bf16.mxu1 %vm12474_vm3, %v12473_v10  ;;  %11214 = vmatprep.mubr.msk.bf16.mxu0 %vm12474_vm3, %v12473_v10 }
 0x27c   :  { %11213 = vmatpush3.bf16.msra.mxu0 %v12109_v56  ;;  %11101 = vmatpush3.bf16.msra.mxu1 %v12108_v59  ;;  %v12153_v56 = vld [vmem:[#allocation3 + $0x140] sm:$0xff]   ;;  %v2802_v59 = vld [vmem:[#allocation2 + $0x14] sm:$0x1] }
 0x27d   :  { %11226 = vmatprep.subr.bf16.mxu0 %v12473_v10  ;;  %11106 = vmatprep.subr.bf16.mxu1 %v12473_v10 }
 0x27f   :  { %11215 = vmatmul.mubr.msk.bf16.vlgmr.msra.gmra.mxu0 %vm932_vm0, %v2873_v60  ;;  %11103 = vmatmul.mubr.msk.bf16.vlgmr.msra.gmra.mxu1 %vm932_vm0, %v1966_v63  ;;  %v3913_v60 = vrot.slane %v12155_v51, 1  ;;  %v12157_v63 = vld [vmem:[#allocation3 + $0x278] sm:$0xff]   ;;  %v12198_v51 = vld [vmem:[#allocation3 + $0x350] sm:$0xff]  }
 0x280   :  { %11227 = vmatpush3.bf16.msra.mxu0 %v12113_v1  ;;  %11107 = vmatpush3.bf16.msra.mxu1 %v12112_v2  ;;  %v12156_v1 = vld [vmem:[#allocation3 + $0x168] sm:$0xff]   ;;  %v12160_v2 = vld [vmem:[#allocation2 + $0x14] ss:$0 sps:$4 sm:$0x44]  }
 0x281   :  { %11228 = vmatprep.subr.bf16.mxu0 %v12473_v10  ;;  %11108 = vmatprep.subr.bf16.mxu1 %v12473_v10 }
 0x282   :  { %11110 = vmatprep.mubr.msk.bf16.mxu1 %vm12474_vm3, %v12473_v10  ;;  %11230 = vmatprep.mubr.msk.bf16.mxu0 %vm12474_vm3, %v12473_v10 }
 0x284   :  { %11229 = vmatpush3.bf16.msra.mxu0 %v12115_v4  ;;  %11109 = vmatpush3.bf16.msra.mxu1 %v12114_v7  ;;  %v12159_v4 = vld [vmem:[#allocation3 + $0x270] sm:$0xff]   ;;  %v12158_v7 = vld [vmem:[#allocation3 + $0x160] sm:$0xff]  }
 0x285   :  { %11242 = vmatprep.subr.bf16.mxu0 %v12473_v10  ;;  %11114 = vmatprep.subr.bf16.mxu1 %v12473_v10 }
 0x287   :  { %11231 = vmatmul.mubr.msk.bf16.vlgmr.msra.gmra.mxu0 %vm932_vm0, %v3005_v57  ;;  %11111 = vmatmul.mubr.msk.bf16.vlgmr.msra.gmra.mxu1 %vm932_vm0, %v2022_v8  ;;  %v4045_v57 = vrot.slane %v12161_v48, 3  ;;  %v2939_v8 = vrot.slane %v12160_v2, 2  ;;  %v12205_v2 = vld [vmem:[#allocation2 + $0x34] ss:$0 sps:$4 sm:$0x88]  }
 0x288   :  { %11243 = vmatpush3.bf16.msra.mxu0 %v12118_v11  ;;  %11115 = vmatpush3.bf16.msra.mxu1 %v12117_v27  ;;  %v12163_v11 = vld [vmem:[#allocation3 + $0x298] sm:$0xff]   ;;  %v12162_v27 = vld [vmem:[#allocation3 + $0x188] sm:$0xff]   ;;  %v12203_v48 = vld [vmem:[#allocation3 + $0x370] sm:$0xff]  }
 0x289   :  { %11244 = vmatprep.subr.bf16.mxu0 %v12473_v10  ;;  %11116 = vmatprep.subr.bf16.mxu1 %v12473_v10 }
 0x28a   :  { %11118 = vmatprep.mubr.msk.bf16.mxu1 %vm12474_vm3, %v12473_v10  ;;  %11246 = vmatprep.mubr.msk.bf16.mxu0 %vm12474_vm3, %v12473_v10 }
 0x28c   :  { %11245 = vmatpush3.bf16.msra.mxu0 %v12120_v14  ;;  %11117 = vmatpush3.bf16.msra.mxu1 %v12119_v16  ;;  %v12165_v14 = vld [vmem:[#allocation3 + $0x290] sm:$0xff]   ;;  %v4173_v16 = vrot.slane %v12166_v53, 1 }
 0x28d   :  { %11258 = vmatprep.subr.bf16.mxu0 %v12473_v10  ;;  %11122 = vmatprep.subr.bf16.mxu1 %v12473_v10  ;;  %v12209_v53 = vld [vmem:[#allocation3 + $0x390] sm:$0xff]  }
 0x28f   :  { %11247 = vmatmul.mubr.msk.bf16.vlgmr.msra.gmra.mxu0 %vm932_vm0, %v3133_v17  ;;  %11119 = vmatmul.mubr.msk.bf16.vlgmr.msra.gmra.mxu1 %vm932_vm0, %v2093_v23  ;;  %v3062_v17 = vld [vmem:[#allocation2 + $0x18] sm:$0x1] }
 0x290   :  { %11259 = vmatpush3.bf16.msra.mxu0 %v12124_v19  ;;  %11123 = vmatpush3.bf16.msra.mxu1 %v12123_v18  ;;  %v12168_v23 = vld [vmem:[#allocation3 + $0x2b8] sm:$0xff]   ;;  %v12167_v19 = vld [vmem:[#allocation3 + $0x1a8] sm:$0xff]  }
 0x291   :  { %11260 = vmatprep.subr.bf16.mxu0 %v12473_v10  ;;  %11124 = vmatprep.subr.bf16.mxu1 %v12473_v10  ;;  %v12172_v18 = vld [vmem:[#allocation2 + $0x28] ss:$0 sps:$4 sm:$0x88]  }
 0x292   :  { %11126 = vmatprep.mubr.msk.bf16.mxu1 %vm12474_vm3, %v12473_v10  ;;  %11262 = vmatprep.mubr.msk.bf16.mxu0 %vm12474_vm3, %v12473_v10 }
 0x294   :  { %11261 = vmatpush3.bf16.msra.mxu0 %v12126_v25  ;;  %11125 = vmatpush3.bf16.msra.mxu1 %v12125_v31  ;;  %v12169_v25 = vld [vmem:[#allocation3 + $0x1a0] sm:$0xff]   ;;  %v4305_v31 = vrot.slane %v12172_v18, 3 }
 0x295   :  { %11274 = vmatprep.subr.bf16.mxu0 %v12473_v10  ;;  %11138 = vmatprep.subr.bf16.mxu1 %v12473_v10  ;;  %v12213_v18 = vld [vmem:[#allocation3 + $0x2a0] sm:$0xff]  }
 0x297   :  { %11263 = vmatmul.mubr.msk.bf16.vlgmr.msra.gmra.mxu0 %vm932_vm0, %v3265_v40  ;;  %11127 = vmatmul.mubr.msk.bf16.vlgmr.msra.gmra.mxu1 %vm932_vm0, %v2159_v46  ;;  %v3199_v40 = vrot.slane %v12171_v36, 2  ;;  %v12174_v46 = vld [vmem:[#allocation3 + $0x2d8] sm:$0xff]  }
 0x298   :  { %11275 = vmatpush3.bf16.msra.mxu0 %v12130_v43  ;;  %11139 = vmatpush3.bf16.msra.mxu1 %v12129_v37  ;;  %v12177_v37 = vld [vmem:[#allocation2 + $0x2c] ss:$0 sps:$4 sm:$0x22]   ;;  %v12216_v36 = vld [vmem:[#allocation2 + $0x38] ss:$0 sps:$4 sm:$0x88]  }
 0x299   :  { %11276 = vmatprep.subr.bf16.mxu0 %v12473_v10  ;;  %11140 = vmatprep.subr.bf16.mxu1 %v12473_v10  ;;  %v12173_v43 = vld [vmem:[#allocation3 + $0x1c8] sm:$0xff]  }
 0x29a   :  { %11142 = vmatprep.mubr.msk.bf16.mxu1 %vm12474_vm3, %v12473_v10  ;;  %11278 = vmatprep.mubr.msk.bf16.mxu0 %vm12474_vm3, %v12473_v10 }
 0x29c   :  { %11277 = vmatpush3.bf16.msra.mxu0 %v12132_v58  ;;  %11141 = vmatpush3.bf16.msra.mxu1 %v12131_v49  ;;  %v12175_v58 = vld [vmem:[#allocation3 + $0x1c0] sm:$0xff]   ;;  %v4433_v49 = vrot.slane %v12177_v37, 1 }
 0x29d   :  { %11290 = vmatprep.subr.bf16.mxu0 %v12473_v10  ;;  %11154 = vmatprep.subr.bf16.mxu1 %v12473_v10 }
 0x29f   :  { %11279 = vmatmul.mubr.msk.bf16.vlgmr.msra.gmra.mxu0 %vm932_vm0, %v3393_v0  ;;  %11143 = vmatmul.mubr.msk.bf16.vlgmr.msra.gmra.mxu1 %vm932_vm0, %v2282_v55  ;;  %v3322_v55 = vld [vmem:[#allocation2 + $0x1c] sm:$0x1] }
 0x2a0   :  { %11291 = vmatpush3.bf16.msra.mxu0 %v12135_v61  ;;  %11155 = vmatpush3.bf16.msra.mxu1 %v12134_v6  ;;  %v12179_v0 = vld [vmem:[#allocation3 + $0x2f8] sm:$0xff]   ;;  %v12178_v6 = vld [vmem:[#allocation3 + $0x1e8] sm:$0xff]  }
 0x2a1   :  { %11292 = vmatprep.subr.bf16.mxu0 %v12473_v10  ;;  %11156 = vmatprep.subr.bf16.mxu1 %v12473_v10  ;;  %v12183_v61 = vld [vmem:[#allocation2 + $0x2c] ss:$0 sps:$4 sm:$0x88]  }
 0x2a2   :  { %11158 = vmatprep.mubr.msk.bf16.mxu1 %vm12474_vm3, %v12473_v10  ;;  %11294 = vmatprep.mubr.msk.bf16.mxu0 %vm12474_vm3, %v12473_v10 }
 0x2a4   :  { %11293 = vmatpush3.bf16.msra.mxu0 %v12137_v22  ;;  %11157 = vmatpush3.bf16.msra.mxu1 %v12136_v13  ;;  %v12180_v22 = vld [vmem:[#allocation3 + $0x1e0] sm:$0xff]   ;;  %v4565_v13 = vrot.slane %v12183_v61, 3 }
 0x2a5   :  { %11306 = vmatprep.subr.bf16.mxu0 %v12473_v10  ;;  %11170 = vmatprep.subr.bf16.mxu1 %v12473_v10 }
 0x2a7   :  { %11295 = vmatmul.mubr.msk.bf16.vlgmr.msra.gmra.mxu0 %vm932_vm0, %v3525_v21  ;;  %11159 = vmatmul.mubr.msk.bf16.vlgmr.msra.gmra.mxu1 %vm932_vm0, %v2419_v9  ;;  %v12184_v21 = vld [vmem:[#allocation3 + $0x208] sm:$0xff]   ;;  %v3459_v9 = vrot.slane %v12182_v3, 2  ;;  %v12221_v3 = vld [vmem:[#allocation2 + $0x3c] ss:$0 sps:$4 sm:$0x22]  }
 0x2a8   :  { %11307 = vmatpush3.bf16.msra.mxu0 %v12141_v15  ;;  %11171 = vmatpush3.bf16.msra.mxu1 %v12140_v30  ;;  %v12185_v15 = vld [vmem:[#allocation3 + $0x318] sm:$0xff]   ;;  %v12187_v30 = vld [vmem:[#allocation3 + $0x310] sm:$0xff]  }
 0x2a9   :  { %11308 = vmatprep.subr.bf16.mxu0 %v12473_v10  ;;  %11172 = vmatprep.subr.bf16.mxu1 %v12473_v10 }
 0x2aa   :  { %11174 = vmatprep.mubr.msk.bf16.mxu1 %vm12474_vm3, %v12473_v10  ;;  %11310 = vmatprep.mubr.msk.bf16.mxu0 %vm12474_vm3, %v12473_v10 }
 0x2ac   :  { %11309 = vmatpush3.bf16.msra.mxu0 %v12143_v26  ;;  %11173 = vmatpush3.bf16.msra.mxu1 %v12142_v35  ;;  %v12186_v26 = vld [vmem:[#allocation3 + $0x200] sm:$0xff]   ;;  %v4693_v35 = vrot.slane %v12188_v39, 1  ;;  %v4362_v39 = vld [vmem:[#allocation2 + $0x2c] sm:$0x1] }
 0x2ad   :  { %11322 = vmatprep.subr.bf16.mxu0 %v12473_v10  ;;  %11186 = vmatprep.subr.bf16.mxu1 %v12473_v10 }
 0x2af   :  { %11311 = vmatmul.mubr.msk.bf16.vlgmr.msra.gmra.mxu0 %vm932_vm0, %v3653_v24  ;;  %11175 = vmatmul.mubr.msk.bf16.vlgmr.msra.gmra.mxu1 %vm932_vm0, %v2542_v5  ;;  %v3582_v5 = vld [vmem:[#allocation2 + $0x20] sm:$0x1]  ;;  %v12190_v24 = vld [vmem:[#allocation3 + $0x338] sm:$0xff]  }
 0x2b0   :  { %11323 = vmatpush3.bf16.msra.mxu0 %v12146_v20  ;;  %11187 = vmatpush3.bf16.msra.mxu1 %v12145_v29  ;;  %v12189_v20 = vld [vmem:[#allocation3 + $0x228] sm:$0xff]   ;;  %v12194_v29 = vld [vmem:[#allocation2 + $0x30] ss:$0 sps:$4 sm:$0x88]  }
 0x2b1   :  { %11324 = vmatprep.subr.bf16.mxu0 %v12473_v10  ;;  %11188 = vmatprep.subr.bf16.mxu1 %v12473_v10 }
 0x2b2   :  { %11190 = vmatprep.mubr.msk.bf16.mxu1 %vm12474_vm3, %v12473_v10  ;;  %11326 = vmatprep.mubr.msk.bf16.mxu0 %vm12474_vm3, %v12473_v10 }
 0x2b4   :  { %11325 = vmatpush3.bf16.msra.mxu0 %v12148_v38  ;;  %11189 = vmatpush3.bf16.msra.mxu1 %v12147_v28  ;;  %v12191_v28 = vld [vmem:[#allocation3 + $0x220] sm:$0xff]   ;;  %v4825_v38 = vrot.slane %v12194_v29, 3  ;;  %v12222_v29 = vld [vmem:[#allocation3 + $0x2e8] sm:$0xff]  }
 0x2b5   :  { %11338 = vmatprep.subr.bf16.mxu0 %v12473_v10  ;;  %11202 = vmatprep.subr.bf16.mxu1 %v12473_v10 }
 0x2b7   :  { %11327 = vmatmul.mubr.msk.bf16.vlgmr.msra.gmra.mxu0 %vm932_vm0, %v3785_v45  ;;  %11191 = vmatmul.mubr.msk.bf16.vlgmr.msra.gmra.mxu1 %vm932_vm0, %v2679_v41  ;;  %v3719_v41 = vrot.slane %v12193_v33, 2  ;;  %v12196_v45 = vld [vmem:[#allocation3 + $0x358] sm:$0xff]  }
 0x2b8   :  { %11339 = vmatpush3.bf16.msra.mxu0 %v12152_v47  ;;  %11203 = vmatpush3.bf16.msra.mxu1 %v12151_v50  ;;  %v12195_v47 = vld [vmem:[#allocation3 + $0x248] sm:$0xff]   ;;  %v12199_v50 = vld [vmem:[#allocation2 + $0x34] ss:$0 sps:$4 sm:$0x22]  }
 0x2b9   :  { %11340 = vmatprep.subr.bf16.mxu0 %v12473_v10  ;;  %11204 = vmatprep.subr.bf16.mxu1 %v12473_v10 }
 0x2ba   :  { %11206 = vmatprep.mubr.msk.bf16.mxu1 %vm12474_vm3, %v12473_v10  ;;  %11342 = vmatprep.mubr.msk.bf16.mxu0 %vm12474_vm3, %v12473_v10 }
 0x2bc   :  { %11341 = vmatpush3.bf16.msra.mxu0 %v12154_v54  ;;  %11205 = vmatpush3.bf16.msra.mxu1 %v12153_v56  ;;  %v12197_v54 = vld [vmem:[#allocation3 + $0x240] sm:$0xff]   ;;  %v4953_v56 = vrot.slane %v12199_v50, 1 }
 0x2bd   :  { %11354 = vmatprep.subr.bf16.mxu0 %v12473_v10  ;;  %11218 = vmatprep.subr.bf16.mxu1 %v12473_v10  ;;  %v12224_v50 = vld [vmem:[#allocation3 + $0x2e0] sm:$0xff]  }
 0x2bf   :  { %11343 = vmatmul.mubr.msk.bf16.vlgmr.msra.gmra.mxu0 %vm932_vm0, %v3913_v60  ;;  %11207 = vmatmul.mubr.msk.bf16.vlgmr.msra.gmra.mxu1 %vm932_vm0, %v2802_v59  ;;  %v3842_v59 = vld [vmem:[#allocation2 + $0x24] sm:$0x1]  ;;  %v12201_v60 = vld [vmem:[#allocation3 + $0x378] sm:$0xff]  }
 0x2c0   :  { %11355 = vmatpush3.bf16.msra.mxu0 %v12157_v63  ;;  %11219 = vmatpush3.bf16.msra.mxu1 %v12156_v1  ;;  %v12200_v63 = vld [vmem:[#allocation3 + $0x268] sm:$0xff]   ;;  %v12204_v1 = vld [vmem:[#allocation2 + $0x24] ss:$0 sps:$4 sm:$0x44]  }
 0x2c1   :  { %11356 = vmatprep.subr.bf16.mxu0 %v12473_v10  ;;  %11220 = vmatprep.subr.bf16.mxu1 %v12473_v10 }
 0x2c2   :  { %11222 = vmatprep.mubr.msk.bf16.mxu1 %vm12474_vm3, %v12473_v10  ;;  %11358 = vmatprep.mubr.msk.bf16.mxu0 %vm12474_vm3, %v12473_v10 }
 0x2c4   :  { %11357 = vmatpush3.bf16.msra.mxu0 %v12159_v4  ;;  %11221 = vmatpush3.bf16.msra.mxu1 %v12158_v7  ;;  %v12202_v4 = vld [vmem:[#allocation3 + $0x260] sm:$0xff]   ;;  %v12207_v7 = vld [vmem:[#allocation3 + $0x398] sm:$0xff]  }
 0x2c5   :  { %11370 = vmatprep.subr.bf16.mxu0 %v12473_v10  ;;  %11234 = vmatprep.subr.bf16.mxu1 %v12473_v10 }
 0x2c7   :  { %11359 = vmatmul.mubr.msk.bf16.vlgmr.msra.gmra.mxu0 %vm932_vm0, %v4045_v57  ;;  %11223 = vmatmul.mubr.msk.bf16.vlgmr.msra.gmra.mxu1 %vm932_vm0, %v2939_v8  ;;  %v3979_v57 = vrot.slane %v12204_v1, 2  ;;  %v5085_v8 = vrot.slane %v12205_v2, 3  ;;  %v12228_v2 = vld [vmem:[#allocation3 + $0x308] sm:$0xff]  }
 0x2c8   :  { %11371 = vmatpush3.bf16.msra.mxu0 %v12163_v11  ;;  %11235 = vmatpush3.bf16.msra.mxu1 %v12162_v27  ;;  %v12206_v11 = vld [vmem:[#allocation3 + $0x288] sm:$0xff]   ;;  %v12210_v27 = vld [vmem:[#allocation2 + $0x38] ss:$0 sps:$4 sm:$0x22]  }
 0x2c9   :  { %11372 = vmatprep.subr.bf16.mxu0 %v12473_v10  ;;  %11236 = vmatprep.subr.bf16.mxu1 %v12473_v10 }
 0x2ca   :  { %11238 = vmatprep.mubr.msk.bf16.mxu1 %vm12474_vm3, %v12473_v10  ;;  %11374 = vmatprep.mubr.msk.bf16.mxu0 %vm12474_vm3, %v12473_v10 }
 0x2cc   :  { %11373 = vmatpush3.bf16.msra.mxu0 %v12165_v14  ;;  %11237 = vmatpush3.bf16.msra.mxu1 %v12164_v44  ;;  %v12208_v44 = vld [vmem:[#allocation3 + $0x280] sm:$0xff]   ;;  %v4102_v14 = vld [vmem:[#allocation2 + $0x28] sm:$0x1] }
 0x2cd   :  { %11386 = vmatprep.subr.bf16.mxu0 %v12473_v10  ;;  %11250 = vmatprep.subr.bf16.mxu1 %v12473_v10 }
 0x2cf   :  { %11375 = vmatmul.mubr.msk.bf16.vlgmr.msra.gmra.mxu0 %vm932_vm0, %v4173_v16  ;;  %11239 = vmatmul.mubr.msk.bf16.vlgmr.msra.gmra.mxu1 %vm932_vm0, %v3062_v17  ;;  %v5213_v16 = vrot.slane %v12210_v27, 1  ;;  %v12212_v17 = vld [vmem:[#allocation3 + $0x3b8] sm:$0xff]   ;;  %v12230_v27 = vld [vmem:[#allocation3 + $0x300] sm:$0xff]  }
 0x2d0   :  { %11387 = vmatpush3.bf16.msra.mxu0 %v12168_v23  ;;  %11251 = vmatpush3.bf16.msra.mxu1 %v12167_v19  ;;  %v12211_v23 = vld [vmem:[#allocation3 + $0x2a8] sm:$0xff]  }
 0x2d1   :  { %11388 = vmatprep.subr.bf16.mxu0 %v12473_v10  ;;  %11252 = vmatprep.subr.bf16.mxu1 %v12473_v10 }
 0x2d2   :  { %11254 = vmatprep.mubr.msk.bf16.mxu1 %vm12474_vm3, %v12473_v10  ;;  %11390 = vmatprep.mubr.msk.bf16.mxu0 %vm12474_vm3, %v12473_v10 }
 0x2d4   :  { %11389 = vmatpush3.bf16.msra.mxu0 %v12170_v34  ;;  %11253 = vmatpush3.bf16.msra.mxu1 %v12169_v25  ;;  %v12214_v25 = vld [vmem:[#allocation3 + $0x3b0] sm:$0xff]  }
 0x2d5   :  { %11402 = vmatprep.subr.bf16.mxu0 %v12473_v10  ;;  %11266 = vmatprep.subr.bf16.mxu1 %v12473_v10 }
 0x2d7   :  { %11391 = vmatmul.mubr.msk.bf16.vlgmr.msra.gmra.mxu0 %vm932_vm0, %v4305_v31  ;;  %11255 = vmatmul.mubr.msk.bf16.vlgmr.msra.gmra.mxu1 %vm932_vm0, %v3199_v40  ;;  %v12215_v31 = vld [vmem:[#allocation2 + $0x28] ss:$0 sps:$4 sm:$0x44]  }
 0x2d8   :  { %11403 = vmatpush3.bf16.msra.mxu0 %v12174_v46  ;;  %11267 = vmatpush3.bf16.msra.mxu1 %v12173_v43 }
 0x2d9   :  { %11404 = vmatprep.subr.bf16.mxu0 %v12473_v10  ;;  %11268 = vmatprep.subr.bf16.mxu1 %v12473_v10 }
 0x2da   :  { %11270 = vmatprep.mubr.msk.bf16.mxu1 %vm12474_vm3, %v12473_v10  ;;  %11406 = vmatprep.mubr.msk.bf16.mxu0 %vm12474_vm3, %v12473_v10 }
 0x2dc   :  { %11405 = vmatpush3.bf16.msra.mxu0 %v12176_v52  ;;  %11269 = vmatpush3.bf16.msra.mxu1 %v12175_v58  ;;  %v5345_v52 = vrot.slane %v12216_v36, 3 }
 0x2dd   :  { %11418 = vmatprep.subr.bf16.mxu0 %v12473_v10  ;;  %11282 = vmatprep.subr.bf16.mxu1 %v12473_v10 }
 0x2df   :  { %11407 = vmatmul.mubr.msk.bf16.vlgmr.msra.gmra.mxu0 %vm932_vm0, %v4433_v49  ;;  %11271 = vmatmul.mubr.msk.bf16.vlgmr.msra.gmra.mxu1 %vm932_vm0, %v3322_v55  ;;  %v4239_v49 = vrot.slane %v12215_v31, 2  ;;  %v12218_v55 = vld [vmem:[#allocation3 + $0x3d8] sm:$0xff]   ;;  %v12237_v31 = vld [vmem:[#allocation2 + $0x30] ss:$0 sps:$4 sm:$0x44]  }
 0x2e0   :  { %11419 = vmatpush3.bf16.msra.mxu0 %v12179_v0  ;;  %11283 = vmatpush3.bf16.msra.mxu1 %v12178_v6  ;;  %v12217_v6 = vld [vmem:[#allocation3 + $0x2c8] sm:$0xff]  }
 0x2e1   :  { %11420 = vmatprep.subr.bf16.mxu0 %v12473_v10  ;;  %11284 = vmatprep.subr.bf16.mxu1 %v12473_v10 }
 0x2e2   :  { %11286 = vmatprep.mubr.msk.bf16.mxu1 %vm12474_vm3, %v12473_v10  ;;  %11422 = vmatprep.mubr.msk.bf16.mxu0 %vm12474_vm3, %v12473_v10 }
 0x2e4   :  { %11421 = vmatpush3.bf16.msra.mxu0 %v12181_v12  ;;  %11285 = vmatpush3.bf16.msra.mxu1 %v12180_v22  ;;  %v12219_v22 = vld [vmem:[#allocation3 + $0x2c0] sm:$0xff]  }
 0x2e5   :  { %11434 = vmatprep.subr.bf16.mxu0 %v12473_v10  ;;  %11298 = vmatprep.subr.bf16.mxu1 %v12473_v10 }
 0x2e7   :  { %11423 = vmatmul.mubr.msk.bf16.vlgmr.msra.gmra.mxu0 %vm932_vm0, %v4565_v13  ;;  %11287 = vmatmul.mubr.msk.bf16.vlgmr.msra.gmra.mxu1 %vm932_vm0, %v3459_v9 }
 0x2e8   :  { %11435 = vmatpush3.bf16.msra.mxu0 %v12185_v15  ;;  %11299 = vmatpush3.bf16.msra.mxu1 %v12184_v21  ;;  %v12220_v21 = vld [vmem:[#allocation3 + $0x3d0] sm:$0xff]  }
 0x2e9   :  { %11436 = vmatprep.subr.bf16.mxu0 %v12473_v10  ;;  %11300 = vmatprep.subr.bf16.mxu1 %v12473_v10 }
 0x2ea   :  { %11302 = vmatprep.mubr.msk.bf16.mxu1 %vm12474_vm3, %v12473_v10  ;;  %11438 = vmatprep.mubr.msk.bf16.mxu0 %vm12474_vm3, %v12473_v10 }
 0x2ec   :  { %11437 = vmatpush3.bf16.msra.mxu0 %v12187_v30  ;;  %11301 = vmatpush3.bf16.msra.mxu1 %v12186_v26  ;;  %v5473_v26 = vrot.slane %v12221_v3, 1  ;;  %v12240_v3 = vld [vmem:[#allocation3 + $0x458] sm:$0xff]  }
 0x2ed   :  { %11450 = vmatprep.subr.bf16.mxu0 %v12473_v10  ;;  %11314 = vmatprep.subr.bf16.mxu1 %v12473_v10 }
 0x2ef   :  { %11439 = vmatmul.mubr.msk.bf16.vlgmr.msra.gmra.mxu0 %vm932_vm0, %v4693_v35  ;;  %11303 = vmatmul.mubr.msk.bf16.vlgmr.msra.gmra.mxu1 %vm932_vm0, %v3582_v5  ;;  %v12223_v5 = vld [vmem:[#allocation3 + $0x3f8] sm:$0xff]  }
 0x2f0   :  { %11451 = vmatpush3.bf16.msra.mxu0 %v12190_v24  ;;  %11315 = vmatpush3.bf16.msra.mxu1 %v12189_v20  ;;  %v12227_v24 = vld [vmem:[#allocation2 + $0x3c] ss:$0 sps:$4 sm:$0x88]  }
 0x2f1   :  { %11452 = vmatprep.subr.bf16.mxu0 %v12473_v10  ;;  %11316 = vmatprep.subr.bf16.mxu1 %v12473_v10 }
 0x2f2   :  { %11318 = vmatprep.mubr.msk.bf16.mxu1 %vm12474_vm3, %v12473_v10  ;;  %11454 = vmatprep.mubr.msk.bf16.mxu0 %vm12474_vm3, %v12473_v10 }
 0x2f4   :  { %11453 = vmatpush3.bf16.msra.mxu0 %v12192_v32  ;;  %11317 = vmatpush3.bf16.msra.mxu1 %v12191_v28 }
 0x2f5   :  { %11466 = vmatprep.subr.bf16.mxu0 %v12473_v10  ;;  %11330 = vmatprep.subr.bf16.mxu1 %v12473_v10 }
 0x2f7   :  { %11455 = vmatmul.mubr.msk.bf16.vlgmr.msra.gmra.mxu0 %vm932_vm0, %v4825_v38  ;;  %11319 = vmatmul.mubr.msk.bf16.vlgmr.msra.gmra.mxu1 %vm932_vm0, %v3719_v41  ;;  %v12225_v38 = vld [vmem:[#allocation3 + $0x3f0] sm:$0xff]   ;;  %v12226_v41 = vld [vmem:[#allocation2 + $0x2c] ss:$0 sps:$4 sm:$0x44]  }
 0x2f8   :  { %11467 = vmatpush3.bf16.msra.mxu0 %v12196_v45  ;;  %11331 = vmatpush3.bf16.msra.mxu1 %v12195_v47 }
 0x2f9   :  { %11468 = vmatprep.subr.bf16.mxu0 %v12473_v10  ;;  %11332 = vmatprep.subr.bf16.mxu1 %v12473_v10 }
 0x2fa   :  { %11334 = vmatprep.mubr.msk.bf16.mxu1 %vm12474_vm3, %v12473_v10  ;;  %11470 = vmatprep.mubr.msk.bf16.mxu0 %vm12474_vm3, %v12473_v10 }
 0x2fc   :  { %11469 = vmatpush3.bf16.msra.mxu0 %v12198_v51  ;;  %11333 = vmatpush3.bf16.msra.mxu1 %v12197_v54  ;;  %v5605_v54 = vrot.slane %v12227_v24, 3 }
 0x2fd   :  { %11482 = vmatprep.subr.bf16.mxu0 %v12473_v10  ;;  %11346 = vmatprep.subr.bf16.mxu1 %v12473_v10 }
 0x2ff   :  { %11471 = vmatmul.mubr.msk.bf16.vlgmr.msra.gmra.mxu0 %vm932_vm0, %v4953_v56  ;;  %11335 = vmatmul.mubr.msk.bf16.vlgmr.msra.gmra.mxu1 %vm932_vm0, %v3842_v59 }
 0x300   :  { %11483 = vmatpush3.bf16.msra.mxu0 %v12201_v60  ;;  %11347 = vmatpush3.bf16.msra.mxu1 %v12200_v63  ;;  %v4499_v60 = vrot.slane %v12226_v41, 2  ;;  %v12229_v63 = vld [vmem:[#allocation3 + $0x418] sm:$0xff]  }
 0x301   :  { %11484 = vmatprep.subr.bf16.mxu0 %v12473_v10  ;;  %11348 = vmatprep.subr.bf16.mxu1 %v12473_v10 }
 0x302   :  { %11350 = vmatprep.mubr.msk.bf16.mxu1 %vm12474_vm3, %v12473_v10  ;;  %11486 = vmatprep.mubr.msk.bf16.mxu0 %vm12474_vm3, %v12473_v10 }
 0x304   :  { %11485 = vmatpush3.bf16.msra.mxu0 %v12203_v48  ;;  %11349 = vmatpush3.bf16.msra.mxu1 %v12202_v4  ;;  %v12232_v48 = vld [vmem:[#allocation2 + $0x40] ss:$0 sps:$4 sm:$0x22]  }
 0x305   :  { %11498 = vmatprep.subr.bf16.mxu0 %v12473_v10  ;;  %11362 = vmatprep.subr.bf16.mxu1 %v12473_v10 }
 0x307   :  { %11487 = vmatmul.mubr.msk.bf16.vlgmr.msra.gmra.mxu0 %vm932_vm0, %v5085_v8  ;;  %11351 = vmatmul.mubr.msk.bf16.vlgmr.msra.gmra.mxu1 %vm932_vm0, %v3979_v57  ;;  %v12231_v8 = vld [vmem:[#allocation3 + $0x410] sm:$0xff]  }
 0x308   :  { %11499 = vmatpush3.bf16.msra.mxu0 %v12207_v7  ;;  %11363 = vmatpush3.bf16.msra.mxu1 %v12206_v11 }
 0x309   :  { %11500 = vmatprep.subr.bf16.mxu0 %v12473_v10  ;;  %11364 = vmatprep.subr.bf16.mxu1 %v12473_v10 }
 0x30a   :  { %11366 = vmatprep.mubr.msk.bf16.mxu1 %vm12474_vm3, %v12473_v10  ;;  %11502 = vmatprep.mubr.msk.bf16.mxu0 %vm12474_vm3, %v12473_v10 }
 0x30c   :  { %11501 = vmatpush3.bf16.msra.mxu0 %v12209_v53  ;;  %11365 = vmatpush3.bf16.msra.mxu1 %v12208_v44 }
 0x30d   :  { %11514 = vmatprep.subr.bf16.mxu0 %v12473_v10  ;;  %11378 = vmatprep.subr.bf16.mxu1 %v12473_v10 }
 0x30f   :  { %v1589_v19 = vpop.f32.mrf.mxu0  ;;  %11503 = vmatmul.mubr.msk.bf16.vlgmr.msra.gmra.mxu0 %vm932_vm0, %v5213_v16  ;;  %v1644_v34 = vpop.f32.mrf.mxu1  ;;  %11367 = vmatmul.mubr.msk.bf16.vlgmr.msra.gmra.mxu1 %vm932_vm0, %v4102_v14  ;;  %v4622_v14 = vld [vmem:[#allocation2 + $0x30] sm:$0x1]  ;;  %v5733_v16 = vrot.slane %v12232_v48, 1 }
 0x310   :  { %11515 = vmatpush3.bf16.msra.mxu0 %v12212_v17  ;;  %v14133_v40 = vadd.f32 %v1644_v34, %v1589_v19  ;;  %11379 = vmatpush3.bf16.msra.mxu1 %v12211_v23  ;;  %v12233_v17 = vld [vmem:[#allocation3 + $0x328] sm:$0xff]   ;;  %v12234_v19 = vld [vmem:[#allocation3 + $0x438] sm:$0xff]   ;;  %v12236_v34 = vld [vmem:[#allocation3 + $0x430] sm:$0xff]  }
 0x311   :  { %v11048_v46 = vpop.f32.mrf.mxu0  ;;  %11516 = vmatprep.subr.bf16.mxu0 %v12473_v10  ;;  %v11056_v37 = vpop.f32.mrf.mxu1  ;;  %11380 = vmatprep.subr.bf16.mxu1 %v12473_v10 }
 0x312   :  { %11382 = vmatprep.mubr.msk.bf16.mxu1 %vm12474_vm3, %v12473_v10  ;;  %11518 = vmatprep.mubr.msk.bf16.mxu0 %vm12474_vm3, %v12473_v10  ;;  %v12238_v46 = vld [vmem:[#allocation2 + $0x40] ss:$0 sps:$4 sm:$0x88]  }
 0x313   :  { %v1592_v43 = vpop.f32.mrf.mxu0  ;;  %v1647_v58 = vpop.f32.mrf.mxu1 }
 0x314   :  { %11517 = vmatpush3.bf16.msra.mxu0 %v12214_v25  ;;  %11381 = vmatpush3.bf16.msra.mxu1 %v12213_v18  ;;  %v12235_v58 = vld [vmem:[#allocation3 + $0x320] sm:$0xff]  }
 0x315   :  { %v11049_v0 = vpop.f32.mrf.mxu0  ;;  %11530 = vmatprep.subr.bf16.mxu0 %v12473_v10  ;;  %v11057_v61 = vpop.f32.mrf.mxu1  ;;  %11394 = vmatprep.subr.bf16.mxu1 %v12473_v10 }
 0x316   :  { %v5865_v0 = vrot.slane %v12238_v46, 3  ;;  %v4759_v61 = vrot.slane %v12237_v31, 2 }
 0x317   :  { %v14143_v12 = vpop.f32.mrf.mxu0  ;;  %11519 = vmatmul.mubr.msk.bf16.vlgmr.msra.gmra.mxu0 %vm932_vm0, %v5345_v52  ;;  %v1709_v13 = vpop.f32.mrf.mxu1  ;;  %11383 = vmatmul.mubr.msk.bf16.vlgmr.msra.gmra.mxu1 %vm932_vm0, %v4239_v49 }
 0x318   :  { %11531 = vmatpush3.bf16.msra.mxu0 %v12218_v55  ;;  %11395 = vmatpush3.bf16.msra.mxu1 %v12217_v6 }
 0x319   :  { %v11136_v9 = vpop.f32.mrf.mxu0  ;;  %11532 = vmatprep.subr.bf16.mxu0 %v12473_v10  ;;  %v11064_v15 = vpop.f32.mrf.mxu1  ;;  %11396 = vmatprep.subr.bf16.mxu1 %v12473_v10 }
 0x31a   :  { %11398 = vmatprep.mubr.msk.bf16.mxu1 %vm12474_vm3, %v12473_v10  ;;  %11534 = vmatprep.mubr.msk.bf16.mxu0 %vm12474_vm3, %v12473_v10  ;;  %v12241_v15 = vld [vmem:[#allocation3 + $0x340] sm:$0xff]  }
 0x31b   :  { %v2278_v30 = vpop.f32.mrf.mxu0  ;;  %v1712_v35 = vpop.f32.mrf.mxu1 }
 0x31c   :  { %11533 = vmatpush3.bf16.msra.mxu0 %v12220_v21  ;;  %11397 = vmatpush3.bf16.msra.mxu1 %v12219_v22  ;;  %v12242_v30 = vld [vmem:[#allocation3 + $0x450] sm:$0xff]  }
 0x31d   :  { %v11137_v20 = vpop.f32.mrf.mxu0  ;;  %11546 = vmatprep.subr.bf16.mxu0 %v12473_v10  ;;  %v11065_v32 = vpop.f32.mrf.mxu1  ;;  %11410 = vmatprep.subr.bf16.mxu1 %v12473_v10 }
 0x31e   :  { %v4882_v20 = vld [vmem:[#allocation2 + $0x34] sm:$0x1]  ;;  %v12244_v32 = vld [vmem:[#allocation3 + $0x368] sm:$0xff]  }
 0x31f   :  { %v14155_v33 = vpop.f32.mrf.mxu0  ;;  %11535 = vmatmul.mubr.msk.bf16.vlgmr.msra.gmra.mxu0 %vm932_vm0, %v5473_v26  ;;  %v1768_v28 = vpop.f32.mrf.mxu1  ;;  %11399 = vmatmul.mubr.msk.bf16.vlgmr.msra.gmra.mxu1 %vm932_vm0, %v4362_v39  ;;  %v12243_v39 = vld [vmem:[#allocation2 + $0x44] ss:$0 sps:$4 sm:$0x22]  }
 0x320   :  { %11547 = vmatpush3.bf16.msra.mxu0 %v12223_v5  ;;  %v14159_v45 = vadd.f32 %v1768_v28, %v1709_v13  ;;  %11411 = vmatpush3.bf16.msra.mxu1 %v12222_v29  ;;  %v12239_v13 = vld [vmem:[#allocation3 + $0x348] sm:$0xff]   ;;  %v5993_v29 = vrot.slane %v12243_v39, 1 }
 0x321   :  { %v11152_v47 = vpop.f32.mrf.mxu0  ;;  %11548 = vmatprep.subr.bf16.mxu0 %v12473_v10  ;;  %v11072_v51 = vpop.f32.mrf.mxu1  ;;  %11412 = vmatprep.subr.bf16.mxu1 %v12473_v10 }
 0x322   :  { %11414 = vmatprep.mubr.msk.bf16.mxu1 %vm12474_vm3, %v12473_v10  ;;  %11550 = vmatprep.mubr.msk.bf16.mxu0 %vm12474_vm3, %v12473_v10 }
 0x323   :  { %v2406_v56 = vpop.f32.mrf.mxu0  ;;  %v1771_v59 = vpop.f32.mrf.mxu1 }
 0x324   :  { %11549 = vmatpush3.bf16.msra.mxu0 %v12225_v38  ;;  %11413 = vmatpush3.bf16.msra.mxu1 %v12224_v50  ;;  %v12245_v38 = vld [vmem:[#allocation3 + $0x478] sm:$0xff]   ;;  %v12247_v50 = vld [vmem:[#allocation3 + $0x470] sm:$0xff]   ;;  %v12249_v59 = vld [vmem:[#allocation2 + $0x44] ss:$0 sps:$4 sm:$0x88]  }
 0x325   :  { %v11153_v1 = vpop.f32.mrf.mxu0  ;;  %11562 = vmatprep.subr.bf16.mxu0 %v12473_v10  ;;  %v11073_v4 = vpop.f32.mrf.mxu1  ;;  %11426 = vmatprep.subr.bf16.mxu1 %v12473_v10  ;;  %v12248_v56 = vld [vmem:[#allocation2 + $0x34] ss:$0 sps:$4 sm:$0x44]  }
 0x327   :  { %v14169_v7 = vpop.f32.mrf.mxu0  ;;  %11551 = vmatmul.mubr.msk.bf16.vlgmr.msra.gmra.mxu0 %vm932_vm0, %v5605_v54  ;;  %v1833_v57 = vpop.f32.mrf.mxu1  ;;  %11415 = vmatmul.mubr.msk.bf16.vlgmr.msra.gmra.mxu1 %vm932_vm0, %v4499_v60  ;;  %v12246_v54 = vld [vmem:[#allocation3 + $0x360] sm:$0xff]  }
 0x328   :  { %11563 = vmatpush3.bf16.msra.mxu0 %v12229_v63  ;;  %11427 = vmatpush3.bf16.msra.mxu1 %v12228_v2 }
 0x329   :  { %v11168_v11 = vpop.f32.mrf.mxu0  ;;  %11564 = vmatprep.subr.bf16.mxu0 %v12473_v10  ;;  %v11080_v53 = vpop.f32.mrf.mxu1  ;;  %11428 = vmatprep.subr.bf16.mxu1 %v12473_v10 }
 0x32a   :  { %11430 = vmatprep.mubr.msk.bf16.mxu1 %vm12474_vm3, %v12473_v10  ;;  %11566 = vmatprep.mubr.msk.bf16.mxu0 %vm12474_vm3, %v12473_v10  ;;  %v5019_v11 = vrot.slane %v12248_v56, 2  ;;  %v12251_v53 = vld [vmem:[#allocation3 + $0x498] sm:$0xff]  }
 0x32b   :  { %v2538_v44 = vpop.f32.mrf.mxu0  ;;  %v1836_v23 = vpop.f32.mrf.mxu1 }
 0x32c   :  { %11565 = vmatpush3.bf16.msra.mxu0 %v12231_v8  ;;  %11429 = vmatpush3.bf16.msra.mxu1 %v12230_v27  ;;  %v12250_v27 = vld [vmem:[#allocation3 + $0x388] sm:$0xff]   ;;  %v12252_v23 = vld [vmem:[#allocation3 + $0x380] sm:$0xff]  }
 0x32d   :  { %v11169_v18 = vpop.f32.mrf.mxu0  ;;  %11578 = vmatprep.subr.bf16.mxu0 %v12473_v10  ;;  %v11081_v36 = vpop.f32.mrf.mxu1  ;;  %11442 = vmatprep.subr.bf16.mxu1 %v12473_v10 }
 0x32e   :  { %v12254_v18 = vld [vmem:[#allocation2 + $0x48] ss:$0 sps:$4 sm:$0x22]  }
 0x32f   :  { %v14181_v25 = vpop.f32.mrf.mxu0  ;;  %11567 = vmatmul.mubr.msk.bf16.vlgmr.msra.gmra.mxu0 %vm932_vm0, %v5733_v16  ;;  %v1892_v37 = vpop.f32.mrf.mxu1  ;;  %11431 = vmatmul.mubr.msk.bf16.vlgmr.msra.gmra.mxu1 %vm932_vm0, %v4622_v14 }
 0x330   :  { %11579 = vmatpush3.bf16.msra.mxu0 %v12234_v19  ;;  %v14185_v43 = vadd.f32 %v1892_v37, %v1833_v57  ;;  %11443 = vmatpush3.bf16.msra.mxu1 %v12233_v17  ;;  %v6125_v57 = vrot.slane %v12249_v59, 3  ;;  %v12253_v19 = vld [vmem:[#allocation3 + $0x490] sm:$0xff]  }
 0x331   :  { %v11184_v52 = vpop.f32.mrf.mxu0  ;;  %11580 = vmatprep.subr.bf16.mxu0 %v12473_v10  ;;  %v11088_v49 = vpop.f32.mrf.mxu1  ;;  %11444 = vmatprep.subr.bf16.mxu1 %v12473_v10 }
 0x332   :  { %11446 = vmatprep.mubr.msk.bf16.mxu1 %vm12474_vm3, %v12473_v10  ;;  %11582 = vmatprep.mubr.msk.bf16.mxu0 %vm12474_vm3, %v12473_v10  ;;  %v5142_v52 = vld [vmem:[#allocation2 + $0x38] sm:$0x1]  ;;  %v12255_v49 = vld [vmem:[#allocation3 + $0x3a8] sm:$0xff]  }
 0x333   :  { %v2666_v55 = vpop.f32.mrf.mxu0  ;;  %v1895_v6 = vpop.f32.mrf.mxu1 }
 0x334   :  { %11581 = vmatpush3.bf16.msra.mxu0 %v12236_v34  ;;  %11445 = vmatpush3.bf16.msra.mxu1 %v12235_v58  ;;  %v6253_v58 = vrot.slane %v12254_v18, 1  ;;  %v12256_v55 = vld [vmem:[#allocation3 + $0x4b8] sm:$0xff]  }
 0x335   :  { %v11185_v22 = vpop.f32.mrf.mxu0  ;;  %11594 = vmatprep.subr.bf16.mxu0 %v12473_v10  ;;  %v11089_v21 = vpop.f32.mrf.mxu1  ;;  %11458 = vmatprep.subr.bf16.mxu1 %v12473_v10 }
 0x336   :  { %v12257_v22 = vld [vmem:[#allocation3 + $0x3a0] sm:$0xff]   ;;  %v12260_v21 = vld [vmem:[#allocation2 + $0x48] ss:$0 sps:$4 sm:$0x88]  }
 0x337   :  { %v2795_v9 = vpop.f32.mrf.mxu0  ;;  %11583 = vmatmul.mubr.msk.bf16.vlgmr.msra.gmra.mxu0 %vm932_vm0, %v5865_v0  ;;  %v1957_v26 = vpop.f32.mrf.mxu1  ;;  %11447 = vmatmul.mubr.msk.bf16.vlgmr.msra.gmra.mxu1 %vm932_vm0, %v4759_v61  ;;  %v12258_v61 = vld [vmem:[#allocation3 + $0x4b0] sm:$0xff]  }
 0x338   :  { %11595 = vmatpush3.bf16.msra.mxu0 %v12240_v3  ;;  %11459 = vmatpush3.bf16.msra.mxu1 %v12239_v13  ;;  %v12259_v13 = vld [vmem:[#allocation2 + $0x38] ss:$0 sps:$4 sm:$0x44]  }
 0x339   :  { %v11200_v35 = vpop.f32.mrf.mxu0  ;;  %11596 = vmatprep.subr.bf16.mxu0 %v12473_v10  ;;  %v11096_v5 = vpop.f32.mrf.mxu1  ;;  %11460 = vmatprep.subr.bf16.mxu1 %v12473_v10 }
 0x33a   :  { %11462 = vmatprep.mubr.msk.bf16.mxu1 %vm12474_vm3, %v12473_v10  ;;  %11598 = vmatprep.mubr.msk.bf16.mxu0 %vm12474_vm3, %v12473_v10  ;;  %v6385_v5 = vrot.slane %v12260_v21, 3 }
 0x33b   :  { %v2798_v24 = vpop.f32.mrf.mxu0  ;;  %v1960_v28 = vpop.f32.mrf.mxu1 }
 0x33c   :  { %11597 = vmatpush3.bf16.msra.mxu0 %v12242_v30  ;;  %11461 = vmatpush3.bf16.msra.mxu1 %v12241_v15 }
 0x33d   :  { %v11201_v41 = vpop.f32.mrf.mxu0  ;;  %11610 = vmatprep.subr.bf16.mxu0 %v12473_v10  ;;  %v11097_v47 = vpop.f32.mrf.mxu1  ;;  %11474 = vmatprep.subr.bf16.mxu1 %v12473_v10 }
 0x33e   :  { %v12263_v47 = vld [vmem:[#allocation3 + $0x3c0] sm:$0xff]  }
 0x33f   :  { %v14205_v51 = vpop.f32.mrf.mxu0  ;;  %11599 = vmatmul.mubr.msk.bf16.vlgmr.msra.gmra.mxu0 %vm932_vm0, %v5993_v29  ;;  %v2016_v60 = vpop.f32.mrf.mxu1  ;;  %11463 = vmatmul.mubr.msk.bf16.vlgmr.msra.gmra.mxu1 %vm932_vm0, %v4882_v20  ;;  %v12261_v20 = vld [vmem:[#allocation3 + $0x3c8] sm:$0xff]   ;;  %v12262_v29 = vld [vmem:[#allocation3 + $0x4d8] sm:$0xff]  }
 0x340   :  { %11611 = vmatpush3.bf16.msra.mxu0 %v12245_v38  ;;  %v2017_v63 = vadd.f32 %v2016_v60, %v1957_v26  ;;  %11475 = vmatpush3.bf16.msra.mxu1 %v12244_v32 }
 0x341   :  { %v11216_v1 = vpop.f32.mrf.mxu0  ;;  %11612 = vmatprep.subr.bf16.mxu0 %v12473_v10  ;;  %v11104_v2 = vpop.f32.mrf.mxu1  ;;  %11476 = vmatprep.subr.bf16.mxu1 %v12473_v10 }
 0x342   :  { %11478 = vmatprep.mubr.msk.bf16.mxu1 %vm12474_vm3, %v12473_v10  ;;  %v2281_v48 = vadd.f32 %v14143_v12, %v2017_v63  ;;  %11614 = vmatprep.mubr.msk.bf16.mxu0 %vm12474_vm3, %v12473_v10  ;;  %v5402_v2 = vld [vmem:[#allocation2 + $0x3c] sm:$0x1] }
 0x343   :  { %v2926_v4 = vpop.f32.mrf.mxu0  ;;  %v2019_v8 = vpop.f32.mrf.mxu1 }
 0x344   :  { %11613 = vmatpush3.bf16.msra.mxu0 %v12247_v50  ;;  %11477 = vmatpush3.bf16.msra.mxu1 %v12246_v54  ;;  %v2541_v14 = vadd.f32 %v14169_v7, %v2281_v48  ;;  %v12264_v50 = vld [vmem:[#allocation3 + $0x4d0] sm:$0xff]   ;;  %v12265_v54 = vld [vmem:[#allocation2 + $0x4c] ss:$0 sps:$4 sm:$0x22]  }
 0x345   :  { %v11217_v44 = vpop.f32.mrf.mxu0  ;;  %11626 = vmatprep.subr.bf16.mxu0 %v12473_v10  ;;  %v11105_v16 = vpop.f32.mrf.mxu1  ;;  %11490 = vmatprep.subr.bf16.mxu1 %v12473_v10  ;;  %v6513_v48 = vrot.slane %v12265_v54, 1  ;;  %v12266_v4 = vld [vmem:[#allocation3 + $0x3e8] sm:$0xff]  }
 0x346   :  { %v2801_v12 = vadd.f32 %v2795_v9, %v2541_v14  ;;  %v12268_v44 = vld [vmem:[#allocation3 + $0x3e0] sm:$0xff]   ;;  %v12270_v14 = vld [vmem:[#allocation2 + $0x3c] ss:$0 sps:$4 sm:$0x44]  }
 0x347   :  { %v3055_v17 = vpop.f32.mrf.mxu0  ;;  %11615 = vmatmul.mubr.msk.bf16.vlgmr.msra.gmra.mxu0 %vm932_vm0, %v6125_v57  ;;  %v2077_v36 = vpop.f32.mrf.mxu1  ;;  %11479 = vmatmul.mubr.msk.bf16.vlgmr.msra.gmra.mxu1 %vm932_vm0, %v5019_v11  ;;  %v12271_v16 = vld [vmem:[#allocation2 + $0x4c] ss:$0 sps:$4 sm:$0x88]  }
 0x348   :  { %11627 = vmatpush3.bf16.msra.mxu0 %v12251_v53  ;;  %v14222_v34 = vadd.f32 %v2077_v36, %v14133_v40  ;;  %v3061_v7 = vadd.f32 %v3055_v17, %v2801_v12  ;;  %11491 = vmatpush3.bf16.msra.mxu1 %v12250_v27  ;;  %v12269_v27 = vld [vmem:[#allocation3 + $0x4f0] sm:$0xff]  }
 0x349   :  { %v11232_v31 = vpop.f32.mrf.mxu0  ;;  %11628 = vmatprep.subr.bf16.mxu0 %v12473_v10  ;;  %v11112_v46 = vpop.f32.mrf.mxu1  ;;  %11492 = vmatprep.subr.bf16.mxu1 %v12473_v10 }
 0x34a   :  { %11494 = vmatprep.mubr.msk.bf16.mxu1 %vm12474_vm3, %v12473_v10  ;;  %11630 = vmatprep.mubr.msk.bf16.mxu0 %vm12474_vm3, %v12473_v10  ;;  %v5539_v46 = vrot.slane %v12270_v14, 2 }
 0x34b   :  { %v3058_v37 = vpop.f32.mrf.mxu0  ;;  %v2080_v40 = vpop.f32.mrf.mxu1 }
 0x34c   :  { %11629 = vmatpush3.bf16.msra.mxu0 %v12253_v19  ;;  %11493 = vmatpush3.bf16.msra.mxu1 %v12252_v23  ;;  %v12272_v37 = vld [vmem:[#allocation3 + $0x408] sm:$0xff]   ;;  %v12274_v40 = vld [vmem:[#allocation3 + $0x400] sm:$0xff]  }
 0x34d   :  { %v11233_v0 = vpop.f32.mrf.mxu0  ;;  %11642 = vmatprep.subr.bf16.mxu0 %v12473_v10  ;;  %v11113_v6 = vpop.f32.mrf.mxu1  ;;  %11506 = vmatprep.subr.bf16.mxu1 %v12473_v10 }
 0x34e   :  { %v12276_v0 = vld [vmem:[#allocation2 + $0x50] ss:$0 sps:$4 sm:$0x22]  }
 0x34f   :  { %v3183_v3 = vpop.f32.mrf.mxu0  ;;  %11631 = vmatmul.mubr.msk.bf16.vlgmr.msra.gmra.mxu0 %vm932_vm0, %v6253_v58  ;;  %v2143_v9 = vpop.f32.mrf.mxu1  ;;  %11495 = vmatmul.mubr.msk.bf16.vlgmr.msra.gmra.mxu1 %vm932_vm0, %v5142_v52 }
 0x350   :  { %11643 = vmatpush3.bf16.msra.mxu0 %v12256_v55  ;;  %v2149_v15 = vadd.f32 %v2143_v9, %v14159_v45  ;;  %11507 = vmatpush3.bf16.msra.mxu1 %v12255_v49  ;;  %v5279_v45 = vrot.slane %v12259_v13, 2  ;;  %v12275_v55 = vld [vmem:[#allocation3 + $0x510] sm:$0xff]   ;;  %v5662_v9 = vld [vmem:[#allocation2 + $0x40] sm:$0x1] }
 0x351   :  { %v11248_v30 = vpop.f32.mrf.mxu0  ;;  %11644 = vmatprep.subr.bf16.mxu0 %v12473_v10  ;;  %v11120_v39 = vpop.f32.mrf.mxu1  ;;  %11508 = vmatprep.subr.bf16.mxu1 %v12473_v10 }
 0x352   :  { %11510 = vmatprep.mubr.msk.bf16.mxu1 %vm12474_vm3, %v12473_v10  ;;  %v2409_v26 = vadd.f32 %v14155_v33, %v2149_v15  ;;  %11646 = vmatprep.mubr.msk.bf16.mxu0 %vm12474_vm3, %v12473_v10  ;;  %v6773_v15 = vrot.slane %v12276_v0, 1  ;;  %v12277_v39 = vld [vmem:[#allocation3 + $0x428] sm:$0xff]  }
 0x353   :  { %v3186_v35 = vpop.f32.mrf.mxu0  ;;  %v2146_v24 = vpop.f32.mrf.mxu1 }
 0x354   :  { %11645 = vmatpush3.bf16.msra.mxu0 %v12258_v61  ;;  %v2669_v32 = vadd.f32 %v14181_v25, %v2409_v26  ;;  %11509 = vmatpush3.bf16.msra.mxu1 %v12257_v22  ;;  %v12278_v26 = vld [vmem:[#allocation3 + $0x538] sm:$0xff]   ;;  %v12280_v24 = vld [vmem:[#allocation3 + $0x530] sm:$0xff]  }
 0x355   :  { %v11249_v28 = vpop.f32.mrf.mxu0  ;;  %11658 = vmatprep.subr.bf16.mxu0 %v12473_v10  ;;  %v11121_v38 = vpop.f32.mrf.mxu1  ;;  %11522 = vmatprep.subr.bf16.mxu1 %v12473_v10 }
 0x356   :  { %v2929_v33 = vadd.f32 %v14205_v51, %v2669_v32  ;;  %v12282_v32 = vld [vmem:[#allocation2 + $0x50] ss:$0 sps:$4 sm:$0x88]  }
 0x357   :  { %v3315_v41 = vpop.f32.mrf.mxu0  ;;  %11647 = vmatmul.mubr.msk.bf16.vlgmr.msra.gmra.mxu0 %vm932_vm0, %v6385_v5  ;;  %v2209_v56 = vpop.f32.mrf.mxu1  ;;  %11511 = vmatmul.mubr.msk.bf16.vlgmr.msra.gmra.mxu1 %vm932_vm0, %v5279_v45  ;;  %v6905_v54 = vrot.slane %v12282_v32, 3 }
 0x358   :  { %v3321_v59 = vadd.f32 %v3315_v41, %v3061_v7  ;;  %11659 = vmatpush3.bf16.msra.mxu0 %v12262_v29  ;;  %v3189_v25 = vadd.f32 %v3183_v3, %v2929_v33  ;;  %v2215_v60 = vadd.f32 %v2209_v56, %v14185_v43  ;;  %11523 = vmatpush3.bf16.msra.mxu1 %v12261_v20  ;;  %v12267_v43 = vld [vmem:[#allocation3 + $0x4f8] sm:$0xff]   ;;  %v6645_v7 = vrot.slane %v12271_v16, 3  ;;  %v12279_v20 = vld [vmem:[#allocation3 + $0x420] sm:$0xff]  }
 0x359   :  { %v11264_v63 = vpop.f32.mrf.mxu0  ;;  %11660 = vmatprep.subr.bf16.mxu0 %v12473_v10  ;;  %v11128_v1 = vpop.f32.mrf.mxu1  ;;  %11524 = vmatprep.subr.bf16.mxu1 %v12473_v10  ;;  %v12281_v29 = vld [vmem:[#allocation2 + $0x40] ss:$0 sps:$4 sm:$0x44]  }
 0x35a   :  { %11526 = vmatprep.mubr.msk.bf16.mxu1 %vm12474_vm3, %v12473_v10  ;;  %11662 = vmatprep.mubr.msk.bf16.mxu0 %vm12474_vm3, %v12473_v10 }
 0x35b   :  { %v3318_v51 = vpop.f32.mrf.mxu0  ;;  %v2212_v57 = vpop.f32.mrf.mxu1 }
 0x35c   :  { %11661 = vmatpush3.bf16.msra.mxu0 %v12264_v50  ;;  %11525 = vmatpush3.bf16.msra.mxu1 %v12263_v47 }
 0x35d   :  { %v11265_v8 = vpop.f32.mrf.mxu0  ;;  %11674 = vmatprep.subr.bf16.mxu0 %v12473_v10  ;;  %v11129_v11 = vpop.f32.mrf.mxu1  ;;  %11538 = vmatprep.subr.bf16.mxu1 %v12473_v10 }
 0x35f   :  { %v3443_v53 = vpop.f32.mrf.mxu0  ;;  %11663 = vmatmul.mubr.msk.bf16.vlgmr.msra.gmra.mxu0 %vm932_vm0, %v6513_v48  ;;  %v2337_v12 = vpop.f32.mrf.mxu1  ;;  %11527 = vmatmul.mubr.msk.bf16.vlgmr.msra.gmra.mxu1 %vm932_vm0, %v5402_v2  ;;  %v12285_v2 = vld [vmem:[#allocation3 + $0x440] sm:$0xff]   ;;  %v12286_v48 = vld [vmem:[#allocation3 + $0x550] sm:$0xff]  }
 0x360   :  { %v3449_v17 = vadd.f32 %v3443_v53, %v3189_v25  ;;  %11675 = vmatpush3.bf16.msra.mxu0 %v12267_v43  ;;  %v2343_v23 = vadd.f32 %v2337_v12, %v14222_v34  ;;  %11539 = vmatpush3.bf16.msra.mxu1 %v12266_v4  ;;  %v12273_v34 = vld [vmem:[#allocation3 + $0x518] sm:$0xff]   ;;  %v12283_v25 = vld [vmem:[#allocation3 + $0x448] sm:$0xff]   ;;  %v12287_v4 = vld [vmem:[#allocation2 + $0x54] ss:$0 sps:$4 sm:$0x22]  }
 0x361   :  { %v11280_v19 = vpop.f32.mrf.mxu0  ;;  %11676 = vmatprep.subr.bf16.mxu0 %v12473_v10  ;;  %v11144_v18 = vpop.f32.mrf.mxu1  ;;  %11540 = vmatprep.subr.bf16.mxu1 %v12473_v10  ;;  %v7033_v14 = vrot.slane %v12287_v4, 1  ;;  %v12288_v12 = vld [vmem:[#allocation3 + $0x468] sm:$0xff]  }
 0x362   :  { %11542 = vmatprep.mubr.msk.bf16.mxu1 %vm12474_vm3, %v12473_v10  ;;  %11678 = vmatprep.mubr.msk.bf16.mxu0 %vm12474_vm3, %v12473_v10  ;;  %v12291_v18 = vld [vmem:[#allocation3 + $0x570] sm:$0xff]  }
 0x363   :  { %v3446_v36 = vpop.f32.mrf.mxu0  ;;  %v2340_v31 = vpop.f32.mrf.mxu1 }
 0x364   :  { %11677 = vmatpush3.bf16.msra.mxu0 %v12269_v27  ;;  %11541 = vmatpush3.bf16.msra.mxu1 %v12268_v44  ;;  %v5922_v44 = vld [vmem:[#allocation2 + $0x44] sm:$0x1] }
 0x365   :  { %v11281_v52 = vpop.f32.mrf.mxu0  ;;  %11690 = vmatprep.subr.bf16.mxu0 %v12473_v10  ;;  %v11145_v58 = vpop.f32.mrf.mxu1  ;;  %11554 = vmatprep.subr.bf16.mxu1 %v12473_v10  ;;  %v12292_v31 = vld [vmem:[#allocation2 + $0x44] ss:$0 sps:$4 sm:$0x44]  }
 0x367   :  { %v3575_v49 = vpop.f32.mrf.mxu0  ;;  %11679 = vmatmul.mubr.msk.bf16.vlgmr.msra.gmra.mxu0 %vm932_vm0, %v6645_v7  ;;  %v2469_v6 = vpop.f32.mrf.mxu1  ;;  %11543 = vmatmul.mubr.msk.bf16.vlgmr.msra.gmra.mxu1 %vm932_vm0, %v5539_v46  ;;  %v12290_v7 = vld [vmem:[#allocation3 + $0x460] sm:$0xff]   ;;  %v12293_v46 = vld [vmem:[#allocation2 + $0x54] ss:$0 sps:$4 sm:$0x88]  }
 0x368   :  { %v3581_v61 = vadd.f32 %v3575_v49, %v3321_v59  ;;  %11691 = vmatpush3.bf16.msra.mxu0 %v12273_v34  ;;  %v2475_v3 = vadd.f32 %v2469_v6, %v2215_v60  ;;  %11555 = vmatpush3.bf16.msra.mxu1 %v12272_v37  ;;  %v5799_v59 = vrot.slane %v12281_v29, 2  ;;  %v12284_v60 = vld [vmem:[#allocation3 + $0x558] sm:$0xff]   ;;  %v6059_v6 = vrot.slane %v12292_v31, 2 }
 0x369   :  { %v11296_v22 = vpop.f32.mrf.mxu0  ;;  %11692 = vmatprep.subr.bf16.mxu0 %v12473_v10  ;;  %v11160_v13 = vpop.f32.mrf.mxu1  ;;  %11556 = vmatprep.subr.bf16.mxu1 %v12473_v10 }
 0x36a   :  { %11558 = vmatprep.mubr.msk.bf16.mxu1 %vm12474_vm3, %v12473_v10  ;;  %11694 = vmatprep.mubr.msk.bf16.mxu0 %vm12474_vm3, %v12473_v10 }
 0x36b   :  { %v3578_v21 = vpop.f32.mrf.mxu0  ;;  %v2472_v30 = vpop.f32.mrf.mxu1 }
 0x36c   :  { %11693 = vmatpush3.bf16.msra.mxu0 %v12275_v55  ;;  %11557 = vmatpush3.bf16.msra.mxu1 %v12274_v40  ;;  %v7165_v55 = vrot.slane %v12293_v46, 3  ;;  %v12298_v30 = vld [vmem:[#allocation2 + $0x58] ss:$0 sps:$4 sm:$0x22]  }
 0x36d   :  { %v11297_v35 = vpop.f32.mrf.mxu0  ;;  %11706 = vmatprep.subr.bf16.mxu0 %v12473_v10  ;;  %v11161_v5 = vpop.f32.mrf.mxu1  ;;  %11570 = vmatprep.subr.bf16.mxu1 %v12473_v10  ;;  %v7293_v29 = vrot.slane %v12298_v30, 1  ;;  %v12311_v46 = vld [vmem:[#allocation3 + $0x5f8] sm:$0xff]  }
 0x36f   :  { %v3703_v45 = vpop.f32.mrf.mxu0  ;;  %11695 = vmatmul.mubr.msk.bf16.vlgmr.msra.gmra.mxu0 %vm932_vm0, %v6773_v15  ;;  %v2597_v28 = vpop.f32.mrf.mxu1  ;;  %11559 = vmatmul.mubr.msk.bf16.vlgmr.msra.gmra.mxu1 %vm932_vm0, %v5662_v9  ;;  %v12296_v9 = vld [vmem:[#allocation3 + $0x480] sm:$0xff]   ;;  %v12297_v15 = vld [vmem:[#allocation3 + $0x590] sm:$0xff]  }
 0x370   :  { %v3709_v38 = vadd.f32 %v3703_v45, %v3449_v17  ;;  %11707 = vmatpush3.bf16.msra.mxu0 %v12278_v26  ;;  %v2603_v33 = vadd.f32 %v2597_v28, %v2343_v23  ;;  %11571 = vmatpush3.bf16.msra.mxu1 %v12277_v39  ;;  %v12289_v17 = vld [vmem:[#allocation3 + $0x578] sm:$0xff]   ;;  %v12299_v28 = vld [vmem:[#allocation3 + $0x4a8] sm:$0xff]  }
 0x371   :  { %v11312_v41 = vpop.f32.mrf.mxu0  ;;  %11708 = vmatprep.subr.bf16.mxu0 %v12473_v10  ;;  %v11176_v47 = vpop.f32.mrf.mxu1  ;;  %11572 = vmatprep.subr.bf16.mxu1 %v12473_v10 }
 0x372   :  { %11574 = vmatprep.mubr.msk.bf16.mxu1 %vm12474_vm3, %v12473_v10  ;;  %11710 = vmatprep.mubr.msk.bf16.mxu0 %vm12474_vm3, %v12473_v10  ;;  %v12302_v47 = vld [vmem:[#allocation3 + $0x5b0] sm:$0xff]  }
 0x373   :  { %v3706_v50 = vpop.f32.mrf.mxu0  ;;  %v2600_v56 = vpop.f32.mrf.mxu1 }
 0x374   :  { %11709 = vmatpush3.bf16.msra.mxu0 %v12280_v24  ;;  %11573 = vmatpush3.bf16.msra.mxu1 %v12279_v20  ;;  %v6182_v20 = vld [vmem:[#allocation2 + $0x48] sm:$0x1] }
 0x375   :  { %v11313_v63 = vpop.f32.mrf.mxu0  ;;  %11722 = vmatprep.subr.bf16.mxu0 %v12473_v10  ;;  %v11177_v1 = vpop.f32.mrf.mxu1  ;;  %11586 = vmatprep.subr.bf16.mxu1 %v12473_v10  ;;  %v12303_v56 = vld [vmem:[#allocation2 + $0x48] ss:$0 sps:$4 sm:$0x44]  }
 0x377   :  { %v3835_v51 = vpop.f32.mrf.mxu0  ;;  %11711 = vmatmul.mubr.msk.bf16.vlgmr.msra.gmra.mxu0 %vm932_vm0, %v6905_v54  ;;  %v2729_v57 = vpop.f32.mrf.mxu1  ;;  %11575 = vmatmul.mubr.msk.bf16.vlgmr.msra.gmra.mxu1 %vm932_vm0, %v5799_v59  ;;  %v12301_v54 = vld [vmem:[#allocation3 + $0x4a0] sm:$0xff]   ;;  %v12304_v59 = vld [vmem:[#allocation2 + $0x58] ss:$0 sps:$4 sm:$0x88]  }
 0x378   :  { %v3841_v43 = vadd.f32 %v3835_v51, %v3581_v61  ;;  %11723 = vmatpush3.bf16.msra.mxu0 %v12284_v60  ;;  %v2735_v8 = vadd.f32 %v2729_v57, %v2475_v3  ;;  %11587 = vmatpush3.bf16.msra.mxu1 %v12283_v25  ;;  %v12294_v61 = vld [vmem:[#allocation3 + $0x488] sm:$0xff]   ;;  %v12295_v3 = vld [vmem:[#allocation3 + $0x598] sm:$0xff]   ;;  %v6319_v57 = vrot.slane %v12303_v56, 2 }
 0x379   :  { %v11328_v11 = vpop.f32.mrf.mxu0  ;;  %11724 = vmatprep.subr.bf16.mxu0 %v12473_v10  ;;  %v11192_v27 = vpop.f32.mrf.mxu1  ;;  %11588 = vmatprep.subr.bf16.mxu1 %v12473_v10 }
 0x37a   :  { %11590 = vmatprep.mubr.msk.bf16.mxu1 %vm12474_vm3, %v12473_v10  ;;  %11726 = vmatprep.mubr.msk.bf16.mxu0 %vm12474_vm3, %v12473_v10  ;;  %v12305_v11 = vld [vmem:[#allocation3 + $0x4c8] sm:$0xff]  }
 0x37b   :  { %v3838_v53 = vpop.f32.mrf.mxu0  ;;  %v2732_v16 = vpop.f32.mrf.mxu1 }
 0x37c   :  { %11725 = vmatpush3.bf16.msra.mxu0 %v12286_v48  ;;  %11589 = vmatpush3.bf16.msra.mxu1 %v12285_v2  ;;  %v7425_v48 = vrot.slane %v12304_v59, 3  ;;  %v12322_v59 = vld [vmem:[#allocation3 + $0x638] sm:$0xff]  }
 0x37d   :  { %v11329_v23 = vpop.f32.mrf.mxu0  ;;  %11738 = vmatprep.subr.bf16.mxu0 %v12473_v10  ;;  %v11193_v19 = vpop.f32.mrf.mxu1  ;;  %11602 = vmatprep.subr.bf16.mxu1 %v12473_v10 }
 0x37e   :  { %v12307_v19 = vld [vmem:[#allocation3 + $0x4c0] sm:$0xff]  }
 0x37f   :  { %v3963_v36 = vpop.f32.mrf.mxu0  ;;  %11727 = vmatmul.mubr.msk.bf16.vlgmr.msra.gmra.mxu0 %vm932_vm0, %v7033_v14  ;;  %v2857_v37 = vpop.f32.mrf.mxu1  ;;  %11591 = vmatmul.mubr.msk.bf16.vlgmr.msra.gmra.mxu1 %vm932_vm0, %v5922_v44  ;;  %v12309_v44 = vld [vmem:[#allocation2 + $0x5c] ss:$0 sps:$4 sm:$0x22]  }
 0x380   :  { %v3969_v34 = vadd.f32 %v3963_v36, %v3709_v38  ;;  %11739 = vmatpush3.bf16.msra.mxu0 %v12289_v17  ;;  %v2863_v52 = vadd.f32 %v2857_v37, %v2603_v33  ;;  %11603 = vmatpush3.bf16.msra.mxu1 %v12288_v12  ;;  %v12300_v38 = vld [vmem:[#allocation3 + $0x5b8] sm:$0xff]   ;;  %v12308_v12 = vld [vmem:[#allocation3 + $0x5d0] sm:$0xff]  }
 0x381   :  { %v11344_v58 = vpop.f32.mrf.mxu0  ;;  %11740 = vmatprep.subr.bf16.mxu0 %v12473_v10  ;;  %v11208_v49 = vpop.f32.mrf.mxu1  ;;  %11604 = vmatprep.subr.bf16.mxu1 %v12473_v10 }
 0x382   :  { %11606 = vmatprep.mubr.msk.bf16.mxu1 %vm12474_vm3, %v12473_v10  ;;  %11742 = vmatprep.mubr.msk.bf16.mxu0 %vm12474_vm3, %v12473_v10 }
 0x383   :  { %v3966_v40 = vpop.f32.mrf.mxu0  ;;  %v2860_v0 = vpop.f32.mrf.mxu1 }
 0x384   :  { %11741 = vmatpush3.bf16.msra.mxu0 %v12291_v18  ;;  %11605 = vmatpush3.bf16.msra.mxu1 %v12290_v7  ;;  %v7553_v7 = vrot.slane %v12309_v44, 1  ;;  %v12315_v40 = vld [vmem:[#allocation2 + $0x5c] ss:$0 sps:$4 sm:$0x88]  }
 0x385   :  { %v11345_v22 = vpop.f32.mrf.mxu0  ;;  %11754 = vmatprep.subr.bf16.mxu0 %v12473_v10  ;;  %v11209_v13 = vpop.f32.mrf.mxu1  ;;  %11618 = vmatprep.subr.bf16.mxu1 %v12473_v10 }
 0x386   :  { %v12312_v13 = vld [vmem:[#allocation3 + $0x4e0] sm:$0xff]  }
 0x387   :  { %v4095_v21 = vpop.f32.mrf.mxu0  ;;  %11743 = vmatmul.mubr.msk.bf16.vlgmr.msra.gmra.mxu0 %vm932_vm0, %v7165_v55  ;;  %v2989_v39 = vpop.f32.mrf.mxu1  ;;  %11607 = vmatmul.mubr.msk.bf16.vlgmr.msra.gmra.mxu1 %vm932_vm0, %v6059_v6  ;;  %v12313_v6 = vld [vmem:[#allocation3 + $0x5f0] sm:$0xff]  }
 0x388   :  { %v4101_v26 = vadd.f32 %v4095_v21, %v3841_v43  ;;  %11755 = vmatpush3.bf16.msra.mxu0 %v12295_v3  ;;  %v2995_v35 = vadd.f32 %v2989_v39, %v2735_v8  ;;  %11619 = vmatpush3.bf16.msra.mxu1 %v12294_v61  ;;  %v12306_v43 = vld [vmem:[#allocation3 + $0x5d8] sm:$0xff]   ;;  %v12314_v61 = vld [vmem:[#allocation2 + $0x4c] ss:$0 sps:$4 sm:$0x44]  }
 0x389   :  { %v11360_v5 = vpop.f32.mrf.mxu0  ;;  %11756 = vmatprep.subr.bf16.mxu0 %v12473_v10  ;;  %v11224_v24 = vpop.f32.mrf.mxu1  ;;  %11620 = vmatprep.subr.bf16.mxu1 %v12473_v10  ;;  %v6579_v39 = vrot.slane %v12314_v61, 2 }
 0x38a   :  { %11622 = vmatprep.mubr.msk.bf16.mxu1 %vm12474_vm3, %v12473_v10  ;;  %11758 = vmatprep.mubr.msk.bf16.mxu0 %vm12474_vm3, %v12473_v10  ;;  %v12316_v5 = vld [vmem:[#allocation3 + $0x508] sm:$0xff]  }
 0x38b   :  { %v4098_v45 = vpop.f32.mrf.mxu0  ;;  %v2992_v32 = vpop.f32.mrf.mxu1 }
 0x38c   :  { %11757 = vmatpush3.bf16.msra.mxu0 %v12297_v15  ;;  %11621 = vmatpush3.bf16.msra.mxu1 %v12296_v9  ;;  %v7685_v15 = vrot.slane %v12315_v40, 3 }
 0x38d   :  { %v11361_v33 = vpop.f32.mrf.mxu0  ;;  %11770 = vmatprep.subr.bf16.mxu0 %v12473_v10  ;;  %v11225_v41 = vpop.f32.mrf.mxu1  ;;  %11634 = vmatprep.subr.bf16.mxu1 %v12473_v10 }
 0x38e   :  { %v12318_v41 = vld [vmem:[#allocation3 + $0x500] sm:$0xff]  }
 0x38f   :  { %v4223_v50 = vpop.f32.mrf.mxu0  ;;  %11759 = vmatmul.mubr.msk.bf16.vlgmr.msra.gmra.mxu0 %vm932_vm0, %v7293_v29  ;;  %v3117_v25 = vpop.f32.mrf.mxu1  ;;  %11623 = vmatmul.mubr.msk.bf16.vlgmr.msra.gmra.mxu1 %vm932_vm0, %v6182_v20  ;;  %v12320_v20 = vld [vmem:[#allocation2 + $0x60] ss:$0 sps:$4 sm:$0x22]  }
 0x390   :  { %v4229_v60 = vadd.f32 %v4223_v50, %v3969_v34  ;;  %11771 = vmatpush3.bf16.msra.mxu0 %v12300_v38  ;;  %v3123_v63 = vadd.f32 %v3117_v25, %v2863_v52  ;;  %11635 = vmatpush3.bf16.msra.mxu1 %v12299_v28  ;;  %v6442_v34 = vld [vmem:[#allocation2 + $0x4c] sm:$0x1]  ;;  %v12319_v28 = vld [vmem:[#allocation3 + $0x610] sm:$0xff]  }
 0x391   :  { %v11376_v1 = vpop.f32.mrf.mxu0  ;;  %11772 = vmatprep.subr.bf16.mxu0 %v12473_v10  ;;  %v11240_v51 = vpop.f32.mrf.mxu1  ;;  %11636 = vmatprep.subr.bf16.mxu1 %v12473_v10  ;;  %v12310_v52 = vld [vmem:[#allocation3 + $0x4e8] sm:$0xff]  }
 0x392   :  { %11638 = vmatprep.mubr.msk.bf16.mxu1 %vm12474_vm3, %v12473_v10  ;;  %11774 = vmatprep.mubr.msk.bf16.mxu0 %vm12474_vm3, %v12473_v10 }
 0x393   :  { %v4226_v2 = vpop.f32.mrf.mxu0  ;;  %v3120_v4 = vpop.f32.mrf.mxu1 }
 0x394   :  { %11773 = vmatpush3.bf16.msra.mxu0 %v12302_v47  ;;  %11637 = vmatpush3.bf16.msra.mxu1 %v12301_v54  ;;  %v7813_v54 = vrot.slane %v12320_v20, 1  ;;  %v12326_v2 = vld [vmem:[#allocation2 + $0x60] ss:$0 sps:$4 sm:$0x88]  }
 0x395   :  { %v11377_v8 = vpop.f32.mrf.mxu0  ;;  %11786 = vmatprep.subr.bf16.mxu0 %v12473_v10  ;;  %v11241_v27 = vpop.f32.mrf.mxu1  ;;  %11650 = vmatprep.subr.bf16.mxu1 %v12473_v10 }
 0x396   :  { %v12323_v27 = vld [vmem:[#allocation3 + $0x520] sm:$0xff]  }
 0x397   :  { %v4355_v53 = vpop.f32.mrf.mxu0  ;;  %11775 = vmatmul.mubr.msk.bf16.vlgmr.msra.gmra.mxu0 %vm932_vm0, %v7425_v48  ;;  %v3249_v14 = vpop.f32.mrf.mxu1  ;;  %11639 = vmatmul.mubr.msk.bf16.vlgmr.msra.gmra.mxu1 %vm932_vm0, %v6319_v57  ;;  %v12324_v57 = vld [vmem:[#allocation3 + $0x630] sm:$0xff]  }
 0x398   :  { %v4361_v16 = vadd.f32 %v4355_v53, %v4101_v26  ;;  %11787 = vmatpush3.bf16.msra.mxu0 %v12306_v43  ;;  %v3255_v17 = vadd.f32 %v3249_v14, %v2995_v35  ;;  %11651 = vmatpush3.bf16.msra.mxu1 %v12305_v11  ;;  %v12317_v26 = vld [vmem:[#allocation3 + $0x618] sm:$0xff]   ;;  %v12325_v43 = vld [vmem:[#allocation2 + $0x50] ss:$0 sps:$4 sm:$0x44]   ;;  %v7945_v14 = vrot.slane %v12326_v2, 3 }
 0x399   :  { %v11392_v23 = vpop.f32.mrf.mxu0  ;;  %11788 = vmatprep.subr.bf16.mxu0 %v12473_v10  ;;  %v11256_v18 = vpop.f32.mrf.mxu1  ;;  %11652 = vmatprep.subr.bf16.mxu1 %v12473_v10 }
 0x39a   :  { %11654 = vmatprep.mubr.msk.bf16.mxu1 %vm12474_vm3, %v12473_v10  ;;  %11790 = vmatprep.mubr.msk.bf16.mxu0 %vm12474_vm3, %v12473_v10 }
 0x39b   :  { %v4358_v36 = vpop.f32.mrf.mxu0  ;;  %v3252_v31 = vpop.f32.mrf.mxu1 }
 0x39c   :  { %11789 = vmatpush3.bf16.msra.mxu0 %v12308_v12  ;;  %11653 = vmatpush3.bf16.msra.mxu1 %v12307_v19  ;;  %v6839_v12 = vrot.slane %v12325_v43, 2  ;;  %v12327_v19 = vld [vmem:[#allocation3 + $0x548] sm:$0xff]  }
 0x39d   :  { %v11393_v37 = vpop.f32.mrf.mxu0  ;;  %11802 = vmatprep.subr.bf16.mxu0 %v12473_v10  ;;  %v11257_v58 = vpop.f32.mrf.mxu1  ;;  %11666 = vmatprep.subr.bf16.mxu1 %v12473_v10 }
 0x39e   :  { %v12330_v37 = vld [vmem:[#allocation3 + $0x650] sm:$0xff]   ;;  %v12329_v58 = vld [vmem:[#allocation3 + $0x540] sm:$0xff]  }
 0x39f   :  { %v4483_v49 = vpop.f32.mrf.mxu0  ;;  %11791 = vmatmul.mubr.msk.bf16.vlgmr.msra.gmra.mxu0 %vm932_vm0, %v7553_v7  ;;  %v3377_v55 = vpop.f32.mrf.mxu1  ;;  %11655 = vmatmul.mubr.msk.bf16.vlgmr.msra.gmra.mxu1 %vm932_vm0, %v6442_v34  ;;  %v12331_v7 = vld [vmem:[#allocation2 + $0x64] ss:$0 sps:$4 sm:$0x22]  }
 0x3a0   :  { %v4489_v0 = vadd.f32 %v4483_v49, %v4229_v60  ;;  %11803 = vmatpush3.bf16.msra.mxu0 %v12311_v46  ;;  %v3383_v3 = vadd.f32 %v3377_v55, %v3123_v63  ;;  %11667 = vmatpush3.bf16.msra.mxu1 %v12310_v52  ;;  %v6702_v60 = vld [vmem:[#allocation2 + $0x50] sm:$0x1]  ;;  %v12321_v63 = vld [vmem:[#allocation3 + $0x528] sm:$0xff]   ;;  %v8073_v55 = vrot.slane %v12331_v7, 1 }
 0x3a1   :  { %v11408_v22 = vpop.f32.mrf.mxu0  ;;  %11804 = vmatprep.subr.bf16.mxu0 %v12473_v10  ;;  %v11272_v21 = vpop.f32.mrf.mxu1  ;;  %11668 = vmatprep.subr.bf16.mxu1 %v12473_v10 }
 0x3a2   :  { %11670 = vmatprep.mubr.msk.bf16.mxu1 %vm12474_vm3, %v12473_v10  ;;  %11806 = vmatprep.mubr.msk.bf16.mxu0 %vm12474_vm3, %v12473_v10  ;;  %v12332_v22 = vld [vmem:[#allocation3 + $0x568] sm:$0xff]  }
 0x3a3   :  { %v4486_v9 = vpop.f32.mrf.mxu0  ;;  %v3380_v30 = vpop.f32.mrf.mxu1 }
 0x3a4   :  { %11805 = vmatpush3.bf16.msra.mxu0 %v12313_v6  ;;  %11669 = vmatpush3.bf16.msra.mxu1 %v12312_v13  ;;  %v12333_v6 = vld [vmem:[#allocation3 + $0x678] sm:$0xff]   ;;  %v12337_v9 = vld [vmem:[#allocation2 + $0x64] ss:$0 sps:$4 sm:$0x88]  }
 0x3a5   :  { %v11409_v35 = vpop.f32.mrf.mxu0  ;;  %11818 = vmatprep.subr.bf16.mxu0 %v12473_v10  ;;  %v11273_v24 = vpop.f32.mrf.mxu1  ;;  %11682 = vmatprep.subr.bf16.mxu1 %v12473_v10 }
 0x3a6   :  { %v12334_v24 = vld [vmem:[#allocation3 + $0x560] sm:$0xff]  }
 0x3a7   :  { %v4615_v45 = vpop.f32.mrf.mxu0  ;;  %11807 = vmatmul.mubr.msk.bf16.vlgmr.msra.gmra.mxu0 %vm932_vm0, %v7685_v15  ;;  %v3509_v29 = vpop.f32.mrf.mxu1  ;;  %11671 = vmatmul.mubr.msk.bf16.vlgmr.msra.gmra.mxu1 %vm932_vm0, %v6579_v39  ;;  %v12335_v39 = vld [vmem:[#allocation3 + $0x670] sm:$0xff]  }
 0x3a8   :  { %v4621_v32 = vadd.f32 %v4615_v45, %v4361_v16  ;;  %11819 = vmatpush3.bf16.msra.mxu0 %v12317_v26  ;;  %v3515_v38 = vadd.f32 %v3509_v29, %v3255_v17  ;;  %11683 = vmatpush3.bf16.msra.mxu1 %v12316_v5  ;;  %v12328_v17 = vld [vmem:[#allocation3 + $0x658] sm:$0xff]   ;;  %v12336_v26 = vld [vmem:[#allocation2 + $0x54] ss:$0 sps:$4 sm:$0x44]   ;;  %v8205_v29 = vrot.slane %v12337_v9, 3 }
 0x3a9   :  { %v11424_v33 = vpop.f32.mrf.mxu0  ;;  %11820 = vmatprep.subr.bf16.mxu0 %v12473_v10  ;;  %v11288_v47 = vpop.f32.mrf.mxu1  ;;  %11684 = vmatprep.subr.bf16.mxu1 %v12473_v10 }
 0x3aa   :  { %11686 = vmatprep.mubr.msk.bf16.mxu1 %vm12474_vm3, %v12473_v10  ;;  %11822 = vmatprep.mubr.msk.bf16.mxu0 %vm12474_vm3, %v12473_v10 }
 0x3ab   :  { %v4618_v50 = vpop.f32.mrf.mxu0  ;;  %v3512_v56 = vpop.f32.mrf.mxu1 }
 0x3ac   :  { %11821 = vmatpush3.bf16.msra.mxu0 %v12319_v28  ;;  %11685 = vmatpush3.bf16.msra.mxu1 %v12318_v41  ;;  %v7099_v28 = vrot.slane %v12336_v26, 2  ;;  %v12338_v41 = vld [vmem:[#allocation3 + $0x588] sm:$0xff]  }
 0x3ad   :  { %v11425_v25 = vpop.f32.mrf.mxu0  ;;  %11834 = vmatprep.subr.bf16.mxu0 %v12473_v10  ;;  %v11289_v1 = vpop.f32.mrf.mxu1  ;;  %11698 = vmatprep.subr.bf16.mxu1 %v12473_v10 }
 0x3ae   :  { %v12341_v25 = vld [vmem:[#allocation3 + $0x690] sm:$0xff]   ;;  %v12340_v1 = vld [vmem:[#allocation3 + $0x580] sm:$0xff]  }
 0x3af   :  { %v4743_v51 = vpop.f32.mrf.mxu0  ;;  %11823 = vmatmul.mubr.msk.bf16.vlgmr.msra.gmra.mxu0 %vm932_vm0, %v7813_v54  ;;  %v3637_v48 = vpop.f32.mrf.mxu1  ;;  %11687 = vmatmul.mubr.msk.bf16.vlgmr.msra.gmra.mxu1 %vm932_vm0, %v6702_v60  ;;  %v12342_v54 = vld [vmem:[#allocation2 + $0x68] ss:$0 sps:$4 sm:$0x22]  }
 0x3b0   :  { %v4749_v4 = vadd.f32 %v4743_v51, %v4489_v0  ;;  %11835 = vmatpush3.bf16.msra.mxu0 %v12322_v59  ;;  %v3643_v8 = vadd.f32 %v3637_v48, %v3383_v3  ;;  %11699 = vmatpush3.bf16.msra.mxu1 %v12321_v63  ;;  %v6962_v3 = vld [vmem:[#allocation2 + $0x54] sm:$0x1]  ;;  %v8333_v48 = vrot.slane %v12342_v54, 1 }
 0x3b1   :  { %v11440_v11 = vpop.f32.mrf.mxu0  ;;  %11836 = vmatprep.subr.bf16.mxu0 %v12473_v10  ;;  %v11304_v53 = vpop.f32.mrf.mxu1  ;;  %11700 = vmatprep.subr.bf16.mxu1 %v12473_v10 }
 0x3b2   :  { %11702 = vmatprep.mubr.msk.bf16.mxu1 %vm12474_vm3, %v12473_v10  ;;  %11838 = vmatprep.mubr.msk.bf16.mxu0 %vm12474_vm3, %v12473_v10  ;;  %v12343_v11 = vld [vmem:[#allocation3 + $0x5a8] sm:$0xff]  }
 0x3b3   :  { %v4746_v44 = vpop.f32.mrf.mxu0  ;;  %v3640_v16 = vpop.f32.mrf.mxu1 }
 0x3b4   :  { %11837 = vmatpush3.bf16.msra.mxu0 %v12324_v57  ;;  %11701 = vmatpush3.bf16.msra.mxu1 %v12323_v27  ;;  %v12344_v57 = vld [vmem:[#allocation3 + $0x6b8] sm:$0xff]   ;;  %v12348_v44 = vld [vmem:[#allocation2 + $0x68] ss:$0 sps:$4 sm:$0x88]  }
 0x3b5   :  { %v11441_v23 = vpop.f32.mrf.mxu0  ;;  %11850 = vmatprep.subr.bf16.mxu0 %v12473_v10  ;;  %v11305_v18 = vpop.f32.mrf.mxu1  ;;  %11714 = vmatprep.subr.bf16.mxu1 %v12473_v10 }
 0x3b6   :  { %v12345_v18 = vld [vmem:[#allocation3 + $0x5a0] sm:$0xff]  }
 0x3b7   :  { %v4875_v36 = vpop.f32.mrf.mxu0  ;;  %11839 = vmatmul.mubr.msk.bf16.vlgmr.msra.gmra.mxu0 %vm932_vm0, %v7945_v14  ;;  %v3769_v31 = vpop.f32.mrf.mxu1  ;;  %11703 = vmatmul.mubr.msk.bf16.vlgmr.msra.gmra.mxu1 %vm932_vm0, %v6839_v12  ;;  %v12346_v12 = vld [vmem:[#allocation3 + $0x6b0] sm:$0xff]  }
 0x3b8   :  { %v4881_v46 = vadd.f32 %v4875_v36, %v4621_v32  ;;  %11851 = vmatpush3.bf16.msra.mxu0 %v12328_v17  ;;  %v3775_v34 = vadd.f32 %v3769_v31, %v3515_v38  ;;  %11715 = vmatpush3.bf16.msra.mxu1 %v12327_v19  ;;  %v12339_v38 = vld [vmem:[#allocation3 + $0x698] sm:$0xff]   ;;  %v8465_v31 = vrot.slane %v12348_v44, 3 }
 0x3b9   :  { %v11456_v52 = vpop.f32.mrf.mxu0  ;;  %11852 = vmatprep.subr.bf16.mxu0 %v12473_v10  ;;  %v11320_v49 = vpop.f32.mrf.mxu1  ;;  %11716 = vmatprep.subr.bf16.mxu1 %v12473_v10  ;;  %v12347_v17 = vld [vmem:[#allocation2 + $0x58] ss:$0 sps:$4 sm:$0x44]  }
 0x3ba   :  { %11718 = vmatprep.mubr.msk.bf16.mxu1 %vm12474_vm3, %v12473_v10  ;;  %11854 = vmatprep.mubr.msk.bf16.mxu0 %vm12474_vm3, %v12473_v10 }
 0x3bb   :  { %v4878_v40 = vpop.f32.mrf.mxu0  ;;  %v3772_v0 = vpop.f32.mrf.mxu1 }
 0x3bc   :  { %11853 = vmatpush3.bf16.msra.mxu0 %v12330_v37  ;;  %11717 = vmatpush3.bf16.msra.mxu1 %v12329_v58  ;;  %v7359_v37 = vrot.slane %v12347_v17, 2  ;;  %v12349_v58 = vld [vmem:[#allocation3 + $0x5c8] sm:$0xff]  }
 0x3bd   :  { %v11457_v61 = vpop.f32.mrf.mxu0  ;;  %11866 = vmatprep.subr.bf16.mxu0 %v12473_v10  ;;  %v11321_v13 = vpop.f32.mrf.mxu1  ;;  %11730 = vmatprep.subr.bf16.mxu1 %v12473_v10 }
 0x3be   :  { %v12352_v61 = vld [vmem:[#allocation3 + $0x6d0] sm:$0xff]   ;;  %v12351_v13 = vld [vmem:[#allocation3 + $0x5c0] sm:$0xff]  }
 0x3bf   :  { %v5003_v21 = vpop.f32.mrf.mxu0  ;;  %11855 = vmatmul.mubr.msk.bf16.vlgmr.msra.gmra.mxu0 %vm932_vm0, %v8073_v55  ;;  %v3897_v15 = vpop.f32.mrf.mxu1  ;;  %11719 = vmatmul.mubr.msk.bf16.vlgmr.msra.gmra.mxu1 %vm932_vm0, %v6962_v3  ;;  %v12353_v55 = vld [vmem:[#allocation2 + $0x6c] ss:$0 sps:$4 sm:$0x22]  }
 0x3c0   :  { %v5009_v30 = vadd.f32 %v5003_v21, %v4749_v4  ;;  %11867 = vmatpush3.bf16.msra.mxu0 %v12333_v6  ;;  %v3903_v35 = vadd.f32 %v3897_v15, %v3643_v8  ;;  %11731 = vmatpush3.bf16.msra.mxu1 %v12332_v22  ;;  %v7222_v8 = vld [vmem:[#allocation2 + $0x58] sm:$0x1]  ;;  %v8593_v15 = vrot.slane %v12353_v55, 1 }
 0x3c1   :  { %v11472_v5 = vpop.f32.mrf.mxu0  ;;  %11868 = vmatprep.subr.bf16.mxu0 %v12473_v10  ;;  %v11336_v45 = vpop.f32.mrf.mxu1  ;;  %11732 = vmatprep.subr.bf16.mxu1 %v12473_v10 }
 0x3c2   :  { %11734 = vmatprep.mubr.msk.bf16.mxu1 %vm12474_vm3, %v12473_v10  ;;  %11870 = vmatprep.mubr.msk.bf16.mxu0 %vm12474_vm3, %v12473_v10  ;;  %v12354_v5 = vld [vmem:[#allocation3 + $0x5e8] sm:$0xff]  }
 0x3c3   :  { %v5006_v20 = vpop.f32.mrf.mxu0  ;;  %v3900_v32 = vpop.f32.mrf.mxu1 }
 0x3c4   :  { %11869 = vmatpush3.bf16.msra.mxu0 %v12335_v39  ;;  %11733 = vmatpush3.bf16.msra.mxu1 %v12334_v24  ;;  %v12355_v39 = vld [vmem:[#allocation3 + $0x6f8] sm:$0xff]   ;;  %v12359_v20 = vld [vmem:[#allocation2 + $0x6c] ss:$0 sps:$4 sm:$0x88]  }
 0x3c5   :  { %v11473_v33 = vpop.f32.mrf.mxu0  ;;  %11882 = vmatprep.subr.bf16.mxu0 %v12473_v10  ;;  %v11337_v47 = vpop.f32.mrf.mxu1  ;;  %11746 = vmatprep.subr.bf16.mxu1 %v12473_v10 }
 0x3c6   :  { %v12356_v47 = vld [vmem:[#allocation3 + $0x5e0] sm:$0xff]  }
 0x3c7   :  { %v5135_v50 = vpop.f32.mrf.mxu0  ;;  %11871 = vmatmul.mubr.msk.bf16.vlgmr.msra.gmra.mxu0 %vm932_vm0, %v8205_v29  ;;  %v4029_v56 = vpop.f32.mrf.mxu1  ;;  %11735 = vmatmul.mubr.msk.bf16.vlgmr.msra.gmra.mxu1 %vm932_vm0, %v7099_v28  ;;  %v12357_v28 = vld [vmem:[#allocation3 + $0x6f0] sm:$0xff]  }
 0x3c8   :  { %v5141_v59 = vadd.f32 %v5135_v50, %v4881_v46  ;;  %11883 = vmatpush3.bf16.msra.mxu0 %v12339_v38  ;;  %v4035_v60 = vadd.f32 %v4029_v56, %v3775_v34  ;;  %11747 = vmatpush3.bf16.msra.mxu1 %v12338_v41  ;;  %v12350_v34 = vld [vmem:[#allocation3 + $0x6d8] sm:$0xff]   ;;  %v8725_v56 = vrot.slane %v12359_v20, 3 }
 0x3c9   :  { %v11488_v63 = vpop.f32.mrf.mxu0  ;;  %11884 = vmatprep.subr.bf16.mxu0 %v12473_v10  ;;  %v11352_v51 = vpop.f32.mrf.mxu1  ;;  %11748 = vmatprep.subr.bf16.mxu1 %v12473_v10  ;;  %v12358_v38 = vld [vmem:[#allocation2 + $0x5c] ss:$0 sps:$4 sm:$0x44]  }
 0x3ca   :  { %11750 = vmatprep.mubr.msk.bf16.mxu1 %vm12474_vm3, %v12473_v10  ;;  %11886 = vmatprep.mubr.msk.bf16.mxu0 %vm12474_vm3, %v12473_v10 }
 0x3cb   :  { %v5138_v2 = vpop.f32.mrf.mxu0  ;;  %v4032_v4 = vpop.f32.mrf.mxu1 }
 0x3cc   :  { %11885 = vmatpush3.bf16.msra.mxu0 %v12341_v25  ;;  %11749 = vmatpush3.bf16.msra.mxu1 %v12340_v1  ;;  %v7619_v25 = vrot.slane %v12358_v38, 2  ;;  %v12360_v1 = vld [vmem:[#allocation3 + $0x608] sm:$0xff]  }
 0x3cd   :  { %v11489_v43 = vpop.f32.mrf.mxu0  ;;  %11898 = vmatprep.subr.bf16.mxu0 %v12473_v10  ;;  %v11353_v27 = vpop.f32.mrf.mxu1  ;;  %11762 = vmatprep.subr.bf16.mxu1 %v12473_v10 }
 0x3ce   :  { %v12363_v43 = vld [vmem:[#allocation3 + $0x710] sm:$0xff]   ;;  %v12362_v27 = vld [vmem:[#allocation3 + $0x600] sm:$0xff]  }
 0x3cf   :  { %v5263_v53 = vpop.f32.mrf.mxu0  ;;  %11887 = vmatmul.mubr.msk.bf16.vlgmr.msra.gmra.mxu0 %vm932_vm0, %v8333_v48  ;;  %v4157_v14 = vpop.f32.mrf.mxu1  ;;  %11751 = vmatmul.mubr.msk.bf16.vlgmr.msra.gmra.mxu1 %vm932_vm0, %v7222_v8  ;;  %v12364_v48 = vld [vmem:[#allocation2 + $0x70] ss:$0 sps:$4 sm:$0x22]  }
 0x3d0   :  { %v5269_v16 = vadd.f32 %v5263_v53, %v5009_v30  ;;  %11899 = vmatpush3.bf16.msra.mxu0 %v12344_v57  ;;  %v4163_v23 = vadd.f32 %v4157_v14, %v3903_v35  ;;  %11763 = vmatpush3.bf16.msra.mxu1 %v12343_v11  ;;  %v7482_v35 = vld [vmem:[#allocation2 + $0x5c] sm:$0x1]  ;;  %v8853_v14 = vrot.slane %v12364_v48, 1 }
 0x3d1   :  { %v11504_v19 = vpop.f32.mrf.mxu0  ;;  %11900 = vmatprep.subr.bf16.mxu0 %v12473_v10  ;;  %v11368_v36 = vpop.f32.mrf.mxu1  ;;  %11764 = vmatprep.subr.bf16.mxu1 %v12473_v10 }
 0x3d2   :  { %11766 = vmatprep.mubr.msk.bf16.mxu1 %vm12474_vm3, %v12473_v10  ;;  %11902 = vmatprep.mubr.msk.bf16.mxu0 %vm12474_vm3, %v12473_v10  ;;  %v12365_v19 = vld [vmem:[#allocation3 + $0x628] sm:$0xff]  }
 0x3d3   :  { %v5266_v7 = vpop.f32.mrf.mxu0  ;;  %v4160_v46 = vpop.f32.mrf.mxu1 }
 0x3d4   :  { %11901 = vmatpush3.bf16.msra.mxu0 %v12346_v12  ;;  %11765 = vmatpush3.bf16.msra.mxu1 %v12345_v18  ;;  %v12366_v12 = vld [vmem:[#allocation3 + $0x738] sm:$0xff]   ;;  %v12370_v7 = vld [vmem:[#allocation2 + $0x70] ss:$0 sps:$4 sm:$0x88]  }
 0x3d5   :  { %v11505_v52 = vpop.f32.mrf.mxu0  ;;  %11914 = vmatprep.subr.bf16.mxu0 %v12473_v10  ;;  %v11369_v49 = vpop.f32.mrf.mxu1  ;;  %11778 = vmatprep.subr.bf16.mxu1 %v12473_v10 }
 0x3d6   :  { %v12367_v49 = vld [vmem:[#allocation3 + $0x620] sm:$0xff]  }
 0x3d7   :  { %v5395_v40 = vpop.f32.mrf.mxu0  ;;  %11903 = vmatmul.mubr.msk.bf16.vlgmr.msra.gmra.mxu0 %vm932_vm0, %v8465_v31  ;;  %v4289_v0 = vpop.f32.mrf.mxu1  ;;  %11767 = vmatmul.mubr.msk.bf16.vlgmr.msra.gmra.mxu1 %vm932_vm0, %v7359_v37  ;;  %v12368_v37 = vld [vmem:[#allocation3 + $0x730] sm:$0xff]  }
 0x3d8   :  { %v5401_v6 = vadd.f32 %v5395_v40, %v5141_v59  ;;  %11915 = vmatpush3.bf16.msra.mxu0 %v12350_v34  ;;  %v4295_v3 = vadd.f32 %v4289_v0, %v4035_v60  ;;  %11779 = vmatpush3.bf16.msra.mxu1 %v12349_v58  ;;  %v12361_v60 = vld [vmem:[#allocation3 + $0x718] sm:$0xff]   ;;  %v12369_v34 = vld [vmem:[#allocation2 + $0x60] ss:$0 sps:$4 sm:$0x44]   ;;  %v8985_v0 = vrot.slane %v12370_v7, 3 }
 0x3d9   :  { %v11520_v22 = vpop.f32.mrf.mxu0  ;;  %11916 = vmatprep.subr.bf16.mxu0 %v12473_v10  ;;  %v11384_v21 = vpop.f32.mrf.mxu1  ;;  %11780 = vmatprep.subr.bf16.mxu1 %v12473_v10 }
 0x3da   :  { %11782 = vmatprep.mubr.msk.bf16.mxu1 %vm12474_vm3, %v12473_v10  ;;  %11918 = vmatprep.mubr.msk.bf16.mxu0 %vm12474_vm3, %v12473_v10 }
 0x3db   :  { %v5398_v9 = vpop.f32.mrf.mxu0  ;;  %v4292_v30 = vpop.f32.mrf.mxu1 }
 0x3dc   :  { %11917 = vmatpush3.bf16.msra.mxu0 %v12352_v61  ;;  %11781 = vmatpush3.bf16.msra.mxu1 %v12351_v13  ;;  %v7879_v61 = vrot.slane %v12369_v34, 2  ;;  %v12371_v13 = vld [vmem:[#allocation3 + $0x648] sm:$0xff]  }
 0x3dd   :  { %v11521_v26 = vpop.f32.mrf.mxu0  ;;  %11930 = vmatprep.subr.bf16.mxu0 %v12473_v10  ;;  %v11385_v24 = vpop.f32.mrf.mxu1  ;;  %11794 = vmatprep.subr.bf16.mxu1 %v12473_v10 }
 0x3de   :  { %v12374_v26 = vld [vmem:[#allocation3 + $0x750] sm:$0xff]   ;;  %v12373_v24 = vld [vmem:[#allocation3 + $0x640] sm:$0xff]  }
 0x3df   :  { %v5523_v45 = vpop.f32.mrf.mxu0  ;;  %11919 = vmatmul.mubr.msk.bf16.vlgmr.msra.gmra.mxu0 %vm932_vm0, %v8593_v15  ;;  %v4417_v29 = vpop.f32.mrf.mxu1  ;;  %11783 = vmatmul.mubr.msk.bf16.vlgmr.msra.gmra.mxu1 %vm932_vm0, %v7482_v35  ;;  %v12375_v15 = vld [vmem:[#allocation2 + $0x74] ss:$0 sps:$4 sm:$0x22]  }
 0x3e0   :  { %v5529_v32 = vadd.f32 %v5523_v45, %v5269_v16  ;;  %11931 = vmatpush3.bf16.msra.mxu0 %v12355_v39  ;;  %v4423_v33 = vadd.f32 %v4417_v29, %v4163_v23  ;;  %11795 = vmatpush3.bf16.msra.mxu1 %v12354_v5  ;;  %v7742_v23 = vld [vmem:[#allocation2 + $0x60] sm:$0x1]  ;;  %v9113_v29 = vrot.slane %v12375_v15, 1 }
 0x3e1   :  { %v11536_v41 = vpop.f32.mrf.mxu0  ;;  %11932 = vmatprep.subr.bf16.mxu0 %v12473_v10  ;;  %v11400_v50 = vpop.f32.mrf.mxu1  ;;  %11796 = vmatprep.subr.bf16.mxu1 %v12473_v10 }
 0x3e2   :  { %11798 = vmatprep.mubr.msk.bf16.mxu1 %vm12474_vm3, %v12473_v10  ;;  %11934 = vmatprep.mubr.msk.bf16.mxu0 %vm12474_vm3, %v12473_v10  ;;  %v12376_v41 = vld [vmem:[#allocation3 + $0x668] sm:$0xff]  }
 0x3e3   :  { %v5526_v54 = vpop.f32.mrf.mxu0  ;;  %v4420_v59 = vpop.f32.mrf.mxu1 }
 0x3e4   :  { %11933 = vmatpush3.bf16.msra.mxu0 %v12357_v28  ;;  %11797 = vmatpush3.bf16.msra.mxu1 %v12356_v47  ;;  %v12377_v28 = vld [vmem:[#allocation3 + $0x778] sm:$0xff]   ;;  %v12381_v54 = vld [vmem:[#allocation2 + $0x74] ss:$0 sps:$4 sm:$0x88]  }
 0x3e5   :  { %v11537_v63 = vpop.f32.mrf.mxu0  ;;  %11946 = vmatprep.subr.bf16.mxu0 %v12473_v10  ;;  %v11401_v51 = vpop.f32.mrf.mxu1  ;;  %11810 = vmatprep.subr.bf16.mxu1 %v12473_v10 }
 0x3e6   :  { %v12378_v51 = vld [vmem:[#allocation3 + $0x660] sm:$0xff]  }
 0x3e7   :  { %v5655_v2 = vpop.f32.mrf.mxu0  ;;  %11935 = vmatmul.mubr.msk.bf16.vlgmr.msra.gmra.mxu0 %vm932_vm0, %v8725_v56  ;;  %v4549_v4 = vpop.f32.mrf.mxu1  ;;  %11799 = vmatmul.mubr.msk.bf16.vlgmr.msra.gmra.mxu1 %vm932_vm0, %v7619_v25  ;;  %v12379_v25 = vld [vmem:[#allocation3 + $0x770] sm:$0xff]  }
 0x3e8   :  { %v5661_v57 = vadd.f32 %v5655_v2, %v5401_v6  ;;  %11947 = vmatpush3.bf16.msra.mxu0 %v12361_v60  ;;  %v4555_v8 = vadd.f32 %v4549_v4, %v4295_v3  ;;  %11811 = vmatpush3.bf16.msra.mxu1 %v12360_v1  ;;  %v12372_v3 = vld [vmem:[#allocation3 + $0x758] sm:$0xff]   ;;  %v12380_v60 = vld [vmem:[#allocation2 + $0x64] ss:$0 sps:$4 sm:$0x44]   ;;  %v9245_v4 = vrot.slane %v12381_v54, 3 }
 0x3e9   :  { %v11552_v11 = vpop.f32.mrf.mxu0  ;;  %11948 = vmatprep.subr.bf16.mxu0 %v12473_v10  ;;  %v11416_v53 = vpop.f32.mrf.mxu1  ;;  %11812 = vmatprep.subr.bf16.mxu1 %v12473_v10  ;;  %v8522_v54 = vld [vmem:[#allocation2 + $0x6c] sm:$0x1] }
 0x3ea   :  { %11814 = vmatprep.mubr.msk.bf16.mxu1 %vm12474_vm3, %v12473_v10  ;;  %11950 = vmatprep.mubr.msk.bf16.mxu0 %vm12474_vm3, %v12473_v10 }
 0x3eb   :  { %v5658_v44 = vpop.f32.mrf.mxu0  ;;  %v4552_v16 = vpop.f32.mrf.mxu1 }
 0x3ec   :  { %11949 = vmatpush3.bf16.msra.mxu0 %v12363_v43  ;;  %11813 = vmatpush3.bf16.msra.mxu1 %v12362_v27  ;;  %v8139_v43 = vrot.slane %v12380_v60, 2  ;;  %v12382_v27 = vld [vmem:[#allocation3 + $0x688] sm:$0xff]  }
 0x3ed   :  { %v11553_v17 = vpop.f32.mrf.mxu0  ;;  %11962 = vmatprep.subr.bf16.mxu0 %v12473_v10  ;;  %v11417_v18 = vpop.f32.mrf.mxu1  ;;  %11826 = vmatprep.subr.bf16.mxu1 %v12473_v10 }
 0x3ee   :  { %v12385_v17 = vld [vmem:[#allocation3 + $0x790] sm:$0xff]   ;;  %v12384_v18 = vld [vmem:[#allocation3 + $0x680] sm:$0xff]  }
 0x3ef   :  { %v5783_v36 = vpop.f32.mrf.mxu0  ;;  %11951 = vmatmul.mubr.msk.bf16.vlgmr.msra.gmra.mxu0 %vm932_vm0, %v8853_v14  ;;  %v4677_v31 = vpop.f32.mrf.mxu1  ;;  %11815 = vmatmul.mubr.msk.bf16.vlgmr.msra.gmra.mxu1 %vm932_vm0, %v7742_v23  ;;  %v12386_v14 = vld [vmem:[#allocation2 + $0x78] ss:$0 sps:$4 sm:$0x22]  }
 0x3f0   :  { %v5789_v46 = vadd.f32 %v5783_v36, %v5529_v32  ;;  %11963 = vmatpush3.bf16.msra.mxu0 %v12366_v12  ;;  %v4683_v52 = vadd.f32 %v4677_v31, %v4423_v33  ;;  %11827 = vmatpush3.bf16.msra.mxu1 %v12365_v19  ;;  %v8002_v33 = vld [vmem:[#allocation2 + $0x64] sm:$0x1]  ;;  %v9373_v31 = vrot.slane %v12386_v14, 1 }
 0x3f1   :  { %v11568_v58 = vpop.f32.mrf.mxu0  ;;  %11964 = vmatprep.subr.bf16.mxu0 %v12473_v10  ;;  %v11432_v40 = vpop.f32.mrf.mxu1  ;;  %11828 = vmatprep.subr.bf16.mxu1 %v12473_v10 }
 0x3f2   :  { %11830 = vmatprep.mubr.msk.bf16.mxu1 %vm12474_vm3, %v12473_v10  ;;  %11966 = vmatprep.mubr.msk.bf16.mxu0 %vm12474_vm3, %v12473_v10  ;;  %v12387_v58 = vld [vmem:[#allocation3 + $0x6a8] sm:$0xff]  }
 0x3f3   :  { %v5786_v55 = vpop.f32.mrf.mxu0  ;;  %v4680_v6 = vpop.f32.mrf.mxu1 }
 0x3f4   :  { %11965 = vmatpush3.bf16.msra.mxu0 %v12368_v37  ;;  %11829 = vmatpush3.bf16.msra.mxu1 %v12367_v49  ;;  %v12388_v37 = vld [vmem:[#allocation3 + $0x7b8] sm:$0xff]  }
 0x3f5   :  { %v11569_v22 = vpop.f32.mrf.mxu0  ;;  %11978 = vmatprep.subr.bf16.mxu0 %v12473_v10  ;;  %v11433_v21 = vpop.f32.mrf.mxu1  ;;  %11842 = vmatprep.subr.bf16.mxu1 %v12473_v10  ;;  %v12392_v55 = vld [vmem:[#allocation2 + $0x78] ss:$0 sps:$4 sm:$0x88]  }
 0x3f6   :  { %v12389_v21 = vld [vmem:[#allocation3 + $0x6a0] sm:$0xff]  }
 0x3f7   :  { %v5915_v9 = vpop.f32.mrf.mxu0  ;;  %11967 = vmatmul.mubr.msk.bf16.vlgmr.msra.gmra.mxu0 %vm932_vm0, %v8985_v0  ;;  %v4809_v30 = vpop.f32.mrf.mxu1  ;;  %11831 = vmatmul.mubr.msk.bf16.vlgmr.msra.gmra.mxu1 %vm932_vm0, %v7879_v61  ;;  %v12390_v61 = vld [vmem:[#allocation3 + $0x7b0] sm:$0xff]  }
 0x3f8   :  { %v5921_v39 = vadd.f32 %v5915_v9, %v5661_v57  ;;  %11979 = vmatpush3.bf16.msra.mxu0 %v12372_v3  ;;  %v4815_v35 = vadd.f32 %v4809_v30, %v4555_v8  ;;  %11843 = vmatpush3.bf16.msra.mxu1 %v12371_v13  ;;  %v12383_v8 = vld [vmem:[#allocation3 + $0x798] sm:$0xff]   ;;  %v12391_v3 = vld [vmem:[#allocation2 + $0x68] ss:$0 sps:$4 sm:$0x44]   ;;  %v9505_v30 = vrot.slane %v12392_v55, 3 }
 0x3f9   :  { %v11584_v5 = vpop.f32.mrf.mxu0  ;;  %11980 = vmatprep.subr.bf16.mxu0 %v12473_v10  ;;  %v11448_v45 = vpop.f32.mrf.mxu1  ;;  %11844 = vmatprep.subr.bf16.mxu1 %v12473_v10 }
 0x3fa   :  { %11846 = vmatprep.mubr.msk.bf16.mxu1 %vm12474_vm3, %v12473_v10  ;;  %11982 = vmatprep.mubr.msk.bf16.mxu0 %vm12474_vm3, %v12473_v10  ;;  %v12393_v5 = vld [vmem:[#allocation3 + $0x6c8] sm:$0xff]  }
 0x3fb   :  { %v5918_v20 = vpop.f32.mrf.mxu0  ;;  %v4812_v32 = vpop.f32.mrf.mxu1 }
 0x3fc   :  { %11981 = vmatpush3.bf16.msra.mxu0 %v12374_v26  ;;  %11845 = vmatpush3.bf16.msra.mxu1 %v12373_v24  ;;  %v8399_v26 = vrot.slane %v12391_v3, 2 }
 0x3fd   :  { %v11585_v38 = vpop.f32.mrf.mxu0  ;;  %11994 = vmatprep.subr.bf16.mxu0 %v12473_v10  ;;  %v11449_v47 = vpop.f32.mrf.mxu1  ;;  %11858 = vmatprep.subr.bf16.mxu1 %v12473_v10 }
 0x3fe   :  { %v12394_v38 = vld [vmem:[#allocation3 + $0x6c0] sm:$0xff]  }
 0x3ff   :  { %v6043_v50 = vpop.f32.mrf.mxu0  ;;  %11983 = vmatmul.mubr.msk.bf16.vlgmr.msra.gmra.mxu0 %vm932_vm0, %v9113_v29  ;;  %v4937_v56 = vpop.f32.mrf.mxu1  ;;  %11847 = vmatmul.mubr.msk.bf16.vlgmr.msra.gmra.mxu1 %vm932_vm0, %v8002_v33 }
 0x400   :  { %v6049_v59 = vadd.f32 %v6043_v50, %v5789_v46  ;;  %11995 = vmatpush3.bf16.msra.mxu0 %v12377_v28  ;;  %v4943_v63 = vadd.f32 %v4937_v56, %v4683_v52  ;;  %11859 = vmatpush3.bf16.msra.mxu1 %v12376_v41  ;;  %v8262_v52 = vld [vmem:[#allocation2 + $0x68] sm:$0x1] }
 0x401   :  { %v11600_v1 = vpop.f32.mrf.mxu0  ;;  %11996 = vmatprep.subr.bf16.mxu0 %v12473_v10  ;;  %v11464_v2 = vpop.f32.mrf.mxu1  ;;  %11860 = vmatprep.subr.bf16.mxu1 %v12473_v10  ;;  %v12395_v56 = vld [vmem:[#allocation3 + $0x6e8] sm:$0xff]  }
 0x402   :  { %11862 = vmatprep.mubr.msk.bf16.mxu1 %vm12474_vm3, %v12473_v10  ;;  %11998 = vmatprep.mubr.msk.bf16.mxu0 %vm12474_vm3, %v12473_v10  ;;  %v12397_v1 = vld [vmem:[#allocation2 + $0x6c] ss:$0 sps:$4 sm:$0x44]  }
 0x403   :  { %v6046_v48 = vpop.f32.mrf.mxu0  ;;  %v4940_v57 = vpop.f32.mrf.mxu1 }
 0x404   :  { %11997 = vmatpush3.bf16.msra.mxu0 %v12379_v25  ;;  %11861 = vmatpush3.bf16.msra.mxu1 %v12378_v51  ;;  %v12396_v48 = vld [vmem:[#allocation3 + $0x6e0] sm:$0xff]  }
 0x405   :  { %v11601_v11 = vpop.f32.mrf.mxu0  ;;  %12010 = vmatprep.subr.bf16.mxu0 %v12473_v10  ;;  %v11465_v53 = vpop.f32.mrf.mxu1  ;;  %11874 = vmatprep.subr.bf16.mxu1 %v12473_v10 }
 0x407   :  { %v6175_v44 = vpop.f32.mrf.mxu0  ;;  %11999 = vmatmul.mubr.msk.bf16.vlgmr.msra.gmra.mxu0 %vm932_vm0, %v9245_v4  ;;  %v5069_v16 = vpop.f32.mrf.mxu1  ;;  %11863 = vmatmul.mubr.msk.bf16.vlgmr.msra.gmra.mxu1 %vm932_vm0, %v8139_v43 }
 0x408   :  { %v6181_v12 = vadd.f32 %v6175_v44, %v5921_v39  ;;  %12011 = vmatpush3.bf16.msra.mxu0 %v12383_v8  ;;  %v5075_v23 = vadd.f32 %v5069_v16, %v4815_v35  ;;  %11875 = vmatpush3.bf16.msra.mxu1 %v12382_v27  ;;  %v8659_v8 = vrot.slane %v12397_v1, 2  ;;  %v12398_v27 = vld [vmem:[#allocation3 + $0x708] sm:$0xff]  }
 0x409   :  { %v11616_v19 = vpop.f32.mrf.mxu0  ;;  %12012 = vmatprep.subr.bf16.mxu0 %v12473_v10  ;;  %v11480_v36 = vpop.f32.mrf.mxu1  ;;  %11876 = vmatprep.subr.bf16.mxu1 %v12473_v10 }
 0x40a   :  { %11878 = vmatprep.mubr.msk.bf16.mxu1 %vm12474_vm3, %v12473_v10  ;;  %12014 = vmatprep.mubr.msk.bf16.mxu0 %vm12474_vm3, %v12473_v10 }
 0x40b   :  { %v6178_v7 = vpop.f32.mrf.mxu0  ;;  %v5072_v46 = vpop.f32.mrf.mxu1 }
 0x40c   :  { %12013 = vmatpush3.bf16.msra.mxu0 %v12385_v17  ;;  %11877 = vmatpush3.bf16.msra.mxu1 %v12384_v18  ;;  %v12400_v46 = vld [vmem:[#allocation3 + $0x728] sm:$0xff]  }
 0x40d   :  { %v11617_v34 = vpop.f32.mrf.mxu0  ;;  %12026 = vmatprep.subr.bf16.mxu0 %v12473_v10  ;;  %v11481_v49 = vpop.f32.mrf.mxu1  ;;  %11890 = vmatprep.subr.bf16.mxu1 %v12473_v10 }
 0x40e   :  { %v12402_v49 = vld [vmem:[#allocation2 + $0x70] ss:$0 sps:$4 sm:$0x44]  }
 0x40f   :  { %v6303_v40 = vpop.f32.mrf.mxu0  ;;  %12015 = vmatmul.mubr.msk.bf16.vlgmr.msra.gmra.mxu0 %vm932_vm0, %v9373_v31  ;;  %v5197_v0 = vpop.f32.mrf.mxu1  ;;  %11879 = vmatmul.mubr.msk.bf16.vlgmr.msra.gmra.mxu1 %vm932_vm0, %v8262_v52  ;;  %v8782_v31 = vld [vmem:[#allocation2 + $0x70] sm:$0x1] }
 0x410   :  { %v6309_v6 = vadd.f32 %v6303_v40, %v6049_v59  ;;  %12027 = vmatpush3.bf16.msra.mxu0 %v12388_v37  ;;  %v5203_v22 = vadd.f32 %v5197_v0, %v4943_v63  ;;  %11891 = vmatpush3.bf16.msra.mxu1 %v12387_v58  ;;  %v12401_v0 = vld [vmem:[#allocation3 + $0x720] sm:$0xff]  }
 0x411   :  { %v11632_v13 = vpop.f32.mrf.mxu0  ;;  %12028 = vmatprep.subr.bf16.mxu0 %v12473_v10  ;;  %v11496_v9 = vpop.f32.mrf.mxu1  ;;  %11892 = vmatprep.subr.bf16.mxu1 %v12473_v10 }
 0x412   :  { %11894 = vmatprep.mubr.msk.bf16.mxu1 %vm12474_vm3, %v12473_v10  ;;  %12030 = vmatprep.mubr.msk.bf16.mxu0 %vm12474_vm3, %v12473_v10 }
 0x413   :  { %v6306_v15 = vpop.f32.mrf.mxu0  ;;  %v5200_v39 = vpop.f32.mrf.mxu1 }
 0x414   :  { %12029 = vmatpush3.bf16.msra.mxu0 %v12390_v61  ;;  %11893 = vmatpush3.bf16.msra.mxu1 %v12389_v21  ;;  %v12403_v21 = vld [vmem:[#allocation3 + $0x748] sm:$0xff]  }
 0x415   :  { %v11633_v35 = vpop.f32.mrf.mxu0  ;;  %v11497_v24 = vpop.f32.mrf.mxu1  ;;  %11906 = vmatprep.subr.bf16.mxu1 %v12473_v10 }
 0x417   :  { %v6435_v45 = vpop.f32.mrf.mxu0  ;;  %12031 = vmatmul.mubr.msk.bf16.vlgmr.msra.gmra.mxu0 %vm932_vm0, %v9505_v30  ;;  %v5329_v20 = vpop.f32.mrf.mxu1  ;;  %11895 = vmatmul.mubr.msk.bf16.vlgmr.msra.gmra.mxu1 %vm932_vm0, %v8399_v26 }
 0x418   :  { %v6441_v29 = vadd.f32 %v6435_v45, %v6181_v12  ;;  %v5335_v32 = vadd.f32 %v5329_v20, %v5075_v23  ;;  %11907 = vmatpush3.bf16.msra.mxu1 %v12393_v5  ;;  %11910 = vmatprep.mubr.msk.bf16.mxu1 %vm12474_vm3, %v12473_v10  ;;  %v12399_v23 = vld [vmem:[#allocation3 + $0x700] sm:$0xff]  }
 0x419   :  { %v11648_v28 = vpop.f32.mrf.mxu0  ;;  %v11512_v33 = vpop.f32.mrf.mxu1  ;;  %11908 = vmatprep.subr.bf16.mxu1 %v12473_v10  ;;  %v12404_v5 = vld [vmem:[#allocation3 + $0x740] sm:$0xff]  }
 0x41a   :  { %v12405_v28 = vld [vmem:[#allocation3 + $0x768] sm:$0xff]  }
 0x41b   :  { %v6438_v41 = vpop.f32.mrf.mxu0  ;;  %v5332_v47 = vpop.f32.mrf.mxu1 }
 0x41c   :  { %11909 = vmatpush3.bf16.msra.mxu1 %v12394_v38 }
 0x41d   :  { %v11649_v50 = vpop.f32.mrf.mxu0  ;;  %v11513_v59 = vpop.f32.mrf.mxu1  ;;  %11922 = vmatprep.subr.bf16.mxu1 %v12473_v10 }
 0x41e   :  { %v12407_v50 = vld [vmem:[#allocation2 + $0x74] ss:$0 sps:$4 sm:$0x44]   ;;  %v12406_v59 = vld [vmem:[#allocation3 + $0x760] sm:$0xff]  }
 0x41f   :  { %v6563_v25 = vpop.f32.mrf.mxu0  ;;  %v5457_v60 = vpop.f32.mrf.mxu1  ;;  %11911 = vmatmul.mubr.msk.bf16.vlgmr.msra.gmra.mxu1 %vm932_vm0, %v8522_v54  ;;  %v9179_v1 = vrot.slane %v12407_v50, 2 }
 0x420   :  { %v6569_v63 = vadd.f32 %v6563_v25, %v6309_v6  ;;  %v5463_v51 = vadd.f32 %v5457_v60, %v5203_v22  ;;  %11923 = vmatpush3.bf16.msra.mxu1 %v12395_v56  ;;  %11926 = vmatprep.mubr.msk.bf16.mxu1 %vm12474_vm3, %v12473_v10  ;;  %v8919_v22 = vrot.slane %v12402_v49, 2 }
 0x421   :  { %v11664_v2 = vpop.f32.mrf.mxu0  ;;  %v11528_v4 = vpop.f32.mrf.mxu1  ;;  %11924 = vmatprep.subr.bf16.mxu1 %v12473_v10 }
 0x422   :  { %v12408_v2 = vld [vmem:[#allocation3 + $0x788] sm:$0xff]  }
 0x423   :  { %v6566_v57 = vpop.f32.mrf.mxu0  ;;  %v5460_v43 = vpop.f32.mrf.mxu1 }
 0x424   :  { %11925 = vmatpush3.bf16.msra.mxu1 %v12396_v48 }
 0x425   :  { %v11665_v11 = vpop.f32.mrf.mxu0  ;;  %v11529_v53 = vpop.f32.mrf.mxu1  ;;  %11938 = vmatprep.subr.bf16.mxu1 %v12473_v10 }
 0x427   :  { %v6695_v44 = vpop.f32.mrf.mxu0  ;;  %v5589_v14 = vpop.f32.mrf.mxu1  ;;  %11927 = vmatmul.mubr.msk.bf16.vlgmr.msra.gmra.mxu1 %vm932_vm0, %v8659_v8 }
 0x428   :  { %v6701_v16 = vadd.f32 %v6695_v44, %v6441_v29  ;;  %v5595_v12 = vadd.f32 %v5589_v14, %v5335_v32  ;;  %11939 = vmatpush3.bf16.msra.mxu1 %v12398_v27  ;;  %11942 = vmatprep.mubr.msk.bf16.mxu1 %vm12474_vm3, %v12473_v10  ;;  %v9042_v32 = vld [vmem:[#allocation2 + $0x74] sm:$0x1]  ;;  %v12409_v27 = vld [vmem:[#allocation3 + $0x780] sm:$0xff]  }
 0x429   :  { %v11680_v17 = vpop.f32.mrf.mxu0  ;;  %v11544_v19 = vpop.f32.mrf.mxu1  ;;  %11940 = vmatprep.subr.bf16.mxu1 %v12473_v10 }
 0x42a   :  { %v12410_v17 = vld [vmem:[#allocation3 + $0x7a8] sm:$0xff]  }
 0x42b   :  { %v6698_v18 = vpop.f32.mrf.mxu0  ;;  %v5592_v36 = vpop.f32.mrf.mxu1 }
 0x42c   :  { %11941 = vmatpush3.bf16.msra.mxu1 %v12399_v23 }
 0x42d   :  { %v11681_v7 = vpop.f32.mrf.mxu0  ;;  %v11545_v37 = vpop.f32.mrf.mxu1  ;;  %11954 = vmatprep.subr.bf16.mxu1 %v12473_v10 }
 0x42e   :  { %v12412_v7 = vld [vmem:[#allocation2 + $0x78] ss:$0 sps:$4 sm:$0x44]   ;;  %v12411_v37 = vld [vmem:[#allocation3 + $0x7a0] sm:$0xff]  }
 0x42f   :  { %v6823_v34 = vpop.f32.mrf.mxu0  ;;  %v5717_v52 = vpop.f32.mrf.mxu1  ;;  %11943 = vmatmul.mubr.msk.bf16.vlgmr.msra.gmra.mxu1 %vm932_vm0, %v8782_v31  ;;  %v9439_v49 = vrot.slane %v12412_v7, 2 }
 0x430   :  { %v6829_v58 = vadd.f32 %v6823_v34, %v6569_v63  ;;  %v5723_v40 = vadd.f32 %v5717_v52, %v5463_v51  ;;  %11955 = vmatpush3.bf16.msra.mxu1 %v12400_v46  ;;  %11958 = vmatprep.mubr.msk.bf16.mxu1 %vm12474_vm3, %v12473_v10 }
 0x431   :  { %v11696_v55 = vpop.f32.mrf.mxu0  ;;  %v11560_v6 = vpop.f32.mrf.mxu1  ;;  %11956 = vmatprep.subr.bf16.mxu1 %v12473_v10 }
 0x432   :  { %v12413_v55 = vld [vmem:[#allocation3 + $0x7c8] sm:$0xff]  }
 0x433   :  { %v6826_v61 = vpop.f32.mrf.mxu0  ;;  %v5720_v3 = vpop.f32.mrf.mxu1 }
 0x434   :  { %11957 = vmatpush3.bf16.msra.mxu1 %v12401_v0 }
 0x435   :  { %v11697_v13 = vpop.f32.mrf.mxu0  ;;  %v11561_v9 = vpop.f32.mrf.mxu1  ;;  %11970 = vmatprep.subr.bf16.mxu1 %v12473_v10 }
 0x437   :  { %v6955_v15 = vpop.f32.mrf.mxu0  ;;  %v5849_v30 = vpop.f32.mrf.mxu1  ;;  %11959 = vmatmul.mubr.msk.bf16.vlgmr.msra.gmra.mxu1 %vm932_vm0, %v8919_v22 }
 0x438   :  { %v6961_v39 = vadd.f32 %v6955_v15, %v6701_v16  ;;  %v5855_v26 = vadd.f32 %v5849_v30, %v5595_v12  ;;  %11971 = vmatpush3.bf16.msra.mxu1 %v12403_v21  ;;  %11974 = vmatprep.mubr.msk.bf16.mxu1 %vm12474_vm3, %v12473_v10  ;;  %v9302_v12 = vld [vmem:[#allocation2 + $0x78] sm:$0x1]  ;;  %v12414_v21 = vld [vmem:[#allocation3 + $0x7c0] sm:$0xff]  }
 0x439   :  { %v11712_v35 = vpop.f32.mrf.mxu0  ;;  %v11576_v24 = vpop.f32.mrf.mxu1  ;;  %11972 = vmatprep.subr.bf16.mxu1 %v12473_v10 }
 0x43b   :  { %v6958_v45 = vpop.f32.mrf.mxu0  ;;  %v5852_v20 = vpop.f32.mrf.mxu1 }
 0x43c   :  { %11973 = vmatpush3.bf16.msra.mxu1 %v12404_v5 }
 0x43d   :  { %v11713_v29 = vpop.f32.mrf.mxu0  ;;  %v11577_v38 = vpop.f32.mrf.mxu1  ;;  %11986 = vmatprep.subr.bf16.mxu1 %v12473_v10 }
 0x43f   :  { %v7083_v33 = vpop.f32.mrf.mxu0  ;;  %v5977_v41 = vpop.f32.mrf.mxu1  ;;  %11975 = vmatmul.mubr.msk.bf16.vlgmr.msra.gmra.mxu1 %vm932_vm0, %v9042_v32 }
 0x440   :  { %v7089_v47 = vadd.f32 %v7083_v33, %v6829_v58  ;;  %v5983_v54 = vadd.f32 %v5977_v41, %v5723_v40  ;;  %11987 = vmatpush3.bf16.msra.mxu1 %v12405_v28  ;;  %11990 = vmatprep.mubr.msk.bf16.mxu1 %vm12474_vm3, %v12473_v10 }
 0x441   :  { %v11728_v56 = vpop.f32.mrf.mxu0  ;;  %v11592_v25 = vpop.f32.mrf.mxu1  ;;  %11988 = vmatprep.subr.bf16.mxu1 %v12473_v10 }
 0x443   :  { %v7086_v60 = vpop.f32.mrf.mxu0  ;;  %v5980_v63 = vpop.f32.mrf.mxu1 }
 0x444   :  { %11989 = vmatpush3.bf16.msra.mxu1 %v12406_v59 }
 0x445   :  { %v11729_v51 = vpop.f32.mrf.mxu0  ;;  %v11593_v48 = vpop.f32.mrf.mxu1  ;;  %12002 = vmatprep.subr.bf16.mxu1 %v12473_v10 }
 0x447   :  { %v7215_v4 = vpop.f32.mrf.mxu0  ;;  %v6109_v57 = vpop.f32.mrf.mxu1  ;;  %11991 = vmatmul.mubr.msk.bf16.vlgmr.msra.gmra.mxu1 %vm932_vm0, %v9179_v1 }
 0x448   :  { %v7221_v43 = vadd.f32 %v7215_v4, %v6961_v39  ;;  %v6115_v8 = vadd.f32 %v6109_v57, %v5855_v26  ;;  %12003 = vmatpush3.bf16.msra.mxu1 %v12408_v2  ;;  %12006 = vmatprep.mubr.msk.bf16.mxu1 %vm12474_vm3, %v12473_v10  ;;  %v9562_v26 = vld [vmem:[#allocation2 + $0x7c] sm:$0x1] }
 0x449   :  { %v11744_v11 = vpop.f32.mrf.mxu0  ;;  %v11608_v53 = vpop.f32.mrf.mxu1  ;;  %12004 = vmatprep.subr.bf16.mxu1 %v12473_v10 }
 0x44b   :  { %v7218_v44 = vpop.f32.mrf.mxu0  ;;  %v6112_v14 = vpop.f32.mrf.mxu1 }
 0x44c   :  { %12005 = vmatpush3.bf16.msra.mxu1 %v12409_v27 }
 0x44d   :  { %v11745_v16 = vpop.f32.mrf.mxu0  ;;  %v11609_v23 = vpop.f32.mrf.mxu1  ;;  %12018 = vmatprep.subr.bf16.mxu1 %v12473_v10 }
 0x44f   :  { %v7343_v19 = vpop.f32.mrf.mxu0  ;;  %v6237_v18 = vpop.f32.mrf.mxu1  ;;  %12007 = vmatmul.mubr.msk.bf16.vlgmr.msra.gmra.mxu1 %vm932_vm0, %v9302_v12 }
 0x450   :  { %v7349_v36 = vadd.f32 %v7343_v19, %v7089_v47  ;;  %v6243_v31 = vadd.f32 %v6237_v18, %v5983_v54  ;;  %12019 = vmatpush3.bf16.msra.mxu1 %v12410_v17  ;;  %12022 = vmatprep.mubr.msk.bf16.mxu1 %vm12474_vm3, %v12473_v10 }
 0x451   :  { %v11760_v46 = vpop.f32.mrf.mxu0  ;;  %v11624_v34 = vpop.f32.mrf.mxu1  ;;  %12020 = vmatprep.subr.bf16.mxu1 %v12473_v10 }
 0x453   :  { %v7346_v52 = vpop.f32.mrf.mxu0  ;;  %v6240_v58 = vpop.f32.mrf.mxu1 }
 0x454   :  { %12021 = vmatpush3.bf16.msra.mxu1 %v12411_v37 }
 0x455   :  { %v11761_v40 = vpop.f32.mrf.mxu0  ;;  %v11625_v0 = vpop.f32.mrf.mxu1  ;;  %12034 = vmatprep.subr.bf16.mxu1 %v12473_v10 }
 0x457   :  { %v7475_v6 = vpop.f32.mrf.mxu0  ;;  %v6369_v61 = vpop.f32.mrf.mxu1  ;;  %12023 = vmatmul.mubr.msk.bf16.vlgmr.msra.gmra.mxu1 %vm932_vm0, %v9439_v49 }
 0x458   :  { %v7481_v3 = vadd.f32 %v7475_v6, %v7221_v43  ;;  %v6375_v22 = vadd.f32 %v6369_v61, %v6115_v8  ;;  %12035 = vmatpush3.bf16.msra.mxu1 %v12413_v55  ;;  %12038 = vmatprep.mubr.msk.bf16.mxu1 %vm12474_vm3, %v12473_v10 }
 0x459   :  { %v11776_v13 = vpop.f32.mrf.mxu0  ;;  %v11640_v9 = vpop.f32.mrf.mxu1  ;;  %12036 = vmatprep.subr.bf16.mxu1 %v12473_v10 }
 0x45b   :  { %v7478_v15 = vpop.f32.mrf.mxu0  ;;  %v6372_v30 = vpop.f32.mrf.mxu1 }
 0x45c   :  { %12037 = vmatpush3.bf16.msra.mxu1 %v12414_v21 }
 0x45d   :  { %v11777_v39 = vpop.f32.mrf.mxu0  ;;  %v11641_v35 = vpop.f32.mrf.mxu1 }
 0x45f   :  { %v7603_v5 = vpop.f32.mrf.mxu0  ;;  %v6497_v24 = vpop.f32.mrf.mxu1  ;;  %12039 = vmatmul.mubr.msk.bf16.vlgmr.msra.gmra.mxu1 %vm932_vm0, %v9562_v26 }
 0x460   :  { %v7609_v45 = vadd.f32 %v7603_v5, %v7349_v36  ;;  %v6503_v20 = vadd.f32 %v6497_v24, %v6243_v31 }
 0x461   :  { %v11792_v29 = vpop.f32.mrf.mxu0  ;;  %v11656_v32 = vpop.f32.mrf.mxu1 }
 0x463   :  { %v7606_v28 = vpop.f32.mrf.mxu0  ;;  %v6500_v38 = vpop.f32.mrf.mxu1 }
 0x465   :  { %v11793_v33 = vpop.f32.mrf.mxu0  ;;  %v11657_v41 = vpop.f32.mrf.mxu1 }
 0x467   :  { %v7735_v47 = vpop.f32.mrf.mxu0  ;;  %v6629_v10 = vpop.f32.mrf.mxu1 }
 0x468   :  { %v7741_v50 = vadd.f32 %v7735_v47, %v7481_v3  ;;  %v6635_v54 = vadd.f32 %v6629_v10, %v6375_v22 }
 0x469   :  { %v11808_v56 = vpop.f32.mrf.mxu0  ;;  %v11672_v59 = vpop.f32.mrf.mxu1 }
 0x46b   :  { %v7738_v25 = vpop.f32.mrf.mxu0  ;;  %v6632_v60 = vpop.f32.mrf.mxu1 }
 0x46d   :  { %v11809_v63 = vpop.f32.mrf.mxu0  ;;  %v11673_v1 = vpop.f32.mrf.mxu1 }
 0x46f   :  { %v7863_v51 = vpop.f32.mrf.mxu0  ;;  %v6757_v2 = vpop.f32.mrf.mxu1 }
 0x470   :  { %v7869_v48 = vadd.f32 %v7863_v51, %v7609_v45  ;;  %v6763_v4 = vadd.f32 %v6757_v2, %v6503_v20 }
 0x471   :  { %v11824_v57 = vpop.f32.mrf.mxu0  ;;  %v11688_v43 = vpop.f32.mrf.mxu1 }
 0x473   :  { %v7866_v8 = vpop.f32.mrf.mxu0  ;;  %v6760_v11 = vpop.f32.mrf.mxu1 }
 0x475   :  { %v11825_v27 = vpop.f32.mrf.mxu0  ;;  %v11689_v53 = vpop.f32.mrf.mxu1 }
 0x477   :  { %v7995_v44 = vpop.f32.mrf.mxu0  ;;  %v6889_v14 = vpop.f32.mrf.mxu1 }
 0x478   :  { %v8001_v16 = vadd.f32 %v7995_v44, %v7741_v50  ;;  %v6895_v12 = vadd.f32 %v6889_v14, %v6635_v54 }
 0x479   :  { %v11840_v17 = vpop.f32.mrf.mxu0  ;;  %v11704_v23 = vpop.f32.mrf.mxu1 }
 0x47b   :  { %v7998_v19 = vpop.f32.mrf.mxu0  ;;  %v6892_v18 = vpop.f32.mrf.mxu1 }
 0x47d   :  { %v11841_v36 = vpop.f32.mrf.mxu0  ;;  %v11705_v7 = vpop.f32.mrf.mxu1 }
 0x47f   :  { %v8123_v31 = vpop.f32.mrf.mxu0  ;;  %v7017_v46 = vpop.f32.mrf.mxu1 }
 0x480   :  { %v8129_v37 = vadd.f32 %v8123_v31, %v7869_v48  ;;  %v7023_v34 = vadd.f32 %v7017_v46, %v6763_v4 }
 0x481   :  { %v11856_v52 = vpop.f32.mrf.mxu0  ;;  %v11720_v58 = vpop.f32.mrf.mxu1 }
 0x483   :  { %v8126_v49 = vpop.f32.mrf.mxu0  ;;  %v7020_v40 = vpop.f32.mrf.mxu1 }
 0x485   :  { %v11857_v55 = vpop.f32.mrf.mxu0  ;;  %v11721_v0 = vpop.f32.mrf.mxu1 }
 0x487   :  { %v8255_v6 = vpop.f32.mrf.mxu0  ;;  %v7149_v61 = vpop.f32.mrf.mxu1 }
 0x488   :  { %v8261_v3 = vadd.f32 %v8255_v6, %v8001_v16  ;;  %v7155_v22 = vadd.f32 %v7149_v61, %v6895_v12 }
 0x489   :  { %v11872_v13 = vpop.f32.mrf.mxu0  ;;  %v11736_v21 = vpop.f32.mrf.mxu1 }
 0x48b   :  { %v8258_v9 = vpop.f32.mrf.mxu0  ;;  %v7152_v15 = vpop.f32.mrf.mxu1 }
 0x48d   :  { %v11873_v30 = vpop.f32.mrf.mxu0  ;;  %v11737_v39 = vpop.f32.mrf.mxu1 }
 0x48f   :  { %v8383_v26 = vpop.f32.mrf.mxu0  ;;  %v7277_v35 = vpop.f32.mrf.mxu1 }
 0x490   :  { %v8389_v5 = vadd.f32 %v8383_v26, %v8129_v37  ;;  %v7283_v24 = vadd.f32 %v7277_v35, %v7023_v34 }
 0x491   :  { %v11888_v45 = vpop.f32.mrf.mxu0  ;;  %v11752_v20 = vpop.f32.mrf.mxu1 }
 0x493   :  { %v8386_v29 = vpop.f32.mrf.mxu0  ;;  %v7280_v32 = vpop.f32.mrf.mxu1 }
 0x495   :  { %v11889_v28 = vpop.f32.mrf.mxu0  ;;  %v11753_v38 = vpop.f32.mrf.mxu1 }
 0x497   :  { %v8515_v33 = vpop.f32.mrf.mxu0  ;;  %v7409_v41 = vpop.f32.mrf.mxu1 }
 0x498   :  { %v8521_v47 = vadd.f32 %v8515_v33, %v8261_v3  ;;  %v7415_v10 = vadd.f32 %v7409_v41, %v7155_v22 }
 0x499   :  { %v11904_v50 = vpop.f32.mrf.mxu0  ;;  %v11768_v54 = vpop.f32.mrf.mxu1 }
 0x49b   :  { %v8518_v56 = vpop.f32.mrf.mxu0  ;;  %v7412_v59 = vpop.f32.mrf.mxu1 }
 0x49d   :  { %v11905_v25 = vpop.f32.mrf.mxu0  ;;  %v11769_v60 = vpop.f32.mrf.mxu1 }
 0x49f   :  { %v8643_v63 = vpop.f32.mrf.mxu0  ;;  %v7537_v1 = vpop.f32.mrf.mxu1 }
 0x4a0   :  { %v8649_v51 = vadd.f32 %v8643_v63, %v8389_v5  ;;  %v7543_v2 = vadd.f32 %v7537_v1, %v7283_v24 }
 0x4a1   :  { %v11920_v48 = vpop.f32.mrf.mxu0  ;;  %v11784_v4 = vpop.f32.mrf.mxu1 }
 0x4a2   :  { %v12417_v4 = vld [vmem:[%s14642_s7 + $0x34] ss:$8 sps:$4 sm:$0xff]  }
 0x4a3   :  { %v8646_v57 = vpop.f32.mrf.mxu0  ;;  %v7540_v43 = vpop.f32.mrf.mxu1  ;;  %9737 = vmatprep.subr.bf16.mxu0 %v12417_v4 }
 0x4a4   :  { %v12415_v43 = vld [vmem:[%s14642_s7 + $0x30] ss:$8 sps:$4 sm:$0xff]  }
 0x4a5   :  { %v11921_v8 = vpop.f32.mrf.mxu0  ;;  %v11785_v11 = vpop.f32.mrf.mxu1  ;;  %9738 = vmatpush1.bf16.msra.mxu0 %v12415_v43 }
 0x4a7   :  { %v8775_v27 = vpop.f32.mrf.mxu0  ;;  %v7669_v53 = vpop.f32.mrf.mxu1 }
 0x4a8   :  { %v8781_v44 = vadd.f32 %v8775_v27, %v8521_v47  ;;  %v7675_v14 = vadd.f32 %v7669_v53, %v7415_v10  ;;  %v12420_v53 = vld [vmem:[%s14642_s7 + $0x24] ss:$8 sps:$4 sm:$0xff]  }
 0x4a9   :  { %v11936_v16 = vpop.f32.mrf.mxu0  ;;  %v11800_v12 = vpop.f32.mrf.mxu1  ;;  %9739 = vmatprep.subr.bf16.mxu0 %v12420_v53 }
 0x4aa   :  { %v12418_v16 = vld [vmem:[%s14642_s7 + $0x20] ss:$8 sps:$4 sm:$0xff]  }
 0x4ab   :  { %v8778_v17 = vpop.f32.mrf.mxu0  ;;  %v7672_v23 = vpop.f32.mrf.mxu1  ;;  %9740 = vmatpush1.bf16.msra.mxu0 %v12418_v16 }
 0x4ad   :  { %v11937_v19 = vpop.f32.mrf.mxu0  ;;  %v11801_v18 = vpop.f32.mrf.mxu1 }
 0x4ae   :  { %v12423_v18 = vld [vmem:[%s14642_s7 + $0x14] ss:$8 sps:$4 sm:$0xff]  }
 0x4af   :  { %v8903_v36 = vpop.f32.mrf.mxu0  ;;  %v7797_v7 = vpop.f32.mrf.mxu1  ;;  %9741 = vmatprep.subr.bf16.mxu0 %v12423_v18 }
 0x4b0   :  { %v8909_v31 = vadd.f32 %v8903_v36, %v8649_v51  ;;  %v7803_v46 = vadd.f32 %v7797_v7, %v7543_v2  ;;  %v12421_v7 = vld [vmem:[%s14642_s7 + $0x10] ss:$8 sps:$4 sm:$0xff]  }
 0x4b1   :  { %v11952_v37 = vpop.f32.mrf.mxu0  ;;  %v11816_v34 = vpop.f32.mrf.mxu1  ;;  %9742 = vmatpush1.bf16.msra.mxu0 %v12421_v7 }
 0x4b2   :  { %v12426_v37 = vld [vmem:[%s14642_s7 + $0x4] ss:$8 sps:$4 sm:$0xff]  }
 0x4b3   :  { %v8906_v52 = vpop.f32.mrf.mxu0  ;;  %v7800_v58 = vpop.f32.mrf.mxu1  ;;  %9743 = vmatprep.subr.bf16.mxu0 %v12426_v37 }
 0x4b4   :  { %v12424_v52 = vld [vmem:[%s14642_s7] ss:$8 sps:$4 sm:$0xff]  }
 0x4b5   :  { %v11953_v49 = vpop.f32.mrf.mxu0  ;;  %v11817_v40 = vpop.f32.mrf.mxu1  ;;  %9744 = vmatpush1.bf16.msra.mxu0 %v12424_v52 }
 0x4b6   :  { %v12475_v40 = vmov 0  }
 0x4b7   :  { %v9035_v55 = vpop.f32.mrf.mxu0  ;;  %v7929_v0 = vpop.f32.mrf.mxu1  ;;  %9761 = vmatprep.mubr.bf16.mxu0 %v12475_v40 }
 0x4b8   :  { %v9041_v6 = vadd.f32 %v9035_v55, %v8781_v44  ;;  %v7935_v61 = vadd.f32 %v7929_v0, %v7675_v14  ;;  %v12427_v55 = vld [vmem:[%s14644_s9 + $0x78] sm:$0xff]  }
 0x4b9   :  { %v11968_v3 = vpop.f32.mrf.mxu0  ;;  %v11832_v22 = vpop.f32.mrf.mxu1  ;;  %v12428_v0 = vld [vmem:[%s14644_s9 + $0x38] sm:$0xff]   ;;  %10972 = vmatprep.subr.bf16.mxu1 %v12427_v55 }
 0x4ba   :  { %10973 = vmatpush3.bf16.msra.mxu1 %v12428_v0  ;;  %v12430_v22 = vld [vmem:[%s14644_s9 + $0x30] sm:$0xff]  }
 0x4bb   :  { %v9038_v13 = vpop.f32.mrf.mxu0  ;;  %v7932_v21 = vpop.f32.mrf.mxu1 }
 0x4bc   :  { %v12431_v13 = vld [vmem:[%s14644_s9 + $0x68] sm:$0xff]  }
 0x4bd   :  { %v11969_v9 = vpop.f32.mrf.mxu0  ;;  %v11833_v15 = vpop.f32.mrf.mxu1 }
 0x4be   :  { %v12432_v15 = vld [vmem:[%s14644_s9 + $0x28] sm:$0xff]  }
 0x4bf   :  { %v9163_v30 = vpop.f32.mrf.mxu0  ;;  %v8057_v39 = vpop.f32.mrf.mxu1 }
 0x4c0   :  { %v9169_v26 = vadd.f32 %v9163_v30, %v8909_v31  ;;  %v8063_v35 = vadd.f32 %v8057_v39, %v7803_v46  ;;  %v12433_v30 = vld [vmem:[%s14644_s9 + $0x60] sm:$0xff]  }
 0x4c1   :  { %v11984_v5 = vpop.f32.mrf.mxu0  ;;  %v11848_v24 = vpop.f32.mrf.mxu1 }
 0x4c2   :  { %v12435_v5 = vld [vmem:[%s14644_s9 + $0x58] sm:$0xff]  }
 0x4c3   :  { %v9166_v45 = vpop.f32.mrf.mxu0  ;;  %v8060_v20 = vpop.f32.mrf.mxu1 }
 0x4c4   :  { %v12436_v20 = vld [vmem:[%s14644_s9 + $0x18] sm:$0xff]  }
 0x4c5   :  { %v11985_v29 = vpop.f32.mrf.mxu0  ;;  %v11849_v32 = vpop.f32.mrf.mxu1 }
 0x4c6   :  { %v12437_v29 = vld [vmem:[%s14644_s9 + $0x50] sm:$0xff]  }
 0x4c7   :  { %v9295_v28 = vpop.f32.mrf.mxu0  ;;  %v8189_v38 = vpop.f32.mrf.mxu1 }
 0x4c8   :  { %v9301_v33 = vadd.f32 %v9295_v28, %v9041_v6  ;;  %v8195_v41 = vadd.f32 %v8189_v38, %v7935_v61  ;;  %v12429_v6 = vld [vmem:[%s14644_s9 + $0x70] sm:$0xff]  }
 0x4c9   :  { %v12000_v47 = vpop.f32.mrf.mxu0  ;;  %v11864_v10 = vpop.f32.mrf.mxu1  ;;  %10974 = vmatprep.subr.bf16.mxu1 %v12429_v6  ;;  %v12438_v38 = vld [vmem:[%s14644_s9 + $0x10] sm:$0xff]  }
 0x4ca   :  { %10975 = vmatpush3.bf16.msra.mxu1 %v12430_v22 }
 0x4cb   :  { %v9298_v50 = vpop.f32.mrf.mxu0  ;;  %v8192_v54 = vpop.f32.mrf.mxu1  ;;  %10976 = vmatprep.subr.bf16.mxu1 %v12431_v13 }
 0x4cd   :  { %v12001_v56 = vpop.f32.mrf.mxu0  ;;  %v11865_v59 = vpop.f32.mrf.mxu1 }
 0x4ce   :  { %10977 = vmatpush3.bf16.msra.mxu1 %v12432_v15 }
 0x4cf   :  { %v9423_v25 = vpop.f32.mrf.mxu0  ;;  %v8317_v60 = vpop.f32.mrf.mxu1  ;;  %10978 = vmatprep.subr.bf16.mxu1 %v12433_v30 }
 0x4d0   :  { %v14533_v63 = vadd.f32 %v9423_v25, %v9169_v26  ;;  %v14535_v1 = vadd.f32 %v8317_v60, %v8063_v35  ;;  %v12434_v35 = vld [vmem:[%s14644_s9 + $0x20] sm:$0xff]  }
 0x4d1   :  { %v12016_v51 = vpop.f32.mrf.mxu0  ;;  %v11880_v2 = vpop.f32.mrf.mxu1 }
 0x4d2   :  { %10979 = vmatpush3.bf16.msra.mxu1 %v12434_v35 }
 0x4d3   :  { %v9426_v48 = vpop.f32.mrf.mxu0  ;;  %v8320_v57 = vpop.f32.mrf.mxu1  ;;  %10980 = vmatprep.subr.bf16.mxu1 %v12435_v5  ;;  %v9648_v5 = vld [vmem:[%s14640_s5] sm:$0x1] }
 0x4d5   :  { %v12017_v8 = vpop.f32.mrf.mxu0  ;;  %v11881_v11 = vpop.f32.mrf.mxu1 }
 0x4d6   :  { %10981 = vmatpush3.bf16.msra.mxu1 %v12436_v20 }
 0x4d7   :  { %v9555_v27 = vpop.f32.mrf.mxu0  ;;  %v8449_v44 = vpop.f32.mrf.mxu1  ;;  %10982 = vmatprep.subr.bf16.mxu1 %v12437_v29  ;;  %v10513_v29 = vld [vmem:[%s14641_s6] ss:$0 sm:$0xff] }
 0x4d8   :  { %v14546_v14 = vadd.f32 %v9555_v27, %v9301_v33  ;;  %v14551_v12 = vadd.f32 %v8449_v44, %v8195_v41 }
 0x4d9   :  { %v12032_v17 = vpop.f32.mrf.mxu0  ;;  %v11896_v23 = vpop.f32.mrf.mxu1 }
 0x4da   :  { %10983 = vmatpush3.bf16.msra.mxu1 %v12438_v38 }
 0x4db   :  { %v9558_v19 = vpop.f32.mrf.mxu0  ;;  %v8452_v36 = vpop.f32.mrf.mxu1 }
 0x4dd   :  { %v12033_v31 = vpop.f32.mrf.mxu0  ;;  %v11897_v46 = vpop.f32.mrf.mxu1 }
 0x4df   :  { %v8577_v34 = vpop.f32.mrf.mxu1 }
 0x4e0   :  { %v8583_v53 = vadd.f32 %v8577_v34, %v14535_v1 }
 0x4e1   :  { %v11912_v58 = vpop.f32.mrf.mxu1 }
 0x4e3   :  { %v8580_v49 = vpop.f32.mrf.mxu1 }
 0x4e5   :  { %v11913_v61 = vpop.f32.mrf.mxu1 }
 0x4e7   :  { %v8709_v3 = vpop.f32.mrf.mxu1 }
 0x4e8   :  { %v8715_v4 = vadd.f32 %v8709_v3, %v14551_v12 }
 0x4e9   :  { %v11928_v21 = vpop.f32.mrf.mxu1 }
 0x4eb   :  { %v8712_v9 = vpop.f32.mrf.mxu1 }
 0x4ed   :  { %v11929_v39 = vpop.f32.mrf.mxu1 }
 0x4ef   :  { %v8837_v26 = vpop.f32.mrf.mxu1 }
 0x4f0   :  { %v8843_v17 = vadd.f32 %v8837_v26, %v8583_v53 }
 0x4f1   :  { %v11944_v24 = vpop.f32.mrf.mxu1 }
 0x4f3   :  { %v8840_v45 = vpop.f32.mrf.mxu1 }
 0x4f5   :  { %v11945_v32 = vpop.f32.mrf.mxu1 }
 0x4f7   :  { %v8969_v28 = vpop.f32.mrf.mxu1 }
 0x4f8   :  { %v8975_v43 = vadd.f32 %v8969_v28, %v8715_v4 }
 0x4f9   :  { %v11960_v33 = vpop.f32.mrf.mxu1 }
 0x4fb   :  { %v8972_v41 = vpop.f32.mrf.mxu1 }
 0x4fc   :  { %v12439_v41 = vld [vmem:[%s14644_s9 + $0x48] sm:$0xff]  }
 0x4fd   :  { %v11961_v47 = vpop.f32.mrf.mxu1  ;;  %10984 = vmatprep.subr.bf16.mxu1 %v12439_v41 }
 0x4fe   :  { %v12440_v47 = vld [vmem:[%s14644_s9 + $0x8] sm:$0xff]  }
 0x4ff   :  { %v9097_v10 = vpop.f32.mrf.mxu1  ;;  %10985 = vmatpush3.bf16.msra.mxu1 %v12440_v47 }
 0x500   :  { %v9103_v18 = vadd.f32 %v9097_v10, %v8843_v17  ;;  %v12441_v10 = vld [vmem:[%s14644_s9 + $0x40] sm:$0xff]  }
 0x501   :  { %v11976_v50 = vpop.f32.mrf.mxu1  ;;  %10986 = vmatprep.subr.bf16.mxu1 %v12441_v10 }
 0x502   :  { %v12442_v50 = vld [vmem:[%s14644_s9] sm:$0xff]  }
 0x503   :  { %v9100_v54 = vpop.f32.mrf.mxu1  ;;  %10987 = vmatpush3.bf16.msra.mxu1 %v12442_v50 }
 0x504   :  { %v9673_v54 = vld [vmem:[%s14643_s8] sm:$0x3] }
 0x505   :  { %v11977_v56 = vpop.f32.mrf.mxu1 }
 0x506   :  { %v9681_v56 = vsub.s32 1, %v13667_v42  ;;  %v10523_v42 = vld [vmem:[%s14645_s10] ss:$0 sm:$0xff]  ;;  %s12449_s10 = scalar_lea.vmem %s9967_s13, 32 }
 0x507   :  { %v9229_v59 = vpop.f32.mrf.mxu1  ;;  %p12450_p0 = scmp.ne.s32.totalorder %s9967_s13, %s12449_s10  ;;  %p12455_p2 = scmp.lt.s32.totalorder %s12449_s10, %s12449_s10 }
 0x508   :  { %v9235_v11 = vadd.f32 %v9229_v59, %v8975_v43  ;;  %v9678_v59 = vrot.slane %v9673_v54, %v13716_v62 }
 0x509   :  { %v11992_v25 = vpop.f32.mrf.mxu1  ;;  %p12456_p3 = por %p12455_p2, %p12454_p1 }
 0x50a   :  { %v9682_v25 = vrot.slane %v9673_v54, %v9681_v56 }
 0x50b   :  { %v9232_v60 = vpop.f32.mrf.mxu1  ;;  %p12457_p4 = pnand %p12456_p3, %p12450_p0 }
 0x50d   :  { %v11993_v51 = vpop.f32.mrf.mxu1 }
 0x50f   :  { %v9357_v2 = vpop.f32.mrf.mxu1 }
 0x510   :  { %v9363_v7 = vadd.f32 %v9357_v2, %v9103_v18 }
 0x511   :  { %v12008_v48 = vpop.f32.mrf.mxu1 }
 0x513   :  { %v9360_v57 = vpop.f32.mrf.mxu1 }
 0x515   :  { %v12009_v8 = vpop.f32.mrf.mxu1 }
 0x517   :  { %v9489_v27 = vpop.f32.mrf.mxu1 }
 0x518   :  { %v9495_v44 = vadd.f32 %v9489_v27, %v9235_v11 }
 0x519   :  { %v12024_v16 = vpop.f32.mrf.mxu1 }
 0x51a   :  { %v9625_v23 = vadd.f32 %v14546_v14, %v9495_v44 }
 0x51b   :  { %v9492_v19 = vpop.f32.mrf.mxu1 }
 0x51d   :  { %v12025_v36 = vpop.f32.mrf.mxu1 }
 0x51f   :  { %v9617_v31 = vpop.f32.mrf.mxu1 }
 0x520   :  { %v9623_v46 = vadd.f32 %v9617_v31, %v9363_v7 }
 0x521   :  { %v12040_v37 = vpop.f32.mrf.mxu1 }
 0x522   :  { %v9624_v12 = vadd.f32 %v9623_v46, %v14533_v63 }
 0x523   :  { %v9620_v52 = vpop.f32.mrf.mxu1 }
 0x524   :  { %v9626_v58 = vadd.f32 %v9625_v23, %v9624_v12 }
 0x525   :  { %v12041_v49 = vpop.f32.mrf.mxu1 }
 0x526   :  { %v9628_v40 = vsel %vm9627_vm4, %v9626_v58, 0.0 }
 0x527   :  { %v9629_v1 = vrot.slane %v9628_v40, 4 }
 0x529   :  { %v9630_v34 = vadd.f32 %v9629_v1, %v9628_v40 }
 0x52b   :  { %v9631_v55 = vrot.slane %v9630_v34, 2 }
 0x52d   :  { %v9632_v0 = vadd.f32 %v9631_v55, %v9630_v34 }
 0x52f   :  { %v9633_v6 = vrot.slane %v9632_v0, 1 }
 0x531   :  { %v9634_v14 = vadd.f32 %v9633_v6, %v9632_v0 }
 0x533   :  { %v9635_v61 = vmul.f32 0.5, %v9634_v14 }
 0x535   :  { %v9636_v3 = vsub.f32 %v9626_v58, %v9635_v61 }
 0x537   :  { %v9637_v22 = vmul.f32 %v9636_v3, %v9636_v3 }
 0x539   :  { %v9638_v13 = vsel %vm9627_vm4, %v9637_v22, 0.0 }
 0x53a   :  { %v9639_v21 = vrot.slane %v9638_v13, 4 }
 0x53c   :  { %v9640_v9 = vadd.f32 %v9639_v21, %v9638_v13 }
 0x53e   :  { %v9641_v15 = vrot.slane %v9640_v9, 2 }
 0x540   :  { %v9642_v30 = vadd.f32 %v9641_v15, %v9640_v9 }
 0x542   :  { %v9643_v63 = vrot.slane %v9642_v30, 1 }
 0x544   :  { %v9644_v39 = vadd.f32 %v9643_v63, %v9642_v30 }
 0x546   :  { %v9645_v26 = vmul.f32 0.5, %v9644_v39 }
 0x548   :  { %v9646_v35 = vadd.f32 1e-05, %v9645_v26 }
 0x54a   :  { %12443 = vrsqrt.f32 %v9646_v35 }
 0x557   :  { %v12444_v24 = vpop.eup %12443 }
 0x558   :  { %v9649_v45 = vmul.f32 %v12444_v24, %v9648_v5 }
 0x55a   :  { %v9653_v20 = vrot.slane %v9649_v45, %v13716_v62 }
 0x55c   :  { %v9654_v32 = vmul.f32 %v9653_v20, %v9636_v3 }
 0x55e   :  { %v9662_v28 = vadd.f32 %v10513_v29, %v9654_v32 }
 0x560   :  { %v9663_v38 = vmax.f32 %v9662_v28, 0.0 }
 0x562   :  { %v9664_v33 = vpack.c.bf16 %v9663_v38, %v9663_v38 }
 0x564   :  { %10522 = vmatmul.mubr.msk.bf16.vlgmr.msra.gmra.mxu0 %vm9725_vm5, %v9664_v33 }
 0x624   :  { %v9763_v60 = vpop.f32.mrf.mxu0 }
 0x625   :  { %v9764_v51 = vadd.f32 %v9763_v60, %v9678_v59 }
 0x626   :  { %v9765_v2 = vpop.f32.mrf.mxu0 }
 0x627   :  { %v9766_v48 = vadd.f32 %v9765_v2, %v9682_v25  ;;  %v9770_v4 = vmax.f32 %v9764_v51, 0.0 }
 0x628   :  { %v9767_v57 = vpop.f32.mrf.mxu0 }
 0x629   :  { %v9771_v43 = vmax.f32 %v9766_v48, 0.0  ;;  %v9772_v27 = vpack.c.bf16 %v9770_v4, %v9770_v4 }
 0x62a   :  { %v9768_v8 = vpop.f32.mrf.mxu0 }
 0x62b   :  { %v9773_v11 = vpack.c.bf16 %v9771_v43, %v9771_v43 }
 0x62d   :  { %9941 = vmatprep.mubr.bf16.mxu1 %v9773_v11 }
 0x62e   :  { %9942 = vmatmul.mubr.bf16.vlgmr.msra.gmra.mxu1 %v9772_v27 }
 0x6ee   :  { %v10988_v53 = vpop.f32.mrf.mxu1 }
 0x6f0   :  { %v10989_v44 = vpop.f32.mrf.mxu1 }
 0x6f1   :  { %v10990_v62 = vadd.f32 %v10989_v44, %v10988_v53 }
 0x6f2   :  { %v10991_v16 = vpop.f32.mrf.mxu1 }
 0x6f3   :  { %v9944_v17 = vadd.f32 %v10990_v62, %v10523_v42 }
 0x6f4   :  { %v10992_v23 = vpop.f32.mrf.mxu1 }
 0x6f5   :  { %v9949_v19 = vand.u32 2147483647, %v9944_v17  ;;  %vm9955_vm7 = vcmp.ge.f32.partialorder %v9944_v17, 0.0 }
 0x6f7   :  { %v9950_v18 = vsub.f32 0.0, %v9949_v19 }
 0x6f9   :  { %v9951_v36 = vmul.f32 1.442695, %v9950_v18 }
 0x6fb   :  { %12445 = vpow2.f32 %v9951_v36 }
 0x708   :  { %v12446_v7 = vpop.eup %12445 }
 0x709   :  { %v9953_v31 = vadd.f32 1.0, %v12446_v7 }
 0x70b   :  { %12447 = vrcp.f32 %v9953_v31 }
 0x718   :  { %v12448_v46 = vpop.eup %12447 }
 0x719   :  { %v9956_v37 = vmul.f32 %v12448_v46, %v12446_v7 }
 0x71b   :  { %v9957_v12 = vsel %vm9955_vm7, %v12448_v46, %v9956_v37 }
 0x71c   :  { %9959 = vst.msk [vmem:[#allocation5] sm:$0x3] %vm9958_vm6, %v9957_v12 }
 0x71d   :  { %12460 = shalt.err (!%p12457_p4)
}
 0x71e   :  { %9969 = dma.vmem_to_hbm [thread:$0]  %s9967_s13, 32, %s14646_s11, [#allocation6]  }
 0x71f   :  { %12471 = dma.done.wait [#allocation6], 32  }
 0x720   :  { %12472 = vsyncadd [#allocation6], 4294967264 }
 0x721   :  { %9973 = vsyncpa [#allocation6], 1 }
 0x722   :  { %9974 = vsyncmov [#allocation4] }
 0x725   :  { %s9975_s16 = vpop.sfrf %9974 }
 0x726   :  { %p10540_p5 = scmp.ne.s32.totalorder %s9975_s16, 0 }
 0x728   :  { %9979 = shalt.err (%p10540_p5)  }

</bundles_post_ra>
